<compile_context>
chip_gen: v7x
topology: tpu7x:2x2x1
jax: 0.10.0
libtpu: 0.0.40
codegen_flags: <defaults>
</compile_context>

<pallas_src>
import functools
import math

import jax
import jax.numpy as jnp
from jax import lax
from jax.experimental import pallas as pl
from jax.experimental.pallas import tpu as pltpu


# ----------------------------------------------------------------------------
# Fused per-layer Pallas kernel
# ----------------------------------------------------------------------------
def _torch_norm(v, alpha, bias, eps):
    # torch: alpha * (x - mean) / (std(unbiased) + eps) + bias
    d = v.shape[-1]
    mean = jnp.mean(v, axis=-1, keepdims=True)
    c = v - mean
    var_unbiased = jnp.sum(c * c, axis=-1, keepdims=True) * (1.0 / (d - 1))
    return alpha * c / (jnp.sqrt(var_unbiased) + eps) + bias


def _layer_kernel(
    x_ref,
    n1a_ref, n1b_ref,
    wqkv_ref, bqkv_ref,
    wout_ref, bout_ref,
    n1la_ref, n1lb_ref,
    w1_ref, b1_ref,
    n2la_ref, n2lb_ref,
    w2_ref, b2_ref,
    n2a_ref, n2b_ref,
    wff_ref, bff_ref,
    o_ref,
    *, heads, d_model, seq, eps,
):
    """One full Encoder_Decoder_Layer for a single batch element.

    x_ref: (S, D).  Weights are (Din, Dout); biases / norm params are (1, Dout).
    """
    d = d_model
    dk = d // heads
    scale = 1.0 / math.sqrt(dk)

    x = x_ref[...]                                                 # (S, D)

    # --- self-attention block ------------------------------------------------
    x2 = _torch_norm(x, n1a_ref[...], n1b_ref[...], eps)           # norm_1
    qkv = jnp.dot(x2, wqkv_ref[...],
                  preferred_element_type=jnp.float32) + bqkv_ref[...]       # (S, 3D)
    q = qkv[:, 0 * d:1 * d]
    k = qkv[:, 1 * d:2 * d]
    v = qkv[:, 2 * d:3 * d]

    # torch: mask = triu(ones(S, S), 1); scores.masked_fill(mask == 0, -1e9)
    row = lax.broadcasted_iota(jnp.int32, (seq, seq), 0)
    col = lax.broadcasted_iota(jnp.int32, (seq, seq), 1)
    allow = col > row                                              # strict upper triangle

    head_outs = []
    for h in range(heads):                                         # static unroll, heads is small
        qh = q[:, h * dk:(h + 1) * dk]                             # (S, dk)
        kh = k[:, h * dk:(h + 1) * dk]
        vh = v[:, h * dk:(h + 1) * dk]
        s = lax.dot_general(qh, kh, (((1,), (1,)), ((), ())),      # q @ k.T, no transpose
                            preferred_element_type=jnp.float32) * scale
        s = jnp.where(allow, s, -1000000000.0)                     # exact masked_fill semantics
        m = jnp.max(s, axis=-1, keepdims=True)
        p = jnp.exp(s - m)
        denom = jnp.sum(p, axis=-1, keepdims=True)
        p = p * pl.reciprocal(denom, approx=True)                  # EUP slot, VPU stays free
        head_outs.append(jnp.dot(p, vh, preferred_element_type=jnp.float32))
    concat = jnp.concatenate(head_outs, axis=-1)                   # (S, D) heads already merged

    attn_out = jnp.dot(concat, wout_ref[...],
                       preferred_element_type=jnp.float32) + bout_ref[...]
    x = x + attn_out                                               # dropout_1 = identity

    # --- linear / norm chain ---------------------------------------------------
    x = _torch_norm(x, n1la_ref[...], n1lb_ref[...], eps)          # norm_1_linear
    x = jnp.dot(x, w1_ref[...],
                preferred_element_type=jnp.float32) + b1_ref[...]            # (S, 4D)
    x = _torch_norm(x, n2la_ref[...], n2lb_ref[...], eps)          # norm_2_linear
    x = jnp.dot(x, w2_ref[...],
                preferred_element_type=jnp.float32) + b2_ref[...]            # (S, D)

    # --- feed-forward head -------------------------------------------------------
    x2 = _torch_norm(x, n2a_ref[...], n2b_ref[...], eps)           # norm_2
    y = jnp.dot(x2, wff_ref[...],
                preferred_element_type=jnp.float32) + bff_ref[...]
    y = jnp.maximum(y, 0.0)                                        # relu; dropout_2 = identity
    o_ref[...] = y.astype(o_ref.dtype)


def encoder_decoder_layer(p, x, heads, eps=1e-6):
    """x: (B, S, D) -> (B, S, d_output).  One fused pallas_call, grid over batch."""
    B, S, D = x.shape
    d_out = p["ff"]["W"].shape[1]

    def _row(v):
        return v.reshape(1, -1)

    weights = [
        _row(p["norm_1"]["alpha"]), _row(p["norm_1"]["bias"]),
        p["attn"]["qkv_W"], _row(p["attn"]["qkv_b"]),
        p["attn"]["out_W"], _row(p["attn"]["out_b"]),
        _row(p["norm_1_linear"]["alpha"]), _row(p["norm_1_linear"]["bias"]),
        p["linear_1"]["W"], _row(p["linear_1"]["b"]),
        _row(p["norm_2_linear"]["alpha"]), _row(p["norm_2_linear"]["bias"]),
        p["linear_2"]["W"], _row(p["linear_2"]["b"]),
        _row(p["norm_2"]["alpha"]), _row(p["norm_2"]["bias"]),
        p["ff"]["W"], _row(p["ff"]["b"]),
    ]

    def _w_spec(arr):
        # Full-array block; same block index for every grid step (no re-DMA).
        return pl.BlockSpec(arr.shape, lambda b: (0,) * arr.ndim)

    in_specs = [pl.BlockSpec((None, S, D), lambda b: (b, 0, 0))]
    in_specs += [_w_spec(w) for w in weights]
    out_spec = pl.BlockSpec((None, S, d_out), lambda b: (b, 0, 0))

    kernel = functools.partial(_layer_kernel, heads=heads, d_model=D, seq=S, eps=eps)
    return pl.pallas_call(
        kernel,
        out_shape=jax.ShapeDtypeStruct((B, S, d_out), jnp.float32),
        grid=(B,),
        in_specs=in_specs,
        out_specs=out_spec,
        compiler_params=pltpu.CompilerParams(
            dimension_semantics=("parallel",)   # B parallel steps -> both TCs usable on v7x
        ),
    )(x, *weights)


# ----------------------------------------------------------------------------
# Parameter setup + glue (plain JAX; hot path fully inside the fused kernels)
# ----------------------------------------------------------------------------
class _KeyGen:
    def __init__(self, key):
        self._key = key

    def __call__(self):
        self._key, k = jax.random.split(self._key)
        return k


def _init_linear(kg, din, dout, scale=0.05):
    # Stored pre-transposed as (Din, Dout): kernel does x @ W, never W.T.
    return {
        "W": jax.random.normal(kg(), (din, dout), jnp.float32) * scale,
        "b": jax.random.normal(kg(), (dout,), jnp.float32) * scale,
    }


def _init_norm(d):
    return {"alpha": jnp.ones((d,), jnp.float32), "bias": jnp.zeros((d,), jnp.float32)}


def _init_layer(kg, d_model, d_output):
    q = _init_linear(kg, d_model, d_model)
    k = _init_linear(kg, d_model, d_model)
    v = _init_linear(kg, d_model, d_model)
    out = _init_linear(kg, d_model, d_model)
    return {
        "norm_1": _init_norm(d_model),
        "norm_2": _init_norm(d_model),
        "norm_1_linear": _init_norm(d_model),
        "norm_2_linear": _init_norm(4 * d_model),
        "attn": {
            # fused QKV projection: one (D, 3D) matmul instead of three (D, D)
            "qkv_W": jnp.concatenate([q["W"], k["W"], v["W"]], axis=1),
            "qkv_b": jnp.concatenate([q["b"], k["b"], v["b"]], axis=0),
            "out_W": out["W"],
            "out_b": out["b"],
        },
        "ff": _init_linear(kg, d_model, d_output),
        "linear_1": _init_linear(kg, d_model, 4 * d_model),
        "linear_2": _init_linear(kg, 4 * d_model, d_model),
    }


def init_dncoder(key, d_model, d_output):
    kg = _KeyGen(key)
    return {
        "cls_up": jax.random.normal(kg(), (1, 1, d_model), jnp.float32),
        "cls_left": jax.random.normal(kg(), (1, 1, d_model), jnp.float32),
        "cls_right": jax.random.normal(kg(), (1, 1, d_model), jnp.float32),
        "cls_down": jax.random.normal(kg(), (1, 1, d_model), jnp.float32),
        "layer1": _init_layer(kg, d_model, 2 * d_model),
        "layer2": _init_layer(kg, 2 * d_model, 4 * d_model),
        "layer3": _init_layer(kg, 4 * d_model, d_output),
    }


@functools.partial(jax.jit, static_argnames=("derection", "heads"))
def dncoder_forward(params, x, *, derection, heads):
    b, n, d = x.shape
    cls = params["cls_" + derection]                    # (1, 1, d)
    cls_tokens = jnp.broadcast_to(cls, (b, 1, d))
    # (b, n+1, d); reference hard-codes n+1 == 65 for its masks — the in-kernel
    # triu mask uses the actual sequence length, which matches for n == 64.
    x = jnp.concatenate([cls_tokens, x], axis=1)
    x = encoder_decoder_layer(params["layer1"], x, heads)
    x = x[:, 0:x.shape[1] // 2 + 1, :]
    x = encoder_decoder_layer(params["layer2"], x, heads)
    x = x[:, 0:x.shape[1] // 2 + 1, :]
    x = encoder_decoder_layer(params["layer3"], x, heads)
    x = x[:, 1:, :]
    return x


# ----------------------------------------------------------------------------
if __name__ == "__main__":
    # Shapes consistent with the module's hard-coded 65/33/17 masks:
    # input sequence length must be 64 (65 after the cls token is prepended).
    d_model = 16
    heads = 4
    d_output = 32
    B, N = 2, 64

    key = jax.random.PRNGKey(0)
    k_param, k_x = jax.random.split(key)
    params = init_dncoder(k_param, d_model, d_output)
    x = jax.random.normal(k_x, (B, N, d_model), jnp.float32)

    out = dncoder_forward(params, x, derection="up", heads=heads)
    out = jax.block_until_ready(out)
    assert out.shape == (B, 16, d_output), out.shape
    print("KERNEL_OK")
</pallas_src>

<mosaic_0001>
module attributes {stable_mosaic.version = 11 : i64} {
  func.func @_layer_kernel(%arg0: i32, %arg1: memref<1x65x16xf32, #tpu.memory_space<vmem>>, %arg2: memref<1x16xf32, #tpu.memory_space<vmem>>, %arg3: memref<1x16xf32, #tpu.memory_space<vmem>>, %arg4: memref<16x48xf32, #tpu.memory_space<vmem>>, %arg5: memref<1x48xf32, #tpu.memory_space<vmem>>, %arg6: memref<16x16xf32, #tpu.memory_space<vmem>>, %arg7: memref<1x16xf32, #tpu.memory_space<vmem>>, %arg8: memref<1x16xf32, #tpu.memory_space<vmem>>, %arg9: memref<1x16xf32, #tpu.memory_space<vmem>>, %arg10: memref<16x64xf32, #tpu.memory_space<vmem>>, %arg11: memref<1x64xf32, #tpu.memory_space<vmem>>, %arg12: memref<1x64xf32, #tpu.memory_space<vmem>>, %arg13: memref<1x64xf32, #tpu.memory_space<vmem>>, %arg14: memref<64x16xf32, #tpu.memory_space<vmem>>, %arg15: memref<1x16xf32, #tpu.memory_space<vmem>>, %arg16: memref<1x16xf32, #tpu.memory_space<vmem>>, %arg17: memref<1x16xf32, #tpu.memory_space<vmem>>, %arg18: memref<16x32xf32, #tpu.memory_space<vmem>>, %arg19: memref<1x32xf32, #tpu.memory_space<vmem>>, %arg20: memref<1x65x32xf32, #tpu.memory_space<vmem>>) attributes {dimension_semantics = [#tpu.dimension_semantics<parallel>], iteration_bounds = array<i64: 2>, scalar_prefetch = 0 : i64, scratch_operands = 0 : i64, tpu.core_type = #tpu.core_type<tc>, window_params = [{transform_indices = @transform_0, window_bounds = array<i64: 1, 65, 16>}, {pipeline_mode = #tpu.pipeline_mode<synchronous>, transform_indices = @transform_1, window_bounds = array<i64: 1, 16>}, {pipeline_mode = #tpu.pipeline_mode<synchronous>, transform_indices = @transform_2, window_bounds = array<i64: 1, 16>}, {pipeline_mode = #tpu.pipeline_mode<synchronous>, transform_indices = @transform_3, window_bounds = array<i64: 16, 48>}, {pipeline_mode = #tpu.pipeline_mode<synchronous>, transform_indices = @transform_4, window_bounds = array<i64: 1, 48>}, {pipeline_mode = #tpu.pipeline_mode<synchronous>, transform_indices = @transform_5, window_bounds = array<i64: 16, 16>}, {pipeline_mode = #tpu.pipeline_mode<synchronous>, transform_indices = @transform_6, window_bounds = array<i64: 1, 16>}, {pipeline_mode = #tpu.pipeline_mode<synchronous>, transform_indices = @transform_7, window_bounds = array<i64: 1, 16>}, {pipeline_mode = #tpu.pipeline_mode<synchronous>, transform_indices = @transform_8, window_bounds = array<i64: 1, 16>}, {pipeline_mode = #tpu.pipeline_mode<synchronous>, transform_indices = @transform_9, window_bounds = array<i64: 16, 64>}, {pipeline_mode = #tpu.pipeline_mode<synchronous>, transform_indices = @transform_10, window_bounds = array<i64: 1, 64>}, {pipeline_mode = #tpu.pipeline_mode<synchronous>, transform_indices = @transform_11, window_bounds = array<i64: 1, 64>}, {pipeline_mode = #tpu.pipeline_mode<synchronous>, transform_indices = @transform_12, window_bounds = array<i64: 1, 64>}, {pipeline_mode = #tpu.pipeline_mode<synchronous>, transform_indices = @transform_13, window_bounds = array<i64: 64, 16>}, {pipeline_mode = #tpu.pipeline_mode<synchronous>, transform_indices = @transform_14, window_bounds = array<i64: 1, 16>}, {pipeline_mode = #tpu.pipeline_mode<synchronous>, transform_indices = @transform_15, window_bounds = array<i64: 1, 16>}, {pipeline_mode = #tpu.pipeline_mode<synchronous>, transform_indices = @transform_16, window_bounds = array<i64: 1, 16>}, {pipeline_mode = #tpu.pipeline_mode<synchronous>, transform_indices = @transform_17, window_bounds = array<i64: 16, 32>}, {pipeline_mode = #tpu.pipeline_mode<synchronous>, transform_indices = @transform_18, window_bounds = array<i64: 1, 32>}, {transform_indices = @transform_19, window_bounds = array<i64: 1, 65, 32>}]} {
    %c0 = arith.constant 0 : index
    %c0_0 = arith.constant 0 : index
    %c0_1 = arith.constant 0 : index
    %0 = vector.load %arg1[%c0, %c0_0, %c0_1] : memref<1x65x16xf32, #tpu.memory_space<vmem>>, vector<1x65x16xf32>
    %1 = vector.shape_cast %0 : vector<1x65x16xf32> to vector<65x16xf32>
    %c0_2 = arith.constant 0 : index
    %c0_3 = arith.constant 0 : index
    %2 = vector.load %arg2[%c0_2, %c0_3] : memref<1x16xf32, #tpu.memory_space<vmem>>, vector<1x16xf32>
    %c0_4 = arith.constant 0 : index
    %c0_5 = arith.constant 0 : index
    %3 = vector.load %arg3[%c0_4, %c0_5] : memref<1x16xf32, #tpu.memory_space<vmem>>, vector<1x16xf32>
    %cst = arith.constant dense<0.000000e+00> : vector<65xf32>
    %4 = vector.multi_reduction <add>, %1, %cst [1] : vector<65x16xf32> to vector<65xf32>
    %5 = vector.shape_cast %4 : vector<65xf32> to vector<65x1xf32>
    %cst_6 = arith.constant 1.600000e+01 : f32
    %6 = vector.broadcast %cst_6 : f32 to vector<65x1xf32>
    %7 = arith.divf %5, %6 : vector<65x1xf32>
    %8 = vector.broadcast %7 : vector<65x1xf32> to vector<65x16xf32>
    %9 = arith.subf %1, %8 : vector<65x16xf32>
    %10 = arith.mulf %9, %9 : vector<65x16xf32>
    %cst_7 = arith.constant dense<0.000000e+00> : vector<65xf32>
    %11 = vector.multi_reduction <add>, %10, %cst_7 [1] : vector<65x16xf32> to vector<65xf32>
    %12 = vector.shape_cast %11 : vector<65xf32> to vector<65x1xf32>
    %cst_8 = arith.constant 0.0666666701 : f32
    %13 = vector.broadcast %cst_8 : f32 to vector<65x1xf32>
    %14 = arith.mulf %12, %13 : vector<65x1xf32>
    %15 = vector.broadcast %2 : vector<1x16xf32> to vector<65x16xf32>
    %16 = arith.mulf %15, %9 : vector<65x16xf32>
    %17 = math.sqrt %14 : vector<65x1xf32>
    %cst_9 = arith.constant 9.99999997E-7 : f32
    %18 = vector.broadcast %cst_9 : f32 to vector<65x1xf32>
    %19 = arith.addf %17, %18 : vector<65x1xf32>
    %20 = vector.broadcast %19 : vector<65x1xf32> to vector<65x16xf32>
    %21 = arith.divf %16, %20 : vector<65x16xf32>
    %22 = vector.broadcast %3 : vector<1x16xf32> to vector<65x16xf32>
    %23 = arith.addf %21, %22 : vector<65x16xf32>
    %c0_10 = arith.constant 0 : index
    %c0_11 = arith.constant 0 : index
    %24 = vector.load %arg4[%c0_10, %c0_11] : memref<16x48xf32, #tpu.memory_space<vmem>>, vector<16x48xf32>
    %cst_12 = arith.constant dense<0.000000e+00> : vector<65x48xf32>
    %25 = tpu.matmul %23, %24, %cst_12 {dimension_numbers = #tpu.dot_dimension_numbers<[1], [0], [0], [1], [0, 0, 1, 1], [], []>} : vector<65x16xf32>, vector<16x48xf32>, vector<65x48xf32> -> vector<65x48xf32>
    %c0_13 = arith.constant 0 : index
    %c0_14 = arith.constant 0 : index
    %26 = vector.load %arg5[%c0_13, %c0_14] : memref<1x48xf32, #tpu.memory_space<vmem>>, vector<1x48xf32>
    %27 = vector.broadcast %26 : vector<1x48xf32> to vector<65x48xf32>
    %28 = arith.addf %25, %27 : vector<65x48xf32>
    %29 = vector.extract_strided_slice %28 {offsets = [0, 0], sizes = [65, 16], strides = [1, 1]} : vector<65x48xf32> to vector<65x16xf32>
    %30 = vector.extract_strided_slice %28 {offsets = [0, 16], sizes = [65, 16], strides = [1, 1]} : vector<65x48xf32> to vector<65x16xf32>
    %31 = vector.extract_strided_slice %28 {offsets = [0, 32], sizes = [65, 16], strides = [1, 1]} : vector<65x48xf32> to vector<65x16xf32>
    %32 = tpu.iota {dimensions = array<i32: 0>} : vector<65x65xi32>
    %33 = tpu.iota {dimensions = array<i32: 1>} : vector<65x65xi32>
    %34 = arith.cmpi sgt, %33, %32 : vector<65x65xi32>
    %35 = vector.extract_strided_slice %29 {offsets = [0, 0], sizes = [65, 4], strides = [1, 1]} : vector<65x16xf32> to vector<65x4xf32>
    %36 = vector.extract_strided_slice %30 {offsets = [0, 0], sizes = [65, 4], strides = [1, 1]} : vector<65x16xf32> to vector<65x4xf32>
    %37 = vector.extract_strided_slice %31 {offsets = [0, 0], sizes = [65, 4], strides = [1, 1]} : vector<65x16xf32> to vector<65x4xf32>
    %cst_15 = arith.constant dense<0.000000e+00> : vector<65x65xf32>
    %38 = tpu.matmul %35, %36, %cst_15 {dimension_numbers = #tpu.dot_dimension_numbers<[1], [1], [0], [0], [0, 0, 1, 0], [], []>} : vector<65x4xf32>, vector<65x4xf32>, vector<65x65xf32> -> vector<65x65xf32>
    %cst_16 = arith.constant 5.000000e-01 : f32
    %39 = vector.broadcast %cst_16 : f32 to vector<65x65xf32>
    %40 = arith.mulf %38, %39 : vector<65x65xf32>
    %cst_17 = arith.constant -1.000000e+09 : f32
    %41 = vector.broadcast %cst_17 : f32 to vector<65x65xf32>
    %42 = arith.select %34, %40, %41 : vector<65x65xi1>, vector<65x65xf32>
    %cst_18 = arith.constant dense<0xFF800000> : vector<65xf32>
    %43 = vector.multi_reduction <maximumf>, %42, %cst_18 [1] : vector<65x65xf32> to vector<65xf32>
    %44 = vector.shape_cast %43 : vector<65xf32> to vector<65x1xf32>
    %45 = vector.broadcast %44 : vector<65x1xf32> to vector<65x65xf32>
    %46 = arith.subf %42, %45 : vector<65x65xf32>
    %47 = math.exp %46 : vector<65x65xf32>
    %cst_19 = arith.constant dense<0.000000e+00> : vector<65xf32>
    %48 = vector.multi_reduction <add>, %47, %cst_19 [1] : vector<65x65xf32> to vector<65xf32>
    %49 = vector.shape_cast %48 : vector<65xf32> to vector<65x1xf32>
    %50 = tpu.reciprocal %49 {approx = true} : vector<65x1xf32> -> vector<65x1xf32>
    %51 = vector.broadcast %50 : vector<65x1xf32> to vector<65x65xf32>
    %52 = arith.mulf %47, %51 : vector<65x65xf32>
    %cst_20 = arith.constant dense<0.000000e+00> : vector<65x4xf32>
    %53 = tpu.matmul %52, %37, %cst_20 {dimension_numbers = #tpu.dot_dimension_numbers<[1], [0], [0], [1], [0, 0, 1, 1], [], []>} : vector<65x65xf32>, vector<65x4xf32>, vector<65x4xf32> -> vector<65x4xf32>
    %54 = vector.extract_strided_slice %29 {offsets = [0, 4], sizes = [65, 4], strides = [1, 1]} : vector<65x16xf32> to vector<65x4xf32>
    %55 = vector.extract_strided_slice %30 {offsets = [0, 4], sizes = [65, 4], strides = [1, 1]} : vector<65x16xf32> to vector<65x4xf32>
    %56 = vector.extract_strided_slice %31 {offsets = [0, 4], sizes = [65, 4], strides = [1, 1]} : vector<65x16xf32> to vector<65x4xf32>
    %cst_21 = arith.constant dense<0.000000e+00> : vector<65x65xf32>
    %57 = tpu.matmul %54, %55, %cst_21 {dimension_numbers = #tpu.dot_dimension_numbers<[1], [1], [0], [0], [0, 0, 1, 0], [], []>} : vector<65x4xf32>, vector<65x4xf32>, vector<65x65xf32> -> vector<65x65xf32>
    %cst_22 = arith.constant 5.000000e-01 : f32
    %58 = vector.broadcast %cst_22 : f32 to vector<65x65xf32>
    %59 = arith.mulf %57, %58 : vector<65x65xf32>
    %cst_23 = arith.constant -1.000000e+09 : f32
    %60 = vector.broadcast %cst_23 : f32 to vector<65x65xf32>
    %61 = arith.select %34, %59, %60 : vector<65x65xi1>, vector<65x65xf32>
    %cst_24 = arith.constant dense<0xFF800000> : vector<65xf32>
    %62 = vector.multi_reduction <maximumf>, %61, %cst_24 [1] : vector<65x65xf32> to vector<65xf32>
    %63 = vector.shape_cast %62 : vector<65xf32> to vector<65x1xf32>
    %64 = vector.broadcast %63 : vector<65x1xf32> to vector<65x65xf32>
    %65 = arith.subf %61, %64 : vector<65x65xf32>
    %66 = math.exp %65 : vector<65x65xf32>
    %cst_25 = arith.constant dense<0.000000e+00> : vector<65xf32>
    %67 = vector.multi_reduction <add>, %66, %cst_25 [1] : vector<65x65xf32> to vector<65xf32>
    %68 = vector.shape_cast %67 : vector<65xf32> to vector<65x1xf32>
    %69 = tpu.reciprocal %68 {approx = true} : vector<65x1xf32> -> vector<65x1xf32>
    %70 = vector.broadcast %69 : vector<65x1xf32> to vector<65x65xf32>
    %71 = arith.mulf %66, %70 : vector<65x65xf32>
    %cst_26 = arith.constant dense<0.000000e+00> : vector<65x4xf32>
    %72 = tpu.matmul %71, %56, %cst_26 {dimension_numbers = #tpu.dot_dimension_numbers<[1], [0], [0], [1], [0, 0, 1, 1], [], []>} : vector<65x65xf32>, vector<65x4xf32>, vector<65x4xf32> -> vector<65x4xf32>
    %73 = vector.extract_strided_slice %29 {offsets = [0, 8], sizes = [65, 4], strides = [1, 1]} : vector<65x16xf32> to vector<65x4xf32>
    %74 = vector.extract_strided_slice %30 {offsets = [0, 8], sizes = [65, 4], strides = [1, 1]} : vector<65x16xf32> to vector<65x4xf32>
    %75 = vector.extract_strided_slice %31 {offsets = [0, 8], sizes = [65, 4], strides = [1, 1]} : vector<65x16xf32> to vector<65x4xf32>
    %cst_27 = arith.constant dense<0.000000e+00> : vector<65x65xf32>
    %76 = tpu.matmul %73, %74, %cst_27 {dimension_numbers = #tpu.dot_dimension_numbers<[1], [1], [0], [0], [0, 0, 1, 0], [], []>} : vector<65x4xf32>, vector<65x4xf32>, vector<65x65xf32> -> vector<65x65xf32>
    %cst_28 = arith.constant 5.000000e-01 : f32
    %77 = vector.broadcast %cst_28 : f32 to vector<65x65xf32>
    %78 = arith.mulf %76, %77 : vector<65x65xf32>
    %cst_29 = arith.constant -1.000000e+09 : f32
    %79 = vector.broadcast %cst_29 : f32 to vector<65x65xf32>
    %80 = arith.select %34, %78, %79 : vector<65x65xi1>, vector<65x65xf32>
    %cst_30 = arith.constant dense<0xFF800000> : vector<65xf32>
    %81 = vector.multi_reduction <maximumf>, %80, %cst_30 [1] : vector<65x65xf32> to vector<65xf32>
    %82 = vector.shape_cast %81 : vector<65xf32> to vector<65x1xf32>
    %83 = vector.broadcast %82 : vector<65x1xf32> to vector<65x65xf32>
    %84 = arith.subf %80, %83 : vector<65x65xf32>
    %85 = math.exp %84 : vector<65x65xf32>
    %cst_31 = arith.constant dense<0.000000e+00> : vector<65xf32>
    %86 = vector.multi_reduction <add>, %85, %cst_31 [1] : vector<65x65xf32> to vector<65xf32>
    %87 = vector.shape_cast %86 : vector<65xf32> to vector<65x1xf32>
    %88 = tpu.reciprocal %87 {approx = true} : vector<65x1xf32> -> vector<65x1xf32>
    %89 = vector.broadcast %88 : vector<65x1xf32> to vector<65x65xf32>
    %90 = arith.mulf %85, %89 : vector<65x65xf32>
    %cst_32 = arith.constant dense<0.000000e+00> : vector<65x4xf32>
    %91 = tpu.matmul %90, %75, %cst_32 {dimension_numbers = #tpu.dot_dimension_numbers<[1], [0], [0], [1], [0, 0, 1, 1], [], []>} : vector<65x65xf32>, vector<65x4xf32>, vector<65x4xf32> -> vector<65x4xf32>
    %92 = vector.extract_strided_slice %29 {offsets = [0, 12], sizes = [65, 4], strides = [1, 1]} : vector<65x16xf32> to vector<65x4xf32>
    %93 = vector.extract_strided_slice %30 {offsets = [0, 12], sizes = [65, 4], strides = [1, 1]} : vector<65x16xf32> to vector<65x4xf32>
    %94 = vector.extract_strided_slice %31 {offsets = [0, 12], sizes = [65, 4], strides = [1, 1]} : vector<65x16xf32> to vector<65x4xf32>
    %cst_33 = arith.constant dense<0.000000e+00> : vector<65x65xf32>
    %95 = tpu.matmul %92, %93, %cst_33 {dimension_numbers = #tpu.dot_dimension_numbers<[1], [1], [0], [0], [0, 0, 1, 0], [], []>} : vector<65x4xf32>, vector<65x4xf32>, vector<65x65xf32> -> vector<65x65xf32>
    %cst_34 = arith.constant 5.000000e-01 : f32
    %96 = vector.broadcast %cst_34 : f32 to vector<65x65xf32>
    %97 = arith.mulf %95, %96 : vector<65x65xf32>
    %cst_35 = arith.constant -1.000000e+09 : f32
    %98 = vector.broadcast %cst_35 : f32 to vector<65x65xf32>
    %99 = arith.select %34, %97, %98 : vector<65x65xi1>, vector<65x65xf32>
    %cst_36 = arith.constant dense<0xFF800000> : vector<65xf32>
    %100 = vector.multi_reduction <maximumf>, %99, %cst_36 [1] : vector<65x65xf32> to vector<65xf32>
    %101 = vector.shape_cast %100 : vector<65xf32> to vector<65x1xf32>
    %102 = vector.broadcast %101 : vector<65x1xf32> to vector<65x65xf32>
    %103 = arith.subf %99, %102 : vector<65x65xf32>
    %104 = math.exp %103 : vector<65x65xf32>
    %cst_37 = arith.constant dense<0.000000e+00> : vector<65xf32>
    %105 = vector.multi_reduction <add>, %104, %cst_37 [1] : vector<65x65xf32> to vector<65xf32>
    %106 = vector.shape_cast %105 : vector<65xf32> to vector<65x1xf32>
    %107 = tpu.reciprocal %106 {approx = true} : vector<65x1xf32> -> vector<65x1xf32>
    %108 = vector.broadcast %107 : vector<65x1xf32> to vector<65x65xf32>
    %109 = arith.mulf %104, %108 : vector<65x65xf32>
    %cst_38 = arith.constant dense<0.000000e+00> : vector<65x4xf32>
    %110 = tpu.matmul %109, %94, %cst_38 {dimension_numbers = #tpu.dot_dimension_numbers<[1], [0], [0], [1], [0, 0, 1, 1], [], []>} : vector<65x65xf32>, vector<65x4xf32>, vector<65x4xf32> -> vector<65x4xf32>
    %111 = tpu.concatenate %53, %72, %91, %110 in 1 : vector<65x4xf32>, vector<65x4xf32>, vector<65x4xf32>, vector<65x4xf32> -> vector<65x16xf32>
    %c0_39 = arith.constant 0 : index
    %c0_40 = arith.constant 0 : index
    %112 = vector.load %arg6[%c0_39, %c0_40] : memref<16x16xf32, #tpu.memory_space<vmem>>, vector<16x16xf32>
    %cst_41 = arith.constant dense<0.000000e+00> : vector<65x16xf32>
    %113 = tpu.matmul %111, %112, %cst_41 {dimension_numbers = #tpu.dot_dimension_numbers<[1], [0], [0], [1], [0, 0, 1, 1], [], []>} : vector<65x16xf32>, vector<16x16xf32>, vector<65x16xf32> -> vector<65x16xf32>
    %c0_42 = arith.constant 0 : index
    %c0_43 = arith.constant 0 : index
    %114 = vector.load %arg7[%c0_42, %c0_43] : memref<1x16xf32, #tpu.memory_space<vmem>>, vector<1x16xf32>
    %115 = vector.broadcast %114 : vector<1x16xf32> to vector<65x16xf32>
    %116 = arith.addf %113, %115 : vector<65x16xf32>
    %117 = arith.addf %1, %116 : vector<65x16xf32>
    %c0_44 = arith.constant 0 : index
    %c0_45 = arith.constant 0 : index
    %118 = vector.load %arg8[%c0_44, %c0_45] : memref<1x16xf32, #tpu.memory_space<vmem>>, vector<1x16xf32>
    %c0_46 = arith.constant 0 : index
    %c0_47 = arith.constant 0 : index
    %119 = vector.load %arg9[%c0_46, %c0_47] : memref<1x16xf32, #tpu.memory_space<vmem>>, vector<1x16xf32>
    %cst_48 = arith.constant dense<0.000000e+00> : vector<65xf32>
    %120 = vector.multi_reduction <add>, %117, %cst_48 [1] : vector<65x16xf32> to vector<65xf32>
    %121 = vector.shape_cast %120 : vector<65xf32> to vector<65x1xf32>
    %cst_49 = arith.constant 1.600000e+01 : f32
    %122 = vector.broadcast %cst_49 : f32 to vector<65x1xf32>
    %123 = arith.divf %121, %122 : vector<65x1xf32>
    %124 = vector.broadcast %123 : vector<65x1xf32> to vector<65x16xf32>
    %125 = arith.subf %117, %124 : vector<65x16xf32>
    %126 = arith.mulf %125, %125 : vector<65x16xf32>
    %cst_50 = arith.constant dense<0.000000e+00> : vector<65xf32>
    %127 = vector.multi_reduction <add>, %126, %cst_50 [1] : vector<65x16xf32> to vector<65xf32>
    %128 = vector.shape_cast %127 : vector<65xf32> to vector<65x1xf32>
    %cst_51 = arith.constant 0.0666666701 : f32
    %129 = vector.broadcast %cst_51 : f32 to vector<65x1xf32>
    %130 = arith.mulf %128, %129 : vector<65x1xf32>
    %131 = vector.broadcast %118 : vector<1x16xf32> to vector<65x16xf32>
    %132 = arith.mulf %131, %125 : vector<65x16xf32>
    %133 = math.sqrt %130 : vector<65x1xf32>
    %cst_52 = arith.constant 9.99999997E-7 : f32
    %134 = vector.broadcast %cst_52 : f32 to vector<65x1xf32>
    %135 = arith.addf %133, %134 : vector<65x1xf32>
    %136 = vector.broadcast %135 : vector<65x1xf32> to vector<65x16xf32>
    %137 = arith.divf %132, %136 : vector<65x16xf32>
    %138 = vector.broadcast %119 : vector<1x16xf32> to vector<65x16xf32>
    %139 = arith.addf %137, %138 : vector<65x16xf32>
    %c0_53 = arith.constant 0 : index
    %c0_54 = arith.constant 0 : index
    %140 = vector.load %arg10[%c0_53, %c0_54] : memref<16x64xf32, #tpu.memory_space<vmem>>, vector<16x64xf32>
    %cst_55 = arith.constant dense<0.000000e+00> : vector<65x64xf32>
    %141 = tpu.matmul %139, %140, %cst_55 {dimension_numbers = #tpu.dot_dimension_numbers<[1], [0], [0], [1], [0, 0, 1, 1], [], []>} : vector<65x16xf32>, vector<16x64xf32>, vector<65x64xf32> -> vector<65x64xf32>
    %c0_56 = arith.constant 0 : index
    %c0_57 = arith.constant 0 : index
    %142 = vector.load %arg11[%c0_56, %c0_57] : memref<1x64xf32, #tpu.memory_space<vmem>>, vector<1x64xf32>
    %143 = vector.broadcast %142 : vector<1x64xf32> to vector<65x64xf32>
    %144 = arith.addf %141, %143 : vector<65x64xf32>
    %c0_58 = arith.constant 0 : index
    %c0_59 = arith.constant 0 : index
    %145 = vector.load %arg12[%c0_58, %c0_59] : memref<1x64xf32, #tpu.memory_space<vmem>>, vector<1x64xf32>
    %c0_60 = arith.constant 0 : index
    %c0_61 = arith.constant 0 : index
    %146 = vector.load %arg13[%c0_60, %c0_61] : memref<1x64xf32, #tpu.memory_space<vmem>>, vector<1x64xf32>
    %cst_62 = arith.constant dense<0.000000e+00> : vector<65xf32>
    %147 = vector.multi_reduction <add>, %144, %cst_62 [1] : vector<65x64xf32> to vector<65xf32>
    %148 = vector.shape_cast %147 : vector<65xf32> to vector<65x1xf32>
    %cst_63 = arith.constant 6.400000e+01 : f32
    %149 = vector.broadcast %cst_63 : f32 to vector<65x1xf32>
    %150 = arith.divf %148, %149 : vector<65x1xf32>
    %151 = vector.broadcast %150 : vector<65x1xf32> to vector<65x64xf32>
    %152 = arith.subf %144, %151 : vector<65x64xf32>
    %153 = arith.mulf %152, %152 : vector<65x64xf32>
    %cst_64 = arith.constant dense<0.000000e+00> : vector<65xf32>
    %154 = vector.multi_reduction <add>, %153, %cst_64 [1] : vector<65x64xf32> to vector<65xf32>
    %155 = vector.shape_cast %154 : vector<65xf32> to vector<65x1xf32>
    %cst_65 = arith.constant 0.0158730168 : f32
    %156 = vector.broadcast %cst_65 : f32 to vector<65x1xf32>
    %157 = arith.mulf %155, %156 : vector<65x1xf32>
    %158 = vector.broadcast %145 : vector<1x64xf32> to vector<65x64xf32>
    %159 = arith.mulf %158, %152 : vector<65x64xf32>
    %160 = math.sqrt %157 : vector<65x1xf32>
    %cst_66 = arith.constant 9.99999997E-7 : f32
    %161 = vector.broadcast %cst_66 : f32 to vector<65x1xf32>
    %162 = arith.addf %160, %161 : vector<65x1xf32>
    %163 = vector.broadcast %162 : vector<65x1xf32> to vector<65x64xf32>
    %164 = arith.divf %159, %163 : vector<65x64xf32>
    %165 = vector.broadcast %146 : vector<1x64xf32> to vector<65x64xf32>
    %166 = arith.addf %164, %165 : vector<65x64xf32>
    %c0_67 = arith.constant 0 : index
    %c0_68 = arith.constant 0 : index
    %167 = vector.load %arg14[%c0_67, %c0_68] : memref<64x16xf32, #tpu.memory_space<vmem>>, vector<64x16xf32>
    %cst_69 = arith.constant dense<0.000000e+00> : vector<65x16xf32>
    %168 = tpu.matmul %166, %167, %cst_69 {dimension_numbers = #tpu.dot_dimension_numbers<[1], [0], [0], [1], [0, 0, 1, 1], [], []>} : vector<65x64xf32>, vector<64x16xf32>, vector<65x16xf32> -> vector<65x16xf32>
    %c0_70 = arith.constant 0 : index
    %c0_71 = arith.constant 0 : index
    %169 = vector.load %arg15[%c0_70, %c0_71] : memref<1x16xf32, #tpu.memory_space<vmem>>, vector<1x16xf32>
    %170 = vector.broadcast %169 : vector<1x16xf32> to vector<65x16xf32>
    %171 = arith.addf %168, %170 : vector<65x16xf32>
    %c0_72 = arith.constant 0 : index
    %c0_73 = arith.constant 0 : index
    %172 = vector.load %arg16[%c0_72, %c0_73] : memref<1x16xf32, #tpu.memory_space<vmem>>, vector<1x16xf32>
    %c0_74 = arith.constant 0 : index
    %c0_75 = arith.constant 0 : index
    %173 = vector.load %arg17[%c0_74, %c0_75] : memref<1x16xf32, #tpu.memory_space<vmem>>, vector<1x16xf32>
    %cst_76 = arith.constant dense<0.000000e+00> : vector<65xf32>
    %174 = vector.multi_reduction <add>, %171, %cst_76 [1] : vector<65x16xf32> to vector<65xf32>
    %175 = vector.shape_cast %174 : vector<65xf32> to vector<65x1xf32>
    %cst_77 = arith.constant 1.600000e+01 : f32
    %176 = vector.broadcast %cst_77 : f32 to vector<65x1xf32>
    %177 = arith.divf %175, %176 : vector<65x1xf32>
    %178 = vector.broadcast %177 : vector<65x1xf32> to vector<65x16xf32>
    %179 = arith.subf %171, %178 : vector<65x16xf32>
    %180 = arith.mulf %179, %179 : vector<65x16xf32>
    %cst_78 = arith.constant dense<0.000000e+00> : vector<65xf32>
    %181 = vector.multi_reduction <add>, %180, %cst_78 [1] : vector<65x16xf32> to vector<65xf32>
    %182 = vector.shape_cast %181 : vector<65xf32> to vector<65x1xf32>
    %cst_79 = arith.constant 0.0666666701 : f32
    %183 = vector.broadcast %cst_79 : f32 to vector<65x1xf32>
    %184 = arith.mulf %182, %183 : vector<65x1xf32>
    %185 = vector.broadcast %172 : vector<1x16xf32> to vector<65x16xf32>
    %186 = arith.mulf %185, %179 : vector<65x16xf32>
    %187 = math.sqrt %184 : vector<65x1xf32>
    %cst_80 = arith.constant 9.99999997E-7 : f32
    %188 = vector.broadcast %cst_80 : f32 to vector<65x1xf32>
    %189 = arith.addf %187, %188 : vector<65x1xf32>
    %190 = vector.broadcast %189 : vector<65x1xf32> to vector<65x16xf32>
    %191 = arith.divf %186, %190 : vector<65x16xf32>
    %192 = vector.broadcast %173 : vector<1x16xf32> to vector<65x16xf32>
    %193 = arith.addf %191, %192 : vector<65x16xf32>
    %c0_81 = arith.constant 0 : index
    %c0_82 = arith.constant 0 : index
    %194 = vector.load %arg18[%c0_81, %c0_82] : memref<16x32xf32, #tpu.memory_space<vmem>>, vector<16x32xf32>
    %cst_83 = arith.constant dense<0.000000e+00> : vector<65x32xf32>
    %195 = tpu.matmul %193, %194, %cst_83 {dimension_numbers = #tpu.dot_dimension_numbers<[1], [0], [0], [1], [0, 0, 1, 1], [], []>} : vector<65x16xf32>, vector<16x32xf32>, vector<65x32xf32> -> vector<65x32xf32>
    %c0_84 = arith.constant 0 : index
    %c0_85 = arith.constant 0 : index
    %196 = vector.load %arg19[%c0_84, %c0_85] : memref<1x32xf32, #tpu.memory_space<vmem>>, vector<1x32xf32>
    %197 = vector.broadcast %196 : vector<1x32xf32> to vector<65x32xf32>
    %198 = arith.addf %195, %197 : vector<65x32xf32>
    %cst_86 = arith.constant 0.000000e+00 : f32
    %199 = vector.broadcast %cst_86 : f32 to vector<65x32xf32>
    %200 = arith.maximumf %198, %199 : vector<65x32xf32>
    %c0_87 = arith.constant 0 : index
    %c0_88 = arith.constant 0 : index
    %c0_89 = arith.constant 0 : index
    %201 = vector.load %arg20[%c0_87, %c0_88, %c0_89] : memref<1x65x32xf32, #tpu.memory_space<vmem>>, vector<1x65x32xf32>
    %202 = vector.shape_cast %201 : vector<1x65x32xf32> to vector<65x32xf32>
    %203 = vector.shape_cast %200 : vector<65x32xf32> to vector<1x65x32xf32>
    tpu.vector_store %arg20[%c0_87, %c0_88, %c0_89], %203 {strides = array<i32>} : memref<1x65x32xf32, #tpu.memory_space<vmem>>, vector<1x65x32xf32>,
    return
  }
  func.func @transform_0(%arg0: i32) -> (i32, i32, i32) {
    %c0_i32 = arith.constant 0 : i32
    %c0_i32_0 = arith.constant 0 : i32
    %c0_i32_1 = arith.constant 0 : i32
    return %arg0, %c0_i32, %c0_i32_0 : i32, i32, i32
  }
  func.func @transform_1(%arg0: i32) -> (i32, i32) {
    %c0_i32 = arith.constant 0 : i32
    %c0_i32_0 = arith.constant 0 : i32
    %c0_i32_1 = arith.constant 0 : i32
    return %c0_i32, %c0_i32_0 : i32, i32
  }
  func.func @transform_2(%arg0: i32) -> (i32, i32) {
    %c0_i32 = arith.constant 0 : i32
    %c0_i32_0 = arith.constant 0 : i32
    %c0_i32_1 = arith.constant 0 : i32
    return %c0_i32, %c0_i32_0 : i32, i32
  }
  func.func @transform_3(%arg0: i32) -> (i32, i32) {
    %c0_i32 = arith.constant 0 : i32
    %c0_i32_0 = arith.constant 0 : i32
    %c0_i32_1 = arith.constant 0 : i32
    return %c0_i32, %c0_i32_0 : i32, i32
  }
  func.func @transform_4(%arg0: i32) -> (i32, i32) {
    %c0_i32 = arith.constant 0 : i32
    %c0_i32_0 = arith.constant 0 : i32
    %c0_i32_1 = arith.constant 0 : i32
    return %c0_i32, %c0_i32_0 : i32, i32
  }
  func.func @transform_5(%arg0: i32) -> (i32, i32) {
    %c0_i32 = arith.constant 0 : i32
    %c0_i32_0 = arith.constant 0 : i32
    %c0_i32_1 = arith.constant 0 : i32
    return %c0_i32, %c0_i32_0 : i32, i32
  }
  func.func @transform_6(%arg0: i32) -> (i32, i32) {
    %c0_i32 = arith.constant 0 : i32
    %c0_i32_0 = arith.constant 0 : i32
    %c0_i32_1 = arith.constant 0 : i32
    return %c0_i32, %c0_i32_0 : i32, i32
  }
  func.func @transform_7(%arg0: i32) -> (i32, i32) {
    %c0_i32 = arith.constant 0 : i32
    %c0_i32_0 = arith.constant 0 : i32
    %c0_i32_1 = arith.constant 0 : i32
    return %c0_i32, %c0_i32_0 : i32, i32
  }
  func.func @transform_8(%arg0: i32) -> (i32, i32) {
    %c0_i32 = arith.constant 0 : i32
    %c0_i32_0 = arith.constant 0 : i32
    %c0_i32_1 = arith.constant 0 : i32
    return %c0_i32, %c0_i32_0 : i32, i32
  }
  func.func @transform_9(%arg0: i32) -> (i32, i32) {
    %c0_i32 = arith.constant 0 : i32
    %c0_i32_0 = arith.constant 0 : i32
    %c0_i32_1 = arith.constant 0 : i32
    return %c0_i32, %c0_i32_0 : i32, i32
  }
  func.func @transform_10(%arg0: i32) -> (i32, i32) {
    %c0_i32 = arith.constant 0 : i32
    %c0_i32_0 = arith.constant 0 : i32
    %c0_i32_1 = arith.constant 0 : i32
    return %c0_i32, %c0_i32_0 : i32, i32
  }
  func.func @transform_11(%arg0: i32) -> (i32, i32) {
    %c0_i32 = arith.constant 0 : i32
    %c0_i32_0 = arith.constant 0 : i32
    %c0_i32_1 = arith.constant 0 : i32
    return %c0_i32, %c0_i32_0 : i32, i32
  }
  func.func @transform_12(%arg0: i32) -> (i32, i32) {
    %c0_i32 = arith.constant 0 : i32
    %c0_i32_0 = arith.constant 0 : i32
    %c0_i32_1 = arith.constant 0 : i32
    return %c0_i32, %c0_i32_0 : i32, i32
  }
  func.func @transform_13(%arg0: i32) -> (i32, i32) {
    %c0_i32 = arith.constant 0 : i32
    %c0_i32_0 = arith.constant 0 : i32
    %c0_i32_1 = arith.constant 0 : i32
    return %c0_i32, %c0_i32_0 : i32, i32
  }
  func.func @transform_14(%arg0: i32) -> (i32, i32) {
    %c0_i32 = arith.constant 0 : i32
    %c0_i32_0 = arith.constant 0 : i32
    %c0_i32_1 = arith.constant 0 : i32
    return %c0_i32, %c0_i32_0 : i32, i32
  }
  func.func @transform_15(%arg0: i32) -> (i32, i32) {
    %c0_i32 = arith.constant 0 : i32
    %c0_i32_0 = arith.constant 0 : i32
    %c0_i32_1 = arith.constant 0 : i32
    return %c0_i32, %c0_i32_0 : i32, i32
  }
  func.func @transform_16(%arg0: i32) -> (i32, i32) {
    %c0_i32 = arith.constant 0 : i32
    %c0_i32_0 = arith.constant 0 : i32
    %c0_i32_1 = arith.constant 0 : i32
    return %c0_i32, %c0_i32_0 : i32, i32
  }
  func.func @transform_17(%arg0: i32) -> (i32, i32) {
    %c0_i32 = arith.constant 0 : i32
    %c0_i32_0 = arith.constant 0 : i32
    %c0_i32_1 = arith.constant 0 : i32
    return %c0_i32, %c0_i32_0 : i32, i32
  }
  func.func @transform_18(%arg0: i32) -> (i32, i32) {
    %c0_i32 = arith.constant 0 : i32
    %c0_i32_0 = arith.constant 0 : i32
    %c0_i32_1 = arith.constant 0 : i32
    return %c0_i32, %c0_i32_0 : i32, i32
  }
  func.func @transform_19(%arg0: i32) -> (i32, i32, i32) {
    %c0_i32 = arith.constant 0 : i32
    %c0_i32_0 = arith.constant 0 : i32
    %c0_i32_1 = arith.constant 0 : i32
    return %arg0, %c0_i32, %c0_i32_0 : i32, i32, i32
  }
}

module attributes {stable_mosaic.version = 11 : i64} {
  func.func @_layer_kernel(%arg0: i32, %arg1: memref<1x33x32xf32, #tpu.memory_space<vmem>>, %arg2: memref<1x32xf32, #tpu.memory_space<vmem>>, %arg3: memref<1x32xf32, #tpu.memory_space<vmem>>, %arg4: memref<32x96xf32, #tpu.memory_space<vmem>>, %arg5: memref<1x96xf32, #tpu.memory_space<vmem>>, %arg6: memref<32x32xf32, #tpu.memory_space<vmem>>, %arg7: memref<1x32xf32, #tpu.memory_space<vmem>>, %arg8: memref<1x32xf32, #tpu.memory_space<vmem>>, %arg9: memref<1x32xf32, #tpu.memory_space<vmem>>, %arg10: memref<32x128xf32, #tpu.memory_space<vmem>>, %arg11: memref<1x128xf32, #tpu.memory_space<vmem>>, %arg12: memref<1x128xf32, #tpu.memory_space<vmem>>, %arg13: memref<1x128xf32, #tpu.memory_space<vmem>>, %arg14: memref<128x32xf32, #tpu.memory_space<vmem>>, %arg15: memref<1x32xf32, #tpu.memory_space<vmem>>, %arg16: memref<1x32xf32, #tpu.memory_space<vmem>>, %arg17: memref<1x32xf32, #tpu.memory_space<vmem>>, %arg18: memref<32x64xf32, #tpu.memory_space<vmem>>, %arg19: memref<1x64xf32, #tpu.memory_space<vmem>>, %arg20: memref<1x33x64xf32, #tpu.memory_space<vmem>>) attributes {dimension_semantics = [#tpu.dimension_semantics<parallel>], iteration_bounds = array<i64: 2>, scalar_prefetch = 0 : i64, scratch_operands = 0 : i64, tpu.core_type = #tpu.core_type<tc>, window_params = [{transform_indices = @transform_0, window_bounds = array<i64: 1, 33, 32>}, {pipeline_mode = #tpu.pipeline_mode<synchronous>, transform_indices = @transform_1, window_bounds = array<i64: 1, 32>}, {pipeline_mode = #tpu.pipeline_mode<synchronous>, transform_indices = @transform_2, window_bounds = array<i64: 1, 32>}, {pipeline_mode = #tpu.pipeline_mode<synchronous>, transform_indices = @transform_3, window_bounds = array<i64: 32, 96>}, {pipeline_mode = #tpu.pipeline_mode<synchronous>, transform_indices = @transform_4, window_bounds = array<i64: 1, 96>}, {pipeline_mode = #tpu.pipeline_mode<synchronous>, transform_indices = @transform_5, window_bounds = array<i64: 32, 32>}, {pipeline_mode = #tpu.pipeline_mode<synchronous>, transform_indices = @transform_6, window_bounds = array<i64: 1, 32>}, {pipeline_mode = #tpu.pipeline_mode<synchronous>, transform_indices = @transform_7, window_bounds = array<i64: 1, 32>}, {pipeline_mode = #tpu.pipeline_mode<synchronous>, transform_indices = @transform_8, window_bounds = array<i64: 1, 32>}, {pipeline_mode = #tpu.pipeline_mode<synchronous>, transform_indices = @transform_9, window_bounds = array<i64: 32, 128>}, {pipeline_mode = #tpu.pipeline_mode<synchronous>, transform_indices = @transform_10, window_bounds = array<i64: 1, 128>}, {pipeline_mode = #tpu.pipeline_mode<synchronous>, transform_indices = @transform_11, window_bounds = array<i64: 1, 128>}, {pipeline_mode = #tpu.pipeline_mode<synchronous>, transform_indices = @transform_12, window_bounds = array<i64: 1, 128>}, {pipeline_mode = #tpu.pipeline_mode<synchronous>, transform_indices = @transform_13, window_bounds = array<i64: 128, 32>}, {pipeline_mode = #tpu.pipeline_mode<synchronous>, transform_indices = @transform_14, window_bounds = array<i64: 1, 32>}, {pipeline_mode = #tpu.pipeline_mode<synchronous>, transform_indices = @transform_15, window_bounds = array<i64: 1, 32>}, {pipeline_mode = #tpu.pipeline_mode<synchronous>, transform_indices = @transform_16, window_bounds = array<i64: 1, 32>}, {pipeline_mode = #tpu.pipeline_mode<synchronous>, transform_indices = @transform_17, window_bounds = array<i64: 32, 64>}, {pipeline_mode = #tpu.pipeline_mode<synchronous>, transform_indices = @transform_18, window_bounds = array<i64: 1, 64>}, {transform_indices = @transform_19, window_bounds = array<i64: 1, 33, 64>}]} {
    %c0 = arith.constant 0 : index
    %c0_0 = arith.constant 0 : index
    %c0_1 = arith.constant 0 : index
    %0 = vector.load %arg1[%c0, %c0_0, %c0_1] : memref<1x33x32xf32, #tpu.memory_space<vmem>>, vector<1x33x32xf32>
    %1 = vector.shape_cast %0 : vector<1x33x32xf32> to vector<33x32xf32>
    %c0_2 = arith.constant 0 : index
    %c0_3 = arith.constant 0 : index
    %2 = vector.load %arg2[%c0_2, %c0_3] : memref<1x32xf32, #tpu.memory_space<vmem>>, vector<1x32xf32>
    %c0_4 = arith.constant 0 : index
    %c0_5 = arith.constant 0 : index
    %3 = vector.load %arg3[%c0_4, %c0_5] : memref<1x32xf32, #tpu.memory_space<vmem>>, vector<1x32xf32>
    %cst = arith.constant dense<0.000000e+00> : vector<33xf32>
    %4 = vector.multi_reduction <add>, %1, %cst [1] : vector<33x32xf32> to vector<33xf32>
    %5 = vector.shape_cast %4 : vector<33xf32> to vector<33x1xf32>
    %cst_6 = arith.constant 3.200000e+01 : f32
    %6 = vector.broadcast %cst_6 : f32 to vector<33x1xf32>
    %7 = arith.divf %5, %6 : vector<33x1xf32>
    %8 = vector.broadcast %7 : vector<33x1xf32> to vector<33x32xf32>
    %9 = arith.subf %1, %8 : vector<33x32xf32>
    %10 = arith.mulf %9, %9 : vector<33x32xf32>
    %cst_7 = arith.constant dense<0.000000e+00> : vector<33xf32>
    %11 = vector.multi_reduction <add>, %10, %cst_7 [1] : vector<33x32xf32> to vector<33xf32>
    %12 = vector.shape_cast %11 : vector<33xf32> to vector<33x1xf32>
    %cst_8 = arith.constant 0.0322580636 : f32
    %13 = vector.broadcast %cst_8 : f32 to vector<33x1xf32>
    %14 = arith.mulf %12, %13 : vector<33x1xf32>
    %15 = vector.broadcast %2 : vector<1x32xf32> to vector<33x32xf32>
    %16 = arith.mulf %15, %9 : vector<33x32xf32>
    %17 = math.sqrt %14 : vector<33x1xf32>
    %cst_9 = arith.constant 9.99999997E-7 : f32
    %18 = vector.broadcast %cst_9 : f32 to vector<33x1xf32>
    %19 = arith.addf %17, %18 : vector<33x1xf32>
    %20 = vector.broadcast %19 : vector<33x1xf32> to vector<33x32xf32>
    %21 = arith.divf %16, %20 : vector<33x32xf32>
    %22 = vector.broadcast %3 : vector<1x32xf32> to vector<33x32xf32>
    %23 = arith.addf %21, %22 : vector<33x32xf32>
    %c0_10 = arith.constant 0 : index
    %c0_11 = arith.constant 0 : index
    %24 = vector.load %arg4[%c0_10, %c0_11] : memref<32x96xf32, #tpu.memory_space<vmem>>, vector<32x96xf32>
    %cst_12 = arith.constant dense<0.000000e+00> : vector<33x96xf32>
    %25 = tpu.matmul %23, %24, %cst_12 {dimension_numbers = #tpu.dot_dimension_numbers<[1], [0], [0], [1], [0, 0, 1, 1], [], []>} : vector<33x32xf32>, vector<32x96xf32>, vector<33x96xf32> -> vector<33x96xf32>
    %c0_13 = arith.constant 0 : index
    %c0_14 = arith.constant 0 : index
    %26 = vector.load %arg5[%c0_13, %c0_14] : memref<1x96xf32, #tpu.memory_space<vmem>>, vector<1x96xf32>
    %27 = vector.broadcast %26 : vector<1x96xf32> to vector<33x96xf32>
    %28 = arith.addf %25, %27 : vector<33x96xf32>
    %29 = vector.extract_strided_slice %28 {offsets = [0, 0], sizes = [33, 32], strides = [1, 1]} : vector<33x96xf32> to vector<33x32xf32>
    %30 = vector.extract_strided_slice %28 {offsets = [0, 32], sizes = [33, 32], strides = [1, 1]} : vector<33x96xf32> to vector<33x32xf32>
    %31 = vector.extract_strided_slice %28 {offsets = [0, 64], sizes = [33, 32], strides = [1, 1]} : vector<33x96xf32> to vector<33x32xf32>
    %32 = tpu.iota {dimensions = array<i32: 0>} : vector<33x33xi32>
    %33 = tpu.iota {dimensions = array<i32: 1>} : vector<33x33xi32>
    %34 = arith.cmpi sgt, %33, %32 : vector<33x33xi32>
    %35 = vector.extract_strided_slice %29 {offsets = [0, 0], sizes = [33, 8], strides = [1, 1]} : vector<33x32xf32> to vector<33x8xf32>
    %36 = vector.extract_strided_slice %30 {offsets = [0, 0], sizes = [33, 8], strides = [1, 1]} : vector<33x32xf32> to vector<33x8xf32>
    %37 = vector.extract_strided_slice %31 {offsets = [0, 0], sizes = [33, 8], strides = [1, 1]} : vector<33x32xf32> to vector<33x8xf32>
    %cst_15 = arith.constant dense<0.000000e+00> : vector<33x33xf32>
    %38 = tpu.matmul %35, %36, %cst_15 {dimension_numbers = #tpu.dot_dimension_numbers<[1], [1], [0], [0], [0, 0, 1, 0], [], []>} : vector<33x8xf32>, vector<33x8xf32>, vector<33x33xf32> -> vector<33x33xf32>
    %cst_16 = arith.constant 0.353553385 : f32
    %39 = vector.broadcast %cst_16 : f32 to vector<33x33xf32>
    %40 = arith.mulf %38, %39 : vector<33x33xf32>
    %cst_17 = arith.constant -1.000000e+09 : f32
    %41 = vector.broadcast %cst_17 : f32 to vector<33x33xf32>
    %42 = arith.select %34, %40, %41 : vector<33x33xi1>, vector<33x33xf32>
    %cst_18 = arith.constant dense<0xFF800000> : vector<33xf32>
    %43 = vector.multi_reduction <maximumf>, %42, %cst_18 [1] : vector<33x33xf32> to vector<33xf32>
    %44 = vector.shape_cast %43 : vector<33xf32> to vector<33x1xf32>
    %45 = vector.broadcast %44 : vector<33x1xf32> to vector<33x33xf32>
    %46 = arith.subf %42, %45 : vector<33x33xf32>
    %47 = math.exp %46 : vector<33x33xf32>
    %cst_19 = arith.constant dense<0.000000e+00> : vector<33xf32>
    %48 = vector.multi_reduction <add>, %47, %cst_19 [1] : vector<33x33xf32> to vector<33xf32>
    %49 = vector.shape_cast %48 : vector<33xf32> to vector<33x1xf32>
    %50 = tpu.reciprocal %49 {approx = true} : vector<33x1xf32> -> vector<33x1xf32>
    %51 = vector.broadcast %50 : vector<33x1xf32> to vector<33x33xf32>
    %52 = arith.mulf %47, %51 : vector<33x33xf32>
    %cst_20 = arith.constant dense<0.000000e+00> : vector<33x8xf32>
    %53 = tpu.matmul %52, %37, %cst_20 {dimension_numbers = #tpu.dot_dimension_numbers<[1], [0], [0], [1], [0, 0, 1, 1], [], []>} : vector<33x33xf32>, vector<33x8xf32>, vector<33x8xf32> -> vector<33x8xf32>
    %54 = vector.extract_strided_slice %29 {offsets = [0, 8], sizes = [33, 8], strides = [1, 1]} : vector<33x32xf32> to vector<33x8xf32>
    %55 = vector.extract_strided_slice %30 {offsets = [0, 8], sizes = [33, 8], strides = [1, 1]} : vector<33x32xf32> to vector<33x8xf32>
    %56 = vector.extract_strided_slice %31 {offsets = [0, 8], sizes = [33, 8], strides = [1, 1]} : vector<33x32xf32> to vector<33x8xf32>
    %cst_21 = arith.constant dense<0.000000e+00> : vector<33x33xf32>
    %57 = tpu.matmul %54, %55, %cst_21 {dimension_numbers = #tpu.dot_dimension_numbers<[1], [1], [0], [0], [0, 0, 1, 0], [], []>} : vector<33x8xf32>, vector<33x8xf32>, vector<33x33xf32> -> vector<33x33xf32>
    %cst_22 = arith.constant 0.353553385 : f32
    %58 = vector.broadcast %cst_22 : f32 to vector<33x33xf32>
    %59 = arith.mulf %57, %58 : vector<33x33xf32>
    %cst_23 = arith.constant -1.000000e+09 : f32
    %60 = vector.broadcast %cst_23 : f32 to vector<33x33xf32>
    %61 = arith.select %34, %59, %60 : vector<33x33xi1>, vector<33x33xf32>
    %cst_24 = arith.constant dense<0xFF800000> : vector<33xf32>
    %62 = vector.multi_reduction <maximumf>, %61, %cst_24 [1] : vector<33x33xf32> to vector<33xf32>
    %63 = vector.shape_cast %62 : vector<33xf32> to vector<33x1xf32>
    %64 = vector.broadcast %63 : vector<33x1xf32> to vector<33x33xf32>
    %65 = arith.subf %61, %64 : vector<33x33xf32>
    %66 = math.exp %65 : vector<33x33xf32>
    %cst_25 = arith.constant dense<0.000000e+00> : vector<33xf32>
    %67 = vector.multi_reduction <add>, %66, %cst_25 [1] : vector<33x33xf32> to vector<33xf32>
    %68 = vector.shape_cast %67 : vector<33xf32> to vector<33x1xf32>
    %69 = tpu.reciprocal %68 {approx = true} : vector<33x1xf32> -> vector<33x1xf32>
    %70 = vector.broadcast %69 : vector<33x1xf32> to vector<33x33xf32>
    %71 = arith.mulf %66, %70 : vector<33x33xf32>
    %cst_26 = arith.constant dense<0.000000e+00> : vector<33x8xf32>
    %72 = tpu.matmul %71, %56, %cst_26 {dimension_numbers = #tpu.dot_dimension_numbers<[1], [0], [0], [1], [0, 0, 1, 1], [], []>} : vector<33x33xf32>, vector<33x8xf32>, vector<33x8xf32> -> vector<33x8xf32>
    %73 = vector.extract_strided_slice %29 {offsets = [0, 16], sizes = [33, 8], strides = [1, 1]} : vector<33x32xf32> to vector<33x8xf32>
    %74 = vector.extract_strided_slice %30 {offsets = [0, 16], sizes = [33, 8], strides = [1, 1]} : vector<33x32xf32> to vector<33x8xf32>
    %75 = vector.extract_strided_slice %31 {offsets = [0, 16], sizes = [33, 8], strides = [1, 1]} : vector<33x32xf32> to vector<33x8xf32>
    %cst_27 = arith.constant dense<0.000000e+00> : vector<33x33xf32>
    %76 = tpu.matmul %73, %74, %cst_27 {dimension_numbers = #tpu.dot_dimension_numbers<[1], [1], [0], [0], [0, 0, 1, 0], [], []>} : vector<33x8xf32>, vector<33x8xf32>, vector<33x33xf32> -> vector<33x33xf32>
    %cst_28 = arith.constant 0.353553385 : f32
    %77 = vector.broadcast %cst_28 : f32 to vector<33x33xf32>
    %78 = arith.mulf %76, %77 : vector<33x33xf32>
    %cst_29 = arith.constant -1.000000e+09 : f32
    %79 = vector.broadcast %cst_29 : f32 to vector<33x33xf32>
    %80 = arith.select %34, %78, %79 : vector<33x33xi1>, vector<33x33xf32>
    %cst_30 = arith.constant dense<0xFF800000> : vector<33xf32>
    %81 = vector.multi_reduction <maximumf>, %80, %cst_30 [1] : vector<33x33xf32> to vector<33xf32>
    %82 = vector.shape_cast %81 : vector<33xf32> to vector<33x1xf32>
    %83 = vector.broadcast %82 : vector<33x1xf32> to vector<33x33xf32>
    %84 = arith.subf %80, %83 : vector<33x33xf32>
    %85 = math.exp %84 : vector<33x33xf32>
    %cst_31 = arith.constant dense<0.000000e+00> : vector<33xf32>
    %86 = vector.multi_reduction <add>, %85, %cst_31 [1] : vector<33x33xf32> to vector<33xf32>
    %87 = vector.shape_cast %86 : vector<33xf32> to vector<33x1xf32>
    %88 = tpu.reciprocal %87 {approx = true} : vector<33x1xf32> -> vector<33x1xf32>
    %89 = vector.broadcast %88 : vector<33x1xf32> to vector<33x33xf32>
    %90 = arith.mulf %85, %89 : vector<33x33xf32>
    %cst_32 = arith.constant dense<0.000000e+00> : vector<33x8xf32>
    %91 = tpu.matmul %90, %75, %cst_32 {dimension_numbers = #tpu.dot_dimension_numbers<[1], [0], [0], [1], [0, 0, 1, 1], [], []>} : vector<33x33xf32>, vector<33x8xf32>, vector<33x8xf32> -> vector<33x8xf32>
    %92 = vector.extract_strided_slice %29 {offsets = [0, 24], sizes = [33, 8], strides = [1, 1]} : vector<33x32xf32> to vector<33x8xf32>
    %93 = vector.extract_strided_slice %30 {offsets = [0, 24], sizes = [33, 8], strides = [1, 1]} : vector<33x32xf32> to vector<33x8xf32>
    %94 = vector.extract_strided_slice %31 {offsets = [0, 24], sizes = [33, 8], strides = [1, 1]} : vector<33x32xf32> to vector<33x8xf32>
    %cst_33 = arith.constant dense<0.000000e+00> : vector<33x33xf32>
    %95 = tpu.matmul %92, %93, %cst_33 {dimension_numbers = #tpu.dot_dimension_numbers<[1], [1], [0], [0], [0, 0, 1, 0], [], []>} : vector<33x8xf32>, vector<33x8xf32>, vector<33x33xf32> -> vector<33x33xf32>
    %cst_34 = arith.constant 0.353553385 : f32
    %96 = vector.broadcast %cst_34 : f32 to vector<33x33xf32>
    %97 = arith.mulf %95, %96 : vector<33x33xf32>
    %cst_35 = arith.constant -1.000000e+09 : f32
    %98 = vector.broadcast %cst_35 : f32 to vector<33x33xf32>
    %99 = arith.select %34, %97, %98 : vector<33x33xi1>, vector<33x33xf32>
    %cst_36 = arith.constant dense<0xFF800000> : vector<33xf32>
    %100 = vector.multi_reduction <maximumf>, %99, %cst_36 [1] : vector<33x33xf32> to vector<33xf32>
    %101 = vector.shape_cast %100 : vector<33xf32> to vector<33x1xf32>
    %102 = vector.broadcast %101 : vector<33x1xf32> to vector<33x33xf32>
    %103 = arith.subf %99, %102 : vector<33x33xf32>
    %104 = math.exp %103 : vector<33x33xf32>
    %cst_37 = arith.constant dense<0.000000e+00> : vector<33xf32>
    %105 = vector.multi_reduction <add>, %104, %cst_37 [1] : vector<33x33xf32> to vector<33xf32>
    %106 = vector.shape_cast %105 : vector<33xf32> to vector<33x1xf32>
    %107 = tpu.reciprocal %106 {approx = true} : vector<33x1xf32> -> vector<33x1xf32>
    %108 = vector.broadcast %107 : vector<33x1xf32> to vector<33x33xf32>
    %109 = arith.mulf %104, %108 : vector<33x33xf32>
    %cst_38 = arith.constant dense<0.000000e+00> : vector<33x8xf32>
    %110 = tpu.matmul %109, %94, %cst_38 {dimension_numbers = #tpu.dot_dimension_numbers<[1], [0], [0], [1], [0, 0, 1, 1], [], []>} : vector<33x33xf32>, vector<33x8xf32>, vector<33x8xf32> -> vector<33x8xf32>
    %111 = tpu.concatenate %53, %72, %91, %110 in 1 : vector<33x8xf32>, vector<33x8xf32>, vector<33x8xf32>, vector<33x8xf32> -> vector<33x32xf32>
    %c0_39 = arith.constant 0 : index
    %c0_40 = arith.constant 0 : index
    %112 = vector.load %arg6[%c0_39, %c0_40] : memref<32x32xf32, #tpu.memory_space<vmem>>, vector<32x32xf32>
    %cst_41 = arith.constant dense<0.000000e+00> : vector<33x32xf32>
    %113 = tpu.matmul %111, %112, %cst_41 {dimension_numbers = #tpu.dot_dimension_numbers<[1], [0], [0], [1], [0, 0, 1, 1], [], []>} : vector<33x32xf32>, vector<32x32xf32>, vector<33x32xf32> -> vector<33x32xf32>
    %c0_42 = arith.constant 0 : index
    %c0_43 = arith.constant 0 : index
    %114 = vector.load %arg7[%c0_42, %c0_43] : memref<1x32xf32, #tpu.memory_space<vmem>>, vector<1x32xf32>
    %115 = vector.broadcast %114 : vector<1x32xf32> to vector<33x32xf32>
    %116 = arith.addf %113, %115 : vector<33x32xf32>
    %117 = arith.addf %1, %116 : vector<33x32xf32>
    %c0_44 = arith.constant 0 : index
    %c0_45 = arith.constant 0 : index
    %118 = vector.load %arg8[%c0_44, %c0_45] : memref<1x32xf32, #tpu.memory_space<vmem>>, vector<1x32xf32>
    %c0_46 = arith.constant 0 : index
    %c0_47 = arith.constant 0 : index
    %119 = vector.load %arg9[%c0_46, %c0_47] : memref<1x32xf32, #tpu.memory_space<vmem>>, vector<1x32xf32>
    %cst_48 = arith.constant dense<0.000000e+00> : vector<33xf32>
    %120 = vector.multi_reduction <add>, %117, %cst_48 [1] : vector<33x32xf32> to vector<33xf32>
    %121 = vector.shape_cast %120 : vector<33xf32> to vector<33x1xf32>
    %cst_49 = arith.constant 3.200000e+01 : f32
    %122 = vector.broadcast %cst_49 : f32 to vector<33x1xf32>
    %123 = arith.divf %121, %122 : vector<33x1xf32>
    %124 = vector.broadcast %123 : vector<33x1xf32> to vector<33x32xf32>
    %125 = arith.subf %117, %124 : vector<33x32xf32>
    %126 = arith.mulf %125, %125 : vector<33x32xf32>
    %cst_50 = arith.constant dense<0.000000e+00> : vector<33xf32>
    %127 = vector.multi_reduction <add>, %126, %cst_50 [1] : vector<33x32xf32> to vector<33xf32>
    %128 = vector.shape_cast %127 : vector<33xf32> to vector<33x1xf32>
    %cst_51 = arith.constant 0.0322580636 : f32
    %129 = vector.broadcast %cst_51 : f32 to vector<33x1xf32>
    %130 = arith.mulf %128, %129 : vector<33x1xf32>
    %131 = vector.broadcast %118 : vector<1x32xf32> to vector<33x32xf32>
    %132 = arith.mulf %131, %125 : vector<33x32xf32>
    %133 = math.sqrt %130 : vector<33x1xf32>
    %cst_52 = arith.constant 9.99999997E-7 : f32
    %134 = vector.broadcast %cst_52 : f32 to vector<33x1xf32>
    %135 = arith.addf %133, %134 : vector<33x1xf32>
    %136 = vector.broadcast %135 : vector<33x1xf32> to vector<33x32xf32>
    %137 = arith.divf %132, %136 : vector<33x32xf32>
    %138 = vector.broadcast %119 : vector<1x32xf32> to vector<33x32xf32>
    %139 = arith.addf %137, %138 : vector<33x32xf32>
    %c0_53 = arith.constant 0 : index
    %c0_54 = arith.constant 0 : index
    %140 = vector.load %arg10[%c0_53, %c0_54] : memref<32x128xf32, #tpu.memory_space<vmem>>, vector<32x128xf32>
    %cst_55 = arith.constant dense<0.000000e+00> : vector<33x128xf32>
    %141 = tpu.matmul %139, %140, %cst_55 {dimension_numbers = #tpu.dot_dimension_numbers<[1], [0], [0], [1], [0, 0, 1, 1], [], []>} : vector<33x32xf32>, vector<32x128xf32>, vector<33x128xf32> -> vector<33x128xf32>
    %c0_56 = arith.constant 0 : index
    %c0_57 = arith.constant 0 : index
    %142 = vector.load %arg11[%c0_56, %c0_57] : memref<1x128xf32, #tpu.memory_space<vmem>>, vector<1x128xf32>
    %143 = vector.broadcast %142 : vector<1x128xf32> to vector<33x128xf32>
    %144 = arith.addf %141, %143 : vector<33x128xf32>
    %c0_58 = arith.constant 0 : index
    %c0_59 = arith.constant 0 : index
    %145 = vector.load %arg12[%c0_58, %c0_59] : memref<1x128xf32, #tpu.memory_space<vmem>>, vector<1x128xf32>
    %c0_60 = arith.constant 0 : index
    %c0_61 = arith.constant 0 : index
    %146 = vector.load %arg13[%c0_60, %c0_61] : memref<1x128xf32, #tpu.memory_space<vmem>>, vector<1x128xf32>
    %cst_62 = arith.constant dense<0.000000e+00> : vector<33xf32>
    %147 = vector.multi_reduction <add>, %144, %cst_62 [1] : vector<33x128xf32> to vector<33xf32>
    %148 = vector.shape_cast %147 : vector<33xf32> to vector<33x1xf32>
    %cst_63 = arith.constant 1.280000e+02 : f32
    %149 = vector.broadcast %cst_63 : f32 to vector<33x1xf32>
    %150 = arith.divf %148, %149 : vector<33x1xf32>
    %151 = vector.broadcast %150 : vector<33x1xf32> to vector<33x128xf32>
    %152 = arith.subf %144, %151 : vector<33x128xf32>
    %153 = arith.mulf %152, %152 : vector<33x128xf32>
    %cst_64 = arith.constant dense<0.000000e+00> : vector<33xf32>
    %154 = vector.multi_reduction <add>, %153, %cst_64 [1] : vector<33x128xf32> to vector<33xf32>
    %155 = vector.shape_cast %154 : vector<33xf32> to vector<33x1xf32>
    %cst_65 = arith.constant 0.00787401571 : f32
    %156 = vector.broadcast %cst_65 : f32 to vector<33x1xf32>
    %157 = arith.mulf %155, %156 : vector<33x1xf32>
    %158 = vector.broadcast %145 : vector<1x128xf32> to vector<33x128xf32>
    %159 = arith.mulf %158, %152 : vector<33x128xf32>
    %160 = math.sqrt %157 : vector<33x1xf32>
    %cst_66 = arith.constant 9.99999997E-7 : f32
    %161 = vector.broadcast %cst_66 : f32 to vector<33x1xf32>
    %162 = arith.addf %160, %161 : vector<33x1xf32>
    %163 = vector.broadcast %162 : vector<33x1xf32> to vector<33x128xf32>
    %164 = arith.divf %159, %163 : vector<33x128xf32>
    %165 = vector.broadcast %146 : vector<1x128xf32> to vector<33x128xf32>
    %166 = arith.addf %164, %165 : vector<33x128xf32>
    %c0_67 = arith.constant 0 : index
    %c0_68 = arith.constant 0 : index
    %167 = vector.load %arg14[%c0_67, %c0_68] : memref<128x32xf32, #tpu.memory_space<vmem>>, vector<128x32xf32>
    %cst_69 = arith.constant dense<0.000000e+00> : vector<33x32xf32>
    %168 = tpu.matmul %166, %167, %cst_69 {dimension_numbers = #tpu.dot_dimension_numbers<[1], [0], [0], [1], [0, 0, 1, 1], [], []>} : vector<33x128xf32>, vector<128x32xf32>, vector<33x32xf32> -> vector<33x32xf32>
    %c0_70 = arith.constant 0 : index
    %c0_71 = arith.constant 0 : index
    %169 = vector.load %arg15[%c0_70, %c0_71] : memref<1x32xf32, #tpu.memory_space<vmem>>, vector<1x32xf32>
    %170 = vector.broadcast %169 : vector<1x32xf32> to vector<33x32xf32>
    %171 = arith.addf %168, %170 : vector<33x32xf32>
    %c0_72 = arith.constant 0 : index
    %c0_73 = arith.constant 0 : index
    %172 = vector.load %arg16[%c0_72, %c0_73] : memref<1x32xf32, #tpu.memory_space<vmem>>, vector<1x32xf32>
    %c0_74 = arith.constant 0 : index
    %c0_75 = arith.constant 0 : index
    %173 = vector.load %arg17[%c0_74, %c0_75] : memref<1x32xf32, #tpu.memory_space<vmem>>, vector<1x32xf32>
    %cst_76 = arith.constant dense<0.000000e+00> : vector<33xf32>
    %174 = vector.multi_reduction <add>, %171, %cst_76 [1] : vector<33x32xf32> to vector<33xf32>
    %175 = vector.shape_cast %174 : vector<33xf32> to vector<33x1xf32>
    %cst_77 = arith.constant 3.200000e+01 : f32
    %176 = vector.broadcast %cst_77 : f32 to vector<33x1xf32>
    %177 = arith.divf %175, %176 : vector<33x1xf32>
    %178 = vector.broadcast %177 : vector<33x1xf32> to vector<33x32xf32>
    %179 = arith.subf %171, %178 : vector<33x32xf32>
    %180 = arith.mulf %179, %179 : vector<33x32xf32>
    %cst_78 = arith.constant dense<0.000000e+00> : vector<33xf32>
    %181 = vector.multi_reduction <add>, %180, %cst_78 [1] : vector<33x32xf32> to vector<33xf32>
    %182 = vector.shape_cast %181 : vector<33xf32> to vector<33x1xf32>
    %cst_79 = arith.constant 0.0322580636 : f32
    %183 = vector.broadcast %cst_79 : f32 to vector<33x1xf32>
    %184 = arith.mulf %182, %183 : vector<33x1xf32>
    %185 = vector.broadcast %172 : vector<1x32xf32> to vector<33x32xf32>
    %186 = arith.mulf %185, %179 : vector<33x32xf32>
    %187 = math.sqrt %184 : vector<33x1xf32>
    %cst_80 = arith.constant 9.99999997E-7 : f32
    %188 = vector.broadcast %cst_80 : f32 to vector<33x1xf32>
    %189 = arith.addf %187, %188 : vector<33x1xf32>
    %190 = vector.broadcast %189 : vector<33x1xf32> to vector<33x32xf32>
    %191 = arith.divf %186, %190 : vector<33x32xf32>
    %192 = vector.broadcast %173 : vector<1x32xf32> to vector<33x32xf32>
    %193 = arith.addf %191, %192 : vector<33x32xf32>
    %c0_81 = arith.constant 0 : index
    %c0_82 = arith.constant 0 : index
    %194 = vector.load %arg18[%c0_81, %c0_82] : memref<32x64xf32, #tpu.memory_space<vmem>>, vector<32x64xf32>
    %cst_83 = arith.constant dense<0.000000e+00> : vector<33x64xf32>
    %195 = tpu.matmul %193, %194, %cst_83 {dimension_numbers = #tpu.dot_dimension_numbers<[1], [0], [0], [1], [0, 0, 1, 1], [], []>} : vector<33x32xf32>, vector<32x64xf32>, vector<33x64xf32> -> vector<33x64xf32>
    %c0_84 = arith.constant 0 : index
    %c0_85 = arith.constant 0 : index
    %196 = vector.load %arg19[%c0_84, %c0_85] : memref<1x64xf32, #tpu.memory_space<vmem>>, vector<1x64xf32>
    %197 = vector.broadcast %196 : vector<1x64xf32> to vector<33x64xf32>
    %198 = arith.addf %195, %197 : vector<33x64xf32>
    %cst_86 = arith.constant 0.000000e+00 : f32
    %199 = vector.broadcast %cst_86 : f32 to vector<33x64xf32>
    %200 = arith.maximumf %198, %199 : vector<33x64xf32>
    %c0_87 = arith.constant 0 : index
    %c0_88 = arith.constant 0 : index
    %c0_89 = arith.constant 0 : index
    %201 = vector.load %arg20[%c0_87, %c0_88, %c0_89] : memref<1x33x64xf32, #tpu.memory_space<vmem>>, vector<1x33x64xf32>
    %202 = vector.shape_cast %201 : vector<1x33x64xf32> to vector<33x64xf32>
    %203 = vector.shape_cast %200 : vector<33x64xf32> to vector<1x33x64xf32>
    tpu.vector_store %arg20[%c0_87, %c0_88, %c0_89], %203 {strides = array<i32>} : memref<1x33x64xf32, #tpu.memory_space<vmem>>, vector<1x33x64xf32>,
    return
  }
  func.func @transform_0(%arg0: i32) -> (i32, i32, i32) {
    %c0_i32 = arith.constant 0 : i32
    %c0_i32_0 = arith.constant 0 : i32
    %c0_i32_1 = arith.constant 0 : i32
    return %arg0, %c0_i32, %c0_i32_0 : i32, i32, i32
  }
  func.func @transform_1(%arg0: i32) -> (i32, i32) {
    %c0_i32 = arith.constant 0 : i32
    %c0_i32_0 = arith.constant 0 : i32
    %c0_i32_1 = arith.constant 0 : i32
    return %c0_i32, %c0_i32_0 : i32, i32
  }
  func.func @transform_2(%arg0: i32) -> (i32, i32) {
    %c0_i32 = arith.constant 0 : i32
    %c0_i32_0 = arith.constant 0 : i32
    %c0_i32_1 = arith.constant 0 : i32
    return %c0_i32, %c0_i32_0 : i32, i32
  }
  func.func @transform_3(%arg0: i32) -> (i32, i32) {
    %c0_i32 = arith.constant 0 : i32
    %c0_i32_0 = arith.constant 0 : i32
    %c0_i32_1 = arith.constant 0 : i32
    return %c0_i32, %c0_i32_0 : i32, i32
  }
  func.func @transform_4(%arg0: i32) -> (i32, i32) {
    %c0_i32 = arith.constant 0 : i32
    %c0_i32_0 = arith.constant 0 : i32
    %c0_i32_1 = arith.constant 0 : i32
    return %c0_i32, %c0_i32_0 : i32, i32
  }
  func.func @transform_5(%arg0: i32) -> (i32, i32) {
    %c0_i32 = arith.constant 0 : i32
    %c0_i32_0 = arith.constant 0 : i32
    %c0_i32_1 = arith.constant 0 : i32
    return %c0_i32, %c0_i32_0 : i32, i32
  }
  func.func @transform_6(%arg0: i32) -> (i32, i32) {
    %c0_i32 = arith.constant 0 : i32
    %c0_i32_0 = arith.constant 0 : i32
    %c0_i32_1 = arith.constant 0 : i32
    return %c0_i32, %c0_i32_0 : i32, i32
  }
  func.func @transform_7(%arg0: i32) -> (i32, i32) {
    %c0_i32 = arith.constant 0 : i32
    %c0_i32_0 = arith.constant 0 : i32
    %c0_i32_1 = arith.constant 0 : i32
    return %c0_i32, %c0_i32_0 : i32, i32
  }
  func.func @transform_8(%arg0: i32) -> (i32, i32) {
    %c0_i32 = arith.constant 0 : i32
    %c0_i32_0 = arith.constant 0 : i32
    %c0_i32_1 = arith.constant 0 : i32
    return %c0_i32, %c0_i32_0 : i32, i32
  }
  func.func @transform_9(%arg0: i32) -> (i32, i32) {
    %c0_i32 = arith.constant 0 : i32
    %c0_i32_0 = arith.constant 0 : i32
    %c0_i32_1 = arith.constant 0 : i32
    return %c0_i32, %c0_i32_0 : i32, i32
  }
  func.func @transform_10(%arg0: i32) -> (i32, i32) {
    %c0_i32 = arith.constant 0 : i32
    %c0_i32_0 = arith.constant 0 : i32
    %c0_i32_1 = arith.constant 0 : i32
    return %c0_i32, %c0_i32_0 : i32, i32
  }
  func.func @transform_11(%arg0: i32) -> (i32, i32) {
    %c0_i32 = arith.constant 0 : i32
    %c0_i32_0 = arith.constant 0 : i32
    %c0_i32_1 = arith.constant 0 : i32
    return %c0_i32, %c0_i32_0 : i32, i32
  }
  func.func @transform_12(%arg0: i32) -> (i32, i32) {
    %c0_i32 = arith.constant 0 : i32
    %c0_i32_0 = arith.constant 0 : i32
    %c0_i32_1 = arith.constant 0 : i32
    return %c0_i32, %c0_i32_0 : i32, i32
  }
  func.func @transform_13(%arg0: i32) -> (i32, i32) {
    %c0_i32 = arith.constant 0 : i32
    %c0_i32_0 = arith.constant 0 : i32
    %c0_i32_1 = arith.constant 0 : i32
    return %c0_i32, %c0_i32_0 : i32, i32
  }
  func.func @transform_14(%arg0: i32) -> (i32, i32) {
    %c0_i32 = arith.constant 0 : i32
    %c0_i32_0 = arith.constant 0 : i32
    %c0_i32_1 = arith.constant 0 : i32
    return %c0_i32, %c0_i32_0 : i32, i32
  }
  func.func @transform_15(%arg0: i32) -> (i32, i32) {
    %c0_i32 = arith.constant 0 : i32
    %c0_i32_0 = arith.constant 0 : i32
    %c0_i32_1 = arith.constant 0 : i32
    return %c0_i32, %c0_i32_0 : i32, i32
  }
  func.func @transform_16(%arg0: i32) -> (i32, i32) {
    %c0_i32 = arith.constant 0 : i32
    %c0_i32_0 = arith.constant 0 : i32
    %c0_i32_1 = arith.constant 0 : i32
    return %c0_i32, %c0_i32_0 : i32, i32
  }
  func.func @transform_17(%arg0: i32) -> (i32, i32) {
    %c0_i32 = arith.constant 0 : i32
    %c0_i32_0 = arith.constant 0 : i32
    %c0_i32_1 = arith.constant 0 : i32
    return %c0_i32, %c0_i32_0 : i32, i32
  }
  func.func @transform_18(%arg0: i32) -> (i32, i32) {
    %c0_i32 = arith.constant 0 : i32
    %c0_i32_0 = arith.constant 0 : i32
    %c0_i32_1 = arith.constant 0 : i32
    return %c0_i32, %c0_i32_0 : i32, i32
  }
  func.func @transform_19(%arg0: i32) -> (i32, i32, i32) {
    %c0_i32 = arith.constant 0 : i32
    %c0_i32_0 = arith.constant 0 : i32
    %c0_i32_1 = arith.constant 0 : i32
    return %arg0, %c0_i32, %c0_i32_0 : i32, i32, i32
  }
}

module attributes {stable_mosaic.version = 11 : i64} {
  func.func @_layer_kernel(%arg0: i32, %arg1: memref<1x17x64xf32, #tpu.memory_space<vmem>>, %arg2: memref<1x64xf32, #tpu.memory_space<vmem>>, %arg3: memref<1x64xf32, #tpu.memory_space<vmem>>, %arg4: memref<64x192xf32, #tpu.memory_space<vmem>>, %arg5: memref<1x192xf32, #tpu.memory_space<vmem>>, %arg6: memref<64x64xf32, #tpu.memory_space<vmem>>, %arg7: memref<1x64xf32, #tpu.memory_space<vmem>>, %arg8: memref<1x64xf32, #tpu.memory_space<vmem>>, %arg9: memref<1x64xf32, #tpu.memory_space<vmem>>, %arg10: memref<64x256xf32, #tpu.memory_space<vmem>>, %arg11: memref<1x256xf32, #tpu.memory_space<vmem>>, %arg12: memref<1x256xf32, #tpu.memory_space<vmem>>, %arg13: memref<1x256xf32, #tpu.memory_space<vmem>>, %arg14: memref<256x64xf32, #tpu.memory_space<vmem>>, %arg15: memref<1x64xf32, #tpu.memory_space<vmem>>, %arg16: memref<1x64xf32, #tpu.memory_space<vmem>>, %arg17: memref<1x64xf32, #tpu.memory_space<vmem>>, %arg18: memref<64x32xf32, #tpu.memory_space<vmem>>, %arg19: memref<1x32xf32, #tpu.memory_space<vmem>>, %arg20: memref<1x17x32xf32, #tpu.memory_space<vmem>>) attributes {dimension_semantics = [#tpu.dimension_semantics<parallel>], iteration_bounds = array<i64: 2>, scalar_prefetch = 0 : i64, scratch_operands = 0 : i64, tpu.core_type = #tpu.core_type<tc>, window_params = [{transform_indices = @transform_0, window_bounds = array<i64: 1, 17, 64>}, {pipeline_mode = #tpu.pipeline_mode<synchronous>, transform_indices = @transform_1, window_bounds = array<i64: 1, 64>}, {pipeline_mode = #tpu.pipeline_mode<synchronous>, transform_indices = @transform_2, window_bounds = array<i64: 1, 64>}, {pipeline_mode = #tpu.pipeline_mode<synchronous>, transform_indices = @transform_3, window_bounds = array<i64: 64, 192>}, {pipeline_mode = #tpu.pipeline_mode<synchronous>, transform_indices = @transform_4, window_bounds = array<i64: 1, 192>}, {pipeline_mode = #tpu.pipeline_mode<synchronous>, transform_indices = @transform_5, window_bounds = array<i64: 64, 64>}, {pipeline_mode = #tpu.pipeline_mode<synchronous>, transform_indices = @transform_6, window_bounds = array<i64: 1, 64>}, {pipeline_mode = #tpu.pipeline_mode<synchronous>, transform_indices = @transform_7, window_bounds = array<i64: 1, 64>}, {pipeline_mode = #tpu.pipeline_mode<synchronous>, transform_indices = @transform_8, window_bounds = array<i64: 1, 64>}, {pipeline_mode = #tpu.pipeline_mode<synchronous>, transform_indices = @transform_9, window_bounds = array<i64: 64, 256>}, {pipeline_mode = #tpu.pipeline_mode<synchronous>, transform_indices = @transform_10, window_bounds = array<i64: 1, 256>}, {pipeline_mode = #tpu.pipeline_mode<synchronous>, transform_indices = @transform_11, window_bounds = array<i64: 1, 256>}, {pipeline_mode = #tpu.pipeline_mode<synchronous>, transform_indices = @transform_12, window_bounds = array<i64: 1, 256>}, {pipeline_mode = #tpu.pipeline_mode<synchronous>, transform_indices = @transform_13, window_bounds = array<i64: 256, 64>}, {pipeline_mode = #tpu.pipeline_mode<synchronous>, transform_indices = @transform_14, window_bounds = array<i64: 1, 64>}, {pipeline_mode = #tpu.pipeline_mode<synchronous>, transform_indices = @transform_15, window_bounds = array<i64: 1, 64>}, {pipeline_mode = #tpu.pipeline_mode<synchronous>, transform_indices = @transform_16, window_bounds = array<i64: 1, 64>}, {pipeline_mode = #tpu.pipeline_mode<synchronous>, transform_indices = @transform_17, window_bounds = array<i64: 64, 32>}, {pipeline_mode = #tpu.pipeline_mode<synchronous>, transform_indices = @transform_18, window_bounds = array<i64: 1, 32>}, {transform_indices = @transform_19, window_bounds = array<i64: 1, 17, 32>}]} {
    %c0 = arith.constant 0 : index
    %c0_0 = arith.constant 0 : index
    %c0_1 = arith.constant 0 : index
    %0 = vector.load %arg1[%c0, %c0_0, %c0_1] : memref<1x17x64xf32, #tpu.memory_space<vmem>>, vector<1x17x64xf32>
    %1 = vector.shape_cast %0 : vector<1x17x64xf32> to vector<17x64xf32>
    %c0_2 = arith.constant 0 : index
    %c0_3 = arith.constant 0 : index
    %2 = vector.load %arg2[%c0_2, %c0_3] : memref<1x64xf32, #tpu.memory_space<vmem>>, vector<1x64xf32>
    %c0_4 = arith.constant 0 : index
    %c0_5 = arith.constant 0 : index
    %3 = vector.load %arg3[%c0_4, %c0_5] : memref<1x64xf32, #tpu.memory_space<vmem>>, vector<1x64xf32>
    %cst = arith.constant dense<0.000000e+00> : vector<17xf32>
    %4 = vector.multi_reduction <add>, %1, %cst [1] : vector<17x64xf32> to vector<17xf32>
    %5 = vector.shape_cast %4 : vector<17xf32> to vector<17x1xf32>
    %cst_6 = arith.constant 6.400000e+01 : f32
    %6 = vector.broadcast %cst_6 : f32 to vector<17x1xf32>
    %7 = arith.divf %5, %6 : vector<17x1xf32>
    %8 = vector.broadcast %7 : vector<17x1xf32> to vector<17x64xf32>
    %9 = arith.subf %1, %8 : vector<17x64xf32>
    %10 = arith.mulf %9, %9 : vector<17x64xf32>
    %cst_7 = arith.constant dense<0.000000e+00> : vector<17xf32>
    %11 = vector.multi_reduction <add>, %10, %cst_7 [1] : vector<17x64xf32> to vector<17xf32>
    %12 = vector.shape_cast %11 : vector<17xf32> to vector<17x1xf32>
    %cst_8 = arith.constant 0.0158730168 : f32
    %13 = vector.broadcast %cst_8 : f32 to vector<17x1xf32>
    %14 = arith.mulf %12, %13 : vector<17x1xf32>
    %15 = vector.broadcast %2 : vector<1x64xf32> to vector<17x64xf32>
    %16 = arith.mulf %15, %9 : vector<17x64xf32>
    %17 = math.sqrt %14 : vector<17x1xf32>
    %cst_9 = arith.constant 9.99999997E-7 : f32
    %18 = vector.broadcast %cst_9 : f32 to vector<17x1xf32>
    %19 = arith.addf %17, %18 : vector<17x1xf32>
    %20 = vector.broadcast %19 : vector<17x1xf32> to vector<17x64xf32>
    %21 = arith.divf %16, %20 : vector<17x64xf32>
    %22 = vector.broadcast %3 : vector<1x64xf32> to vector<17x64xf32>
    %23 = arith.addf %21, %22 : vector<17x64xf32>
    %c0_10 = arith.constant 0 : index
    %c0_11 = arith.constant 0 : index
    %24 = vector.load %arg4[%c0_10, %c0_11] : memref<64x192xf32, #tpu.memory_space<vmem>>, vector<64x192xf32>
    %cst_12 = arith.constant dense<0.000000e+00> : vector<17x192xf32>
    %25 = tpu.matmul %23, %24, %cst_12 {dimension_numbers = #tpu.dot_dimension_numbers<[1], [0], [0], [1], [0, 0, 1, 1], [], []>} : vector<17x64xf32>, vector<64x192xf32>, vector<17x192xf32> -> vector<17x192xf32>
    %c0_13 = arith.constant 0 : index
    %c0_14 = arith.constant 0 : index
    %26 = vector.load %arg5[%c0_13, %c0_14] : memref<1x192xf32, #tpu.memory_space<vmem>>, vector<1x192xf32>
    %27 = vector.broadcast %26 : vector<1x192xf32> to vector<17x192xf32>
    %28 = arith.addf %25, %27 : vector<17x192xf32>
    %29 = vector.extract_strided_slice %28 {offsets = [0, 0], sizes = [17, 64], strides = [1, 1]} : vector<17x192xf32> to vector<17x64xf32>
    %30 = vector.extract_strided_slice %28 {offsets = [0, 64], sizes = [17, 64], strides = [1, 1]} : vector<17x192xf32> to vector<17x64xf32>
    %31 = vector.extract_strided_slice %28 {offsets = [0, 128], sizes = [17, 64], strides = [1, 1]} : vector<17x192xf32> to vector<17x64xf32>
    %32 = tpu.iota {dimensions = array<i32: 0>} : vector<17x17xi32>
    %33 = tpu.iota {dimensions = array<i32: 1>} : vector<17x17xi32>
    %34 = arith.cmpi sgt, %33, %32 : vector<17x17xi32>
    %35 = vector.extract_strided_slice %29 {offsets = [0, 0], sizes = [17, 16], strides = [1, 1]} : vector<17x64xf32> to vector<17x16xf32>
    %36 = vector.extract_strided_slice %30 {offsets = [0, 0], sizes = [17, 16], strides = [1, 1]} : vector<17x64xf32> to vector<17x16xf32>
    %37 = vector.extract_strided_slice %31 {offsets = [0, 0], sizes = [17, 16], strides = [1, 1]} : vector<17x64xf32> to vector<17x16xf32>
    %cst_15 = arith.constant dense<0.000000e+00> : vector<17x17xf32>
    %38 = tpu.matmul %35, %36, %cst_15 {dimension_numbers = #tpu.dot_dimension_numbers<[1], [1], [0], [0], [0, 0, 1, 0], [], []>} : vector<17x16xf32>, vector<17x16xf32>, vector<17x17xf32> -> vector<17x17xf32>
    %cst_16 = arith.constant 2.500000e-01 : f32
    %39 = vector.broadcast %cst_16 : f32 to vector<17x17xf32>
    %40 = arith.mulf %38, %39 : vector<17x17xf32>
    %cst_17 = arith.constant -1.000000e+09 : f32
    %41 = vector.broadcast %cst_17 : f32 to vector<17x17xf32>
    %42 = arith.select %34, %40, %41 : vector<17x17xi1>, vector<17x17xf32>
    %cst_18 = arith.constant dense<0xFF800000> : vector<17xf32>
    %43 = vector.multi_reduction <maximumf>, %42, %cst_18 [1] : vector<17x17xf32> to vector<17xf32>
    %44 = vector.shape_cast %43 : vector<17xf32> to vector<17x1xf32>
    %45 = vector.broadcast %44 : vector<17x1xf32> to vector<17x17xf32>
    %46 = arith.subf %42, %45 : vector<17x17xf32>
    %47 = math.exp %46 : vector<17x17xf32>
    %cst_19 = arith.constant dense<0.000000e+00> : vector<17xf32>
    %48 = vector.multi_reduction <add>, %47, %cst_19 [1] : vector<17x17xf32> to vector<17xf32>
    %49 = vector.shape_cast %48 : vector<17xf32> to vector<17x1xf32>
    %50 = tpu.reciprocal %49 {approx = true} : vector<17x1xf32> -> vector<17x1xf32>
    %51 = vector.broadcast %50 : vector<17x1xf32> to vector<17x17xf32>
    %52 = arith.mulf %47, %51 : vector<17x17xf32>
    %cst_20 = arith.constant dense<0.000000e+00> : vector<17x16xf32>
    %53 = tpu.matmul %52, %37, %cst_20 {dimension_numbers = #tpu.dot_dimension_numbers<[1], [0], [0], [1], [0, 0, 1, 1], [], []>} : vector<17x17xf32>, vector<17x16xf32>, vector<17x16xf32> -> vector<17x16xf32>
    %54 = vector.extract_strided_slice %29 {offsets = [0, 16], sizes = [17, 16], strides = [1, 1]} : vector<17x64xf32> to vector<17x16xf32>
    %55 = vector.extract_strided_slice %30 {offsets = [0, 16], sizes = [17, 16], strides = [1, 1]} : vector<17x64xf32> to vector<17x16xf32>
    %56 = vector.extract_strided_slice %31 {offsets = [0, 16], sizes = [17, 16], strides = [1, 1]} : vector<17x64xf32> to vector<17x16xf32>
    %cst_21 = arith.constant dense<0.000000e+00> : vector<17x17xf32>
    %57 = tpu.matmul %54, %55, %cst_21 {dimension_numbers = #tpu.dot_dimension_numbers<[1], [1], [0], [0], [0, 0, 1, 0], [], []>} : vector<17x16xf32>, vector<17x16xf32>, vector<17x17xf32> -> vector<17x17xf32>
    %cst_22 = arith.constant 2.500000e-01 : f32
    %58 = vector.broadcast %cst_22 : f32 to vector<17x17xf32>
    %59 = arith.mulf %57, %58 : vector<17x17xf32>
    %cst_23 = arith.constant -1.000000e+09 : f32
    %60 = vector.broadcast %cst_23 : f32 to vector<17x17xf32>
    %61 = arith.select %34, %59, %60 : vector<17x17xi1>, vector<17x17xf32>
    %cst_24 = arith.constant dense<0xFF800000> : vector<17xf32>
    %62 = vector.multi_reduction <maximumf>, %61, %cst_24 [1] : vector<17x17xf32> to vector<17xf32>
    %63 = vector.shape_cast %62 : vector<17xf32> to vector<17x1xf32>
    %64 = vector.broadcast %63 : vector<17x1xf32> to vector<17x17xf32>
    %65 = arith.subf %61, %64 : vector<17x17xf32>
    %66 = math.exp %65 : vector<17x17xf32>
    %cst_25 = arith.constant dense<0.000000e+00> : vector<17xf32>
    %67 = vector.multi_reduction <add>, %66, %cst_25 [1] : vector<17x17xf32> to vector<17xf32>
    %68 = vector.shape_cast %67 : vector<17xf32> to vector<17x1xf32>
    %69 = tpu.reciprocal %68 {approx = true} : vector<17x1xf32> -> vector<17x1xf32>
    %70 = vector.broadcast %69 : vector<17x1xf32> to vector<17x17xf32>
    %71 = arith.mulf %66, %70 : vector<17x17xf32>
    %cst_26 = arith.constant dense<0.000000e+00> : vector<17x16xf32>
    %72 = tpu.matmul %71, %56, %cst_26 {dimension_numbers = #tpu.dot_dimension_numbers<[1], [0], [0], [1], [0, 0, 1, 1], [], []>} : vector<17x17xf32>, vector<17x16xf32>, vector<17x16xf32> -> vector<17x16xf32>
    %73 = vector.extract_strided_slice %29 {offsets = [0, 32], sizes = [17, 16], strides = [1, 1]} : vector<17x64xf32> to vector<17x16xf32>
    %74 = vector.extract_strided_slice %30 {offsets = [0, 32], sizes = [17, 16], strides = [1, 1]} : vector<17x64xf32> to vector<17x16xf32>
    %75 = vector.extract_strided_slice %31 {offsets = [0, 32], sizes = [17, 16], strides = [1, 1]} : vector<17x64xf32> to vector<17x16xf32>
    %cst_27 = arith.constant dense<0.000000e+00> : vector<17x17xf32>
    %76 = tpu.matmul %73, %74, %cst_27 {dimension_numbers = #tpu.dot_dimension_numbers<[1], [1], [0], [0], [0, 0, 1, 0], [], []>} : vector<17x16xf32>, vector<17x16xf32>, vector<17x17xf32> -> vector<17x17xf32>
    %cst_28 = arith.constant 2.500000e-01 : f32
    %77 = vector.broadcast %cst_28 : f32 to vector<17x17xf32>
    %78 = arith.mulf %76, %77 : vector<17x17xf32>
    %cst_29 = arith.constant -1.000000e+09 : f32
    %79 = vector.broadcast %cst_29 : f32 to vector<17x17xf32>
    %80 = arith.select %34, %78, %79 : vector<17x17xi1>, vector<17x17xf32>
    %cst_30 = arith.constant dense<0xFF800000> : vector<17xf32>
    %81 = vector.multi_reduction <maximumf>, %80, %cst_30 [1] : vector<17x17xf32> to vector<17xf32>
    %82 = vector.shape_cast %81 : vector<17xf32> to vector<17x1xf32>
    %83 = vector.broadcast %82 : vector<17x1xf32> to vector<17x17xf32>
    %84 = arith.subf %80, %83 : vector<17x17xf32>
    %85 = math.exp %84 : vector<17x17xf32>
    %cst_31 = arith.constant dense<0.000000e+00> : vector<17xf32>
    %86 = vector.multi_reduction <add>, %85, %cst_31 [1] : vector<17x17xf32> to vector<17xf32>
    %87 = vector.shape_cast %86 : vector<17xf32> to vector<17x1xf32>
    %88 = tpu.reciprocal %87 {approx = true} : vector<17x1xf32> -> vector<17x1xf32>
    %89 = vector.broadcast %88 : vector<17x1xf32> to vector<17x17xf32>
    %90 = arith.mulf %85, %89 : vector<17x17xf32>
    %cst_32 = arith.constant dense<0.000000e+00> : vector<17x16xf32>
    %91 = tpu.matmul %90, %75, %cst_32 {dimension_numbers = #tpu.dot_dimension_numbers<[1], [0], [0], [1], [0, 0, 1, 1], [], []>} : vector<17x17xf32>, vector<17x16xf32>, vector<17x16xf32> -> vector<17x16xf32>
    %92 = vector.extract_strided_slice %29 {offsets = [0, 48], sizes = [17, 16], strides = [1, 1]} : vector<17x64xf32> to vector<17x16xf32>
    %93 = vector.extract_strided_slice %30 {offsets = [0, 48], sizes = [17, 16], strides = [1, 1]} : vector<17x64xf32> to vector<17x16xf32>
    %94 = vector.extract_strided_slice %31 {offsets = [0, 48], sizes = [17, 16], strides = [1, 1]} : vector<17x64xf32> to vector<17x16xf32>
    %cst_33 = arith.constant dense<0.000000e+00> : vector<17x17xf32>
    %95 = tpu.matmul %92, %93, %cst_33 {dimension_numbers = #tpu.dot_dimension_numbers<[1], [1], [0], [0], [0, 0, 1, 0], [], []>} : vector<17x16xf32>, vector<17x16xf32>, vector<17x17xf32> -> vector<17x17xf32>
    %cst_34 = arith.constant 2.500000e-01 : f32
    %96 = vector.broadcast %cst_34 : f32 to vector<17x17xf32>
    %97 = arith.mulf %95, %96 : vector<17x17xf32>
    %cst_35 = arith.constant -1.000000e+09 : f32
    %98 = vector.broadcast %cst_35 : f32 to vector<17x17xf32>
    %99 = arith.select %34, %97, %98 : vector<17x17xi1>, vector<17x17xf32>
    %cst_36 = arith.constant dense<0xFF800000> : vector<17xf32>
    %100 = vector.multi_reduction <maximumf>, %99, %cst_36 [1] : vector<17x17xf32> to vector<17xf32>
    %101 = vector.shape_cast %100 : vector<17xf32> to vector<17x1xf32>
    %102 = vector.broadcast %101 : vector<17x1xf32> to vector<17x17xf32>
    %103 = arith.subf %99, %102 : vector<17x17xf32>
    %104 = math.exp %103 : vector<17x17xf32>
    %cst_37 = arith.constant dense<0.000000e+00> : vector<17xf32>
    %105 = vector.multi_reduction <add>, %104, %cst_37 [1] : vector<17x17xf32> to vector<17xf32>
    %106 = vector.shape_cast %105 : vector<17xf32> to vector<17x1xf32>
    %107 = tpu.reciprocal %106 {approx = true} : vector<17x1xf32> -> vector<17x1xf32>
    %108 = vector.broadcast %107 : vector<17x1xf32> to vector<17x17xf32>
    %109 = arith.mulf %104, %108 : vector<17x17xf32>
    %cst_38 = arith.constant dense<0.000000e+00> : vector<17x16xf32>
    %110 = tpu.matmul %109, %94, %cst_38 {dimension_numbers = #tpu.dot_dimension_numbers<[1], [0], [0], [1], [0, 0, 1, 1], [], []>} : vector<17x17xf32>, vector<17x16xf32>, vector<17x16xf32> -> vector<17x16xf32>
    %111 = tpu.concatenate %53, %72, %91, %110 in 1 : vector<17x16xf32>, vector<17x16xf32>, vector<17x16xf32>, vector<17x16xf32> -> vector<17x64xf32>
    %c0_39 = arith.constant 0 : index
    %c0_40 = arith.constant 0 : index
    %112 = vector.load %arg6[%c0_39, %c0_40] : memref<64x64xf32, #tpu.memory_space<vmem>>, vector<64x64xf32>
    %cst_41 = arith.constant dense<0.000000e+00> : vector<17x64xf32>
    %113 = tpu.matmul %111, %112, %cst_41 {dimension_numbers = #tpu.dot_dimension_numbers<[1], [0], [0], [1], [0, 0, 1, 1], [], []>} : vector<17x64xf32>, vector<64x64xf32>, vector<17x64xf32> -> vector<17x64xf32>
    %c0_42 = arith.constant 0 : index
    %c0_43 = arith.constant 0 : index
    %114 = vector.load %arg7[%c0_42, %c0_43] : memref<1x64xf32, #tpu.memory_space<vmem>>, vector<1x64xf32>
    %115 = vector.broadcast %114 : vector<1x64xf32> to vector<17x64xf32>
    %116 = arith.addf %113, %115 : vector<17x64xf32>
    %117 = arith.addf %1, %116 : vector<17x64xf32>
    %c0_44 = arith.constant 0 : index
    %c0_45 = arith.constant 0 : index
    %118 = vector.load %arg8[%c0_44, %c0_45] : memref<1x64xf32, #tpu.memory_space<vmem>>, vector<1x64xf32>
    %c0_46 = arith.constant 0 : index
    %c0_47 = arith.constant 0 : index
    %119 = vector.load %arg9[%c0_46, %c0_47] : memref<1x64xf32, #tpu.memory_space<vmem>>, vector<1x64xf32>
    %cst_48 = arith.constant dense<0.000000e+00> : vector<17xf32>
    %120 = vector.multi_reduction <add>, %117, %cst_48 [1] : vector<17x64xf32> to vector<17xf32>
    %121 = vector.shape_cast %120 : vector<17xf32> to vector<17x1xf32>
    %cst_49 = arith.constant 6.400000e+01 : f32
    %122 = vector.broadcast %cst_49 : f32 to vector<17x1xf32>
    %123 = arith.divf %121, %122 : vector<17x1xf32>
    %124 = vector.broadcast %123 : vector<17x1xf32> to vector<17x64xf32>
    %125 = arith.subf %117, %124 : vector<17x64xf32>
    %126 = arith.mulf %125, %125 : vector<17x64xf32>
    %cst_50 = arith.constant dense<0.000000e+00> : vector<17xf32>
    %127 = vector.multi_reduction <add>, %126, %cst_50 [1] : vector<17x64xf32> to vector<17xf32>
    %128 = vector.shape_cast %127 : vector<17xf32> to vector<17x1xf32>
    %cst_51 = arith.constant 0.0158730168 : f32
    %129 = vector.broadcast %cst_51 : f32 to vector<17x1xf32>
    %130 = arith.mulf %128, %129 : vector<17x1xf32>
    %131 = vector.broadcast %118 : vector<1x64xf32> to vector<17x64xf32>
    %132 = arith.mulf %131, %125 : vector<17x64xf32>
    %133 = math.sqrt %130 : vector<17x1xf32>
    %cst_52 = arith.constant 9.99999997E-7 : f32
    %134 = vector.broadcast %cst_52 : f32 to vector<17x1xf32>
    %135 = arith.addf %133, %134 : vector<17x1xf32>
    %136 = vector.broadcast %135 : vector<17x1xf32> to vector<17x64xf32>
    %137 = arith.divf %132, %136 : vector<17x64xf32>
    %138 = vector.broadcast %119 : vector<1x64xf32> to vector<17x64xf32>
    %139 = arith.addf %137, %138 : vector<17x64xf32>
    %c0_53 = arith.constant 0 : index
    %c0_54 = arith.constant 0 : index
    %140 = vector.load %arg10[%c0_53, %c0_54] : memref<64x256xf32, #tpu.memory_space<vmem>>, vector<64x256xf32>
    %cst_55 = arith.constant dense<0.000000e+00> : vector<17x256xf32>
    %141 = tpu.matmul %139, %140, %cst_55 {dimension_numbers = #tpu.dot_dimension_numbers<[1], [0], [0], [1], [0, 0, 1, 1], [], []>} : vector<17x64xf32>, vector<64x256xf32>, vector<17x256xf32> -> vector<17x256xf32>
    %c0_56 = arith.constant 0 : index
    %c0_57 = arith.constant 0 : index
    %142 = vector.load %arg11[%c0_56, %c0_57] : memref<1x256xf32, #tpu.memory_space<vmem>>, vector<1x256xf32>
    %143 = vector.broadcast %142 : vector<1x256xf32> to vector<17x256xf32>
    %144 = arith.addf %141, %143 : vector<17x256xf32>
    %c0_58 = arith.constant 0 : index
    %c0_59 = arith.constant 0 : index
    %145 = vector.load %arg12[%c0_58, %c0_59] : memref<1x256xf32, #tpu.memory_space<vmem>>, vector<1x256xf32>
    %c0_60 = arith.constant 0 : index
    %c0_61 = arith.constant 0 : index
    %146 = vector.load %arg13[%c0_60, %c0_61] : memref<1x256xf32, #tpu.memory_space<vmem>>, vector<1x256xf32>
    %cst_62 = arith.constant dense<0.000000e+00> : vector<17xf32>
    %147 = vector.multi_reduction <add>, %144, %cst_62 [1] : vector<17x256xf32> to vector<17xf32>
    %148 = vector.shape_cast %147 : vector<17xf32> to vector<17x1xf32>
    %cst_63 = arith.constant 2.560000e+02 : f32
    %149 = vector.broadcast %cst_63 : f32 to vector<17x1xf32>
    %150 = arith.divf %148, %149 : vector<17x1xf32>
    %151 = vector.broadcast %150 : vector<17x1xf32> to vector<17x256xf32>
    %152 = arith.subf %144, %151 : vector<17x256xf32>
    %153 = arith.mulf %152, %152 : vector<17x256xf32>
    %cst_64 = arith.constant dense<0.000000e+00> : vector<17xf32>
    %154 = vector.multi_reduction <add>, %153, %cst_64 [1] : vector<17x256xf32> to vector<17xf32>
    %155 = vector.shape_cast %154 : vector<17xf32> to vector<17x1xf32>
    %cst_65 = arith.constant 0.00392156886 : f32
    %156 = vector.broadcast %cst_65 : f32 to vector<17x1xf32>
    %157 = arith.mulf %155, %156 : vector<17x1xf32>
    %158 = vector.broadcast %145 : vector<1x256xf32> to vector<17x256xf32>
    %159 = arith.mulf %158, %152 : vector<17x256xf32>
    %160 = math.sqrt %157 : vector<17x1xf32>
    %cst_66 = arith.constant 9.99999997E-7 : f32
    %161 = vector.broadcast %cst_66 : f32 to vector<17x1xf32>
    %162 = arith.addf %160, %161 : vector<17x1xf32>
    %163 = vector.broadcast %162 : vector<17x1xf32> to vector<17x256xf32>
    %164 = arith.divf %159, %163 : vector<17x256xf32>
    %165 = vector.broadcast %146 : vector<1x256xf32> to vector<17x256xf32>
    %166 = arith.addf %164, %165 : vector<17x256xf32>
    %c0_67 = arith.constant 0 : index
    %c0_68 = arith.constant 0 : index
    %167 = vector.load %arg14[%c0_67, %c0_68] : memref<256x64xf32, #tpu.memory_space<vmem>>, vector<256x64xf32>
    %cst_69 = arith.constant dense<0.000000e+00> : vector<17x64xf32>
    %168 = tpu.matmul %166, %167, %cst_69 {dimension_numbers = #tpu.dot_dimension_numbers<[1], [0], [0], [1], [0, 0, 1, 1], [], []>} : vector<17x256xf32>, vector<256x64xf32>, vector<17x64xf32> -> vector<17x64xf32>
    %c0_70 = arith.constant 0 : index
    %c0_71 = arith.constant 0 : index
    %169 = vector.load %arg15[%c0_70, %c0_71] : memref<1x64xf32, #tpu.memory_space<vmem>>, vector<1x64xf32>
    %170 = vector.broadcast %169 : vector<1x64xf32> to vector<17x64xf32>
    %171 = arith.addf %168, %170 : vector<17x64xf32>
    %c0_72 = arith.constant 0 : index
    %c0_73 = arith.constant 0 : index
    %172 = vector.load %arg16[%c0_72, %c0_73] : memref<1x64xf32, #tpu.memory_space<vmem>>, vector<1x64xf32>
    %c0_74 = arith.constant 0 : index
    %c0_75 = arith.constant 0 : index
    %173 = vector.load %arg17[%c0_74, %c0_75] : memref<1x64xf32, #tpu.memory_space<vmem>>, vector<1x64xf32>
    %cst_76 = arith.constant dense<0.000000e+00> : vector<17xf32>
    %174 = vector.multi_reduction <add>, %171, %cst_76 [1] : vector<17x64xf32> to vector<17xf32>
    %175 = vector.shape_cast %174 : vector<17xf32> to vector<17x1xf32>
    %cst_77 = arith.constant 6.400000e+01 : f32
    %176 = vector.broadcast %cst_77 : f32 to vector<17x1xf32>
    %177 = arith.divf %175, %176 : vector<17x1xf32>
    %178 = vector.broadcast %177 : vector<17x1xf32> to vector<17x64xf32>
    %179 = arith.subf %171, %178 : vector<17x64xf32>
    %180 = arith.mulf %179, %179 : vector<17x64xf32>
    %cst_78 = arith.constant dense<0.000000e+00> : vector<17xf32>
    %181 = vector.multi_reduction <add>, %180, %cst_78 [1] : vector<17x64xf32> to vector<17xf32>
    %182 = vector.shape_cast %181 : vector<17xf32> to vector<17x1xf32>
    %cst_79 = arith.constant 0.0158730168 : f32
    %183 = vector.broadcast %cst_79 : f32 to vector<17x1xf32>
    %184 = arith.mulf %182, %183 : vector<17x1xf32>
    %185 = vector.broadcast %172 : vector<1x64xf32> to vector<17x64xf32>
    %186 = arith.mulf %185, %179 : vector<17x64xf32>
    %187 = math.sqrt %184 : vector<17x1xf32>
    %cst_80 = arith.constant 9.99999997E-7 : f32
    %188 = vector.broadcast %cst_80 : f32 to vector<17x1xf32>
    %189 = arith.addf %187, %188 : vector<17x1xf32>
    %190 = vector.broadcast %189 : vector<17x1xf32> to vector<17x64xf32>
    %191 = arith.divf %186, %190 : vector<17x64xf32>
    %192 = vector.broadcast %173 : vector<1x64xf32> to vector<17x64xf32>
    %193 = arith.addf %191, %192 : vector<17x64xf32>
    %c0_81 = arith.constant 0 : index
    %c0_82 = arith.constant 0 : index
    %194 = vector.load %arg18[%c0_81, %c0_82] : memref<64x32xf32, #tpu.memory_space<vmem>>, vector<64x32xf32>
    %cst_83 = arith.constant dense<0.000000e+00> : vector<17x32xf32>
    %195 = tpu.matmul %193, %194, %cst_83 {dimension_numbers = #tpu.dot_dimension_numbers<[1], [0], [0], [1], [0, 0, 1, 1], [], []>} : vector<17x64xf32>, vector<64x32xf32>, vector<17x32xf32> -> vector<17x32xf32>
    %c0_84 = arith.constant 0 : index
    %c0_85 = arith.constant 0 : index
    %196 = vector.load %arg19[%c0_84, %c0_85] : memref<1x32xf32, #tpu.memory_space<vmem>>, vector<1x32xf32>
    %197 = vector.broadcast %196 : vector<1x32xf32> to vector<17x32xf32>
    %198 = arith.addf %195, %197 : vector<17x32xf32>
    %cst_86 = arith.constant 0.000000e+00 : f32
    %199 = vector.broadcast %cst_86 : f32 to vector<17x32xf32>
    %200 = arith.maximumf %198, %199 : vector<17x32xf32>
    %c0_87 = arith.constant 0 : index
    %c0_88 = arith.constant 0 : index
    %c0_89 = arith.constant 0 : index
    %201 = vector.load %arg20[%c0_87, %c0_88, %c0_89] : memref<1x17x32xf32, #tpu.memory_space<vmem>>, vector<1x17x32xf32>
    %202 = vector.shape_cast %201 : vector<1x17x32xf32> to vector<17x32xf32>
    %203 = vector.shape_cast %200 : vector<17x32xf32> to vector<1x17x32xf32>
    tpu.vector_store %arg20[%c0_87, %c0_88, %c0_89], %203 {strides = array<i32>} : memref<1x17x32xf32, #tpu.memory_space<vmem>>, vector<1x17x32xf32>,
    return
  }
  func.func @transform_0(%arg0: i32) -> (i32, i32, i32) {
    %c0_i32 = arith.constant 0 : i32
    %c0_i32_0 = arith.constant 0 : i32
    %c0_i32_1 = arith.constant 0 : i32
    return %arg0, %c0_i32, %c0_i32_0 : i32, i32, i32
  }
  func.func @transform_1(%arg0: i32) -> (i32, i32) {
    %c0_i32 = arith.constant 0 : i32
    %c0_i32_0 = arith.constant 0 : i32
    %c0_i32_1 = arith.constant 0 : i32
    return %c0_i32, %c0_i32_0 : i32, i32
  }
  func.func @transform_2(%arg0: i32) -> (i32, i32) {
    %c0_i32 = arith.constant 0 : i32
    %c0_i32_0 = arith.constant 0 : i32
    %c0_i32_1 = arith.constant 0 : i32
    return %c0_i32, %c0_i32_0 : i32, i32
  }
  func.func @transform_3(%arg0: i32) -> (i32, i32) {
    %c0_i32 = arith.constant 0 : i32
    %c0_i32_0 = arith.constant 0 : i32
    %c0_i32_1 = arith.constant 0 : i32
    return %c0_i32, %c0_i32_0 : i32, i32
  }
  func.func @transform_4(%arg0: i32) -> (i32, i32) {
    %c0_i32 = arith.constant 0 : i32
    %c0_i32_0 = arith.constant 0 : i32
    %c0_i32_1 = arith.constant 0 : i32
    return %c0_i32, %c0_i32_0 : i32, i32
  }
  func.func @transform_5(%arg0: i32) -> (i32, i32) {
    %c0_i32 = arith.constant 0 : i32
    %c0_i32_0 = arith.constant 0 : i32
    %c0_i32_1 = arith.constant 0 : i32
    return %c0_i32, %c0_i32_0 : i32, i32
  }
  func.func @transform_6(%arg0: i32) -> (i32, i32) {
    %c0_i32 = arith.constant 0 : i32
    %c0_i32_0 = arith.constant 0 : i32
    %c0_i32_1 = arith.constant 0 : i32
    return %c0_i32, %c0_i32_0 : i32, i32
  }
  func.func @transform_7(%arg0: i32) -> (i32, i32) {
    %c0_i32 = arith.constant 0 : i32
    %c0_i32_0 = arith.constant 0 : i32
    %c0_i32_1 = arith.constant 0 : i32
    return %c0_i32, %c0_i32_0 : i32, i32
  }
  func.func @transform_8(%arg0: i32) -> (i32, i32) {
    %c0_i32 = arith.constant 0 : i32
    %c0_i32_0 = arith.constant 0 : i32
    %c0_i32_1 = arith.constant 0 : i32
    return %c0_i32, %c0_i32_0 : i32, i32
  }
  func.func @transform_9(%arg0: i32) -> (i32, i32) {
    %c0_i32 = arith.constant 0 : i32
    %c0_i32_0 = arith.constant 0 : i32
    %c0_i32_1 = arith.constant 0 : i32
    return %c0_i32, %c0_i32_0 : i32, i32
  }
  func.func @transform_10(%arg0: i32) -> (i32, i32) {
    %c0_i32 = arith.constant 0 : i32
    %c0_i32_0 = arith.constant 0 : i32
    %c0_i32_1 = arith.constant 0 : i32
    return %c0_i32, %c0_i32_0 : i32, i32
  }
  func.func @transform_11(%arg0: i32) -> (i32, i32) {
    %c0_i32 = arith.constant 0 : i32
    %c0_i32_0 = arith.constant 0 : i32
    %c0_i32_1 = arith.constant 0 : i32
    return %c0_i32, %c0_i32_0 : i32, i32
  }
  func.func @transform_12(%arg0: i32) -> (i32, i32) {
    %c0_i32 = arith.constant 0 : i32
    %c0_i32_0 = arith.constant 0 : i32
    %c0_i32_1 = arith.constant 0 : i32
    return %c0_i32, %c0_i32_0 : i32, i32
  }
  func.func @transform_13(%arg0: i32) -> (i32, i32) {
    %c0_i32 = arith.constant 0 : i32
    %c0_i32_0 = arith.constant 0 : i32
    %c0_i32_1 = arith.constant 0 : i32
    return %c0_i32, %c0_i32_0 : i32, i32
  }
  func.func @transform_14(%arg0: i32) -> (i32, i32) {
    %c0_i32 = arith.constant 0 : i32
    %c0_i32_0 = arith.constant 0 : i32
    %c0_i32_1 = arith.constant 0 : i32
    return %c0_i32, %c0_i32_0 : i32, i32
  }
  func.func @transform_15(%arg0: i32) -> (i32, i32) {
    %c0_i32 = arith.constant 0 : i32
    %c0_i32_0 = arith.constant 0 : i32
    %c0_i32_1 = arith.constant 0 : i32
    return %c0_i32, %c0_i32_0 : i32, i32
  }
  func.func @transform_16(%arg0: i32) -> (i32, i32) {
    %c0_i32 = arith.constant 0 : i32
    %c0_i32_0 = arith.constant 0 : i32
    %c0_i32_1 = arith.constant 0 : i32
    return %c0_i32, %c0_i32_0 : i32, i32
  }
  func.func @transform_17(%arg0: i32) -> (i32, i32) {
    %c0_i32 = arith.constant 0 : i32
    %c0_i32_0 = arith.constant 0 : i32
    %c0_i32_1 = arith.constant 0 : i32
    return %c0_i32, %c0_i32_0 : i32, i32
  }
  func.func @transform_18(%arg0: i32) -> (i32, i32) {
    %c0_i32 = arith.constant 0 : i32
    %c0_i32_0 = arith.constant 0 : i32
    %c0_i32_1 = arith.constant 0 : i32
    return %c0_i32, %c0_i32_0 : i32, i32
  }
  func.func @transform_19(%arg0: i32) -> (i32, i32, i32) {
    %c0_i32 = arith.constant 0 : i32
    %c0_i32_0 = arith.constant 0 : i32
    %c0_i32_1 = arith.constant 0 : i32
    return %arg0, %c0_i32, %c0_i32_0 : i32, i32, i32
  }
}

</mosaic_0001>

<bundles_post_ra>
// kernel: dncoder_forward.4
= control target key start
LH: loop header
LB: loop body
LE: loop exit
PB: predicated region body
PF: predicated region fallthrough
CT: control target
= control target key end

     0   :  { %s5169_s0 = inlined_call_operand.vmem [shape: f32[2,33,32], index: 0, kind: input, shape index: {}]   ;;  %s5170_s1 = inlined_call_operand.vmem [shape: f32[1,32], index: 1, kind: input, shape index: {}]   ;;  %s5171_s2 = inlined_call_operand.vmem [shape: f32[1,32], index: 2, kind: input, shape index: {}]   ;;  %s5172_s3 = inlined_call_operand.vmem [shape: f32[32,96], index: 3, kind: input, shape index: {}]   ;;  %s5173_s4 = inlined_call_operand.vmem [shape: f32[1,96], index: 4, kind: input, shape index: {}]   ;;  %s5174_s5 = inlined_call_operand.vmem [shape: f32[32,32], index: 5, kind: input, shape index: {}]   ;;  %s5175_s6 = inlined_call_operand.vmem [shape: f32[1,32], index: 6, kind: input, shape index: {}]   ;;  %s5176_s7 = inlined_call_operand.vmem [shape: f32[1,32], index: 7, kind: input, shape index: {}]   ;;  %s5177_s8 = inlined_call_operand.vmem [shape: f32[1,32], index: 8, kind: input, shape index: {}]   ;;  %s5178_s9 = inlined_call_operand.vmem [shape: f32[32,128], index: 9, kind: input, shape index: {}]   ;;  %s5179_s10 = inlined_call_operand.vmem [shape: f32[1,128], index: 10, kind: input, shape index: {}]   ;;  %s5180_s11 = inlined_call_operand.vmem [shape: f32[1,128], index: 11, kind: input, shape index: {}]   ;;  %s5181_s12 = inlined_call_operand.vmem [shape: f32[1,128], index: 12, kind: input, shape index: {}]   ;;  %s5182_s13 = inlined_call_operand.vmem [shape: f32[128,32], index: 13, kind: input, shape index: {}]   ;;  %s5183_s14 = inlined_call_operand.vmem [shape: f32[1,32], index: 14, kind: input, shape index: {}]   ;;  %s5184_s15 = inlined_call_operand.vmem [shape: f32[1,32], index: 15, kind: input, shape index: {}]   ;;  %s5185_s16 = inlined_call_operand.vmem [shape: f32[1,32], index: 16, kind: input, shape index: {}]   ;;  %s5186_s17 = inlined_call_operand.vmem [shape: f32[32,64], index: 17, kind: input, shape index: {}]   ;;  %s5187_s18 = inlined_call_operand.vmem [shape: f32[1,64], index: 18, kind: input, shape index: {}]   ;;  %s5188_s19 = inlined_call_operand.vmem [shape: f32[2,33,64], index: 19, kind: output, shape index: {}]  }
   0x1   :  { %5190 = sst [smem:[#allocation2_spill]] %s5169_s0  ;;  %s4184_s0 = smov 0  }
   0x2   :  { %5191 = sst [smem:[#allocation3_spill]] %s5170_s1 }
   0x3   :  { %5192 = sst [smem:[#allocation4_spill]] %s5171_s2 }
   0x4   :  { %5193 = sst [smem:[#allocation5_spill]] %s5172_s3 }
   0x5 LB: > { %s3102_s30 = sadd.s32 4294967295, %s4065_s0   ;;  %p3106_p0 = scmp.ge.s32.totalorder %s4065_s0, 1  ;;  %s4065_s0 = sphi %s4184_s0, %s29_s0  }
   0x6   : > { %p537_p1 = scmp.lt.s32.totalorder %s4065_s0, 3 }
   0x8   : > { %p538_p2 = pnand %p3106_p0, %p537_p1 }
   0x9   : > { %p593_p3 = scmp.lt.s32.totalorder (!%p538_p2), %s3102_s30, 1  ;;  %vm610_vm0 = vcmask (!%p538_p2), 261120   ;;  %s5194_s22 = sld [smem:[#allocation2_spill]] (!%p538_p2)  ;;  %vm623_vm1 = vcmask (!%p538_p2), 253952   ;;  %v4067_v38 = vmov (!%p538_p2), 0.0|0.0   ;;  %vm4068_vm2 = vmmov (!%p538_p2), 0  }
   0xa   : > { %541 = sbr.rel (%p538_p2) target bundleno = 3541 (0xdd5), region = 96  ;;  %s5195_s25 = sld [smem:[#allocation5_spill]] (!%p538_p2)  ;;  %3684 = vmatprep.subr.bf16.mxu0 (!%p538_p2), %v4067_v38  ;;  %v4069_v41 = vmov (!%p538_p2), 0.0   ;;  %3690 = vmatprep.subr.bf16.mxu1 (!%p538_p2), %v4067_v38  ;;  %vm879_vm13 = vcmask (!%p538_p2), 64512   ;;  %vm1086_vm15 = vcmask (!%p538_p2), 1040384  }
   0xb   : > { %3353 = vmatprep.mubr.msk.f32.mxu0 (!%p538_p2), %vm4068_vm2, %v4069_v41  ;;  %3378 = vmatprep.mubr.msk.f32.mxu1 (!%p538_p2), %vm4068_vm2, %v4069_v41  ;;  %s5196_s23 = sld [smem:[#allocation3_spill]] (!%p538_p2)  ;;  %s5197_s26 = sld [smem:[#allocation4_spill]] (!%p538_p2)  ;;  %vm4339_vm14 = vmpackc.low (!%p538_p2), %vm879_vm13, %vm879_vm13 }
   0xc   : > { %s4070_s29 = smov (!%p538_p2), 96   ;;  %s4071_s21 = smov (!%p538_p2), 88  }
   0xd   : > { %s4072_s1 = smov (!%p538_p2), 80   ;;  %s4075_s24 = smov (!%p538_p2), 112  }
   0xe   : > { %s4076_s3 = smov (!%p538_p2), 104   ;;  %s4078_s27 = smov (!%p538_p2), 56  }
   0xf   : > { %s4079_s28 = smov (!%p538_p2), 48  }
  0x10   : > { %v735_v35 = vld [vmem:[%s5195_s25] sm:$0xff] (!%p538_p2)  ;;  %v736_v36 = vld [vmem:[%s5195_s25 + $0x8] sm:$0xff] (!%p538_p2)  ;;  %v737_v37 = vld [vmem:[%s5195_s25 + $0x10] sm:$0xff] (!%p538_p2) }
  0x11   : > { %s5201_s30 = smov (!%p593_p3, %s3102_s30), 1  ;;  %v3685_v39 = vpack.c.bf16 %v736_v36, %v735_v35  ;;  %v738_v40 = vld [vmem:[%s5195_s25 + $0x18] sm:$0xff] }
  0x12   : > { %s3788_s20 = smul.u32 40, %s5201_s30  ;;  %v3688_v42 = vpack.c.bf16 %v738_v40, %v737_v37 }
  0x13   : > { %3686 = vmatpush3.bf16.msra.mxu0 %v3685_v39 }
  0x14   : > { %s4200_s2 = scalar_lea.vmem %s5194_s22, %s3788_s20  ;;  %3687 = vmatprep.subr.bf16.mxu0 %v4067_v38  ;;  %s4073_s22 = smov 120  }
  0x15   : > { %v603_v0 = vld [vmem:[%s4200_s2] sm:$0xff]  ;;  %v605_v1 = vld [vmem:[%s4200_s2 + $0x10] sm:$0xff]  ;;  %v604_v2 = vld [vmem:[%s4200_s2 + $0x8] sm:$0xff] }
  0x16   : > { %v611_v3 = vsel %vm610_vm0, %v603_v0, 0.0  ;;  %v617_v4 = vsel %vm610_vm0, %v605_v1, 0.0  ;;  %v606_v5 = vld [vmem:[%s4200_s2 + $0x18] sm:$0xff]  ;;  %v614_v6 = vsel %vm610_vm0, %v604_v2, 0.0  ;;  %v607_v8 = vld [vmem:[%s4200_s2 + $0x20] sm:$0x1] }
  0x17   : > { %612 = vadd.xlane.f32.xlu0 %v611_v3  ;;  %618 = vadd.xlane.f32.xlu1 %v617_v4  ;;  %v620_v7 = vsel %vm610_vm0, %v606_v5, 0.0  ;;  %v624_v9 = vsel %vm623_vm1, %v607_v8, 0.0 }
  0x18   : > { %3689 = vmatpush3.bf16.msra.mxu0 %v3688_v42 }
  0x19   : > { %3698 = vmatprep.subr.bf16.mxu0 %v4067_v38 }
  0x1b   : > { %615 = vadd.xlane.f32.xlu0 %v614_v6  ;;  %621 = vadd.xlane.f32.xlu1 %v620_v7 }
  0x1f   : > { %625 = vadd.xlane.f32.xlu0 %v624_v9 }
  0xa4   : > { %v613_v10 = vpop.xlane.xlu0 %612  ;;  %v619_v11 = vpop.xlane.xlu1 %618 }
  0xa5   : > { %v628_v12 = vmul.f32 0.03125, %v613_v10  ;;  %v630_v13 = vmul.f32 0.03125, %v619_v11 }
  0xa7   : > { %v4212_v14 = vsub.f32 %v603_v0, %v628_v12  ;;  %v4214_v15 = vsub.f32 %v605_v1, %v630_v13 }
  0xa8   : > { %v616_v16 = vpop.xlane.xlu0 %615  ;;  %v622_v17 = vpop.xlane.xlu1 %621 }
  0xa9   : > { %v629_v18 = vmul.f32 0.03125, %v616_v16  ;;  %v631_v19 = vmul.f32 0.03125, %v622_v17  ;;  %v638_v20 = vmul.f32 %v4212_v14, %v4212_v14  ;;  %v640_v21 = vmul.f32 %v4214_v15, %v4214_v15 }
  0xab   : > { %v4220_v22 = vsub.f32 %v604_v2, %v629_v18  ;;  %v4222_v23 = vsub.f32 %v606_v5, %v631_v19  ;;  %v643_v24 = vsel %vm610_vm0, %v638_v20, 0.0  ;;  %v649_v28 = vsel %vm610_vm0, %v640_v21, 0.0  ;;  %v3109_v20 = vld [vmem:[%s5196_s23] ss:$0 sm:$0xff]  ;;  %s4074_s23 = smov 72  }
  0xac   : > { %v626_v25 = vpop.xlane.xlu0 %625  ;;  %644 = vadd.xlane.f32.xlu1 %v643_v24  ;;  %v669_v24 = vmul.f32 %v3109_v20, %v4212_v14 }
  0xad   : > { %v632_v26 = vmul.f32 0.03125, %v626_v25  ;;  %v639_v27 = vmul.f32 %v4220_v22, %v4220_v22  ;;  %v641_v29 = vmul.f32 %v4222_v23, %v4222_v23  ;;  %v672_v37 = vmul.f32 %v3109_v20, %v4222_v23 }
  0xaf   : > { %v4230_v30 = vsub.f32 %v607_v8, %v632_v26  ;;  %v646_v31 = vsel %vm610_vm0, %v639_v27, 0.0  ;;  %v652_v32 = vsel %vm610_vm0, %v641_v29, 0.0  ;;  %v3110_v26 = vld [vmem:[%s5197_s26] ss:$0 sm:$0xff]  ;;  %s4077_s26 = smov 64  }
  0xb0   : > { %647 = vadd.xlane.f32.xlu0 %v646_v31  ;;  %650 = vadd.xlane.f32.xlu1 %v649_v28  ;;  %v670_v28 = vmul.f32 %v3109_v20, %v4220_v22 }
  0xb1   : > { %v642_v33 = vmul.f32 %v4230_v30, %v4230_v30 }
  0xb3   : > { %v655_v34 = vsel %vm623_vm1, %v642_v33, 0.0 }
  0xb4   : > { %653 = vadd.xlane.f32.xlu0 %v652_v32  ;;  %656 = vadd.xlane.f32.xlu1 %v655_v34  ;;  %v671_v34 = vmul.f32 %v3109_v20, %v4214_v15  ;;  %v673_v15 = vmul.f32 %v3109_v20, %v4230_v30 }
 0x139   : > { %v645_v43 = vpop.xlane.xlu1 %644 }
 0x13a   : > { %v658_v44 = vmul.f32 0.032258064, %v645_v43 }
 0x13c   : > { %3894 = vrsqrt.f32 %v658_v44  ;;  %vm676_vm3 = vcmp.eq.f32.partialorder %v658_v44, inf  ;;  %v679_v55 = vand.u32 2147483648, %v658_v44  ;;  %vm678_vm4 = vcmp.eq.f32.partialorder %v658_v44, 0.0 }
 0x13d   : > { %v648_v45 = vpop.xlane.xlu0 %647  ;;  %v651_v46 = vpop.xlane.xlu1 %650 }
 0x13e   : > { %v659_v47 = vmul.f32 0.032258064, %v648_v45  ;;  %v660_v48 = vmul.f32 0.032258064, %v651_v46  ;;  %v3111_v45 = vld [vmem:[%s5173_s4] ss:$0 sm:$0xff] }
 0x140   : > { %3896 = vrsqrt.f32 %v659_v47  ;;  %vm683_vm5 = vcmp.eq.f32.partialorder %v659_v47, inf  ;;  %vm685_vm6 = vcmp.eq.f32.partialorder %v659_v47, 0.0  ;;  %vm690_vm7 = vcmp.eq.f32.partialorder %v660_v48, inf }
 0x141   : > { %3898 = vrsqrt.f32 %v660_v48  ;;  %v654_v49 = vpop.xlane.xlu0 %653  ;;  %v657_v50 = vpop.xlane.xlu1 %656  ;;  %v686_v62 = vand.u32 2147483648, %v659_v47  ;;  %vm692_vm8 = vcmp.eq.f32.partialorder %v660_v48, 0.0  ;;  %v693_v0 = vand.u32 2147483648, %v660_v48 }
 0x142   : > { %v661_v51 = vmul.f32 0.032258064, %v654_v49  ;;  %v662_v52 = vmul.f32 0.032258064, %v657_v50 }
 0x144   : > { %3900 = vrsqrt.f32 %v661_v51  ;;  %vm697_vm9 = vcmp.eq.f32.partialorder %v661_v51, inf  ;;  %vm704_vm10 = vcmp.eq.f32.partialorder %v662_v52, inf  ;;  %v707_v6 = vand.u32 2147483648, %v662_v52 }
 0x145   : > { %3902 = vrsqrt.f32 %v662_v52  ;;  %vm706_vm11 = vcmp.eq.f32.partialorder %v662_v52, 0.0  ;;  %v700_v11 = vand.u32 2147483648, %v661_v51  ;;  %vm699_vm12 = vcmp.eq.f32.partialorder %v661_v51, 0.0 }
 0x146   : > { %v3895_v53 = vpop.eup %3894 }
 0x147   : > { %v675_v54 = vmul.f32 %v3895_v53, %v658_v44 }
 0x149   : > { %v677_v57 = vsel %vm676_vm3, %v658_v44, %v675_v54 }
 0x14a   : > { %v3897_v56 = vpop.eup %3896  ;;  %v680_v60 = vsel %vm678_vm4, %v679_v55, %v677_v57  ;;  %vm1000_vm4 = vcmask 269312  }
 0x14b   : > { %v3899_v58 = vpop.eup %3898  ;;  %v682_v59 = vmul.f32 %v3897_v56, %v659_v47  ;;  %v709_v63 = vadd.f32 1e-06, %v680_v60 }
 0x14c   : > { %v689_v61 = vmul.f32 %v3899_v58, %v660_v48 }
 0x14d   : > { %v684_v1 = vsel %vm683_vm5, %v659_v47, %v682_v59  ;;  %3904 = vrcp.f32 %v709_v63 }
 0x14e   : > { %v3901_v2 = vpop.eup %3900  ;;  %v691_v3 = vsel %vm690_vm7, %v660_v48, %v689_v61  ;;  %v687_v4 = vsel %vm685_vm6, %v686_v62, %v684_v1 }
 0x14f   : > { %v3903_v5 = vpop.eup %3902  ;;  %v696_v7 = vmul.f32 %v3901_v2, %v661_v51  ;;  %v710_v8 = vadd.f32 1e-06, %v687_v4  ;;  %v694_v9 = vsel %vm692_vm8, %v693_v0, %v691_v3  ;;  %v851_v0 = vlaneseq }
 0x150   : > { %v703_v10 = vmul.f32 %v3903_v5, %v662_v52  ;;  %v711_v12 = vadd.f32 1e-06, %v694_v9 }
 0x151   : > { %v698_v13 = vsel %vm697_vm9, %v661_v51, %v696_v7  ;;  %3906 = vrcp.f32 %v710_v8  ;;  %vm1013_vm9 = vcmask 262144  }
 0x152   : > { %v705_v16 = vsel %vm704_vm10, %v662_v52, %v703_v10  ;;  %3908 = vrcp.f32 %v711_v12  ;;  %v701_v17 = vsel %vm699_vm12, %v700_v11, %v698_v13  ;;  %vm2192_vm10 = vcmask 130048  }
 0x153   : > { %v712_v18 = vadd.f32 1e-06, %v701_v17  ;;  %v708_v19 = vsel %vm706_vm11, %v707_v6, %v705_v16  ;;  %vm2198_vm11 = vcmask 195584  }
 0x154   : > { %v713_v21 = vadd.f32 1e-06, %v708_v19 }
 0x155   : > { %3910 = vrcp.f32 %v712_v18 }
 0x156   : > { %3912 = vrcp.f32 %v713_v21 }
 0x157   : > { %v3905_v25 = vpop.eup %3904 }
 0x158   : > { %v715_v27 = vmul.f32 %v3905_v25, %v669_v24 }
 0x15a   : > { %v730_v31 = vadd.f32 %v3110_v26, %v715_v27 }
 0x15b   : > { %v3907_v29 = vpop.eup %3906 }
 0x15c   : > { %v3909_v32 = vpop.eup %3908  ;;  %v717_v33 = vmul.f32 %v3907_v29, %v670_v28  ;;  %3354 = vmatmul.mubr.msk.f32.vlgmr.msra.gmra.mrb[0].mxu0 %vm610_vm0, %v730_v31 }
 0x15d   : > { %3356 = vmatprep.mubr.msk.f32.mxu0 %vm4068_vm2, %v4069_v41  ;;  %v719_v35 = vmul.f32 %v3909_v32, %v671_v34 }
 0x15e   : > { %v731_v14 = vadd.f32 %v3110_v26, %v717_v33 }
 0x15f   : > { %v3911_v36 = vpop.eup %3910  ;;  %v732_v22 = vadd.f32 %v3110_v26, %v719_v35 }
 0x160   : > { %3357 = vmatmul.mubr.msk.f32.gmra.mrb[2].mxu0 %vm610_vm0, %v731_v14  ;;  %v721_v39 = vmul.f32 %v3911_v36, %v672_v37  ;;  %v3913_v40 = vpop.eup %3912 }
 0x161   : > { %3359 = vmatprep.mubr.msk.f32.mxu0 %vm4068_vm2, %v4069_v41  ;;  %v723_v43 = vmul.f32 %v3913_v40, %v673_v15 }
 0x162   : > { %v733_v42 = vadd.f32 %v3110_v26, %v721_v39 }
 0x163   : > { %v734_v23 = vadd.f32 %v3110_v26, %v723_v43 }
 0x164   : > { %3360 = vmatmul.mubr.msk.f32.gmra.mrb[4].mxu0 %vm610_vm0, %v732_v22 }
 0x165   : > { %3362 = vmatprep.mubr.msk.f32.mxu0 %vm4068_vm2, %v4069_v41 }
 0x168   : > { %3363 = vmatmul.mubr.msk.f32.gmra.mrb[6].mxu0 %vm610_vm0, %v733_v42 }
 0x169   : > { %3365 = vmatprep.mubr.msk.f32.mxu0 %vm4068_vm2, %v4069_v41 }
 0x16c   : > { %3366 = vmatmul.mubr.msk.f32.gmra.mrb[8].mxu0 %vm610_vm0, %v734_v23 }
 0x16d   : > { %3403 = vmatprep.mubr.msk.f32.mxu0 %vm4068_vm2, %v4069_v41 }
 0x22f   : > { %v827_v44 = vpop.f32.mrb[0].mxu0 }
 0x230   : > { %v3355_v30 = vpop.f32.mrb[1].mxu0  ;;  %v4286_v47 = vadd.f32 %v3111_v45, %v827_v44 }
 0x233   : > { %v832_v46 = vpop.f32.mrb[2].mxu0 }
 0x234   : > { %v4288_v48 = vadd.f32 %v3111_v45, %v832_v46  ;;  %v3358_v49 = vpop.f32.mrb[3].mxu0 }
 0x236   : > { %v4292_v50 = vpack.i.bf16 %v4288_v48, %v4286_v47 }
 0x237   : > { %v837_v51 = vpop.f32.mrb[4].mxu0 }
 0x238   : > { %3815 = vrot.lane.b32.xlu0 %v4292_v50, %s4070_s29  ;;  %v3361_v52 = vpop.f32.mrb[5].mxu0  ;;  %v4295_v54 = vadd.f32 %v3111_v45, %v837_v51 }
 0x23b   : > { %v842_v53 = vpop.f32.mrb[6].mxu0 }
 0x23c   : > { %v4297_v55 = vadd.f32 %v3111_v45, %v842_v53  ;;  %v3364_v56 = vpop.f32.mrb[7].mxu0 }
 0x23e   : > { %v4301_v57 = vpack.i.bf16 %v4297_v55, %v4295_v54 }
 0x23f   : > { %v847_v58 = vpop.f32.mrb[8].mxu0 }
 0x240   : > { %3830 = vrot.lane.b32.xlu0 %v4301_v57, %s4071_s21  ;;  %3820 = vrot.lane.b32.xlu1 %v4301_v57, %s4070_s29  ;;  %v3367_v59 = vpop.f32.mrb[9].mxu0  ;;  %v4305_v60 = vadd.f32 %v3111_v45, %v847_v58 }
 0x244   : > { %3835 = vrot.lane.b32.xlu0 %v4292_v50, %s4072_s1  ;;  %877 = vrot.lane.b32.xlu1 %v4305_v60, %s4070_s29  ;;  %s4080_s29 = smov 40  }
 0x248   : > { %1181 = vrot.lane.b32.xlu0 %v4288_v48, %s4073_s22  ;;  %3825 = vrot.lane.b32.xlu1 %v4292_v50, %s4071_s21 }
 0x24c   : > { %1183 = vrot.lane.b32.xlu0 %v4295_v54, %s4073_s22  ;;  %1197 = vrot.lane.b32.xlu1 %v4305_v60, %s4071_s21  ;;  %s4081_s21 = smov 8  }
 0x250   : > { %1187 = vrot.lane.b32.xlu0 %v4305_v60, %s4073_s22  ;;  %1179 = vrot.lane.b32.xlu1 %v4286_v47, %s4073_s22 }
 0x254   : > { %3845 = vrot.lane.b32.xlu0 %v4292_v50, %s4074_s23  ;;  %3840 = vrot.lane.b32.xlu1 %v4301_v57, %s4072_s1 }
 0x258   : > { %1497 = vrot.lane.b32.xlu0 %v4288_v48, %s4075_s24  ;;  %1185 = vrot.lane.b32.xlu1 %v4297_v55, %s4073_s22 }
 0x25c   : > { %1499 = vrot.lane.b32.xlu0 %v4295_v54, %s4075_s24  ;;  %1513 = vrot.lane.b32.xlu1 %v4305_v60, %s4072_s1  ;;  %s4083_s1 = smov 24  }
 0x260   : > { %1503 = vrot.lane.b32.xlu0 %v4305_v60, %s4075_s24  ;;  %1495 = vrot.lane.b32.xlu1 %v4286_v47, %s4075_s24 }
 0x264   : > { %1811 = vrot.lane.b32.xlu0 %v4286_v47, %s4076_s3  ;;  %3850 = vrot.lane.b32.xlu1 %v4301_v57, %s4074_s23 }
 0x268   : > { %1815 = vrot.lane.b32.xlu0 %v4295_v54, %s4076_s3  ;;  %1501 = vrot.lane.b32.xlu1 %v4297_v55, %s4075_s24  ;;  %s602_s24 = scalar_lea.vmem %s5188_s19, %s3788_s20 }
 0x26c   : > { %1819 = vrot.lane.b32.xlu0 %v4305_v60, %s4076_s3  ;;  %1829 = vrot.lane.b32.xlu1 %v4305_v60, %s4074_s23 }
 0x270   : > { %3855 = vrot.lane.b32.xlu0 %v4292_v50, %s4077_s26  ;;  %1813 = vrot.lane.b32.xlu1 %v4288_v48, %s4076_s3 }
 0x274   : > { %3870 = vrot.lane.b32.xlu0 %v4301_v57, %s4078_s27  ;;  %1817 = vrot.lane.b32.xlu1 %v4297_v55, %s4076_s3 }
 0x278   : > { %1065 = vrot.lane.b32.xlu0 %v4305_v60, %s4077_s26  ;;  %3860 = vrot.lane.b32.xlu1 %v4301_v57, %s4077_s26 }
 0x27c   : > { %1382 = vrot.lane.b32.xlu0 %v4305_v60, %s4078_s27  ;;  %3865 = vrot.lane.b32.xlu1 %v4292_v50, %s4078_s27 }
 0x2aa   : > { %v3816_v61 = vpop.permute.xlu0 %3815 }
 0x2ab   : > { %v3818_v62 = vunpack.i.h.bf16 %v3816_v61  ;;  %v3817_v63 = vunpack.i.l.bf16 %v3816_v61 }
 0x2ad   : > { %v3691_v1 = vpack.c.bf16 %v3818_v62, %v3817_v63 }
 0x2af   : > { %3693 = vmatpush3.bf16.xpose.msk.msra.mxu1 %vm4339_vm14, %v3691_v1  ;;  %v4458_v1 = vshrl.u32 %v851_v0, 7 }
 0x2b0   : > { %3694 = vmatprep.subr.bf16.mxu1 %v4067_v38 }
 0x2b2   : > { %v3821_v2 = vpop.permute.xlu1 %3820  ;;  %v3831_v3 = vpop.permute.xlu0 %3830 }
 0x2b3   : > { %v3823_v4 = vunpack.i.h.bf16 %v3821_v2  ;;  %v3822_v5 = vunpack.i.l.bf16 %v3821_v2  ;;  %v3833_v20 = vunpack.i.h.bf16 %v3831_v3  ;;  %v3832_v21 = vunpack.i.l.bf16 %v3831_v3 }
 0x2b4   : > { %v4460_v2 = vand.u32 127, %v851_v0 }
 0x2b5   : > { %v3695_v6 = vpack.c.bf16 %v3823_v4, %v3822_v5  ;;  %v3709_v26 = vpack.c.bf16 %v3833_v20, %v3832_v21  ;;  %v4465_v4 = vadd.s32 8, %v4458_v1 }
 0x2b6   : > { %v878_v7 = vpop.permute.xlu1 %877  ;;  %v3836_v8 = vpop.permute.xlu0 %3835  ;;  %vm859_vm3 = vcmp.gt.s32.totalorder %v4460_v2, %v4458_v1 }
 0x2b7   : > { %3697 = vmatpush3.bf16.xpose.msk.msra.mxu1 %vm4339_vm14, %v3695_v6  ;;  %v3838_v32 = vunpack.i.h.bf16 %v3836_v8  ;;  %v3837_v33 = vunpack.i.l.bf16 %v3836_v8  ;;  %vm860_vm5 = vcmp.gt.s32.totalorder %v4460_v2, %v4465_v4 }
 0x2b8   : > { %3376 = vmatprep.subr.mxu1 %v4069_v41 }
 0x2b9   : > { %v3719_v35 = vpack.c.bf16 %v3838_v32, %v3837_v33 }
 0x2ba   : > { %v3826_v9 = vpop.permute.xlu1 %3825  ;;  %v1182_v10 = vpop.permute.xlu0 %1181 }
 0x2bb   : > { %v3828_v11 = vunpack.i.h.bf16 %v3826_v9  ;;  %v3827_v12 = vunpack.i.l.bf16 %v3826_v9 }
 0x2bd   : > { %v3705_v17 = vpack.c.bf16 %v3828_v11, %v3827_v12 }
 0x2be   : > { %v1198_v13 = vpop.permute.xlu1 %1197  ;;  %v1184_v16 = vpop.permute.xlu0 %1183 }
 0x2bf   : > { %3377 = vmatpush3.xpose.msk.msra.mxu1 %vm879_vm13, %v878_v7 }
 0x2c0   : > { %3704 = vmatprep.subr.bf16.mxu1 %v4067_v38 }
 0x2c2   : > { %v1180_v18 = vpop.permute.xlu1 %1179  ;;  %v1188_v19 = vpop.permute.xlu0 %1187  ;;  %3379 = vmatmul.mubr.msk.f32.vlgmr.msra.gmra.mrb[0].mxu1 %vm879_vm13, %v4286_v47 }
 0x2c3   : > { %3707 = vmatpush3.bf16.xpose.msk.msra.mxu1 %vm4339_vm14, %v3705_v17  ;;  %3381 = vmatprep.mubr.msk.f32.mxu1 %vm4068_vm2, %v4069_v41 }
 0x2c4   : > { %3708 = vmatprep.subr.bf16.mxu1 %v4067_v38 }
 0x2c6   : > { %v3841_v24 = vpop.permute.xlu1 %3840  ;;  %v3846_v25 = vpop.permute.xlu0 %3845  ;;  %3382 = vmatmul.mubr.msk.f32.gmra.mrb[2].mxu1 %vm879_vm13, %v4288_v48 }
 0x2c7   : > { %3384 = vmatprep.mubr.msk.f32.mxu1 %vm4068_vm2, %v4069_v41  ;;  %v3843_v22 = vunpack.i.h.bf16 %v3841_v24  ;;  %v3842_v39 = vunpack.i.l.bf16 %v3841_v24  ;;  %v3848_v47 = vunpack.i.h.bf16 %v3846_v25  ;;  %v3847_v48 = vunpack.i.l.bf16 %v3846_v25 }
 0x2c9   : > { %v3723_v42 = vpack.c.bf16 %v3843_v22, %v3842_v39  ;;  %v3733_v52 = vpack.c.bf16 %v3848_v47, %v3847_v48 }
 0x2ca   : > { %v1186_v27 = vpop.permute.xlu1 %1185  ;;  %v4362_v28 = vpop.permute.xlu0 %1497  ;;  %3385 = vmatmul.mubr.msk.f32.gmra.mrb[4].mxu1 %vm879_vm13, %v4295_v54 }
 0x2cb   : > { %3711 = vmatpush3.bf16.xpose.msk.msra.mxu1 %vm4339_vm14, %v3709_v26  ;;  %3387 = vmatprep.mubr.msk.f32.mxu1 %vm4068_vm2, %v4069_v41  ;;  %v4501_v26 = vadd.s32 32, %v4458_v1 }
 0x2cc   : > { %3426 = vmatprep.subr.mxu1 %v4069_v41 }
 0x2cd   : > { %vm863_vm8 = vcmp.gt.s32.totalorder %v4460_v2, %v4501_v26 }
 0x2ce   : > { %v1514_v29 = vpop.permute.xlu1 %1513  ;;  %v4371_v31 = vpop.permute.xlu0 %1499  ;;  %3388 = vmatmul.mubr.msk.f32.gmra.mrb[6].mxu1 %vm879_vm13, %v4297_v55 }
 0x2cf   : > { %3390 = vmatprep.mubr.msk.f32.mxu1 %vm4068_vm2, %v4069_v41 }
 0x2d2   : > { %v1496_v34 = vpop.permute.xlu1 %1495  ;;  %v4377_v14 = vpop.permute.xlu0 %1503  ;;  %3391 = vmatmul.mubr.msk.f32.gmra.mrb[8].mxu1 %vm879_vm13, %v4305_v60 }
 0x2d3   : > { %3427 = vmatpush3.xpose.msk.msra.mxu1 %vm879_vm13, %v1198_v13  ;;  %3428 = vmatprep.mubr.msk.f32.mxu1 %vm4068_vm2, %v4069_v41 }
 0x2d4   : > { %3718 = vmatprep.subr.bf16.mxu1 %v4067_v38 }
 0x2d6   : > { %v3851_v36 = vpop.permute.xlu1 %3850  ;;  %v4385_v37 = vpop.permute.xlu0 %1811  ;;  %3429 = vmatmul.mubr.msk.f32.vlgmr.msra.gmra.mrb[10].mxu1 %vm879_vm13, %v1180_v18  ;;  %v4489_v18 = vadd.s32 24, %v4458_v1 }
 0x2d7   : > { %3721 = vmatpush3.bf16.xpose.msk.msra.mxu1 %vm4339_vm14, %v3719_v35  ;;  %3431 = vmatprep.mubr.msk.f32.mxu1 %vm4068_vm2, %v4069_v41  ;;  %v3853_v58 = vunpack.i.h.bf16 %v3851_v36  ;;  %v3852_v59 = vunpack.i.l.bf16 %v3851_v36 }
 0x2d8   : > { %3722 = vmatprep.subr.bf16.mxu1 %v4067_v38  ;;  %vm862_vm7 = vcmp.gt.s32.totalorder %v4460_v2, %v4489_v18 }
 0x2d9   : > { %v3737_v62 = vpack.c.bf16 %v3853_v58, %v3852_v59 }
 0x2da   : > { %v1502_v40 = vpop.permute.xlu1 %1501  ;;  %v1816_v15 = vpop.permute.xlu0 %1815  ;;  %3432 = vmatmul.mubr.msk.f32.gmra.mrb[12].mxu1 %vm879_vm13, %v1182_v10  ;;  %v4477_v10 = vadd.s32 16, %v4458_v1 }
 0x2db   : > { %3434 = vmatprep.mubr.msk.f32.mxu1 %vm4068_vm2, %v4069_v41 }
 0x2dc   : > { %vm861_vm6 = vcmp.gt.s32.totalorder %v4460_v2, %v4477_v10 }
 0x2de   : > { %v1830_v43 = vpop.permute.xlu1 %1829  ;;  %v1820_v23 = vpop.permute.xlu0 %1819  ;;  %3435 = vmatmul.mubr.msk.f32.gmra.mrb[14].mxu1 %vm879_vm13, %v1184_v16 }
 0x2df   : > { %3725 = vmatpush3.bf16.xpose.msk.msra.mxu1 %vm4339_vm14, %v3723_v42  ;;  %3437 = vmatprep.mubr.msk.f32.mxu1 %vm4068_vm2, %v4069_v41 }
 0x2e0   : > { %3476 = vmatprep.subr.mxu1 %v4069_v41 }
 0x2e2   : > { %v1814_v44 = vpop.permute.xlu1 %1813  ;;  %v3856_v30 = vpop.permute.xlu0 %3855  ;;  %3438 = vmatmul.mubr.msk.f32.gmra.mrb[16].mxu1 %vm879_vm13, %v1186_v27 }
 0x2e3   : > { %v3858_v45 = vunpack.i.h.bf16 %v3856_v30  ;;  %v3857_v46 = vunpack.i.l.bf16 %v3856_v30  ;;  %3440 = vmatprep.mubr.msk.f32.mxu1 %vm4068_vm2, %v4069_v41 }
 0x2e5   : > { %v3699_v49 = vpack.c.bf16 %v3858_v45, %v3857_v46 }
 0x2e6   : > { %v1818_v51 = vpop.permute.xlu1 %1817  ;;  %3441 = vmatmul.mubr.msk.f32.gmra.mrb[18].mxu1 %vm879_vm13, %v1188_v19  ;;  %v4416_v56 = vpop.permute.xlu0 %3870 }
 0x2e7   : > { %3700 = vmatpush3.bf16.msra.mxu0 %v3699_v49  ;;  %3477 = vmatpush3.xpose.msk.msra.mxu1 %vm879_vm13, %v1514_v29 }
 0x2e8   : > { %3478 = vmatprep.mubr.msk.f32.mxu1 %vm4068_vm2, %v4069_v41  ;;  %3732 = vmatprep.subr.bf16.mxu1 %v4067_v38 }
 0x2e9   : > { %3701 = vmatprep.subr.bf16.mxu0 %v4067_v38 }
 0x2ea   : > { %v3861_v53 = vpop.permute.xlu1 %3860  ;;  %3479 = vmatmul.mubr.msk.f32.vlgmr.msra.gmra.mrb[20].mxu1 %vm879_vm13, %v1496_v34  ;;  %v1066_v63 = vpop.permute.xlu0 %1065 }
 0x2eb   : > { %v3863_v54 = vunpack.i.h.bf16 %v3861_v53  ;;  %v3862_v55 = vunpack.i.l.bf16 %v3861_v53  ;;  %3735 = vmatpush3.bf16.xpose.msk.msra.mxu1 %vm4339_vm14, %v3733_v52  ;;  %3481 = vmatprep.mubr.msk.f32.mxu1 %vm4068_vm2, %v4069_v41 }
 0x2ec   : > { %3736 = vmatprep.subr.bf16.mxu1 %v4067_v38 }
 0x2ed   : > { %v3702_v61 = vpack.c.bf16 %v3863_v54, %v3862_v55 }
 0x2ee   : > { %3482 = vmatmul.mubr.msk.f32.gmra.mrb[22].mxu1 %vm879_vm13, %v4362_v28 }
 0x2ef   : > { %3703 = vmatpush3.bf16.msra.mxu0 %v3702_v61  ;;  %3484 = vmatprep.mubr.msk.f32.mxu1 %vm4068_vm2, %v4069_v41 }
 0x2f0   : > { %3401 = vmatprep.subr.mxu0 %v4069_v41 }
 0x2f2   : > { %3485 = vmatmul.mubr.msk.f32.gmra.mrb[24].mxu1 %vm879_vm13, %v4371_v31 }
 0x2f3   : > { %3402 = vmatpush3.msk.msra.mxu0 %vm1086_vm15, %v1066_v63  ;;  %3739 = vmatpush3.bf16.xpose.msk.msra.mxu1 %vm4339_vm14, %v3737_v62 }
 0x2f4   : > { %3487 = vmatprep.mubr.msk.f32.mxu1 %vm4068_vm2, %v4069_v41  ;;  %3526 = vmatprep.subr.mxu1 %v4069_v41 }
 0x2f5   : > { %3712 = vmatprep.subr.bf16.mxu0 %v4067_v38 }
 0x2f6   : > { %3488 = vmatmul.mubr.msk.f32.gmra.mrb[26].mxu1 %vm879_vm13, %v1502_v40 }
 0x2f7   : > { %3490 = vmatprep.mubr.msk.f32.mxu1 %vm4068_vm2, %v4069_v41 }
 0x2fa   : > { %3491 = vmatmul.mubr.msk.f32.gmra.mrb[28].mxu1 %vm879_vm13, %v4377_v14 }
 0x2fb   : > { %3527 = vmatpush3.xpose.msk.msra.mxu1 %vm879_vm13, %v1830_v43  ;;  %3528 = vmatprep.mubr.msk.f32.mxu1 %vm4068_vm2, %v4069_v41 }
 0x2fc   : > { %3746 = vmatprep.subr.bf16.mxu1 %v4067_v38 }
 0x2fe   : > { %3529 = vmatmul.mubr.msk.f32.vlgmr.msra.gmra.mrb[30].mxu1 %vm879_vm13, %v4385_v37 }
 0x2ff   : > { %3531 = vmatprep.mubr.msk.f32.mxu1 %vm4068_vm2, %v4069_v41 }
 0x302   : > { %3532 = vmatmul.mubr.msk.f32.gmra.mrb[32].mxu1 %vm879_vm13, %v1814_v44 }
 0x303   : > { %3534 = vmatprep.mubr.msk.f32.mxu1 %vm4068_vm2, %v4069_v41 }
 0x306   : > { %3535 = vmatmul.mubr.msk.f32.gmra.mrb[34].mxu1 %vm879_vm13, %v1816_v15 }
 0x307   : > { %3537 = vmatprep.mubr.msk.f32.mxu1 %vm4068_vm2, %v4069_v41 }
 0x30a   : > { %3538 = vmatmul.mubr.msk.f32.gmra.mrb[36].mxu1 %vm879_vm13, %v1818_v51 }
 0x30b   : > { %3540 = vmatprep.mubr.msk.f32.mxu1 %vm4068_vm2, %v4069_v41 }
 0x30e   : > { %3541 = vmatmul.mubr.msk.f32.gmra.mrb[38].mxu1 %vm879_vm13, %v1820_v23 }
 0x30f   : > { %3576 = vmatprep.mubr.msk.f32.mxu1 %vm4068_vm2, %v4069_v41 }
 0x395   : > { %v966_v3 = vpop.f32.mrb[0].mxu1 }
 0x396   : > { %v990_v5 = vmul.f32 0.35355338, %v966_v3  ;;  %v3380_v6 = vpop.f32.mrb[1].mxu1 }
 0x398   : > { %v4470_v7 = vsel %vm859_vm3, %v990_v5, -1e+09 }
 0x399   : > { %v971_v8 = vpop.f32.mrb[2].mxu1  ;;  %v1001_v9 = vsel %vm1000_vm4, %v4470_v7, -inf }
 0x39a   : > { %v991_v11 = vmul.f32 0.35355338, %v971_v8  ;;  %1002 = vmax.xlane.f32.xlu1 %v1001_v9  ;;  %v3383_v12 = vpop.f32.mrb[3].mxu1 }
 0x39c   : > { %v4482_v13 = vsel %vm860_vm5, %v991_v11, -1e+09 }
 0x39d   : > { %v976_v16 = vpop.f32.mrb[4].mxu1  ;;  %v1004_v17 = vsel %vm1000_vm4, %v4482_v13, -inf }
 0x39e   : > { %v992_v19 = vmul.f32 0.35355338, %v976_v16  ;;  %1005 = vmax.xlane.f32.xlu0 %v1004_v17  ;;  %v3386_v20 = vpop.f32.mrb[5].mxu1 }
 0x3a0   : > { %v4494_v21 = vsel %vm861_vm6, %v992_v19, -1e+09 }
 0x3a1   : > { %v981_v24 = vpop.f32.mrb[6].mxu1  ;;  %v1007_v25 = vsel %vm1000_vm4, %v4494_v21, -inf }
 0x3a2   : > { %v993_v27 = vmul.f32 0.35355338, %v981_v24  ;;  %1008 = vmax.xlane.f32.xlu0 %v1007_v25  ;;  %v3389_v28 = vpop.f32.mrb[7].mxu1 }
 0x3a4   : > { %v4506_v29 = vsel %vm862_vm7, %v993_v27, -1e+09 }
 0x3a5   : > { %v986_v31 = vpop.f32.mrb[8].mxu1  ;;  %v1010_v32 = vsel %vm1000_vm4, %v4506_v29, -inf }
 0x3a6   : > { %v994_v33 = vmul.f32 0.35355338, %v986_v31  ;;  %1011 = vmax.xlane.f32.xlu0 %v1010_v32  ;;  %v3392_v34 = vpop.f32.mrb[9].mxu1 }
 0x3a8   : > { %v4515_v14 = vsel %vm863_vm8, %v994_v33, -1e+09 }
 0x3a9   : > { %v1285_v35 = vpop.f32.mrb[10].mxu1  ;;  %v1014_v36 = vsel %vm1013_vm9, %v4515_v14, -inf }
 0x3aa   : > { %v1309_v37 = vmul.f32 0.35355338, %v1285_v35  ;;  %1015 = vmax.xlane.f32.xlu1 %v1014_v36  ;;  %v3430_v22 = vpop.f32.mrb[11].mxu1 }
 0x3ac   : > { %v4522_v39 = vsel %vm859_vm3, %v1309_v37, -1e+09 }
 0x3ad   : > { %v1290_v40 = vpop.f32.mrb[12].mxu1  ;;  %v1319_v15 = vsel %vm1000_vm4, %v4522_v39, -inf }
 0x3ae   : > { %v1310_v42 = vmul.f32 0.35355338, %v1290_v40  ;;  %1320 = vmax.xlane.f32.xlu0 %v1319_v15  ;;  %v3433_v43 = vpop.f32.mrb[13].mxu1 }
 0x3b0   : > { %v4529_v23 = vsel %vm860_vm5, %v1310_v42, -1e+09 }
 0x3b1   : > { %v1295_v44 = vpop.f32.mrb[14].mxu1  ;;  %v1322_v30 = vsel %vm1000_vm4, %v4529_v23, -inf }
 0x3b2   : > { %v1311_v45 = vmul.f32 0.35355338, %v1295_v44  ;;  %1323 = vmax.xlane.f32.xlu1 %v1322_v30  ;;  %v3436_v46 = vpop.f32.mrb[15].mxu1 }
 0x3b4   : > { %v4536_v47 = vsel %vm861_vm6, %v1311_v45, -1e+09 }
 0x3b5   : > { %v1300_v48 = vpop.f32.mrb[16].mxu1  ;;  %v1325_v49 = vsel %vm1000_vm4, %v4536_v47, -inf }
 0x3b6   : > { %v1312_v51 = vmul.f32 0.35355338, %v1300_v48  ;;  %1326 = vmax.xlane.f32.xlu0 %v1325_v49  ;;  %v3439_v52 = vpop.f32.mrb[17].mxu1 }
 0x3b8   : > { %v4543_v53 = vsel %vm862_vm7, %v1312_v51, -1e+09 }
 0x3b9   : > { %v1305_v54 = vpop.f32.mrb[18].mxu1  ;;  %v1328_v55 = vsel %vm1000_vm4, %v4543_v53, -inf }
 0x3ba   : > { %v1313_v58 = vmul.f32 0.35355338, %v1305_v54  ;;  %1329 = vmax.xlane.f32.xlu1 %v1328_v55  ;;  %v3442_v59 = vpop.f32.mrb[19].mxu1 }
 0x3bc   : > { %v4550_v61 = vsel %vm863_vm8, %v1313_v58, -1e+09 }
 0x3bd   : > { %v1601_v62 = vpop.f32.mrb[20].mxu1  ;;  %v1331_v63 = vsel %vm1013_vm9, %v4550_v61, -inf }
 0x3be   : > { %v1625_v0 = vmul.f32 0.35355338, %v1601_v62  ;;  %1332 = vmax.xlane.f32.xlu0 %v1331_v63  ;;  %v3480_v3 = vpop.f32.mrb[21].mxu1 }
 0x3c0   : > { %v4557_v5 = vsel %vm859_vm3, %v1625_v0, -1e+09 }
 0x3c1   : > { %v1606_v6 = vpop.f32.mrb[22].mxu1  ;;  %v1635_v8 = vsel %vm1000_vm4, %v4557_v5, -inf }
 0x3c2   : > { %v1626_v9 = vmul.f32 0.35355338, %v1606_v6  ;;  %1636 = vmax.xlane.f32.xlu1 %v1635_v8  ;;  %v3483_v11 = vpop.f32.mrb[23].mxu1  ;;  %v4626_v8 = vpop.permute.xlu1 %3865 }
 0x3c4   : > { %v4564_v12 = vsel %vm860_vm5, %v1626_v9, -1e+09  ;;  %v4628_v9 = vpop.permute.xlu0 %1382 }
 0x3c5   : > { %v1611_v16 = vpop.f32.mrb[24].mxu1  ;;  %v1638_v17 = vsel %vm1000_vm4, %v4564_v12, -inf }
 0x3c6   : > { %v1627_v19 = vmul.f32 0.35355338, %v1611_v16  ;;  %1639 = vmax.xlane.f32.xlu0 %v1638_v17  ;;  %v3486_v20 = vpop.f32.mrb[25].mxu1 }
 0x3c8   : > { %v4571_v24 = vsel %vm861_vm6, %v1627_v19, -1e+09 }
 0x3c9   : > { %v1616_v25 = vpop.f32.mrb[26].mxu1  ;;  %v1641_v27 = vsel %vm1000_vm4, %v4571_v24, -inf }
 0x3ca   : > { %v1628_v28 = vmul.f32 0.35355338, %v1616_v25  ;;  %1642 = vmax.xlane.f32.xlu1 %v1641_v27  ;;  %v3489_v31 = vpop.f32.mrb[27].mxu1 }
 0x3cc   : > { %v4578_v32 = vsel %vm862_vm7, %v1628_v28, -1e+09 }
 0x3cd   : > { %v1621_v33 = vpop.f32.mrb[28].mxu1  ;;  %v1644_v34 = vsel %vm1000_vm4, %v4578_v32, -inf }
 0x3ce   : > { %v1629_v35 = vmul.f32 0.35355338, %v1621_v33  ;;  %1645 = vmax.xlane.f32.xlu0 %v1644_v34  ;;  %v3492_v36 = vpop.f32.mrb[29].mxu1 }
 0x3d0   : > { %v4585_v37 = vsel %vm863_vm8, %v1629_v35, -1e+09 }
 0x3d1   : > { %v1917_v22 = vpop.f32.mrb[30].mxu1  ;;  %v1647_v40 = vsel %vm1013_vm9, %v4585_v37, -inf }
 0x3d2   : > { %v1941_v15 = vmul.f32 0.35355338, %v1917_v22  ;;  %1648 = vmax.xlane.f32.xlu1 %v1647_v40  ;;  %v3530_v42 = vpop.f32.mrb[31].mxu1 }
 0x3d4   : > { %v4592_v43 = vsel %vm859_vm3, %v1941_v15, -1e+09 }
 0x3d5   : > { %v1922_v44 = vpop.f32.mrb[32].mxu1  ;;  %v1951_v30 = vsel %vm1000_vm4, %v4592_v43, -inf }
 0x3d6   : > { %v1942_v45 = vmul.f32 0.35355338, %v1922_v44  ;;  %1952 = vmax.xlane.f32.xlu0 %v1951_v30  ;;  %v3533_v46 = vpop.f32.mrb[33].mxu1 }
 0x3d8   : > { %v4599_v48 = vsel %vm860_vm5, %v1942_v45, -1e+09 }
 0x3d9   : > { %v1927_v49 = vpop.f32.mrb[34].mxu1  ;;  %v1954_v51 = vsel %vm1000_vm4, %v4599_v48, -inf }
 0x3da   : > { %v1943_v52 = vmul.f32 0.35355338, %v1927_v49  ;;  %1955 = vmax.xlane.f32.xlu1 %v1954_v51  ;;  %v3536_v1 = vpop.f32.mrb[35].mxu1 }
 0x3dc   : > { %v4606_v54 = vsel %vm861_vm6, %v1943_v52, -1e+09 }
 0x3dd   : > { %v1932_v55 = vpop.f32.mrb[36].mxu1  ;;  %v1957_v58 = vsel %vm1000_vm4, %v4606_v54, -inf }
 0x3de   : > { %v1944_v59 = vmul.f32 0.35355338, %v1932_v55  ;;  %1958 = vmax.xlane.f32.xlu0 %v1957_v58  ;;  %v3539_v4 = vpop.f32.mrb[37].mxu1 }
 0x3e0   : > { %v4613_v62 = vsel %vm862_vm7, %v1944_v59, -1e+09 }
 0x3e1   : > { %v1937_v63 = vpop.f32.mrb[38].mxu1  ;;  %v1960_v18 = vsel %vm1000_vm4, %v4613_v62, -inf }
 0x3e2   : > { %v1945_v0 = vmul.f32 0.35355338, %v1937_v63  ;;  %v3542_v3 = vpop.f32.mrb[39].mxu1 }
 0x3e4   : > { %v4618_v10 = vsel %vm863_vm8, %v1945_v0, -1e+09 }
 0x3e5   : > { %v1963_v6 = vsel %vm1013_vm9, %v4618_v10, -inf }
 0x3e6   : > { %1964 = vmax.xlane.f32.xlu0 %v1963_v6 }
 0x3eb   : > { %3875 = vrot.lane.b32.xlu1 %v4292_v50, %s4079_s28 }
 0x40f   : > { %1961 = vmax.xlane.f32.xlu1 %v1960_v18 }
 0x427   : > { %v1003_v11 = vpop.xlane.xlu1 %1002 }
 0x428   : > { %v1017_v2 = vsub.f32 %v4470_v7, %v1003_v11 }
 0x42a   : > { %v1022_v26 = vmul.f32 1.442695, %v1017_v2 }
 0x42b   : > { %v1006_v16 = vpop.xlane.xlu0 %1005 }
 0x42c   : > { %3914 = vpow2.f32 %v1022_v26  ;;  %v1018_v17 = vsub.f32 %v4482_v13, %v1006_v16 }
 0x42e   : > { %v1024_v19 = vmul.f32 1.442695, %v1018_v17 }
 0x42f   : > { %v1009_v20 = vpop.xlane.xlu0 %1008 }
 0x430   : > { %3916 = vpow2.f32 %v1024_v19  ;;  %v1019_v25 = vsub.f32 %v4494_v21, %v1009_v20 }
 0x432   : > { %v1026_v27 = vmul.f32 1.442695, %v1019_v25 }
 0x433   : > { %v1012_v31 = vpop.xlane.xlu0 %1011 }
 0x434   : > { %3918 = vpow2.f32 %v1026_v27  ;;  %v1020_v17 = vsub.f32 %v4506_v29, %v1012_v31 }
 0x436   : > { %v4633_v28 = vpop.eup %3914  ;;  %v1028_v27 = vmul.f32 1.442695, %v1020_v17 }
 0x437   : > { %v1016_v33 = vpop.xlane.xlu1 %1015  ;;  %v1032_v34 = vsel %vm1000_vm4, %v4633_v28, 0.0 }
 0x438   : > { %v1021_v7 = vsub.f32 %v4515_v14, %v1016_v33  ;;  %1033 = vadd.xlane.f32.xlu1 %v1032_v34 }
 0x43a   : > { %v4638_v35 = vpop.eup %3916  ;;  %v1030_v13 = vmul.f32 1.442695, %v1021_v7 }
 0x43b   : > { %v1321_v36 = vpop.xlane.xlu0 %1320  ;;  %v1035_v22 = vsel %vm1000_vm4, %v4638_v35, 0.0 }
 0x43c   : > { %3920 = vpow2.f32 %v1030_v13  ;;  %v1334_v21 = vsub.f32 %v4522_v39, %v1321_v36  ;;  %1036 = vadd.xlane.f32.xlu0 %v1035_v22 }
 0x43e   : > { %v4643_v40 = vpop.eup %3918  ;;  %v1339_v15 = vmul.f32 1.442695, %v1334_v21 }
 0x43f   : > { %v1038_v42 = vsel %vm1000_vm4, %v4643_v40, 0.0  ;;  %v1324_v14 = vpop.xlane.xlu1 %1323 }
 0x440   : > { %3922 = vpow2.f32 %v1339_v15  ;;  %1039 = vadd.xlane.f32.xlu1 %v1038_v42  ;;  %v1335_v33 = vsub.f32 %v4529_v23, %v1324_v14 }
 0x442   : > { %v1341_v29 = vmul.f32 1.442695, %v1335_v33 }
 0x443   : > { %v1327_v44 = vpop.xlane.xlu0 %1326 }
 0x444   : > { %v1336_v30 = vsub.f32 %v4536_v47, %v1327_v44 }
 0x446   : > { %v4648_v45 = vpop.eup %3920  ;;  %v1343_v46 = vmul.f32 1.442695, %v1336_v30 }
 0x447   : > { %v1330_v49 = vpop.xlane.xlu1 %1329  ;;  %v1044_v39 = vsel %vm1013_vm9, %v4648_v45, 0.0 }
 0x448   : > { %3924 = vpow2.f32 %v1343_v46  ;;  %v1337_v51 = vsub.f32 %v4543_v53, %v1330_v49  ;;  %1045 = vadd.xlane.f32.xlu1 %v1044_v39 }
 0x44a   : > { %v4653_v52 = vpop.eup %3922  ;;  %v1345_v1 = vmul.f32 1.442695, %v1337_v51 }
 0x44b   : > { %v1333_v55 = vpop.xlane.xlu0 %1332  ;;  %v1349_v58 = vsel %vm1000_vm4, %v4653_v52, 0.0 }
 0x44c   : > { %3926 = vpow2.f32 %v1345_v1  ;;  %v1338_v47 = vsub.f32 %v4550_v61, %v1333_v55  ;;  %1350 = vadd.xlane.f32.xlu1 %v1349_v58 }
 0x44e   : > { %v1347_v59 = vmul.f32 1.442695, %v1338_v47 }
 0x44f   : > { %v1637_v53 = vpop.xlane.xlu1 %1636 }
 0x450   : > { %3928 = vpow2.f32 %v1347_v59  ;;  %v1650_v31 = vsub.f32 %v4557_v5, %v1637_v53 }
 0x452   : > { %v4658_v4 = vpop.eup %3924  ;;  %3880 = vrot.lane.b32.xlu0 %v4301_v57, %s4079_s28  ;;  %v1655_v23 = vmul.f32 1.442695, %v1650_v31 }
 0x453   : > { %v1640_v63 = vpop.xlane.xlu0 %1639  ;;  %v1355_v0 = vsel %vm1000_vm4, %v4658_v4, 0.0 }
 0x454   : > { %v1651_v3 = vsub.f32 %v4564_v12, %v1640_v63  ;;  %1356 = vadd.xlane.f32.xlu1 %v1355_v0 }
 0x456   : > { %v4665_v6 = vpop.eup %3926  ;;  %v1657_v18 = vmul.f32 1.442695, %v1651_v3 }
 0x457   : > { %v1643_v61 = vpop.xlane.xlu1 %1642  ;;  %v1358_v11 = vsel %vm1000_vm4, %v4665_v6, 0.0 }
 0x458   : > { %3930 = vpow2.f32 %v1657_v18  ;;  %v1652_v2 = vsub.f32 %v4571_v24, %v1643_v61  ;;  %1359 = vadd.xlane.f32.xlu1 %v1358_v11 }
 0x45a   : > { %v4670_v26 = vpop.eup %3928  ;;  %v1659_v16 = vmul.f32 1.442695, %v1652_v2 }
 0x45b   : > { %v1646_v19 = vpop.xlane.xlu0 %1645  ;;  %v1361_v12 = vsel %vm1013_vm9, %v4670_v26, 0.0 }
 0x45c   : > { %3932 = vpow2.f32 %v1659_v16  ;;  %v1653_v20 = vsub.f32 %v4578_v32, %v1646_v19  ;;  %1362 = vadd.xlane.f32.xlu1 %v1361_v12 }
 0x45e   : > { %v1661_v25 = vmul.f32 1.442695, %v1653_v20 }
 0x45f   : > { %v1649_v34 = vpop.xlane.xlu1 %1648 }
 0x460   : > { %3934 = vpow2.f32 %v1661_v25  ;;  %v1654_v24 = vsub.f32 %v4585_v37, %v1649_v34 }
 0x461   : > { %3936 = vpow2.f32 %v1028_v27 }
 0x462   : > { %v4678_v7 = vpop.eup %3930  ;;  %v1663_v13 = vmul.f32 1.442695, %v1654_v24  ;;  %v3868_v24 = vunpack.i.h.bf16 %v4626_v8 }
 0x463   : > { %v1668_v36 = vsel %vm1000_vm4, %v4678_v7, 0.0  ;;  %v1953_v32 = vpop.xlane.xlu0 %1952 }
 0x464   : > { %3938 = vpow2.f32 %v1663_v13  ;;  %1669 = vadd.xlane.f32.xlu1 %v1668_v36  ;;  %v1966_v21 = vsub.f32 %v4592_v43, %v1953_v32  ;;  %v3867_v13 = vunpack.i.l.bf16 %v4626_v8  ;;  %v3873_v36 = vunpack.i.h.bf16 %v4416_v56 }
 0x465   : > { %3940 = vpow2.f32 %v1341_v29 }
 0x466   : > { %v4683_v22 = vpop.eup %3932  ;;  %3942 = vpow2.f32 %v1655_v23  ;;  %v1971_v44 = vmul.f32 1.442695, %v1966_v21 }
 0x467   : > { %v1956_v37 = vpop.xlane.xlu1 %1955  ;;  %v1671_v15 = vsel %vm1000_vm4, %v4683_v22, 0.0 }
 0x468   : > { %v1967_v42 = vsub.f32 %v4599_v48, %v1956_v37  ;;  %1672 = vadd.xlane.f32.xlu1 %v1671_v15 }
 0x46a   : > { %v4689_v5 = vpop.eup %3934  ;;  %v1973_v14 = vmul.f32 1.442695, %v1967_v42 }
 0x46b   : > { %v1959_v30 = vpop.xlane.xlu0 %1958  ;;  %v1674_v46 = vsel %vm1000_vm4, %v4689_v5, 0.0  ;;  %v4694_v43 = vpop.eup %3936 }
 0x46c   : > { %3944 = vpow2.f32 %v1973_v14  ;;  %v1968_v49 = vsub.f32 %v4606_v54, %v1959_v30  ;;  %1675 = vadd.xlane.f32.xlu1 %v1674_v46  ;;  %v1041_v1 = vsel %vm1000_vm4, %v4694_v43, 0.0  ;;  %v4724_v61 = vpop.permute.xlu1 %3875 }
 0x46d   : > { %3946 = vpow2.f32 %v1971_v44 }
 0x46e   : > { %v4696_v39 = vpop.eup %3938  ;;  %v1975_v51 = vmul.f32 1.442695, %v1968_v49  ;;  %v3878_v49 = vunpack.i.h.bf16 %v4724_v61 }
 0x46f   : > { %v1677_v48 = vsel %vm1013_vm9, %v4696_v39, 0.0  ;;  %v4702_v55 = vpop.eup %3940 }
 0x470   : > { %3948 = vpow2.f32 %v1975_v51  ;;  %1678 = vadd.xlane.f32.xlu1 %v1677_v48  ;;  %v1352_v54 = vsel %vm1000_vm4, %v4702_v55, 0.0  ;;  %v4706_v58 = vpop.eup %3942  ;;  %v3877_v51 = vunpack.i.l.bf16 %v4724_v61 }
 0x471   : > { %1042 = vadd.xlane.f32.xlu0 %v1041_v1  ;;  %v1665_v53 = vsel %vm1000_vm4, %v4706_v58, 0.0 }
 0x473   : > { %v1965_v11 = vpop.xlane.xlu0 %1964 }
 0x474   : > { %v1970_v2 = vsub.f32 %v4618_v10, %v1965_v11 }
 0x475   : > { %1353 = vadd.xlane.f32.xlu0 %v1352_v54 }
 0x476   : > { %v4708_v47 = vpop.eup %3944  ;;  %v1979_v12 = vmul.f32 1.442695, %v1970_v2 }
 0x477   : > { %v1984_v59 = vsel %vm1000_vm4, %v4708_v47, 0.0  ;;  %v4714_v63 = vpop.eup %3946 }
 0x478   : > { %1985 = vadd.xlane.f32.xlu1 %v1984_v59  ;;  %v1981_v18 = vsel %vm1000_vm4, %v4714_v63, 0.0  ;;  %v3727_v59 = vpack.c.bf16 %v3878_v49, %v3877_v51 }
 0x479   : > { %1666 = vadd.xlane.f32.xlu0 %v1665_v53 }
 0x47a   : > { %v4716_v0 = vpop.eup %3948 }
 0x47b   : > { %v1987_v3 = vsel %vm1000_vm4, %v4716_v0, 0.0 }
 0x47c   : > { %1988 = vadd.xlane.f32.xlu1 %v1987_v3 }
 0x47d   : > { %1982 = vadd.xlane.f32.xlu0 %v1981_v18 }
 0x493   : > { %1698 = vrot.lane.b32.xlu0 %v4305_v60, %s4079_s28 }
 0x49c   : > { %v1962_v16 = vpop.xlane.xlu1 %1961 }
 0x49d   : > { %v1969_v17 = vsub.f32 %v4613_v62, %v1962_v16 }
 0x49f   : > { %v1977_v19 = vmul.f32 1.442695, %v1969_v17 }
 0x4a1   : > { %3950 = vpow2.f32 %v1977_v19 }
 0x4a2   : > { %3952 = vpow2.f32 %v1979_v12 }
 0x4ab   : > { %v4728_v20 = vpop.eup %3950 }
 0x4ac   : > { %v1990_v25 = vsel %vm1000_vm4, %v4728_v20, 0.0  ;;  %v4732_v27 = vpop.eup %3952 }
 0x4ad   : > { %1991 = vadd.xlane.f32.xlu1 %v1990_v25  ;;  %v1993_v33 = vsel %vm1013_vm9, %v4732_v27, 0.0 }
 0x4b2   : > { %1994 = vadd.xlane.f32.xlu0 %v1993_v33 }
 0x4be   : > { %3885 = vrot.lane.b32.xlu1 %v4292_v50, %s4080_s29  ;;  %v3872_v50 = vunpack.i.l.bf16 %v4416_v56 }
 0x4c0   : > { %v3716_v8 = vpack.c.bf16 %v3873_v36, %v3872_v50 }
 0x4c2   : > { %3890 = vrot.lane.b32.xlu1 %v4301_v57, %s4080_s29  ;;  %v3713_v57 = vpack.c.bf16 %v3868_v24, %v3867_v13 }
 0x4c5   : > { %v1034_v62 = vpop.xlane.xlu1 %1033 }
 0x4c6   : > { %3954 = vrcp.f32 %v1034_v62  ;;  %2014 = vrot.lane.b32.xlu1 %v4305_v60, %s4080_s29  ;;  %s4082_s29 = smov 16  }
 0x4c9   : > { %v1037_v10 = vpop.xlane.xlu0 %1036 }
 0x4ca   : > { %3956 = vrcp.f32 %v1037_v10 }
 0x4cd   : > { %v1040_v34 = vpop.xlane.xlu1 %1039 }
 0x4ce   : > { %3958 = vrcp.f32 %v1040_v34 }
 0x4d0   : > { %v3955_v29 = vpop.eup %3954 }
 0x4d1   : > { %v1052_v31 = vmul.f32 %v3955_v29, %v4633_v28 }
 0x4d3   : > { %3404 = vmatmul.mubr.msk.f32.vlgmr.msra.gmra.mrb[10].mxu0 %vm1000_vm4, %v1052_v31 }
 0x4d4   : > { %v3957_v32 = vpop.eup %3956  ;;  %3714 = vmatpush3.bf16.msra.mxu0 %v3713_v57  ;;  %3406 = vmatprep.mubr.msk.f32.mxu0 %vm4068_vm2, %v4069_v41 }
 0x4d5   : > { %3715 = vmatprep.subr.bf16.mxu0 %v4067_v38  ;;  %v1053_v60 = vmul.f32 %v3957_v32, %v4638_v35  ;;  %v3881_v35 = vpop.permute.xlu0 %3880  ;;  %v1046_v23 = vpop.xlane.xlu1 %1045 }
 0x4d6   : > { %v3883_v53 = vunpack.i.h.bf16 %v3881_v35  ;;  %v3882_v3 = vunpack.i.l.bf16 %v3881_v35 }
 0x4d7   : > { %3407 = vmatmul.mubr.msk.f32.gmra.mrb[12].mxu0 %vm1000_vm4, %v1053_v60 }
 0x4d8   : > { %v3959_v28 = vpop.eup %3958  ;;  %3717 = vmatpush3.bf16.msra.mxu0 %v3716_v8  ;;  %3409 = vmatprep.mubr.msk.f32.mxu0 %vm4068_vm2, %v4069_v41  ;;  %v3730_v2 = vpack.c.bf16 %v3883_v53, %v3882_v3 }
 0x4d9   : > { %3451 = vmatprep.subr.mxu0 %v4069_v41  ;;  %v1054_v56 = vmul.f32 %v3959_v28, %v4643_v40  ;;  %v1351_v37 = vpop.xlane.xlu1 %1350 }
 0x4db   : > { %3410 = vmatmul.mubr.msk.f32.gmra.mrb[14].mxu0 %vm1000_vm4, %v1054_v56 }
 0x4dc   : > { %3452 = vmatpush3.msk.msra.mxu0 %vm1086_vm15, %v4628_v9  ;;  %3412 = vmatprep.mubr.msk.f32.mxu0 %vm4068_vm2, %v4069_v41 }
 0x4dd   : > { %3726 = vmatprep.subr.bf16.mxu0 %v4067_v38 }
 0x4e1   : > { %v1357_v15 = vpop.xlane.xlu1 %1356 }
 0x4e5   : > { %v1360_v14 = vpop.xlane.xlu1 %1359 }
 0x4e9   : > { %v1363_v48 = vpop.xlane.xlu1 %1362 }
 0x4fe   : > { %v1043_v21 = vpop.xlane.xlu0 %1042 }
 0x4ff   : > { %3960 = vrcp.f32 %v1043_v21 }
 0x500   : > { %3962 = vrcp.f32 %v1046_v23 }
 0x501   : > { %3964 = vrcp.f32 %v1351_v37 }
 0x502   : > { %v1354_v42 = vpop.xlane.xlu0 %1353 }
 0x503   : > { %3966 = vrcp.f32 %v1354_v42 }
 0x504   : > { %3968 = vrcp.f32 %v1357_v15 }
 0x505   : > { %3970 = vrcp.f32 %v1360_v14 }
 0x506   : > { %v1667_v1 = vpop.xlane.xlu0 %1666  ;;  %3972 = vrcp.f32 %v1363_v48 }
 0x507   : > { %3974 = vrcp.f32 %v1667_v1 }
 0x509   : > { %v3961_v40 = vpop.eup %3960 }
 0x50a   : > { %v1055_v44 = vmul.f32 %v3961_v40, %v4694_v43  ;;  %v3963_v9 = vpop.eup %3962  ;;  %v1983_v18 = vpop.xlane.xlu0 %1982 }
 0x50b   : > { %v1056_v30 = vmul.f32 %v3963_v9, %v4648_v45  ;;  %v3965_v46 = vpop.eup %3964  ;;  %v1670_v45 = vpop.xlane.xlu1 %1669 }
 0x50c   : > { %3413 = vmatmul.mubr.msk.f32.gmra.mrb[16].mxu0 %vm1000_vm4, %v1055_v44  ;;  %v1369_v43 = vmul.f32 %v3965_v46, %v4653_v52  ;;  %3976 = vrcp.f32 %v1670_v45 }
 0x50d   : > { %3415 = vmatprep.mubr.msk.f32.mxu0 %vm4068_vm2, %v4069_v41  ;;  %v3967_v54 = vpop.eup %3966 }
 0x50e   : > { %v1370_v61 = vmul.f32 %v3967_v54, %v4702_v55  ;;  %v3969_v11 = vpop.eup %3968  ;;  %v1699_v19 = vpop.permute.xlu0 %1698 }
 0x50f   : > { %v1673_v52 = vpop.xlane.xlu1 %1672  ;;  %v1371_v16 = vmul.f32 %v3969_v11, %v4658_v4  ;;  %v3971_v17 = vpop.eup %3970 }
 0x510   : > { %3416 = vmatmul.mubr.msk.f32.gmra.mrb[18].mxu0 %vm1000_vm4, %v1056_v30  ;;  %v1372_v55 = vmul.f32 %v3971_v17, %v4665_v6  ;;  %v3973_v12 = vpop.eup %3972  ;;  %3978 = vrcp.f32 %v1673_v52  ;;  %v2204_v52 = vld [vmem:[%s5174_s5] sm:$0xff]  ;;  %v2206_v17 = vld [vmem:[%s5174_s5 + $0x10] sm:$0xff] }
 0x511   : > { %3453 = vmatprep.mubr.msk.f32.mxu0 %vm4068_vm2, %v4069_v41  ;;  %v1373_v4 = vmul.f32 %v3973_v12, %v4670_v26  ;;  %v3975_v33 = vpop.eup %3974  ;;  %v2207_v12 = vld [vmem:[%s5174_s5 + $0x18] sm:$0xff] }
 0x512   : > { %v1685_v62 = vmul.f32 %v3975_v33, %v4706_v58 }
 0x513   : > { %v1676_v25 = vpop.xlane.xlu1 %1675 }
 0x514   : > { %3454 = vmatmul.mubr.msk.f32.vlgmr.msra.gmra.mrb[20].mxu0 %vm1000_vm4, %v1369_v43  ;;  %3980 = vrcp.f32 %v1676_v25 }
 0x515   : > { %3728 = vmatpush3.bf16.msra.mxu0 %v3727_v59  ;;  %3456 = vmatprep.mubr.msk.f32.mxu0 %vm4068_vm2, %v4069_v41 }
 0x516   : > { %3729 = vmatprep.subr.bf16.mxu0 %v4067_v38  ;;  %v3977_v10 = vpop.eup %3976 }
 0x517   : > { %v1679_v6 = vpop.xlane.xlu1 %1678  ;;  %v1686_v34 = vmul.f32 %v3977_v10, %v4678_v7 }
 0x518   : > { %3457 = vmatmul.mubr.msk.f32.gmra.mrb[22].mxu0 %vm1000_vm4, %v1370_v61  ;;  %3982 = vrcp.f32 %v1679_v6 }
 0x519   : > { %3731 = vmatpush3.bf16.msra.mxu0 %v3730_v2  ;;  %3459 = vmatprep.mubr.msk.f32.mxu0 %vm4068_vm2, %v4069_v41  ;;  %3984 = vrcp.f32 %v1983_v18 }
 0x51a   : > { %3501 = vmatprep.subr.mxu0 %v4069_v41  ;;  %v3979_v26 = vpop.eup %3978 }
 0x51b   : > { %v1687_v24 = vmul.f32 %v3979_v26, %v4683_v22  ;;  %v1986_v29 = vpop.xlane.xlu1 %1985 }
 0x51c   : > { %3460 = vmatmul.mubr.msk.f32.gmra.mrb[24].mxu0 %vm1000_vm4, %v1371_v16  ;;  %3986 = vrcp.f32 %v1986_v29  ;;  %v2205_v16 = vld [vmem:[%s5174_s5 + $0x8] sm:$0xff] }
 0x51d   : > { %3502 = vmatpush3.msk.msra.mxu0 %vm1086_vm15, %v1699_v19  ;;  %3462 = vmatprep.mubr.msk.f32.mxu0 %vm4068_vm2, %v4069_v41 }
 0x51e   : > { %3740 = vmatprep.subr.bf16.mxu0 %v4067_v38  ;;  %v3981_v13 = vpop.eup %3980 }
 0x51f   : > { %v1688_v58 = vmul.f32 %v3981_v13, %v4689_v5  ;;  %v1989_v7 = vpop.xlane.xlu1 %1988 }
 0x520   : > { %3463 = vmatmul.mubr.msk.f32.gmra.mrb[26].mxu0 %vm1000_vm4, %v1372_v55  ;;  %3988 = vrcp.f32 %v1989_v7  ;;  %v3747_v55 = vpack.c.bf16 %v2205_v16, %v2204_v52 }
 0x521   : > { %3465 = vmatprep.mubr.msk.f32.mxu0 %vm4068_vm2, %v4069_v41 }
 0x522   : > { %v3983_v31 = vpop.eup %3982  ;;  %3748 = vmatpush3.bf16.msra.mxu1 %v3747_v55  ;;  %v4055_v55 = vld [vmem:[%s4200_s2 + $0x8] sm:$0xff] }
 0x523   : > { %v1689_v36 = vmul.f32 %v3983_v31, %v4696_v39  ;;  %v3985_v56 = vpop.eup %3984  ;;  %3749 = vmatprep.subr.bf16.mxu1 %v4067_v38 }
 0x524   : > { %3466 = vmatmul.mubr.msk.f32.gmra.mrb[28].mxu0 %vm1000_vm4, %v1373_v4  ;;  %v2001_v35 = vmul.f32 %v3985_v56, %v4714_v63  ;;  %v3750_v4 = vpack.c.bf16 %v2207_v12, %v2206_v17 }
 0x525   : > { %3503 = vmatprep.mubr.msk.f32.mxu0 %vm4068_vm2, %v4069_v41 }
 0x526   : > { %v3987_v37 = vpop.eup %3986  ;;  %3751 = vmatpush3.bf16.msra.mxu1 %v3750_v4 }
 0x527   : > { %v2002_v15 = vmul.f32 %v3987_v37, %v4708_v47  ;;  %3758 = vmatprep.subr.bf16.mxu1 %v4067_v38 }
 0x528   : > { %3504 = vmatmul.mubr.msk.f32.vlgmr.msra.gmra.mrb[30].mxu0 %vm1000_vm4, %v1685_v62 }
 0x529   : > { %3506 = vmatprep.mubr.msk.f32.mxu0 %vm4068_vm2, %v4069_v41 }
 0x52a   : > { %v3989_v42 = vpop.eup %3988 }
 0x52b   : > { %v2003_v63 = vmul.f32 %v3989_v42, %v4716_v0 }
 0x52c   : > { %3507 = vmatmul.mubr.msk.f32.gmra.mrb[32].mxu0 %vm1000_vm4, %v1686_v34 }
 0x52d   : > { %3509 = vmatprep.mubr.msk.f32.mxu0 %vm4068_vm2, %v4069_v41 }
 0x530   : > { %3510 = vmatmul.mubr.msk.f32.gmra.mrb[34].mxu0 %vm1000_vm4, %v1687_v24 }
 0x531   : > { %3512 = vmatprep.mubr.msk.f32.mxu0 %vm4068_vm2, %v4069_v41 }
 0x534   : > { %3513 = vmatmul.mubr.msk.f32.gmra.mrb[36].mxu0 %vm1000_vm4, %v1688_v58 }
 0x535   : > { %3515 = vmatprep.mubr.msk.f32.mxu0 %vm4068_vm2, %v4069_v41 }
 0x538   : > { %3516 = vmatmul.mubr.msk.f32.gmra.mrb[38].mxu0 %vm1000_vm4, %v1689_v36 }
 0x539   : > { %3553 = vmatprep.mubr.msk.f32.mxu0 %vm4068_vm2, %v4069_v41 }
 0x53a   : > { %v1992_v22 = vpop.xlane.xlu1 %1991 }
 0x53b   : > { %3990 = vrcp.f32 %v1992_v22 }
 0x53e   : > { %v3886_v50 = vpop.permute.xlu1 %3885 }
 0x53f   : > { %v3888_v57 = vunpack.i.h.bf16 %v3886_v50  ;;  %v3887_v32 = vunpack.i.l.bf16 %v3886_v50  ;;  %v1995_v23 = vpop.xlane.xlu0 %1994 }
 0x540   : > { %3992 = vrcp.f32 %v1995_v23 }
 0x541   : > { %v3741_v5 = vpack.c.bf16 %v3888_v57, %v3887_v32 }
 0x542   : > { %v3891_v60 = vpop.permute.xlu1 %3890 }
 0x543   : > { %v3893_v8 = vunpack.i.h.bf16 %v3891_v60  ;;  %v3892_v28 = vunpack.i.l.bf16 %v3891_v60  ;;  %3742 = vmatpush3.bf16.msra.mxu0 %v3741_v5 }
 0x544   : > { %3743 = vmatprep.subr.bf16.mxu0 %v4067_v38 }
 0x545   : > { %v3744_v39 = vpack.c.bf16 %v3893_v8, %v3892_v28  ;;  %v3991_v40 = vpop.eup %3990 }
 0x546   : > { %v2015_v21 = vpop.permute.xlu1 %2014  ;;  %v2004_v14 = vmul.f32 %v3991_v40, %v4728_v20 }
 0x547   : > { %3745 = vmatpush3.bf16.msra.mxu0 %v3744_v39 }
 0x548   : > { %3551 = vmatprep.subr.mxu0 %v4069_v41 }
 0x54a   : > { %v3993_v44 = vpop.eup %3992 }
 0x54b   : > { %3552 = vmatpush3.msk.msra.mxu0 %vm1086_vm15, %v2015_v21  ;;  %v2005_v47 = vmul.f32 %v3993_v44, %v4732_v27 }
 0x54c   : > { %3554 = vmatmul.mubr.msk.f32.vlgmr.msra.gmra.mrb[40].mxu0 %vm1000_vm4, %v2001_v35  ;;  %3752 = vmatprep.subr.bf16.mxu0 %v4067_v38 }
 0x54d   : > { %3556 = vmatprep.mubr.msk.f32.mxu0 %vm4068_vm2, %v4069_v41 }
 0x550   : > { %3557 = vmatmul.mubr.msk.f32.gmra.mrb[42].mxu0 %vm1000_vm4, %v2002_v15 }
 0x551   : > { %3559 = vmatprep.mubr.msk.f32.mxu0 %vm4068_vm2, %v4069_v41 }
 0x554   : > { %3560 = vmatmul.mubr.msk.f32.gmra.mrb[44].mxu0 %vm1000_vm4, %v2003_v63 }
 0x555   : > { %3562 = vmatprep.mubr.msk.f32.mxu0 %vm4068_vm2, %v4069_v41 }
 0x558   : > { %3563 = vmatmul.mubr.msk.f32.gmra.mrb[46].mxu0 %vm1000_vm4, %v2004_v14 }
 0x559   : > { %3565 = vmatprep.mubr.msk.f32.mxu0 %vm4068_vm2, %v4069_v41 }
 0x55c   : > { %3566 = vmatmul.mubr.msk.f32.gmra.mrb[48].mxu0 %vm1000_vm4, %v2005_v47 }
 0x55d   : > { %3599 = vmatprep.mubr.msk.f32.mxu0 %vm4068_vm2, %v4069_v41 }
 0x5a6   : > { %v4838_v0 = vpop.f32.mrb[10].mxu0 }
 0x5a7   : > { %v3405_v9 = vpop.f32.mrb[11].mxu0 }
 0x5aa   : > { %v4840_v30 = vpop.f32.mrb[12].mxu0 }
 0x5ab   : > { %v3408_v46 = vpop.f32.mrb[13].mxu0 }
 0x5ae   : > { %v4842_v20 = vpop.f32.mrb[14].mxu0 }
 0x5af   : > { %v3411_v49 = vpop.f32.mrb[15].mxu0 }
 0x5df   : > { %v4844_v51 = vpop.f32.mrb[16].mxu0 }
 0x5e0   : > { %v3414_v48 = vpop.f32.mrb[17].mxu0 }
 0x5e3   : > { %v4846_v1 = vpop.f32.mrb[18].mxu0 }
 0x5e4   : > { %v3417_v27 = vpop.f32.mrb[19].mxu0 }
 0x5e7   : > { %v1471_v43 = vpop.f32.mrb[20].mxu0 }
 0x5e8   : > { %2132 = vrot.lane.b32.xlu1 %v1471_v43, %s4081_s21  ;;  %v3455_v54 = vpop.f32.mrb[21].mxu0 }
 0x5eb   : > { %v1476_v59 = vpop.f32.mrb[22].mxu0 }
 0x5ec   : > { %2134 = vrot.lane.b32.xlu1 %v1476_v59, %s4081_s21  ;;  %v3458_v53 = vpop.f32.mrb[23].mxu0 }
 0x5ef   : > { %v1481_v3 = vpop.f32.mrb[24].mxu0 }
 0x5f0   : > { %2136 = vrot.lane.b32.xlu1 %v1481_v3, %s4081_s21  ;;  %v3461_v45 = vpop.f32.mrb[25].mxu0 }
 0x5f1   : > { %v3181_v45 = vld [vmem:[%s5175_s6] ss:$0 sm:$0xff] }
 0x5f3   : > { %v1486_v18 = vpop.f32.mrb[26].mxu0 }
 0x5f4   : > { %v3464_v61 = vpop.f32.mrb[27].mxu0 }
 0x5f7   : > { %v1491_v11 = vpop.f32.mrb[28].mxu0 }
 0x5f8   : > { %v3467_v2 = vpop.f32.mrb[29].mxu0 }
 0x5fb   : > { %v1787_v19 = vpop.f32.mrb[30].mxu0 }
 0x5fc   : > { %2152 = vrot.lane.b32.xlu0 %v1787_v19, %s4082_s29  ;;  %v3505_v25 = vpop.f32.mrb[31].mxu0 }
 0x5ff   : > { %v1792_v33 = vpop.f32.mrb[32].mxu0 }
 0x600   : > { %2154 = vrot.lane.b32.xlu1 %v1792_v33, %s4082_s29  ;;  %v3508_v6 = vpop.f32.mrb[33].mxu0 }
 0x603   : > { %v1797_v62 = vpop.f32.mrb[34].mxu0 }
 0x604   : > { %2156 = vrot.lane.b32.xlu1 %v1797_v62, %s4082_s29  ;;  %v3511_v10 = vpop.f32.mrb[35].mxu0  ;;  %v4056_v62 = vld [vmem:[%s4200_s2 + $0x10] sm:$0xff] }
 0x607   : > { %v1802_v34 = vpop.f32.mrb[36].mxu0 }
 0x608   : > { %2158 = vrot.lane.b32.xlu0 %v1802_v34, %s4082_s29  ;;  %v3514_v26 = vpop.f32.mrb[37].mxu0 }
 0x60b   : > { %v1807_v24 = vpop.f32.mrb[38].mxu0 }
 0x60c   : > { %v3517_v13 = vpop.f32.mrb[39].mxu0 }
 0x61f   : > { %v2103_v29 = vpop.f32.mrb[40].mxu0 }
 0x620   : > { %2172 = vrot.lane.b32.xlu1 %v2103_v29, %s4083_s1  ;;  %v3555_v58 = vpop.f32.mrb[41].mxu0  ;;  %v4057_v29 = vld [vmem:[%s4200_s2 + $0x18] sm:$0xff] }
 0x623   : > { %v2108_v31 = vpop.f32.mrb[42].mxu0 }
 0x624   : > { %2174 = vrot.lane.b32.xlu1 %v2108_v31, %s4083_s1  ;;  %v3558_v7 = vpop.f32.mrb[43].mxu0 }
 0x627   : > { %v2113_v36 = vpop.f32.mrb[44].mxu0 }
 0x628   : > { %2138 = vrot.lane.b32.xlu1 %v1486_v18, %s4081_s21  ;;  %2176 = vrot.lane.b32.xlu0 %v2113_v36, %s4083_s1  ;;  %v3561_v22 = vpop.f32.mrb[45].mxu0 }
 0x62b   : > { %v2118_v50 = vpop.f32.mrb[46].mxu0 }
 0x62c   : > { %2140 = vrot.lane.b32.xlu0 %v1491_v11, %s4081_s21  ;;  %2178 = vrot.lane.b32.xlu1 %v2118_v50, %s4083_s1  ;;  %v3564_v57 = vpop.f32.mrb[47].mxu0  ;;  %v4054_v11 = vld [vmem:[%s4200_s2] sm:$0xff] }
 0x62d   : > { %v4058_v50 = vld [vmem:[%s4200_s2 + $0x20] sm:$0x1] }
 0x62f   : > { %v2123_v32 = vpop.f32.mrb[48].mxu0 }
 0x630   : > { %2160 = vrot.lane.b32.xlu1 %v1807_v24, %s4082_s29  ;;  %2180 = vrot.lane.b32.xlu0 %v2123_v32, %s4083_s1  ;;  %v3567_v5 = vpop.f32.mrb[49].mxu0 }
 0x65a   : > { %v2133_v60 = vpop.permute.xlu1 %2132 }
 0x65b   : > { %v2187_v23 = vsel %vm879_vm13, %v4838_v0, %v2133_v60 }
 0x65e   : > { %v2135_v8 = vpop.permute.xlu1 %2134 }
 0x65f   : > { %v2188_v42 = vsel %vm879_vm13, %v4840_v30, %v2135_v8 }
 0x662   : > { %v2137_v28 = vpop.permute.xlu1 %2136 }
 0x663   : > { %v2189_v47 = vsel %vm879_vm13, %v4842_v20, %v2137_v28 }
 0x66e   : > { %v2153_v35 = vpop.permute.xlu0 %2152 }
 0x66f   : > { %v2193_v21 = vsel %vm2192_vm10, %v2187_v23, %v2153_v35 }
 0x672   : > { %v2155_v39 = vpop.permute.xlu1 %2154 }
 0x673   : > { %v2194_v63 = vsel %vm2192_vm10, %v2188_v42, %v2155_v39 }
 0x676   : > { %v2157_v56 = vpop.permute.xlu1 %2156 }
 0x677   : > { %v2195_v0 = vsel %vm2192_vm10, %v2189_v47, %v2157_v56 }
 0x67a   : > { %v2159_v40 = vpop.permute.xlu0 %2158 }
 0x692   : > { %v2173_v37 = vpop.permute.xlu1 %2172 }
 0x693   : > { %v2199_v15 = vsel %vm2198_vm11, %v2193_v21, %v2173_v37 }
 0x694   : > { %3577 = vmatmul.mubr.msk.f32.vlgmr.msra.gmra.mrb[40].mxu1 %vm610_vm0, %v2199_v15 }
 0x695   : > { %3579 = vmatprep.mubr.msk.f32.mxu1 %vm4068_vm2, %v4069_v41 }
 0x696   : > { %v2175_v14 = vpop.permute.xlu1 %2174 }
 0x697   : > { %v2200_v44 = vsel %vm2198_vm11, %v2194_v63, %v2175_v14 }
 0x698   : > { %3580 = vmatmul.mubr.msk.f32.gmra.mrb[42].mxu1 %vm610_vm0, %v2200_v44 }
 0x699   : > { %3582 = vmatprep.mubr.msk.f32.mxu1 %vm4068_vm2, %v4069_v41 }
 0x69a   : > { %v2139_v9 = vpop.permute.xlu1 %2138  ;;  %v2177_v30 = vpop.permute.xlu0 %2176 }
 0x69b   : > { %v2190_v46 = vsel %vm879_vm13, %v4844_v51, %v2139_v9  ;;  %v2201_v49 = vsel %vm2198_vm11, %v2195_v0, %v2177_v30 }
 0x69c   : > { %3583 = vmatmul.mubr.msk.f32.gmra.mrb[44].mxu1 %vm610_vm0, %v2201_v49  ;;  %v2196_v20 = vsel %vm2192_vm10, %v2190_v46, %v2159_v40 }
 0x69d   : > { %3585 = vmatprep.mubr.msk.f32.mxu1 %vm4068_vm2, %v4069_v41 }
 0x69e   : > { %v2141_v48 = vpop.permute.xlu0 %2140  ;;  %v2179_v27 = vpop.permute.xlu1 %2178 }
 0x69f   : > { %v2202_v43 = vsel %vm2198_vm11, %v2196_v20, %v2179_v27  ;;  %v2191_v51 = vsel %vm879_vm13, %v4846_v1, %v2141_v48 }
 0x6a0   : > { %3586 = vmatmul.mubr.msk.f32.gmra.mrb[46].mxu1 %vm610_vm0, %v2202_v43  ;;  %v2449_v43 = vld [vmem:[%s5178_s9] sm:$0xff] }
 0x6a1   : > { %3588 = vmatprep.mubr.msk.f32.mxu1 %vm4068_vm2, %v4069_v41 }
 0x6a2   : > { %v2161_v54 = vpop.permute.xlu1 %2160  ;;  %v2181_v59 = vpop.permute.xlu0 %2180 }
 0x6a3   : > { %v2197_v53 = vsel %vm2192_vm10, %v2191_v51, %v2161_v54  ;;  %v2450_v51 = vld [vmem:[%s5178_s9 + $0x8] sm:$0xff] }
 0x6a4   : > { %v2203_v3 = vsel %vm2198_vm11, %v2197_v53, %v2181_v59  ;;  %v3753_v54 = vpack.c.bf16 %v2450_v51, %v2449_v43  ;;  %v2451_v59 = vld [vmem:[%s5178_s9 + $0x10] sm:$0xff]  ;;  %v2452_v53 = vld [vmem:[%s5178_s9 + $0x18] sm:$0xff] }
 0x6a5   : > { %3589 = vmatmul.mubr.msk.f32.gmra.mrb[48].mxu1 %vm610_vm0, %v2203_v3  ;;  %v3756_v3 = vpack.c.bf16 %v2452_v53, %v2451_v59 }
 0x6a6   : > { %3646 = vmatprep.mubr.msk.f32.mxu1 %vm4068_vm2, %v4069_v41  ;;  %3754 = vmatpush3.bf16.msra.mxu0 %v3753_v54 }
 0x6a7   : > { %3755 = vmatprep.subr.bf16.mxu0 %v4067_v38 }
 0x6aa   : > { %3757 = vmatpush3.bf16.msra.mxu0 %v3756_v3 }
 0x6ab   : > { %3782 = vmatprep.subr.bf16.mxu0 %v4067_v38 }
 0x767   : > { %v2296_v18 = vpop.f32.mrb[40].mxu1 }
 0x768   : > { %v2297_v61 = vadd.f32 %v3181_v45, %v2296_v18  ;;  %v3578_v1 = vpop.f32.mrb[41].mxu1 }
 0x76a   : > { %v2320_v2 = vadd.f32 %v4054_v11, %v2297_v61 }
 0x76b   : > { %v2301_v52 = vpop.f32.mrb[42].mxu1 }
 0x76c   : > { %v2302_v16 = vadd.f32 %v3181_v45, %v2301_v52  ;;  %v3581_v17 = vpop.f32.mrb[43].mxu1  ;;  %v2327_v19 = vsel %vm610_vm0, %v2320_v2, 0.0 }
 0x76d   : > { %2328 = vadd.xlane.f32.xlu1 %v2327_v19 }
 0x76e   : > { %v2321_v12 = vadd.f32 %v4055_v55, %v2302_v16 }
 0x76f   : > { %v2306_v25 = vpop.f32.mrb[44].mxu1 }
 0x770   : > { %v2307_v4 = vadd.f32 %v3181_v45, %v2306_v25  ;;  %v3584_v33 = vpop.f32.mrb[45].mxu1  ;;  %v2330_v6 = vsel %vm610_vm0, %v2321_v12, 0.0 }
 0x771   : > { %2331 = vadd.xlane.f32.xlu0 %v2330_v6 }
 0x772   : > { %v2322_v10 = vadd.f32 %v4056_v62, %v2307_v4 }
 0x773   : > { %v2311_v34 = vpop.f32.mrb[46].mxu1 }
 0x774   : > { %v2312_v26 = vadd.f32 %v3181_v45, %v2311_v34  ;;  %v3587_v24 = vpop.f32.mrb[47].mxu1  ;;  %v2333_v13 = vsel %vm610_vm0, %v2322_v10, 0.0 }
 0x775   : > { %2334 = vadd.xlane.f32.xlu0 %v2333_v13 }
 0x776   : > { %v2323_v58 = vadd.f32 %v4057_v29, %v2312_v26 }
 0x778   : > { %v2316_v31 = vpop.f32.mrb[48].mxu1  ;;  %v2336_v7 = vsel %vm610_vm0, %v2323_v58, 0.0 }
 0x779   : > { %v2317_v36 = vadd.f32 %v3181_v45, %v2316_v31  ;;  %2337 = vadd.xlane.f32.xlu1 %v2336_v7  ;;  %v3590_v22 = vpop.f32.mrb[49].mxu1 }
 0x77b   : > { %v2324_v57 = vadd.f32 %v4058_v50, %v2317_v36  ;;  %v3187_v50 = vld [vmem:[%s5176_s7] ss:$0 sm:$0xff] }
 0x77d   : > { %v2339_v32 = vsel %vm623_vm1, %v2324_v57, 0.0 }
 0x77e   : > { %2340 = vadd.xlane.f32.xlu0 %v2339_v32 }
 0x7fa   : > { %v2329_v5 = vpop.xlane.xlu1 %2328 }
 0x7fb   : > { %v2342_v60 = vmul.f32 0.03125, %v2329_v5 }
 0x7fd   : > { %v4920_v8 = vsub.f32 %v2320_v2, %v2342_v60 }
 0x7fe   : > { %v2332_v28 = vpop.xlane.xlu0 %2331 }
 0x7ff   : > { %v2343_v39 = vmul.f32 0.03125, %v2332_v28  ;;  %v2352_v56 = vmul.f32 %v4920_v8, %v4920_v8  ;;  %v2383_v28 = vmul.f32 %v3187_v50, %v4920_v8 }
 0x801   : > { %v4924_v35 = vsub.f32 %v2321_v12, %v2343_v39  ;;  %v2357_v23 = vsel %vm610_vm0, %v2352_v56, 0.0 }
 0x802   : > { %v2335_v21 = vpop.xlane.xlu0 %2334  ;;  %2358 = vadd.xlane.f32.xlu1 %v2357_v23  ;;  %v3188_v23 = vld [vmem:[%s5177_s8] ss:$0 sm:$0xff] }
 0x803   : > { %v2344_v37 = vmul.f32 0.03125, %v2335_v21  ;;  %v2353_v15 = vmul.f32 %v4924_v35, %v4924_v35 }
 0x805   : > { %v4929_v42 = vsub.f32 %v2322_v10, %v2344_v37  ;;  %v2360_v63 = vsel %vm610_vm0, %v2353_v15, 0.0 }
 0x806   : > { %v2338_v40 = vpop.xlane.xlu1 %2337  ;;  %2361 = vadd.xlane.f32.xlu0 %v2360_v63 }
 0x807   : > { %v2345_v14 = vmul.f32 0.03125, %v2338_v40  ;;  %v2354_v44 = vmul.f32 %v4929_v42, %v4929_v42  ;;  %v2384_v40 = vmul.f32 %v3187_v50, %v4924_v35 }
 0x809   : > { %v4934_v47 = vsub.f32 %v2323_v58, %v2345_v14  ;;  %v2363_v0 = vsel %vm610_vm0, %v2354_v44, 0.0 }
 0x80a   : > { %2364 = vadd.xlane.f32.xlu1 %v2363_v0 }
 0x80b   : > { %v2341_v9 = vpop.xlane.xlu0 %2340  ;;  %v2355_v30 = vmul.f32 %v4934_v47, %v4934_v47  ;;  %v2386_v43 = vmul.f32 %v3187_v50, %v4934_v47  ;;  %v3189_v47 = vld [vmem:[%s5179_s10] ss:$0 sm:$0xff] }
 0x80c   : > { %v2346_v46 = vmul.f32 0.03125, %v2341_v9 }
 0x80d   : > { %v2366_v49 = vsel %vm610_vm0, %v2355_v30, 0.0 }
 0x80e   : > { %v4940_v48 = vsub.f32 %v2324_v57, %v2346_v46  ;;  %2367 = vadd.xlane.f32.xlu0 %v2366_v49  ;;  %v2385_v49 = vmul.f32 %v3187_v50, %v4929_v42 }
 0x810   : > { %v2356_v20 = vmul.f32 %v4940_v48, %v4940_v48  ;;  %v2387_v53 = vmul.f32 %v3187_v50, %v4940_v48 }
 0x812   : > { %v2369_v27 = vsel %vm623_vm1, %v2356_v20, 0.0 }
 0x813   : > { %2370 = vadd.xlane.f32.xlu1 %v2369_v27 }
 0x88f   : > { %v2359_v45 = vpop.xlane.xlu1 %2358 }
 0x890   : > { %v2372_v18 = vmul.f32 0.032258064, %v2359_v45 }
 0x892   : > { %3994 = vrsqrt.f32 %v2372_v18  ;;  %vm2390_vm12 = vcmp.eq.f32.partialorder %v2372_v18, inf  ;;  %v2393_v55 = vand.u32 2147483648, %v2372_v18  ;;  %vm2392_vm13 = vcmp.eq.f32.partialorder %v2372_v18, 0.0 }
 0x893   : > { %v2362_v61 = vpop.xlane.xlu0 %2361 }
 0x894   : > { %v2373_v1 = vmul.f32 0.032258064, %v2362_v61 }
 0x896   : > { %3996 = vrsqrt.f32 %v2373_v1  ;;  %vm2397_vm14 = vcmp.eq.f32.partialorder %v2373_v1, inf  ;;  %v2400_v34 = vand.u32 2147483648, %v2373_v1  ;;  %vm2399_vm3 = vcmp.eq.f32.partialorder %v2373_v1, 0.0 }
 0x897   : > { %v2365_v11 = vpop.xlane.xlu1 %2364 }
 0x898   : > { %v2374_v2 = vmul.f32 0.032258064, %v2365_v11 }
 0x89a   : > { %3998 = vrsqrt.f32 %v2374_v2  ;;  %vm2404_vm4 = vcmp.eq.f32.partialorder %v2374_v2, inf  ;;  %v2407_v31 = vand.u32 2147483648, %v2374_v2  ;;  %vm2406_vm5 = vcmp.eq.f32.partialorder %v2374_v2, 0.0 }
 0x89b   : > { %v2368_v52 = vpop.xlane.xlu0 %2367 }
 0x89c   : > { %v3995_v16 = vpop.eup %3994  ;;  %v2375_v17 = vmul.f32 0.032258064, %v2368_v52 }
 0x89d   : > { %v2389_v19 = vmul.f32 %v3995_v16, %v2372_v18 }
 0x89e   : > { %4000 = vrsqrt.f32 %v2375_v17  ;;  %vm2411_vm6 = vcmp.eq.f32.partialorder %v2375_v17, inf  ;;  %v2414_v5 = vand.u32 2147483648, %v2375_v17  ;;  %vm2413_vm7 = vcmp.eq.f32.partialorder %v2375_v17, 0.0 }
 0x89f   : > { %v2391_v12 = vsel %vm2390_vm12, %v2372_v18, %v2389_v19 }
 0x8a0   : > { %v3997_v25 = vpop.eup %3996  ;;  %v2394_v4 = vsel %vm2392_vm13, %v2393_v55, %v2391_v12  ;;  %v2371_v33 = vpop.xlane.xlu1 %2370 }
 0x8a1   : > { %v2423_v6 = vadd.f32 1e-06, %v2394_v4  ;;  %v2396_v62 = vmul.f32 %v3997_v25, %v2373_v1  ;;  %v2376_v10 = vmul.f32 0.032258064, %v2371_v33 }
 0x8a3   : > { %4002 = vrcp.f32 %v2423_v6  ;;  %v2398_v26 = vsel %vm2397_vm14, %v2373_v1, %v2396_v62  ;;  %vm2418_vm8 = vcmp.eq.f32.partialorder %v2376_v10, inf  ;;  %v2421_v14 = vand.u32 2147483648, %v2376_v10 }
 0x8a4   : > { %v3999_v24 = vpop.eup %3998  ;;  %v2401_v13 = vsel %vm2399_vm3, %v2400_v34, %v2398_v26  ;;  %4004 = vrsqrt.f32 %v2376_v10  ;;  %vm2420_vm9 = vcmp.eq.f32.partialorder %v2376_v10, 0.0 }
 0x8a5   : > { %v2403_v29 = vmul.f32 %v3999_v24, %v2374_v2  ;;  %v2424_v58 = vadd.f32 1e-06, %v2401_v13 }
 0x8a7   : > { %v2405_v7 = vsel %vm2404_vm4, %v2374_v2, %v2403_v29  ;;  %4006 = vrcp.f32 %v2424_v58 }
 0x8a8   : > { %v4001_v36 = vpop.eup %4000  ;;  %v2408_v22 = vsel %vm2406_vm5, %v2407_v31, %v2405_v7 }
 0x8a9   : > { %v2410_v57 = vmul.f32 %v4001_v36, %v2375_v17  ;;  %v2425_v32 = vadd.f32 1e-06, %v2408_v22 }
 0x8ab   : > { %v2412_v60 = vsel %vm2411_vm6, %v2375_v17, %v2410_v57  ;;  %4008 = vrcp.f32 %v2425_v32 }
 0x8ac   : > { %v2415_v39 = vsel %vm2413_vm7, %v2414_v5, %v2412_v60 }
 0x8ad   : > { %v4003_v56 = vpop.eup %4002  ;;  %v2426_v21 = vadd.f32 1e-06, %v2415_v39 }
 0x8ae   : > { %v4005_v37 = vpop.eup %4004  ;;  %v2429_v15 = vmul.f32 %v4003_v56, %v2383_v28 }
 0x8af   : > { %v2417_v63 = vmul.f32 %v4005_v37, %v2376_v10  ;;  %4010 = vrcp.f32 %v2426_v21  ;;  %v2683_v21 = vld [vmem:[%s5182_s13 + $0x8] sm:$0xff] }
 0x8b0   : > { %v2444_v44 = vadd.f32 %v3188_v23, %v2429_v15 }
 0x8b1   : > { %v4007_v0 = vpop.eup %4006  ;;  %v2419_v9 = vsel %vm2418_vm8, %v2376_v10, %v2417_v63 }
 0x8b2   : > { %v2422_v8 = vsel %vm2420_vm9, %v2421_v14, %v2419_v9  ;;  %3600 = vmatmul.mubr.msk.f32.vlgmr.msra.gmra.mrb[50].mxu0 %vm610_vm0, %v2444_v44  ;;  %v2431_v30 = vmul.f32 %v4007_v0, %v2384_v40  ;;  %v2684_v40 = vld [vmem:[%s5182_s13 + $0x10] sm:$0xff]  ;;  %v2685_v14 = vld [vmem:[%s5182_s13 + $0x18] sm:$0xff]  ;;  %v2686_v0 = vld [vmem:[%s5182_s13 + $0x20] sm:$0xff] }
 0x8b3   : > { %3602 = vmatprep.mubr.msk.f32.mxu0 %vm4068_vm2, %v4069_v41  ;;  %v2427_v46 = vadd.f32 1e-06, %v2422_v8  ;;  %v3762_v44 = vpack.c.bf16 %v2685_v14, %v2684_v40  ;;  %v2687_v9 = vld [vmem:[%s5182_s13 + $0x28] sm:$0xff]  ;;  %v3196_v40 = vld [vmem:[%s5181_s12] ss:$0 sm:$0xff] }
 0x8b4   : > { %v2445_v20 = vadd.f32 %v3188_v23, %v2431_v30  ;;  %v3765_v8 = vpack.c.bf16 %v2687_v9, %v2686_v0  ;;  %v2688_v30 = vld [vmem:[%s5182_s13 + $0x30] sm:$0xff] }
 0x8b5   : > { %v4009_v27 = vpop.eup %4008  ;;  %4012 = vrcp.f32 %v2427_v46  ;;  %v2689_v46 = vld [vmem:[%s5182_s13 + $0x38] sm:$0xff] }
 0x8b6   : > { %3603 = vmatmul.mubr.msk.f32.gmra.mrb[52].mxu0 %vm610_vm0, %v2445_v20  ;;  %v2433_v35 = vmul.f32 %v4009_v27, %v2385_v49  ;;  %v3768_v49 = vpack.c.bf16 %v2689_v46, %v2688_v30  ;;  %v2690_v20 = vld [vmem:[%s5182_s13 + $0x40] sm:$0xff]  ;;  %v2691_v27 = vld [vmem:[%s5182_s13 + $0x48] sm:$0xff] }
 0x8b7   : > { %3605 = vmatprep.mubr.msk.f32.mxu0 %vm4068_vm2, %v4069_v41 }
 0x8b8   : > { %v2446_v51 = vadd.f32 %v3188_v23, %v2433_v35  ;;  %v3771_v35 = vpack.c.bf16 %v2691_v27, %v2690_v20 }
 0x8b9   : > { %v4011_v54 = vpop.eup %4010 }
 0x8ba   : > { %3606 = vmatmul.mubr.msk.f32.gmra.mrb[54].mxu0 %vm610_vm0, %v2446_v51  ;;  %v2435_v59 = vmul.f32 %v4011_v54, %v2386_v43  ;;  %v2692_v43 = vld [vmem:[%s5182_s13 + $0x50] sm:$0xff]  ;;  %v2693_v51 = vld [vmem:[%s5182_s13 + $0x58] sm:$0xff] }
 0x8bb   : > { %3608 = vmatprep.mubr.msk.f32.mxu0 %vm4068_vm2, %v4069_v41  ;;  %v3774_v54 = vpack.c.bf16 %v2693_v51, %v2692_v43 }
 0x8bc   : > { %v2447_v42 = vadd.f32 %v3188_v23, %v2435_v59  ;;  %v2694_v59 = vld [vmem:[%s5182_s13 + $0x60] sm:$0xff] }
 0x8be   : > { %3609 = vmatmul.mubr.msk.f32.gmra.mrb[56].mxu0 %vm610_vm0, %v2447_v42  ;;  %v2695_v42 = vld [vmem:[%s5182_s13 + $0x68] sm:$0xff] }
 0x8bf   : > { %v4013_v3 = vpop.eup %4012  ;;  %3611 = vmatprep.mubr.msk.f32.mxu0 %vm4068_vm2, %v4069_v41 }
 0x8c0   : > { %v2437_v45 = vmul.f32 %v4013_v3, %v2387_v53  ;;  %v3777_v53 = vpack.c.bf16 %v2695_v42, %v2694_v59  ;;  %v2696_v3 = vld [vmem:[%s5182_s13 + $0x70] sm:$0xff] }
 0x8c2   : > { %v2448_v18 = vadd.f32 %v3188_v23, %v2437_v45  ;;  %v2682_v23 = vld [vmem:[%s5182_s13] sm:$0xff]  ;;  %v2697_v45 = vld [vmem:[%s5182_s13 + $0x78] sm:$0xff] }
 0x8c3   : > { %v3759_v37 = vpack.c.bf16 %v2683_v21, %v2682_v23 }
 0x8c4   : > { %3612 = vmatmul.mubr.msk.f32.gmra.mrb[58].mxu0 %vm610_vm0, %v2448_v18  ;;  %v3780_v18 = vpack.c.bf16 %v2697_v45, %v2696_v3 }
 0x8c5   : > { %3669 = vmatprep.mubr.msk.f32.mxu0 %vm4068_vm2, %v4069_v41  ;;  %3760 = vmatpush3.bf16.msra.mxu1 %v3759_v37 }
 0x8c6   : > { %3761 = vmatprep.subr.bf16.mxu1 %v4067_v38 }
 0x8c9   : > { %3763 = vmatpush3.bf16.msra.mxu1 %v3762_v44 }
 0x8ca   : > { %3764 = vmatprep.subr.bf16.mxu1 %v4067_v38 }
 0x8cd   : > { %3766 = vmatpush3.bf16.msra.mxu1 %v3765_v8 }
 0x8ce   : > { %3767 = vmatprep.subr.bf16.mxu1 %v4067_v38 }
 0x8d1   : > { %3769 = vmatpush3.bf16.msra.mxu1 %v3768_v49 }
 0x8d2   : > { %3770 = vmatprep.subr.bf16.mxu1 %v4067_v38 }
 0x8d5   : > { %3772 = vmatpush3.bf16.msra.mxu1 %v3771_v35 }
 0x8d6   : > { %3773 = vmatprep.subr.bf16.mxu1 %v4067_v38 }
 0x8d9   : > { %3775 = vmatpush3.bf16.msra.mxu1 %v3774_v54 }
 0x8da   : > { %3776 = vmatprep.subr.bf16.mxu1 %v4067_v38 }
 0x8dd   : > { %3778 = vmatpush3.bf16.msra.mxu1 %v3777_v53 }
 0x8de   : > { %3779 = vmatprep.subr.bf16.mxu1 %v4067_v38 }
 0x8e1   : > { %3781 = vmatpush3.bf16.msra.mxu1 %v3780_v18 }
 0x985   : > { %v2541_v61 = vpop.f32.mrb[50].mxu0 }
 0x986   : > { %v2542_v1 = vadd.f32 %v3189_v47, %v2541_v61  ;;  %v3601_v48 = vpop.f32.mrb[51].mxu0 }
 0x988   : > { %2567 = vadd.xlane.f32.xlu0 %v2542_v1 }
 0x989   : > { %v2546_v11 = vpop.f32.mrb[52].mxu0 }
 0x98a   : > { %v2547_v2 = vadd.f32 %v3189_v47, %v2546_v11  ;;  %v3604_v52 = vpop.f32.mrb[53].mxu0 }
 0x98c   : > { %2569 = vadd.xlane.f32.xlu1 %v2547_v2 }
 0x98d   : > { %v2551_v16 = vpop.f32.mrb[54].mxu0 }
 0x98e   : > { %v2552_v17 = vadd.f32 %v3189_v47, %v2551_v16  ;;  %v3607_v19 = vpop.f32.mrb[55].mxu0 }
 0x990   : > { %2571 = vadd.xlane.f32.xlu0 %v2552_v17 }
 0x991   : > { %v2556_v55 = vpop.f32.mrb[56].mxu0 }
 0x992   : > { %v2557_v12 = vadd.f32 %v3189_v47, %v2556_v55  ;;  %v3610_v25 = vpop.f32.mrb[57].mxu0 }
 0x994   : > { %2573 = vadd.xlane.f32.xlu1 %v2557_v12 }
 0x997   : > { %v2561_v4 = vpop.f32.mrb[58].mxu0 }
 0x998   : > { %v2562_v33 = vadd.f32 %v3189_v47, %v2561_v4  ;;  %v3613_v6 = vpop.f32.mrb[59].mxu0 }
 0x99a   : > { %v2575_v62 = vsel %vm1086_vm15, %v2562_v33, 0.0 }
 0x99b   : > { %2576 = vadd.xlane.f32.xlu0 %v2575_v62 }
 0xa15   : > { %v2568_v10 = vpop.xlane.xlu0 %2567 }
 0xa16   : > { %v2579_v34 = vmul.f32 0.0078125, %v2568_v10 }
 0xa18   : > { %v4989_v26 = vsub.f32 %v2542_v1, %v2579_v34 }
 0xa19   : > { %v2570_v24 = vpop.xlane.xlu1 %2569 }
 0xa1a   : > { %v2580_v13 = vmul.f32 0.0078125, %v2570_v24  ;;  %v2589_v29 = vmul.f32 %v4989_v26, %v4989_v26 }
 0xa1c   : > { %v4993_v58 = vsub.f32 %v2547_v2, %v2580_v13  ;;  %2594 = vadd.xlane.f32.xlu1 %v2589_v29 }
 0xa1d   : > { %v2572_v31 = vpop.xlane.xlu0 %2571 }
 0xa1e   : > { %v2581_v7 = vmul.f32 0.0078125, %v2572_v31  ;;  %v2590_v36 = vmul.f32 %v4993_v58, %v4993_v58 }
 0xa20   : > { %v4997_v22 = vsub.f32 %v2552_v17, %v2581_v7  ;;  %2596 = vadd.xlane.f32.xlu0 %v2590_v36 }
 0xa21   : > { %v2574_v50 = vpop.xlane.xlu1 %2573 }
 0xa22   : > { %v2582_v57 = vmul.f32 0.0078125, %v2574_v50  ;;  %v2591_v32 = vmul.f32 %v4997_v22, %v4997_v22 }
 0xa24   : > { %v5001_v5 = vsub.f32 %v2557_v12, %v2582_v57  ;;  %2598 = vadd.xlane.f32.xlu1 %v2591_v32 }
 0xa26   : > { %v2592_v60 = vmul.f32 %v5001_v5, %v5001_v5 }
 0xa28   : > { %v2577_v28 = vpop.xlane.xlu0 %2576  ;;  %2600 = vadd.xlane.f32.xlu0 %v2592_v60  ;;  %v3195_v60 = vld [vmem:[%s5180_s11] ss:$0 sm:$0xff] }
 0xa29   : > { %v2583_v39 = vmul.f32 0.0078125, %v2577_v28  ;;  %v2616_v37 = vmul.f32 %v3195_v60, %v4989_v26  ;;  %v2617_v9 = vmul.f32 %v3195_v60, %v4993_v58  ;;  %v2618_v27 = vmul.f32 %v3195_v60, %v4997_v22 }
 0xa2a   : > { %v2619_v59 = vmul.f32 %v3195_v60, %v5001_v5  ;;  %v3197_v5 = vld [vmem:[%s5183_s14] ss:$0 sm:$0xff] }
 0xa2b   : > { %v5005_v56 = vsub.f32 %v2562_v33, %v2583_v39 }
 0xa2d   : > { %v2593_v15 = vmul.f32 %v5005_v56, %v5005_v56  ;;  %v2620_v45 = vmul.f32 %v3195_v60, %v5005_v56 }
 0xa2f   : > { %v2602_v63 = vsel %vm1086_vm15, %v2593_v15, 0.0 }
 0xa30   : > { %2603 = vadd.xlane.f32.xlu1 %v2602_v63 }
 0xaa9   : > { %v2595_v47 = vpop.xlane.xlu1 %2594 }
 0xaaa   : > { %v2605_v61 = vmul.f32 0.007874016, %v2595_v47 }
 0xaac   : > { %4014 = vrsqrt.f32 %v2605_v61  ;;  %vm2623_vm15 = vcmp.eq.f32.partialorder %v2605_v61, inf  ;;  %v2626_v55 = vand.u32 2147483648, %v2605_v61  ;;  %vm2625_vm10 = vcmp.eq.f32.partialorder %v2605_v61, 0.0 }
 0xaad   : > { %v2597_v1 = vpop.xlane.xlu0 %2596 }
 0xaae   : > { %v2606_v48 = vmul.f32 0.007874016, %v2597_v1 }
 0xab0   : > { %4016 = vrsqrt.f32 %v2606_v48  ;;  %vm2630_vm11 = vcmp.eq.f32.partialorder %v2606_v48, inf  ;;  %v2633_v62 = vand.u32 2147483648, %v2606_v48  ;;  %vm2632_vm12 = vcmp.eq.f32.partialorder %v2606_v48, 0.0 }
 0xab1   : > { %v2599_v11 = vpop.xlane.xlu1 %2598 }
 0xab2   : > { %v2607_v2 = vmul.f32 0.007874016, %v2599_v11 }
 0xab4   : > { %4018 = vrsqrt.f32 %v2607_v2  ;;  %vm2637_vm13 = vcmp.eq.f32.partialorder %v2607_v2, inf  ;;  %v2640_v36 = vand.u32 2147483648, %v2607_v2  ;;  %vm2639_vm14 = vcmp.eq.f32.partialorder %v2607_v2, 0.0 }
 0xab5   : > { %v2601_v52 = vpop.xlane.xlu0 %2600 }
 0xab6   : > { %v4015_v16 = vpop.eup %4014  ;;  %v2608_v17 = vmul.f32 0.007874016, %v2601_v52 }
 0xab7   : > { %v2622_v19 = vmul.f32 %v4015_v16, %v2605_v61 }
 0xab8   : > { %4020 = vrsqrt.f32 %v2608_v17  ;;  %vm2644_vm3 = vcmp.eq.f32.partialorder %v2608_v17, inf  ;;  %v2647_v23 = vand.u32 2147483648, %v2608_v17  ;;  %vm2646_vm4 = vcmp.eq.f32.partialorder %v2608_v17, 0.0 }
 0xab9   : > { %v2624_v12 = vsel %vm2623_vm15, %v2605_v61, %v2622_v19 }
 0xaba   : > { %v4017_v25 = vpop.eup %4016  ;;  %v2627_v4 = vsel %vm2625_vm10, %v2626_v55, %v2624_v12 }
 0xabb   : > { %v2656_v33 = vadd.f32 1e-06, %v2627_v4  ;;  %v2629_v6 = vmul.f32 %v4017_v25, %v2606_v48 }
 0xabd   : > { %4022 = vrcp.f32 %v2656_v33  ;;  %v2631_v10 = vsel %vm2630_vm11, %v2606_v48, %v2629_v6  ;;  %v2604_v34 = vpop.xlane.xlu1 %2603 }
 0xabe   : > { %v4019_v24 = vpop.eup %4018  ;;  %v2609_v13 = vmul.f32 0.007874016, %v2604_v34  ;;  %v2634_v29 = vsel %vm2632_vm12, %v2633_v62, %v2631_v10 }
 0xabf   : > { %v2636_v31 = vmul.f32 %v4019_v24, %v2607_v2  ;;  %v2657_v7 = vadd.f32 1e-06, %v2634_v29 }
 0xac0   : > { %4024 = vrsqrt.f32 %v2609_v13  ;;  %vm2651_vm5 = vcmp.eq.f32.partialorder %v2609_v13, inf  ;;  %v2654_v49 = vand.u32 2147483648, %v2609_v13  ;;  %vm2653_vm6 = vcmp.eq.f32.partialorder %v2609_v13, 0.0 }
 0xac1   : > { %v2638_v50 = vsel %vm2637_vm13, %v2607_v2, %v2636_v31  ;;  %4026 = vrcp.f32 %v2657_v7 }
 0xac2   : > { %v4021_v57 = vpop.eup %4020  ;;  %v2641_v32 = vsel %vm2639_vm14, %v2640_v36, %v2638_v50 }
 0xac3   : > { %v2643_v28 = vmul.f32 %v4021_v57, %v2608_v17  ;;  %v2658_v39 = vadd.f32 1e-06, %v2641_v32 }
 0xac5   : > { %v2645_v21 = vsel %vm2644_vm3, %v2608_v17, %v2643_v28  ;;  %4028 = vrcp.f32 %v2658_v39 }
 0xac6   : > { %v2648_v15 = vsel %vm2646_vm4, %v2647_v23, %v2645_v21 }
 0xac7   : > { %v4023_v63 = vpop.eup %4022  ;;  %v2659_v14 = vadd.f32 1e-06, %v2648_v15 }
 0xac8   : > { %v2662_v44 = vmul.f32 %v4023_v63, %v2616_v37 }
 0xac9   : > { %4030 = vrcp.f32 %v2659_v14 }
 0xaca   : > { %v4025_v0 = vpop.eup %4024  ;;  %v2677_v8 = vadd.f32 %v3196_v40, %v2662_v44 }
 0xacb   : > { %v4027_v30 = vpop.eup %4026  ;;  %v2650_v46 = vmul.f32 %v4025_v0, %v2609_v13 }
 0xacc   : > { %3647 = vmatmul.mubr.f32.vlgmr.msra.gmra.mrb[50].mxu1 %v2677_v8  ;;  %v2664_v20 = vmul.f32 %v4027_v30, %v2617_v9 }
 0xacd   : > { %v2652_v26 = vsel %vm2651_vm5, %v2609_v13, %v2650_v46  ;;  %3649 = vmatprep.mubr.msk.f32.mxu1 %vm4068_vm2, %v4069_v41 }
 0xace   : > { %v2678_v35 = vadd.f32 %v3196_v40, %v2664_v20  ;;  %v2655_v43 = vsel %vm2653_vm6, %v2654_v49, %v2652_v26  ;;  %v2919_v26 = vld [vmem:[%s5186_s17] sm:$0xff] }
 0xacf   : > { %v4029_v51 = vpop.eup %4028  ;;  %v2660_v54 = vadd.f32 1e-06, %v2655_v43  ;;  %v2921_v43 = vld [vmem:[%s5186_s17 + $0x10] sm:$0xff] }
 0xad0   : > { %3650 = vmatmul.mubr.f32.gmra.mrb[52].mxu1 %v2678_v35  ;;  %v2666_v58 = vmul.f32 %v4029_v51, %v2618_v27  ;;  %v2920_v27 = vld [vmem:[%s5186_s17 + $0x8] sm:$0xff]  ;;  %v2922_v51 = vld [vmem:[%s5186_s17 + $0x18] sm:$0xff] }
 0xad1   : > { %3652 = vmatprep.mubr.msk.f32.mxu1 %vm4068_vm2, %v4069_v41  ;;  %4032 = vrcp.f32 %v2660_v54  ;;  %v3783_v35 = vpack.c.bf16 %v2920_v27, %v2919_v26  ;;  %v3786_v54 = vpack.c.bf16 %v2922_v51, %v2921_v43 }
 0xad2   : > { %v2679_v42 = vadd.f32 %v3196_v40, %v2666_v58 }
 0xad3   : > { %v4031_v53 = vpop.eup %4030  ;;  %3784 = vmatpush3.bf16.msra.mxu0 %v3783_v35 }
 0xad4   : > { %3653 = vmatmul.mubr.f32.gmra.mrb[54].mxu1 %v2679_v42  ;;  %v2668_v3 = vmul.f32 %v4031_v53, %v2619_v59  ;;  %3785 = vmatprep.subr.bf16.mxu0 %v4067_v38 }
 0xad5   : > { %3655 = vmatprep.mubr.msk.f32.mxu1 %vm4068_vm2, %v4069_v41 }
 0xad6   : > { %v2680_v22 = vadd.f32 %v3196_v40, %v2668_v3 }
 0xad7   : > { %3787 = vmatpush3.bf16.msra.mxu0 %v3786_v54 }
 0xad8   : > { %3656 = vmatmul.mubr.f32.gmra.mrb[56].mxu1 %v2680_v22 }
 0xad9   : > { %3658 = vmatprep.mubr.msk.f32.mxu1 %vm4068_vm2, %v4069_v41 }
 0xadb   : > { %v4033_v18 = vpop.eup %4032 }
 0xadc   : > { %v2670_v47 = vmul.f32 %v4033_v18, %v2620_v45 }
 0xade   : > { %v2681_v61 = vadd.f32 %v3196_v40, %v2670_v47 }
 0xae0   : > { %3659 = vmatmul.mubr.f32.gmra.mrb[58].mxu1 %v2681_v61 }
 0xb9f   : > { %v2771_v1 = vpop.f32.mrb[50].mxu1 }
 0xba0   : > { %v2772_v48 = vadd.f32 %v3197_v5, %v2771_v1  ;;  %v3648_v11 = vpop.f32.mrb[51].mxu1 }
 0xba2   : > { %v2797_v2 = vsel %vm610_vm0, %v2772_v48, 0.0 }
 0xba3   : > { %2798 = vadd.xlane.f32.xlu0 %v2797_v2  ;;  %v2776_v52 = vpop.f32.mrb[52].mxu1 }
 0xba4   : > { %v2777_v16 = vadd.f32 %v3197_v5, %v2776_v52  ;;  %v3651_v17 = vpop.f32.mrb[53].mxu1 }
 0xba6   : > { %v2800_v19 = vsel %vm610_vm0, %v2777_v16, 0.0 }
 0xba7   : > { %2801 = vadd.xlane.f32.xlu1 %v2800_v19  ;;  %v2781_v56 = vpop.f32.mrb[54].mxu1 }
 0xba8   : > { %v2782_v55 = vadd.f32 %v3197_v5, %v2781_v56  ;;  %v3654_v12 = vpop.f32.mrb[55].mxu1 }
 0xbaa   : > { %v2803_v25 = vsel %vm610_vm0, %v2782_v55, 0.0 }
 0xbab   : > { %2804 = vadd.xlane.f32.xlu0 %v2803_v25  ;;  %v2786_v4 = vpop.f32.mrb[56].mxu1 }
 0xbac   : > { %v2787_v33 = vadd.f32 %v3197_v5, %v2786_v4  ;;  %v3657_v6 = vpop.f32.mrb[57].mxu1 }
 0xbae   : > { %v2806_v62 = vsel %vm610_vm0, %v2787_v33, 0.0 }
 0xbaf   : > { %2807 = vadd.xlane.f32.xlu1 %v2806_v62 }
 0xbb3   : > { %v2791_v10 = vpop.f32.mrb[58].mxu1 }
 0xbb4   : > { %v2792_v34 = vadd.f32 %v3197_v5, %v2791_v10  ;;  %v3660_v24 = vpop.f32.mrb[59].mxu1  ;;  %v3198_v10 = vld [vmem:[%s5184_s15] ss:$0 sm:$0xff] }
 0xbb6   : > { %v2809_v13 = vsel %vm623_vm1, %v2792_v34, 0.0 }
 0xbb7   : > { %2810 = vadd.xlane.f32.xlu0 %v2809_v13 }
 0xc30   : > { %v2799_v29 = vpop.xlane.xlu0 %2798 }
 0xc31   : > { %v2812_v31 = vmul.f32 0.03125, %v2799_v29 }
 0xc33   : > { %v5092_v7 = vsub.f32 %v2772_v48, %v2812_v31 }
 0xc34   : > { %v2802_v36 = vpop.xlane.xlu1 %2801 }
 0xc35   : > { %v2813_v50 = vmul.f32 0.03125, %v2802_v36  ;;  %v2822_v57 = vmul.f32 %v5092_v7, %v5092_v7  ;;  %v2853_v31 = vmul.f32 %v3198_v10, %v5092_v7 }
 0xc37   : > { %v5096_v32 = vsub.f32 %v2777_v16, %v2813_v50  ;;  %v2827_v60 = vsel %vm610_vm0, %v2822_v57, 0.0 }
 0xc38   : > { %v2805_v28 = vpop.xlane.xlu0 %2804  ;;  %2828 = vadd.xlane.f32.xlu1 %v2827_v60  ;;  %v3199_v60 = vld [vmem:[%s5185_s16] ss:$0 sm:$0xff] }
 0xc39   : > { %v2814_v39 = vmul.f32 0.03125, %v2805_v28  ;;  %v2823_v23 = vmul.f32 %v5096_v32, %v5096_v32 }
 0xc3b   : > { %v5101_v21 = vsub.f32 %v2782_v55, %v2814_v39  ;;  %v2830_v37 = vsel %vm610_vm0, %v2823_v23, 0.0  ;;  %v2854_v23 = vmul.f32 %v3198_v10, %v5096_v32 }
 0xc3c   : > { %v2808_v15 = vpop.xlane.xlu1 %2807  ;;  %2831 = vadd.xlane.f32.xlu0 %v2830_v37 }
 0xc3d   : > { %v2815_v63 = vmul.f32 0.03125, %v2808_v15  ;;  %v2824_v40 = vmul.f32 %v5101_v21, %v5101_v21 }
 0xc3f   : > { %v5106_v14 = vsub.f32 %v2787_v33, %v2815_v63  ;;  %v2833_v44 = vsel %vm610_vm0, %v2824_v40, 0.0 }
 0xc40   : > { %2834 = vadd.xlane.f32.xlu1 %v2833_v44 }
 0xc41   : > { %v2825_v0 = vmul.f32 %v5106_v14, %v5106_v14 }
 0xc43   : > { %v2836_v9 = vsel %vm610_vm0, %v2825_v0, 0.0  ;;  %v2855_v0 = vmul.f32 %v3198_v10, %v5101_v21 }
 0xc44   : > { %v2811_v8 = vpop.xlane.xlu0 %2810  ;;  %2837 = vadd.xlane.f32.xlu0 %v2836_v9 }
 0xc45   : > { %v2816_v30 = vmul.f32 0.03125, %v2811_v8 }
 0xc47   : > { %v5112_v46 = vsub.f32 %v2792_v34, %v2816_v30 }
 0xc49   : > { %v2826_v49 = vmul.f32 %v5112_v46, %v5112_v46  ;;  %v2857_v43 = vmul.f32 %v3198_v10, %v5112_v46 }
 0xc4b   : > { %v2839_v20 = vsel %vm623_vm1, %v2826_v49, 0.0 }
 0xc4c   : > { %2840 = vadd.xlane.f32.xlu1 %v2839_v20  ;;  %v2856_v20 = vmul.f32 %v3198_v10, %v5106_v14 }
 0xcc5   : > { %v2829_v58 = vpop.xlane.xlu1 %2828 }
 0xcc6   : > { %v2842_v59 = vmul.f32 0.032258064, %v2829_v58  ;;  %v3200_v58 = vld [vmem:[%s5187_s18] ss:$0 sm:$0xff] }
 0xcc8   : > { %4034 = vrsqrt.f32 %v2842_v59  ;;  %vm2860_vm1 = vcmp.eq.f32.partialorder %v2842_v59, inf  ;;  %v2863_v61 = vand.u32 2147483648, %v2842_v59  ;;  %vm2862_vm7 = vcmp.eq.f32.partialorder %v2842_v59, 0.0 }
 0xcc9   : > { %v2832_v42 = vpop.xlane.xlu0 %2831 }
 0xcca   : > { %v2843_v53 = vmul.f32 0.032258064, %v2832_v42 }
 0xccc   : > { %4036 = vrsqrt.f32 %v2843_v53  ;;  %vm2867_vm8 = vcmp.eq.f32.partialorder %v2843_v53, inf  ;;  %v2870_v52 = vand.u32 2147483648, %v2843_v53  ;;  %vm2869_vm9 = vcmp.eq.f32.partialorder %v2843_v53, 0.0 }
 0xccd   : > { %v2835_v3 = vpop.xlane.xlu1 %2834 }
 0xcce   : > { %v2844_v22 = vmul.f32 0.032258064, %v2835_v3 }
 0xcd0   : > { %4038 = vrsqrt.f32 %v2844_v22  ;;  %vm2874_vm15 = vcmp.eq.f32.partialorder %v2844_v22, inf  ;;  %v2877_v4 = vand.u32 2147483648, %v2844_v22  ;;  %vm2876_vm10 = vcmp.eq.f32.partialorder %v2844_v22, 0.0 }
 0xcd1   : > { %v2838_v38 = vpop.xlane.xlu0 %2837 }
 0xcd2   : > { %v4035_v45 = vpop.eup %4034  ;;  %v2845_v18 = vmul.f32 0.032258064, %v2838_v38 }
 0xcd3   : > { %v2859_v47 = vmul.f32 %v4035_v45, %v2842_v59 }
 0xcd4   : > { %4040 = vrsqrt.f32 %v2845_v18  ;;  %vm2881_vm11 = vcmp.eq.f32.partialorder %v2845_v18, inf  ;;  %v2884_v13 = vand.u32 2147483648, %v2845_v18  ;;  %vm2883_vm12 = vcmp.eq.f32.partialorder %v2845_v18, 0.0 }
 0xcd5   : > { %v2861_v5 = vsel %vm2860_vm1, %v2842_v59, %v2859_v47 }
 0xcd6   : > { %v4037_v1 = vpop.eup %4036  ;;  %v2864_v48 = vsel %vm2862_vm7, %v2863_v61, %v2861_v5 }
 0xcd7   : > { %v2893_v11 = vadd.f32 1e-06, %v2864_v48  ;;  %v2866_v2 = vmul.f32 %v4037_v1, %v2843_v53 }
 0xcd9   : > { %4042 = vrcp.f32 %v2893_v11  ;;  %v2868_v16 = vsel %vm2867_vm8, %v2843_v53, %v2866_v2  ;;  %v2841_v17 = vpop.xlane.xlu1 %2840 }
 0xcda   : > { %v4039_v19 = vpop.eup %4038  ;;  %v2871_v56 = vsel %vm2869_vm9, %v2870_v52, %v2868_v16  ;;  %v2846_v55 = vmul.f32 0.032258064, %v2841_v17 }
 0xcdb   : > { %v2873_v12 = vmul.f32 %v4039_v19, %v2844_v22  ;;  %v2894_v25 = vadd.f32 1e-06, %v2871_v56 }
 0xcdc   : > { %4044 = vrsqrt.f32 %v2846_v55  ;;  %vm2888_vm13 = vcmp.eq.f32.partialorder %v2846_v55, inf  ;;  %v2891_v40 = vand.u32 2147483648, %v2846_v55  ;;  %vm2890_vm14 = vcmp.eq.f32.partialorder %v2846_v55, 0.0 }
 0xcdd   : > { %v2875_v33 = vsel %vm2874_vm15, %v2844_v22, %v2873_v12  ;;  %4046 = vrcp.f32 %v2894_v25 }
 0xcde   : > { %v4041_v6 = vpop.eup %4040  ;;  %v2878_v62 = vsel %vm2876_vm10, %v2877_v4, %v2875_v33 }
 0xcdf   : > { %v2880_v34 = vmul.f32 %v4041_v6, %v2845_v18  ;;  %v2895_v24 = vadd.f32 1e-06, %v2878_v62 }
 0xce1   : > { %v2882_v29 = vsel %vm2881_vm11, %v2845_v18, %v2880_v34  ;;  %4048 = vrcp.f32 %v2895_v24 }
 0xce2   : > { %v2885_v36 = vsel %vm2883_vm12, %v2884_v13, %v2882_v29 }
 0xce3   : > { %v4043_v50 = vpop.eup %4042  ;;  %v2896_v57 = vadd.f32 1e-06, %v2885_v36 }
 0xce4   : > { %v2899_v28 = vmul.f32 %v4043_v50, %v2853_v31 }
 0xce5   : > { %4050 = vrcp.f32 %v2896_v57 }
 0xce6   : > { %v4045_v39 = vpop.eup %4044  ;;  %v2914_v37 = vadd.f32 %v3199_v60, %v2899_v28 }
 0xce7   : > { %v4047_v15 = vpop.eup %4046  ;;  %v2887_v63 = vmul.f32 %v4045_v39, %v2846_v55 }
 0xce8   : > { %3670 = vmatmul.mubr.msk.f32.vlgmr.msra.gmra.mrb[60].mxu0 %vm610_vm0, %v2914_v37  ;;  %v2901_v7 = vmul.f32 %v4047_v15, %v2854_v23 }
 0xce9   : > { %v2889_v44 = vsel %vm2888_vm13, %v2846_v55, %v2887_v63  ;;  %3672 = vmatprep.mubr.msk.f32.mxu0 %vm4068_vm2, %v4069_v41 }
 0xcea   : > { %v2892_v9 = vsel %vm2890_vm14, %v2891_v40, %v2889_v44  ;;  %v2915_v8 = vadd.f32 %v3199_v60, %v2901_v7 }
 0xceb   : > { %v4049_v30 = vpop.eup %4048  ;;  %v2897_v49 = vadd.f32 1e-06, %v2892_v9 }
 0xcec   : > { %3673 = vmatmul.mubr.msk.f32.gmra.mrb[62].mxu0 %vm610_vm0, %v2915_v8  ;;  %v2903_v32 = vmul.f32 %v4049_v30, %v2855_v0 }
 0xced   : > { %3675 = vmatprep.mubr.msk.f32.mxu0 %vm4068_vm2, %v4069_v41  ;;  %4052 = vrcp.f32 %v2897_v49 }
 0xcee   : > { %v2916_v26 = vadd.f32 %v3199_v60, %v2903_v32 }
 0xcef   : > { %v4051_v27 = vpop.eup %4050 }
 0xcf0   : > { %3676 = vmatmul.mubr.msk.f32.gmra.mrb[64].mxu0 %vm610_vm0, %v2916_v26  ;;  %v2905_v35 = vmul.f32 %v4051_v27, %v2856_v20 }
 0xcf1   : > { %3678 = vmatprep.mubr.msk.f32.mxu0 %vm4068_vm2, %v4069_v41 }
 0xcf2   : > { %v2917_v21 = vadd.f32 %v3199_v60, %v2905_v35 }
 0xcf4   : > { %3679 = vmatmul.mubr.msk.f32.gmra.mrb[66].mxu0 %vm610_vm0, %v2917_v21 }
 0xcf5   : > { %3681 = vmatprep.mubr.msk.f32.mxu0 %vm4068_vm2, %v4069_v41  ;;  %vm3040_vm2 = vcmask 523264  }
 0xcf7   : > { %v4053_v51 = vpop.eup %4052 }
 0xcf8   : > { %v2907_v54 = vmul.f32 %v4053_v51, %v2857_v43 }
 0xcfa   : > { %v2918_v14 = vadd.f32 %v3199_v60, %v2907_v54 }
 0xcfc   : > { %3682 = vmatmul.mubr.msk.f32.gmra.mrb[68].mxu0 %vm610_vm0, %v2918_v14  ;;  %vm3045_vm0 = vcmask 516096  }
 0xdbb   : > { %v3011_v59 = vpop.f32.mrb[60].mxu0 }
 0xdbc   : > { %v3012_v42 = vadd.f32 %v3200_v58, %v3011_v59  ;;  %v3671_v53 = vpop.f32.mrb[61].mxu0 }
 0xdbe   : > { %v3035_v41 = vmax.f32 %v3012_v42, 0.0 }
 0xdbf   : > { %v3016_v46 = vpop.f32.mrb[62].mxu0 }
 0xdc0   : > { %3041 = vst.msk [vmem:[%s602_s24] sm:$0xff] %vm3040_vm2, %v3035_v41  ;;  %v3017_v3 = vadd.f32 %v3200_v58, %v3016_v46  ;;  %v3674_v22 = vpop.f32.mrb[63].mxu0 }
 0xdc2   : > { %v3036_v38 = vmax.f32 %v3017_v3, 0.0 }
 0xdc3   : > { %v3021_v45 = vpop.f32.mrb[64].mxu0 }
 0xdc4   : > { %3042 = vst.msk [vmem:[%s602_s24 + $0x8] sm:$0xff] %vm3040_vm2, %v3036_v38  ;;  %v3022_v18 = vadd.f32 %v3200_v58, %v3021_v45  ;;  %v3677_v47 = vpop.f32.mrb[65].mxu0 }
 0xdc6   : > { %v3037_v61 = vmax.f32 %v3022_v18, 0.0 }
 0xdc7   : > { %v3026_v5 = vpop.f32.mrb[66].mxu0 }
 0xdc8   : > { %3043 = vst.msk [vmem:[%s602_s24 + $0x10] sm:$0xff] %vm3040_vm2, %v3037_v61  ;;  %v3027_v1 = vadd.f32 %v3200_v58, %v3026_v5  ;;  %v3680_v48 = vpop.f32.mrb[67].mxu0 }
 0xdca   : > { %v3038_v11 = vmax.f32 %v3027_v1, 0.0 }
 0xdcc   : > { %3044 = vst.msk [vmem:[%s602_s24 + $0x18] sm:$0xff] %vm3040_vm2, %v3038_v11 }
 0xdcf   : > { %v3031_v2 = vpop.f32.mrb[68].mxu0 }
 0xdd0   : > { %v3032_v52 = vadd.f32 %v3200_v58, %v3031_v2  ;;  %v3683_v16 = vpop.f32.mrb[69].mxu0 }
 0xdd2   : > { %v3039_v17 = vmax.f32 %v3032_v52, 0.0 }
 0xdd4   : > { %3046 = vst.msk [vmem:[%s602_s24 + $0x20] sm:$0x1] %vm3045_vm0, %v3039_v17 }
 0xdd5 PF: > { %s29_s0 = sadd.s32 1, %s4065_s0  }
 0xdd6   : > { %p26_p4 = scmp.ge.s32.totalorder %s29_s0, 4  }
 0xdd8   :  { %28 = sbr.rel (!%p26_p4) target bundleno = 5 (0x5), region = 126 }

// kernel: dncoder_forward.5
= control target key start
LH: loop header
LB: loop body
LE: loop exit
PB: predicated region body
PF: predicated region fallthrough
CT: control target
= control target key end

     0   :  { %s4163_s0 = inlined_call_operand.vmem [shape: f32[2,17,64], index: 0, kind: input, shape index: {}]   ;;  %s4164_s1 = inlined_call_operand.vmem [shape: f32[1,64], index: 1, kind: input, shape index: {}]   ;;  %s4165_s2 = inlined_call_operand.vmem [shape: f32[1,64], index: 2, kind: input, shape index: {}]   ;;  %s4166_s3 = inlined_call_operand.vmem [shape: f32[64,192], index: 3, kind: input, shape index: {}]   ;;  %s4167_s4 = inlined_call_operand.vmem [shape: f32[1,192], index: 4, kind: input, shape index: {}]   ;;  %s4168_s5 = inlined_call_operand.vmem [shape: f32[64,64], index: 5, kind: input, shape index: {}]   ;;  %s4169_s6 = inlined_call_operand.vmem [shape: f32[1,64], index: 6, kind: input, shape index: {}]   ;;  %s4170_s7 = inlined_call_operand.vmem [shape: f32[1,64], index: 7, kind: input, shape index: {}]   ;;  %s4171_s8 = inlined_call_operand.vmem [shape: f32[1,64], index: 8, kind: input, shape index: {}]   ;;  %s4172_s9 = inlined_call_operand.vmem [shape: f32[64,256], index: 9, kind: input, shape index: {}]   ;;  %s4173_s10 = inlined_call_operand.vmem [shape: f32[1,256], index: 10, kind: input, shape index: {}]   ;;  %s4174_s11 = inlined_call_operand.vmem [shape: f32[1,256], index: 11, kind: input, shape index: {}]   ;;  %s4175_s12 = inlined_call_operand.vmem [shape: f32[1,256], index: 12, kind: input, shape index: {}]   ;;  %s4176_s13 = inlined_call_operand.vmem [shape: f32[256,64], index: 13, kind: input, shape index: {}]   ;;  %s4177_s14 = inlined_call_operand.vmem [shape: f32[1,64], index: 14, kind: input, shape index: {}]   ;;  %s4178_s15 = inlined_call_operand.vmem [shape: f32[1,64], index: 15, kind: input, shape index: {}]   ;;  %s4179_s16 = inlined_call_operand.vmem [shape: f32[1,64], index: 16, kind: input, shape index: {}]   ;;  %s4180_s17 = inlined_call_operand.vmem [shape: f32[64,32], index: 17, kind: input, shape index: {}]   ;;  %s4181_s18 = inlined_call_operand.vmem [shape: f32[1,32], index: 18, kind: input, shape index: {}]   ;;  %s4182_s19 = inlined_call_operand.vmem [shape: f32[2,17,32], index: 19, kind: output, shape index: {}]  }
   0x1   :  { %4188 = sst [smem:[#allocation2_spill]] %s4163_s0  ;;  %s3349_s0 = smov 0  }
   0x2   :  { %4189 = sst [smem:[#allocation3_spill]] %s4164_s1 }
   0x3   :  { %4190 = sst [smem:[#allocation4_spill]] %s4165_s2 }
   0x4   :  { %4191 = sst [smem:[#allocation5_spill]] %s4166_s3 }
   0x5 LB: > { %s2611_s30 = sadd.s32 4294967295, %s3237_s0   ;;  %p2615_p0 = scmp.ge.s32.totalorder %s3237_s0, 1  ;;  %s3237_s0 = sphi %s3349_s0, %s29_s0  }
   0x6   : > { %p537_p1 = scmp.lt.s32.totalorder %s3237_s0, 3 }
   0x8   : > { %p538_p2 = pnand %p2615_p0, %p537_p1 }
   0x9   : > { %p593_p3 = scmp.lt.s32.totalorder (!%p538_p2), %s2611_s30, 1  ;;  %vm608_vm0 = vcmask (!%p538_p2), 523264   ;;  %vm615_vm1 = vcmask (!%p538_p2), 516096   ;;  %s4192_s22 = sld [smem:[#allocation2_spill]] (!%p538_p2)  ;;  %v3239_v37 = vmov (!%p538_p2), 0.0   ;;  %vm3242_vm8 = vmmov (!%p538_p2), 0  }
   0xa   : > { %541 = sbr.rel (%p538_p2) target bundleno = 3496 (0xda8), region = 96  ;;  %s4193_s25 = sld [smem:[#allocation5_spill]] (!%p538_p2)  ;;  %790 = vmatprep.mubr.f32.mxu0 (!%p538_p2), %v3239_v37  ;;  %2798 = vmatprep.mubr.msk.f32.mxu1 (!%p538_p2), %vm3242_vm8, %v3239_v37  ;;  %vm827_vm9 = vcmask (!%p538_p2), 130048   ;;  %vm970_vm11 = vcmask (!%p538_p2), 1040384   ;;  %vm926_vm13 = vcmask (!%p538_p2), 138240  }
   0xb   : > { %s4194_s3 = sld [smem:[#allocation3_spill]] (!%p538_p2)  ;;  %s4195_s28 = sld [smem:[#allocation4_spill]] (!%p538_p2)  ;;  %vm3509_vm10 = vmpackc.low (!%p538_p2), %vm827_vm9, %vm827_vm9 }
   0xc   : > { %s3243_s1 = smov (!%p538_p2), 32   ;;  %s3245_s23 = smov (!%p538_p2), 112  }
   0xd   : > { %s3246_s24 = smov (!%p538_p2), 96   ;;  %s3248_s26 = smov (!%p538_p2), 80  }
  0x10   : > { %v690_v21 = vld [vmem:[%s4193_s25 + $0x8] sm:$0xff] (!%p538_p2)  ;;  %v692_v22 = vld [vmem:[%s4193_s25 + $0x18] sm:$0xff] (!%p538_p2)  ;;  %v689_v24 = vld [vmem:[%s4193_s25] sm:$0xff] (!%p538_p2) }
  0x11   : > { %s4202_s30 = smov (!%p593_p3, %s2611_s30), 1  ;;  %v2962_v23 = vpack.c.bf16 %v692_v22, %v690_v21  ;;  %v691_v25 = vld [vmem:[%s4193_s25 + $0x10] sm:$0xff]  ;;  %v694_v27 = vld [vmem:[%s4193_s25 + $0x28] sm:$0xff]  ;;  %v696_v28 = vld [vmem:[%s4193_s25 + $0x38] sm:$0xff]  ;;  %v707_v22 = vlaneseq }
  0x12   : > { %s4184_s20 = smul.u32 24, %s4202_s30  ;;  %v2964_v26 = vpack.c.bf16 %v691_v25, %v689_v24  ;;  %v2966_v29 = vpack.c.bf16 %v696_v28, %v694_v27  ;;  %v693_v30 = vld [vmem:[%s4193_s25 + $0x20] sm:$0xff]  ;;  %v695_v31 = vld [vmem:[%s4193_s25 + $0x30] sm:$0xff]  ;;  %v698_v32 = vld [vmem:[%s4193_s25 + $0x48] sm:$0xff] }
  0x13   : > { %2963 = vmatprep.subr.bf16.mxu0 %v2962_v23  ;;  %v2968_v33 = vpack.c.bf16 %v695_v31, %v693_v30  ;;  %v700_v34 = vld [vmem:[%s4193_s25 + $0x58] sm:$0xff]  ;;  %v697_v35 = vld [vmem:[%s4193_s25 + $0x40] sm:$0xff]  ;;  %v699_v36 = vld [vmem:[%s4193_s25 + $0x50] sm:$0xff] }
  0x14   : > { %s3365_s2 = scalar_lea.vmem %s4192_s22, %s4184_s20  ;;  %2965 = vmatpush1.bf16.msra.mxu0 %v2964_v26  ;;  %v2970_v38 = vpack.c.bf16 %v700_v34, %v698_v32  ;;  %v702_v39 = vld [vmem:[%s4193_s25 + $0x68] sm:$0xff]  ;;  %v704_v40 = vld [vmem:[%s4193_s25 + $0x78] sm:$0xff]  ;;  %v2972_v41 = vpack.c.bf16 %v699_v36, %v697_v35  ;;  %v701_v43 = vld [vmem:[%s4193_s25 + $0x60] sm:$0xff]  ;;  %v3240_v26 = vmov 0.0|0.0   ;;  %s3241_s20 = smov 64  }
  0x15   : > { %v603_v0 = vld [vmem:[%s3365_s2] sm:$0xff]  ;;  %v605_v1 = vld [vmem:[%s3365_s2 + $0x10] sm:$0x1]  ;;  %v604_v2 = vld [vmem:[%s3365_s2 + $0x8] sm:$0xff]  ;;  %2967 = vmatprep.subr.bf16.mxu0 %v2966_v29  ;;  %v2974_v42 = vpack.c.bf16 %v704_v40, %v702_v39  ;;  %2978 = vmatprep.subr.bf16.mxu1 %v3240_v26  ;;  %s4186_s22 = smov 48  }
  0x16   : > { %v609_v3 = vsel %vm608_vm0, %v603_v0, 0.0  ;;  %v616_v4 = vsel %vm615_vm1, %v605_v1, 0.0  ;;  %v612_v5 = vsel %vm608_vm0, %v604_v2, 0.0  ;;  %v703_v44 = vld [vmem:[%s4193_s25 + $0x70] sm:$0xff] }
  0x17   : > { %610 = vadd.xlane.f32.xlu0 %v609_v3  ;;  %617 = vadd.xlane.f32.xlu1 %v616_v4  ;;  %v2976_v45 = vpack.c.bf16 %v703_v44, %v701_v43 }
  0x18   : > { %2969 = vmatpush1.bf16.msra.mxu0 %v2968_v33 }
  0x19   : > { %2971 = vmatprep.subr.bf16.mxu0 %v2970_v38 }
  0x1b   : > { %613 = vadd.xlane.f32.xlu0 %v612_v5 }
  0x1c   : > { %2973 = vmatpush1.bf16.msra.mxu0 %v2972_v41 }
  0x1d   : > { %2975 = vmatprep.subr.bf16.mxu0 %v2974_v42 }
  0x20   : > { %2977 = vmatpush1.bf16.msra.mxu0 %v2976_v45 }
  0x21   : > { %2985 = vmatprep.subr.bf16.mxu0 %v3240_v26 }
  0xa4   : > { %v611_v6 = vpop.xlane.xlu0 %610  ;;  %v618_v7 = vpop.xlane.xlu1 %617 }
  0xa5   : > { %v620_v8 = vmul.f32 0.015625, %v611_v6  ;;  %v622_v9 = vmul.f32 0.015625, %v618_v7  ;;  %v2618_v6 = vld [vmem:[%s4194_s3] ss:$0 sm:$0xff]  ;;  %s4185_s3 = smov 16  }
  0xa7   : > { %v3373_v10 = vsub.f32 %v603_v0, %v620_v8  ;;  %v3375_v11 = vsub.f32 %v605_v1, %v622_v9  ;;  %v2619_v9 = vld [vmem:[%s4195_s28] ss:$0 sm:$0xff] }
  0xa8   : > { %v614_v12 = vpop.xlane.xlu0 %613 }
  0xa9   : > { %v621_v13 = vmul.f32 0.015625, %v614_v12  ;;  %v626_v14 = vmul.f32 %v3373_v10, %v3373_v10  ;;  %v628_v15 = vmul.f32 %v3375_v11, %v3375_v11  ;;  %v647_v7 = vmul.f32 %v2618_v6, %v3373_v10 }
  0xab   : > { %v3381_v16 = vsub.f32 %v604_v2, %v621_v13  ;;  %v629_v17 = vsel %vm608_vm0, %v626_v14, 0.0  ;;  %v635_v18 = vsel %vm615_vm1, %v628_v15, 0.0 }
  0xac   : > { %630 = vadd.xlane.f32.xlu1 %v629_v17 }
  0xad   : > { %v627_v19 = vmul.f32 %v3381_v16, %v3381_v16  ;;  %v648_v15 = vmul.f32 %v2618_v6, %v3381_v16  ;;  %v3452_v16 = vshrl.u32 %v707_v22, 7 }
  0xaf   : > { %v632_v20 = vsel %vm608_vm0, %v627_v19, 0.0  ;;  %v3455_v23 = vsub.s32 0, %v3452_v16  ;;  %v3461_v24 = vsub.s32 1, %v3452_v16 }
  0xb0   : > { %636 = vadd.xlane.f32.xlu1 %v635_v18  ;;  %633 = vadd.xlane.f32.xlu0 %v632_v20  ;;  %v649_v18 = vmul.f32 %v2618_v6, %v3375_v11  ;;  %v705_v11 = vld [vmem:[%s4167_s4] sm:$0x3] }
  0xb1   : > { %v710_v28 = vrot.slane %v705_v11, %v3455_v23  ;;  %v3467_v29 = vrot.slane %v705_v11, %v3461_v24 }
 0x139   : > { %v631_v46 = vpop.xlane.xlu1 %630 }
 0x13a   : > { %v638_v47 = vmul.f32 0.015873017, %v631_v46 }
 0x13c   : > { %3132 = vrsqrt.f32 %v638_v47  ;;  %vm652_vm2 = vcmp.eq.f32.partialorder %v638_v47, inf  ;;  %v655_v54 = vand.u32 2147483648, %v638_v47  ;;  %vm654_vm3 = vcmp.eq.f32.partialorder %v638_v47, 0.0 }
 0x13d   : > { %v637_v48 = vpop.xlane.xlu1 %636  ;;  %v634_v49 = vpop.xlane.xlu0 %633 }
 0x13e   : > { %v640_v50 = vmul.f32 0.015873017, %v637_v48  ;;  %v639_v51 = vmul.f32 0.015873017, %v634_v49 }
 0x140   : > { %3134 = vrsqrt.f32 %v640_v50  ;;  %vm666_vm4 = vcmp.eq.f32.partialorder %v640_v50, inf  ;;  %vm668_vm5 = vcmp.eq.f32.partialorder %v640_v50, 0.0  ;;  %v669_v61 = vand.u32 2147483648, %v640_v50 }
 0x141   : > { %3136 = vrsqrt.f32 %v639_v51  ;;  %vm659_vm6 = vcmp.eq.f32.partialorder %v639_v51, inf  ;;  %v662_v0 = vand.u32 2147483648, %v639_v51  ;;  %vm661_vm7 = vcmp.eq.f32.partialorder %v639_v51, 0.0 }
 0x146   : > { %v3133_v52 = vpop.eup %3132 }
 0x147   : > { %v651_v53 = vmul.f32 %v3133_v52, %v638_v47 }
 0x149   : > { %v653_v55 = vsel %vm652_vm2, %v638_v47, %v651_v53  ;;  %vm933_vm2 = vcmask 131072  }
 0x14a   : > { %v3135_v56 = vpop.eup %3134  ;;  %v656_v57 = vsel %vm654_vm3, %v655_v54, %v653_v55  ;;  %vm1821_vm3 = vcmask 261120  }
 0x14b   : > { %v3137_v58 = vpop.eup %3136  ;;  %v665_v59 = vmul.f32 %v3135_v56, %v640_v50  ;;  %v671_v60 = vadd.f32 1e-06, %v656_v57 }
 0x14c   : > { %v658_v62 = vmul.f32 %v3137_v58, %v639_v51 }
 0x14d   : > { %v667_v63 = vsel %vm666_vm4, %v640_v50, %v665_v59  ;;  %3138 = vrcp.f32 %v671_v60  ;;  %vm1825_vm4 = vcmask 392192  }
 0x14e   : > { %v670_v1 = vsel %vm668_vm5, %v669_v61, %v667_v63  ;;  %v660_v2 = vsel %vm659_vm6, %v639_v51, %v658_v62 }
 0x14f   : > { %v663_v3 = vsel %vm661_vm7, %v662_v0, %v660_v2  ;;  %v673_v4 = vadd.f32 1e-06, %v670_v1 }
 0x150   : > { %v672_v5 = vadd.f32 1e-06, %v663_v3 }
 0x151   : > { %3140 = vrcp.f32 %v673_v4 }
 0x152   : > { %3142 = vrcp.f32 %v672_v5 }
 0x157   : > { %v3139_v8 = vpop.eup %3138 }
 0x158   : > { %v675_v12 = vmul.f32 %v3139_v8, %v647_v7 }
 0x15a   : > { %v686_v13 = vadd.f32 %v2619_v9, %v675_v12  ;;  %v3579_v12 = vand.u32 127, %v707_v22 }
 0x15b   : > { %v3141_v14 = vpop.eup %3140 }
 0x15c   : > { %v3143_v17 = vpop.eup %3142  ;;  %2620 = vmatmul.mubr.msk.f32.vlgmr.msra.gmra.mrb[0].mxu0 %vm608_vm0, %v686_v13  ;;  %v679_v10 = vmul.f32 %v3141_v14, %v649_v18  ;;  %vm815_vm12 = vcmp.gt.s32.totalorder %v3579_v12, %v3452_v16 }
 0x15d   : > { %796 = vmatprep.mubr.f32.mxu0 %v3239_v37  ;;  %v677_v19 = vmul.f32 %v3143_v17, %v648_v15 }
 0x15e   : > { %v688_v21 = vadd.f32 %v2619_v9, %v679_v10 }
 0x15f   : > { %v687_v20 = vadd.f32 %v2619_v9, %v677_v19 }
 0x161   : > { %2621 = vmatmul.mubr.msk.f32.gmra.mrb[2].mxu0 %vm608_vm0, %v687_v20  ;;  %v3591_v20 = vadd.s32 8, %v3452_v16 }
 0x162   : > { %802 = vmatprep.mubr.f32.mxu0 %v3239_v37 }
 0x163   : > { %vm816_vm14 = vcmp.gt.s32.totalorder %v3579_v12, %v3591_v20 }
 0x165   : > { %2622 = vmatmul.mubr.msk.f32.gmra.mrb[4].mxu0 %vm608_vm0, %v688_v21 }
 0x166   : > { %2828 = vmatprep.mubr.msk.f32.mxu0 %vm3242_vm8, %v3239_v37 }
 0x22f   : > { %v792_v25 = vpop.f32.mrb[0].mxu0 }
 0x230   : > { %v794_v27 = vpop.f32.mrb[1].mxu0  ;;  %v793_v31 = vadd.f32 %v792_v25, %v710_v28 }
 0x231   : > { %v795_v34 = vadd.f32 %v794_v27, %v3467_v29 }
 0x234   : > { %v798_v30 = vpop.f32.mrb[2].mxu0 }
 0x235   : > { %v3469_v32 = vadd.f32 %v798_v30, %v710_v28  ;;  %v800_v33 = vpop.f32.mrb[3].mxu0 }
 0x236   : > { %v801_v35 = vadd.f32 %v800_v33, %v3467_v29 }
 0x237   : > { %v3097_v36 = vpack.i.bf16 %v3469_v32, %v793_v31 }
 0x238   : > { %v804_v38 = vpop.f32.mrb[4].mxu0  ;;  %v2983_v39 = vpack.c.bf16 %v801_v35, %v795_v34  ;;  %v3474_v40 = vpack.i.bf16 %v801_v35, %v795_v34 }
 0x239   : > { %v3476_v41 = vadd.f32 %v804_v38, %v710_v28  ;;  %v806_v42 = vpop.f32.mrb[5].mxu0  ;;  %3098 = vrot.lane.b32.xlu0 %v3097_v36, %s3241_s20  ;;  %v812_v28 = vadd.s32 16, %v3452_v16 }
 0x23a   : > { %v3526_v58 = vadd.f32 %v806_v42, %v3467_v29 }
 0x23b   : > { %825 = vrot.lane.b32.xlu1 %v3476_v41, %s3241_s20  ;;  %vm817_vm15 = vcmp.gt.s32.totalorder %v3579_v12, %v812_v28 }
 0x23d   : > { %3108 = vrot.lane.b32.xlu0 %v3097_v36, %s3243_s1 }
 0x23f   : > { %3103 = vrot.lane.b32.xlu1 %v3097_v36, %s4186_s22 }
 0x241   : > { %1056 = vrot.lane.b32.xlu0 %v3469_v32, %s3245_s23 }
 0x243   : > { %1064 = vrot.lane.b32.xlu1 %v3476_v41, %s4186_s22  ;;  %s4198_s22 = smov 48  }
 0x245   : > { %1308 = vrot.lane.b32.xlu0 %v3476_v41, %s3243_s1 }
 0x247   : > { %1054 = vrot.lane.b32.xlu1 %v793_v31, %s3245_s23 }
 0x249   : > { %1298 = vrot.lane.b32.xlu0 %v793_v31, %s3246_s24 }
 0x24b   : > { %1058 = vrot.lane.b32.xlu1 %v3476_v41, %s3245_s23 }
 0x24d   : > { %1302 = vrot.lane.b32.xlu0 %v3476_v41, %s3246_s24 }
 0x24f   : > { %3113 = vrot.lane.b32.xlu1 %v3097_v36, %s4185_s3 }
 0x251   : > { %1540 = vrot.lane.b32.xlu0 %v793_v31, %s3248_s26 }
 0x253   : > { %1300 = vrot.lane.b32.xlu1 %v3469_v32, %s3246_s24 }
 0x255   : > { %1544 = vrot.lane.b32.xlu0 %v3476_v41, %s3248_s26 }
 0x257   : > { %1550 = vrot.lane.b32.xlu1 %v3476_v41, %s4185_s3 }
 0x25b   : > { %1542 = vrot.lane.b32.xlu1 %v3469_v32, %s3248_s26 }
 0x2ab   : > { %v3099_v43 = vpop.permute.xlu0 %3098 }
 0x2ac   : > { %v3101_v44 = vunpack.i.h.bf16 %v3099_v43  ;;  %v3100_v45 = vunpack.i.l.bf16 %v3099_v43 }
 0x2ad   : > { %v826_v46 = vpop.permute.xlu1 %825 }
 0x2ae   : > { %v2979_v48 = vpack.c.bf16 %v3101_v44, %v3100_v45 }
 0x2af   : > { %v3109_v54 = vpop.permute.xlu0 %3108 }
 0x2b0   : > { %2981 = vmatpush3.bf16.xpose.msk.msra.mxu1 %vm3509_vm10, %v2979_v48  ;;  %v3111_v56 = vunpack.i.h.bf16 %v3109_v54  ;;  %v3110_v57 = vunpack.i.l.bf16 %v3109_v54 }
 0x2b1   : > { %v3104_v49 = vpop.permute.xlu1 %3103  ;;  %2796 = vmatprep.subr.mxu1 %v3239_v37 }
 0x2b2   : > { %v3106_v50 = vunpack.i.h.bf16 %v3104_v49  ;;  %v3105_v51 = vunpack.i.l.bf16 %v3104_v49  ;;  %v2993_v60 = vpack.c.bf16 %v3111_v56, %v3110_v57 }
 0x2b3   : > { %v1057_v61 = vpop.permute.xlu0 %1056 }
 0x2b4   : > { %v2986_v52 = vpack.c.bf16 %v3106_v50, %v3105_v51 }
 0x2b5   : > { %v1065_v53 = vpop.permute.xlu1 %1064 }
 0x2b6   : > { %2988 = vmatpush3.bf16.xpose.msk.msra.mxu0 %vm3509_vm10, %v2986_v52 }
 0x2b7   : > { %2826 = vmatprep.subr.mxu0 %v3239_v37  ;;  %v1309_v63 = vpop.permute.xlu0 %1308 }
 0x2b8   : > { %2797 = vmatpush3.xpose.msk.msra.mxu1 %vm827_vm9, %v826_v46 }
 0x2b9   : > { %v1055_v55 = vpop.permute.xlu1 %1054  ;;  %2982 = vmatprep.subr.bf16.mxu1 %v3240_v26 }
 0x2bb   : > { %2799 = vmatmul.mubr.msk.f32.vlgmr.msra.gmra.mrb[0].mxu1 %vm827_vm9, %v793_v31  ;;  %v1299_v2 = vpop.permute.xlu0 %1298 }
 0x2bc   : > { %2984 = vmatpush3.bf16.msra.mxu1 %v2983_v39  ;;  %2801 = vmatprep.mubr.msk.f32.mxu1 %vm3242_vm8, %v3239_v37 }
 0x2bd   : > { %2811 = vmatprep.subr.mxu1 %v3239_v37  ;;  %v1059_v59 = vpop.permute.xlu1 %1058 }
 0x2be   : > { %2827 = vmatpush3.xpose.msk.msra.mxu0 %vm827_vm9, %v1065_v53 }
 0x2bf   : > { %2802 = vmatmul.mubr.msk.f32.gmra.mrb[2].mxu1 %vm827_vm9, %v3469_v32  ;;  %2992 = vmatprep.subr.bf16.mxu0 %v3240_v26  ;;  %v1303_v5 = vpop.permute.xlu0 %1302 }
 0x2c0   : > { %2812 = vmatpush3.msk.msra.mxu1 %vm970_vm11, %v3526_v58  ;;  %2804 = vmatprep.mubr.msk.f32.mxu1 %vm3242_vm8, %v3239_v37 }
 0x2c1   : > { %2829 = vmatmul.mubr.msk.f32.vlgmr.msra.gmra.mrb[6].mxu0 %vm827_vm9, %v1055_v55  ;;  %2989 = vmatprep.subr.bf16.mxu1 %v3240_v26  ;;  %v3114_v62 = vpop.permute.xlu1 %3113 }
 0x2c2   : > { %2995 = vmatpush3.bf16.xpose.msk.msra.mxu0 %vm3509_vm10, %v2993_v60  ;;  %2831 = vmatprep.mubr.msk.f32.mxu0 %vm3242_vm8, %v3239_v37  ;;  %v3116_v0 = vunpack.i.h.bf16 %v3114_v62  ;;  %v3115_v1 = vunpack.i.l.bf16 %v3114_v62 }
 0x2c3   : > { %2805 = vmatmul.mubr.msk.f32.gmra.mrb[4].mxu1 %vm827_vm9, %v3476_v41  ;;  %2856 = vmatprep.subr.mxu0 %v3239_v37  ;;  %v1541_v7 = vpop.permute.xlu0 %1540 }
 0x2c4   : > { %2813 = vmatprep.mubr.msk.f32.mxu1 %vm3242_vm8, %v3239_v37  ;;  %v3000_v3 = vpack.c.bf16 %v3116_v0, %v3115_v1 }
 0x2c5   : > { %2832 = vmatmul.mubr.msk.f32.gmra.mrb[8].mxu0 %vm827_vm9, %v1057_v61  ;;  %v1301_v4 = vpop.permute.xlu1 %1300 }
 0x2c6   : > { %2834 = vmatprep.mubr.msk.f32.mxu0 %vm3242_vm8, %v3239_v37 }
 0x2c7   : > { %v1545_v9 = vpop.permute.xlu0 %1544 }
 0x2c9   : > { %2835 = vmatmul.mubr.msk.f32.gmra.mrb[10].mxu0 %vm827_vm9, %v1059_v59  ;;  %v1551_v6 = vpop.permute.xlu1 %1550 }
 0x2ca   : > { %2857 = vmatpush3.xpose.msk.msra.mxu0 %vm827_vm9, %v1309_v63  ;;  %2858 = vmatprep.mubr.msk.f32.mxu0 %vm3242_vm8, %v3239_v37 }
 0x2cb   : > { %2999 = vmatprep.subr.bf16.mxu0 %v3240_v26 }
 0x2cd   : > { %2859 = vmatmul.mubr.msk.f32.vlgmr.msra.gmra.mrb[12].mxu0 %vm827_vm9, %v1299_v2  ;;  %v1543_v8 = vpop.permute.xlu1 %1542 }
 0x2ce   : > { %3002 = vmatpush3.bf16.xpose.msk.msra.mxu0 %vm3509_vm10, %v3000_v3  ;;  %2861 = vmatprep.mubr.msk.f32.mxu0 %vm3242_vm8, %v3239_v37 }
 0x2cf   : > { %2886 = vmatprep.subr.mxu0 %v3239_v37 }
 0x2d1   : > { %2862 = vmatmul.mubr.msk.f32.gmra.mrb[14].mxu0 %vm827_vm9, %v1301_v4 }
 0x2d2   : > { %2864 = vmatprep.mubr.msk.f32.mxu0 %vm3242_vm8, %v3239_v37 }
 0x2d5   : > { %2865 = vmatmul.mubr.msk.f32.gmra.mrb[16].mxu0 %vm827_vm9, %v1303_v5 }
 0x2d6   : > { %2887 = vmatpush3.xpose.msk.msra.mxu0 %vm827_vm9, %v1551_v6  ;;  %2888 = vmatprep.mubr.msk.f32.mxu0 %vm3242_vm8, %v3239_v37 }
 0x2d7   : > { %3006 = vmatprep.subr.bf16.mxu0 %v3240_v26 }
 0x2d9   : > { %2889 = vmatmul.mubr.msk.f32.vlgmr.msra.gmra.mrb[18].mxu0 %vm827_vm9, %v1541_v7 }
 0x2da   : > { %2891 = vmatprep.mubr.msk.f32.mxu0 %vm3242_vm8, %v3239_v37 }
 0x2dd   : > { %2892 = vmatmul.mubr.msk.f32.gmra.mrb[20].mxu0 %vm827_vm9, %v1543_v8 }
 0x2de   : > { %2894 = vmatprep.mubr.msk.f32.mxu0 %vm3242_vm8, %v3239_v37 }
 0x2e1   : > { %2895 = vmatmul.mubr.msk.f32.gmra.mrb[22].mxu0 %vm827_vm9, %v1545_v9 }
 0x2e2   : > { %2928 = vmatprep.mubr.msk.f32.mxu0 %vm3242_vm8, %v3239_v37 }
 0x38e   : > { %v906_v13 = vpop.f32.mrb[0].mxu1 }
 0x38f   : > { %v920_v14 = vmul.f32 0.25, %v906_v13  ;;  %v2800_v15 = vpop.f32.mrb[1].mxu1 }
 0x391   : > { %v3586_v17 = vsel %vm815_vm12, %v920_v14, -1e+09 }
 0x392   : > { %v911_v18 = vpop.f32.mrb[2].mxu1  ;;  %v927_v19 = vsel %vm926_vm13, %v3586_v17, -inf }
 0x393   : > { %928 = vmax.xlane.f32.xlu1 %v927_v19  ;;  %v2803_v10 = vpop.f32.mrb[3].mxu1  ;;  %v921_v22 = vmul.f32 0.25, %v911_v18 }
 0x394   : > { %v1144_v21 = vpop.f32.mrb[6].mxu0 }
 0x395   : > { %v1158_v11 = vmul.f32 0.25, %v1144_v21  ;;  %v2830_v25 = vpop.f32.mrb[7].mxu0  ;;  %v3606_v36 = vsel %vm816_vm14, %v921_v22, -1e+09 }
 0x396   : > { %v916_v27 = vpop.f32.mrb[4].mxu1  ;;  %v930_v42 = vsel %vm926_vm13, %v3606_v36, -inf }
 0x397   : > { %v2806_v29 = vpop.f32.mrb[5].mxu1  ;;  %v3599_v30 = vsel %vm815_vm12, %v1158_v11, -1e+09  ;;  %v922_v33 = vmul.f32 0.25, %v916_v27 }
 0x398   : > { %v1149_v31 = vpop.f32.mrb[8].mxu0  ;;  %v1164_v32 = vsel %vm926_vm13, %v3599_v30, -inf }
 0x399   : > { %v1159_v34 = vmul.f32 0.25, %v1149_v31  ;;  %1165 = vmax.xlane.f32.xlu0 %v1164_v32  ;;  %v2833_v35 = vpop.f32.mrb[9].mxu0  ;;  %v3620_v45 = vsel %vm817_vm15, %v922_v33, -1e+09 }
 0x39a   : > { %v934_v47 = vsel %vm933_vm2, %v3620_v45, -inf }
 0x39b   : > { %v3612_v38 = vsel %vm816_vm14, %v1159_v34, -1e+09 }
 0x39c   : > { %v1154_v39 = vpop.f32.mrb[10].mxu0  ;;  %v1167_v41 = vsel %vm926_vm13, %v3612_v38, -inf }
 0x39d   : > { %v1160_v43 = vmul.f32 0.25, %v1154_v39  ;;  %v2836_v44 = vpop.f32.mrb[11].mxu0  ;;  %1168 = vmax.xlane.f32.xlu1 %v1167_v41  ;;  %931 = vmax.xlane.f32.xlu0 %v930_v42 }
 0x39f   : > { %v3626_v50 = vsel %vm817_vm15, %v1160_v43, -1e+09 }
 0x3a0   : > { %v1388_v46 = vpop.f32.mrb[12].mxu0  ;;  %v1170_v54 = vsel %vm933_vm2, %v3626_v50, -inf }
 0x3a1   : > { %v1402_v48 = vmul.f32 0.25, %v1388_v46  ;;  %v2860_v49 = vpop.f32.mrb[13].mxu0  ;;  %935 = vmax.xlane.f32.xlu0 %v934_v47 }
 0x3a3   : > { %v3631_v51 = vsel %vm815_vm12, %v1402_v48, -1e+09 }
 0x3a4   : > { %v1393_v52 = vpop.f32.mrb[14].mxu0  ;;  %v1408_v53 = vsel %vm926_vm13, %v3631_v51, -inf }
 0x3a5   : > { %v1403_v55 = vmul.f32 0.25, %v1393_v52  ;;  %v2863_v56 = vpop.f32.mrb[15].mxu0  ;;  %1409 = vmax.xlane.f32.xlu1 %v1408_v53  ;;  %1171 = vmax.xlane.f32.xlu0 %v1170_v54 }
 0x3a7   : > { %v3640_v57 = vsel %vm816_vm14, %v1403_v55, -1e+09 }
 0x3a8   : > { %v1398_v59 = vpop.f32.mrb[16].mxu0  ;;  %v1411_v60 = vsel %vm926_vm13, %v3640_v57, -inf }
 0x3a9   : > { %v1404_v61 = vmul.f32 0.25, %v1398_v59  ;;  %v2866_v62 = vpop.f32.mrb[17].mxu0  ;;  %1412 = vmax.xlane.f32.xlu0 %v1411_v60 }
 0x3ab   : > { %v3646_v63 = vsel %vm817_vm15, %v1404_v61, -1e+09 }
 0x3ac   : > { %v1630_v0 = vpop.f32.mrb[18].mxu0  ;;  %v1414_v1 = vsel %vm933_vm2, %v3646_v63, -inf }
 0x3ad   : > { %v1644_v2 = vmul.f32 0.25, %v1630_v0  ;;  %v2890_v3 = vpop.f32.mrb[19].mxu0  ;;  %1415 = vmax.xlane.f32.xlu1 %v1414_v1 }
 0x3af   : > { %v3653_v4 = vsel %vm815_vm12, %v1644_v2, -1e+09 }
 0x3b0   : > { %v1635_v5 = vpop.f32.mrb[20].mxu0  ;;  %v1650_v6 = vsel %vm926_vm13, %v3653_v4, -inf }
 0x3b1   : > { %v1645_v7 = vmul.f32 0.25, %v1635_v5  ;;  %v2893_v8 = vpop.f32.mrb[21].mxu0  ;;  %1651 = vmax.xlane.f32.xlu0 %v1650_v6 }
 0x3b3   : > { %v3660_v9 = vsel %vm816_vm14, %v1645_v7, -1e+09 }
 0x3b4   : > { %v1640_v13 = vpop.f32.mrb[22].mxu0  ;;  %v1653_v14 = vsel %vm926_vm13, %v3660_v9, -inf }
 0x3b5   : > { %v1646_v15 = vmul.f32 0.25, %v1640_v13  ;;  %v2896_v16 = vpop.f32.mrb[23].mxu0  ;;  %1654 = vmax.xlane.f32.xlu1 %v1653_v14 }
 0x3b7   : > { %v3666_v18 = vsel %vm817_vm15, %v1646_v15, -1e+09 }
 0x3b8   : > { %v1656_v19 = vsel %vm933_vm2, %v3666_v18, -inf }
 0x3c6   : > { %3118 = vrot.lane.b32.xlu1 %v3474_v40, %s3245_s23 }
 0x3c7   : > { %1203 = vrot.lane.b32.xlu0 %v3526_v58, %s3245_s23 }
 0x3e6   : > { %1657 = vmax.xlane.f32.xlu0 %v1656_v19 }
 0x420   : > { %v929_v20 = vpop.xlane.xlu1 %928 }
 0x421   : > { %v937_v10 = vsub.f32 %v3586_v17, %v929_v20 }
 0x423   : > { %v940_v21 = vmul.f32 1.442695, %v937_v10 }
 0x425   : > { %3144 = vpow2.f32 %v940_v21 }
 0x426   : > { %v1166_v22 = vpop.xlane.xlu0 %1165 }
 0x427   : > { %v1173_v12 = vsub.f32 %v3599_v30, %v1166_v22 }
 0x429   : > { %v1176_v11 = vmul.f32 1.442695, %v1173_v12 }
 0x42a   : > { %v1169_v25 = vpop.xlane.xlu1 %1168  ;;  %v932_v27 = vpop.xlane.xlu0 %931 }
 0x42b   : > { %3146 = vpow2.f32 %v1176_v11  ;;  %v1174_v28 = vsub.f32 %v3612_v38, %v1169_v25  ;;  %v938_v29 = vsub.f32 %v3606_v36, %v932_v27 }
 0x42d   : > { %v1178_v31 = vmul.f32 1.442695, %v1174_v28  ;;  %v942_v32 = vmul.f32 1.442695, %v938_v29 }
 0x42e   : > { %v936_v33 = vpop.xlane.xlu0 %935 }
 0x42f   : > { %v3678_v34 = vpop.eup %3144  ;;  %3148 = vpow2.f32 %v1178_v31  ;;  %v939_v17 = vsub.f32 %v3620_v45, %v936_v33 }
 0x430   : > { %3150 = vpow2.f32 %v942_v32  ;;  %v946_v30 = vsel %vm926_vm13, %v3678_v34, 0.0 }
 0x431   : > { %v944_v35 = vmul.f32 1.442695, %v939_v17  ;;  %947 = vadd.xlane.f32.xlu1 %v946_v30 }
 0x432   : > { %v1172_v46 = vpop.xlane.xlu0 %1171  ;;  %v1410_v47 = vpop.xlane.xlu1 %1409 }
 0x433   : > { %3152 = vpow2.f32 %v944_v35  ;;  %v1175_v48 = vsub.f32 %v3626_v50, %v1172_v46  ;;  %v1417_v53 = vsub.f32 %v3631_v51, %v1410_v47 }
 0x435   : > { %v3683_v39 = vpop.eup %3146  ;;  %v1180_v54 = vmul.f32 1.442695, %v1175_v48  ;;  %v1420_v59 = vmul.f32 1.442695, %v1417_v53 }
 0x436   : > { %v1182_v36 = vsel %vm926_vm13, %v3683_v39, 0.0  ;;  %v1413_v52 = vpop.xlane.xlu0 %1412 }
 0x437   : > { %1183 = vadd.xlane.f32.xlu0 %v1182_v36  ;;  %v1418_v55 = vsub.f32 %v3640_v57, %v1413_v52  ;;  %3154 = vpow2.f32 %v1180_v54 }
 0x438   : > { %3156 = vpow2.f32 %v1420_v59 }
 0x439   : > { %v3687_v38 = vpop.eup %3148  ;;  %v1422_v61 = vmul.f32 1.442695, %v1418_v55 }
 0x43a   : > { %v3689_v41 = vpop.eup %3150  ;;  %v1185_v42 = vsel %vm926_vm13, %v3687_v38, 0.0  ;;  %v1416_v49 = vpop.xlane.xlu1 %1415 }
 0x43b   : > { %1186 = vadd.xlane.f32.xlu1 %v1185_v42  ;;  %v949_v43 = vsel %vm926_vm13, %v3689_v41, 0.0  ;;  %v1419_v62 = vsub.f32 %v3646_v63, %v1416_v49  ;;  %3158 = vpow2.f32 %v1422_v61 }
 0x43c   : > { %950 = vadd.xlane.f32.xlu0 %v949_v43 }
 0x43d   : > { %v3695_v44 = vpop.eup %3152  ;;  %v1424_v50 = vmul.f32 1.442695, %v1419_v62 }
 0x43e   : > { %v952_v45 = vsel %vm933_vm2, %v3695_v44, 0.0  ;;  %v1652_v0 = vpop.xlane.xlu0 %1651 }
 0x43f   : > { %953 = vadd.xlane.f32.xlu1 %v952_v45  ;;  %v1659_v2 = vsub.f32 %v3653_v4, %v1652_v0 }
 0x441   : > { %v1662_v51 = vmul.f32 1.442695, %v1659_v2  ;;  %v3709_v3 = vpop.eup %3154 }
 0x442   : > { %v1655_v56 = vpop.xlane.xlu1 %1654  ;;  %v1204_v57 = vpop.permute.xlu0 %1203  ;;  %v1188_v6 = vsel %vm933_vm2, %v3709_v3, 0.0 }
 0x443   : > { %v1660_v60 = vsub.f32 %v3660_v9, %v1655_v56  ;;  %v3711_v5 = vpop.eup %3156 }
 0x444   : > { %v1426_v8 = vsel %vm926_vm13, %v3711_v5, 0.0 }
 0x445   : > { %v1664_v1 = vmul.f32 1.442695, %v1660_v60  ;;  %v3715_v63 = vpop.eup %3158 }
 0x446   : > { %v1429_v13 = vsel %vm926_vm13, %v3715_v63, 0.0  ;;  %v3119_v22 = vpop.permute.xlu1 %3118 }
 0x447   : > { %3160 = vpow2.f32 %v1664_v1  ;;  %v3121_v25 = vunpack.i.h.bf16 %v3119_v22  ;;  %v3120_v27 = vunpack.i.l.bf16 %v3119_v22 }
 0x448   : > { %3162 = vpow2.f32 %v1424_v50 }
 0x449   : > { %3164 = vpow2.f32 %v1662_v51  ;;  %v2990_v33 = vpack.c.bf16 %v3121_v25, %v3120_v27  ;;  %v1831_v25 = vld [vmem:[%s4168_s5 + $0x10] sm:$0xff]  ;;  %v1832_v27 = vld [vmem:[%s4168_s5 + $0x18] sm:$0xff] }
 0x450   : > { %1445 = vrot.lane.b32.xlu1 %v3526_v58, %s3246_s24 }
 0x451   : > { %v3719_v4 = vpop.eup %3160 }
 0x452   : > { %3123 = vrot.lane.b32.xlu0 %v3474_v40, %s3246_s24  ;;  %v3724_v14 = vpop.eup %3162  ;;  %v1671_v16 = vsel %vm926_vm13, %v3719_v4, 0.0 }
 0x453   : > { %v1432_v19 = vsel %vm933_vm2, %v3724_v14, 0.0  ;;  %v3730_v20 = vpop.eup %3164 }
 0x471   : > { %1189 = vadd.xlane.f32.xlu0 %v1188_v6 }
 0x473   : > { %v1658_v7 = vpop.xlane.xlu0 %1657 }
 0x474   : > { %v1661_v9 = vsub.f32 %v3666_v18, %v1658_v7  ;;  %1427 = vadd.xlane.f32.xlu1 %v1426_v8  ;;  %v1668_v18 = vsel %vm926_vm13, %v3730_v20, 0.0 }
 0x475   : > { %1430 = vadd.xlane.f32.xlu0 %v1429_v13 }
 0x476   : > { %v1666_v15 = vmul.f32 1.442695, %v1661_v9 }
 0x478   : > { %3166 = vpow2.f32 %v1666_v15  ;;  %1672 = vadd.xlane.f32.xlu1 %v1671_v16 }
 0x479   : > { %1433 = vadd.xlane.f32.xlu0 %v1432_v19 }
 0x47d   : > { %1669 = vadd.xlane.f32.xlu0 %v1668_v18 }
 0x482   : > { %v3734_v10 = vpop.eup %3166 }
 0x483   : > { %v1674_v21 = vsel %vm933_vm2, %v3734_v10, 0.0 }
 0x484   : > { %1675 = vadd.xlane.f32.xlu0 %v1674_v21 }
 0x489   : > { %1687 = vrot.lane.b32.xlu1 %v3526_v58, %s3248_s26 }
 0x49a   : > { %3128 = vrot.lane.b32.xlu0 %v3474_v40, %s3248_s26 }
 0x4be   : > { %v948_v12 = vpop.xlane.xlu1 %947 }
 0x4bf   : > { %3168 = vrcp.f32 %v948_v12  ;;  %v1830_v12 = vld [vmem:[%s4168_s5 + $0x8] sm:$0xff] }
 0x4c4   : > { %v1184_v11 = vpop.xlane.xlu0 %1183 }
 0x4c8   : > { %v1187_v28 = vpop.xlane.xlu1 %1186 }
 0x4c9   : > { %v3169_v29 = vpop.eup %3168  ;;  %v951_v31 = vpop.xlane.xlu0 %950 }
 0x4ca   : > { %v958_v32 = vmul.f32 %v3169_v29, %v3678_v34  ;;  %3170 = vrcp.f32 %v951_v31  ;;  %v3010_v29 = vpack.c.bf16 %v1832_v27, %v1831_v25  ;;  %v1834_v31 = vld [vmem:[%s4168_s5 + $0x28] sm:$0xff] }
 0x4cc   : > { %2814 = vmatmul.mubr.msk.f32.vlgmr.msra.gmra.mrb[6].mxu1 %vm926_vm13, %v958_v32  ;;  %v954_v17 = vpop.xlane.xlu1 %953 }
 0x4cd   : > { %2991 = vmatpush3.bf16.msra.mxu1 %v2990_v33  ;;  %3172 = vrcp.f32 %v954_v17  ;;  %2816 = vmatprep.mubr.msk.f32.mxu1 %vm3242_vm8, %v3239_v37  ;;  %v3124_v30 = vpop.permute.xlu0 %3123  ;;  %v1835_v17 = vld [vmem:[%s4168_s5 + $0x30] sm:$0xff] }
 0x4ce   : > { %2841 = vmatprep.subr.mxu1 %v3239_v37  ;;  %3174 = vrcp.f32 %v1184_v11  ;;  %v3126_v42 = vunpack.i.h.bf16 %v3124_v30  ;;  %v3125_v43 = vunpack.i.l.bf16 %v3124_v30 }
 0x4cf   : > { %3176 = vrcp.f32 %v1187_v28  ;;  %v1833_v28 = vld [vmem:[%s4168_s5 + $0x20] sm:$0xff] }
 0x4d0   : > { %v2997_v46 = vpack.c.bf16 %v3126_v42, %v3125_v43  ;;  %v1446_v47 = vpop.permute.xlu1 %1445  ;;  %v3013_v32 = vpack.c.bf16 %v1834_v31, %v1833_v28 }
 0x4d1   : > { %2842 = vmatpush3.msk.msra.mxu1 %vm970_vm11, %v1204_v57 }
 0x4d2   : > { %2996 = vmatprep.subr.bf16.mxu1 %v3240_v26 }
 0x4d4   : > { %v3171_v40 = vpop.eup %3170 }
 0x4d5   : > { %v959_v58 = vmul.f32 %v3171_v40, %v3689_v41  ;;  %v1836_v40 = vld [vmem:[%s4168_s5 + $0x38] sm:$0xff] }
 0x4d7   : > { %v3173_v34 = vpop.eup %3172  ;;  %2817 = vmatmul.mubr.msk.f32.gmra.mrb[8].mxu1 %vm926_vm13, %v959_v58 }
 0x4d8   : > { %2819 = vmatprep.mubr.msk.f32.mxu1 %vm3242_vm8, %v3239_v37  ;;  %v960_v35 = vmul.f32 %v3173_v34, %v3695_v44  ;;  %v3175_v36 = vpop.eup %3174  ;;  %v3016_v34 = vpack.c.bf16 %v1836_v40, %v1835_v17 }
 0x4d9   : > { %v1194_v45 = vmul.f32 %v3175_v36, %v3683_v39  ;;  %v3177_v41 = vpop.eup %3176 }
 0x4da   : > { %v1195_v44 = vmul.f32 %v3177_v41, %v3687_v38 }
 0x4db   : > { %2820 = vmatmul.mubr.msk.f32.gmra.mrb[10].mxu1 %vm926_vm13, %v960_v35 }
 0x4dc   : > { %2843 = vmatprep.mubr.msk.f32.mxu1 %vm3242_vm8, %v3239_v37 }
 0x4df   : > { %2844 = vmatmul.mubr.msk.f32.vlgmr.msra.gmra.mrb[12].mxu1 %vm926_vm13, %v1194_v45 }
 0x4e0   : > { %2998 = vmatpush3.bf16.msra.mxu1 %v2997_v46  ;;  %2846 = vmatprep.mubr.msk.f32.mxu1 %vm3242_vm8, %v3239_v37 }
 0x4e1   : > { %2871 = vmatprep.subr.mxu1 %v3239_v37 }
 0x4e3   : > { %2847 = vmatmul.mubr.msk.f32.gmra.mrb[14].mxu1 %vm926_vm13, %v1195_v44 }
 0x4e4   : > { %2872 = vmatpush3.msk.msra.mxu1 %vm970_vm11, %v1446_v47  ;;  %2849 = vmatprep.mubr.msk.f32.mxu1 %vm3242_vm8, %v3239_v37 }
 0x4e5   : > { %3003 = vmatprep.subr.bf16.mxu1 %v3240_v26 }
 0x4fe   : > { %v1190_v39 = vpop.xlane.xlu0 %1189 }
 0x4ff   : > { %3178 = vrcp.f32 %v1190_v39 }
 0x501   : > { %v1428_v48 = vpop.xlane.xlu1 %1427 }
 0x502   : > { %3180 = vrcp.f32 %v1428_v48  ;;  %v1431_v49 = vpop.xlane.xlu0 %1430 }
 0x503   : > { %3182 = vrcp.f32 %v1431_v49 }
 0x505   : > { %v1673_v60 = vpop.xlane.xlu1 %1672 }
 0x506   : > { %v1434_v52 = vpop.xlane.xlu0 %1433 }
 0x507   : > { %3184 = vrcp.f32 %v1434_v52 }
 0x509   : > { %v3179_v53 = vpop.eup %3178 }
 0x50a   : > { %v1196_v38 = vmul.f32 %v3179_v53, %v3709_v3  ;;  %v1670_v56 = vpop.xlane.xlu0 %1669 }
 0x50b   : > { %3186 = vrcp.f32 %v1670_v56 }
 0x50c   : > { %v3181_v54 = vpop.eup %3180  ;;  %2850 = vmatmul.mubr.msk.f32.gmra.mrb[16].mxu1 %vm926_vm13, %v1196_v38  ;;  %3188 = vrcp.f32 %v1673_v60 }
 0x50d   : > { %v1438_v55 = vmul.f32 %v3181_v54, %v3711_v5  ;;  %2873 = vmatprep.mubr.msk.f32.mxu1 %vm3242_vm8, %v3239_v37  ;;  %v3183_v59 = vpop.eup %3182  ;;  %v1688_v5 = vpop.permute.xlu1 %1687 }
 0x50e   : > { %v1439_v62 = vmul.f32 %v3183_v59, %v3715_v63 }
 0x510   : > { %2874 = vmatmul.mubr.msk.f32.vlgmr.msra.gmra.mrb[18].mxu1 %vm926_vm13, %v1438_v55 }
 0x511   : > { %v1676_v61 = vpop.xlane.xlu0 %1675  ;;  %2876 = vmatprep.mubr.msk.f32.mxu1 %vm3242_vm8, %v3239_v37  ;;  %v3185_v0 = vpop.eup %3184 }
 0x512   : > { %v1440_v51 = vmul.f32 %v3185_v0, %v3724_v14  ;;  %3190 = vrcp.f32 %v1676_v61 }
 0x514   : > { %2877 = vmatmul.mubr.msk.f32.gmra.mrb[20].mxu1 %vm926_vm13, %v1439_v62 }
 0x515   : > { %v3129_v1 = vpop.permute.xlu0 %3128  ;;  %2879 = vmatprep.mubr.msk.f32.mxu1 %vm3242_vm8, %v3239_v37  ;;  %v3187_v57 = vpop.eup %3186 }
 0x516   : > { %v3131_v50 = vunpack.i.h.bf16 %v3129_v1  ;;  %v3130_v2 = vunpack.i.l.bf16 %v3129_v1  ;;  %v1680_v6 = vmul.f32 %v3187_v57, %v3730_v20  ;;  %v3189_v63 = vpop.eup %3188 }
 0x517   : > { %v1681_v7 = vmul.f32 %v3189_v63, %v3719_v4 }
 0x518   : > { %v3004_v3 = vpack.c.bf16 %v3131_v50, %v3130_v2  ;;  %2880 = vmatmul.mubr.msk.f32.gmra.mrb[22].mxu1 %vm926_vm13, %v1440_v51 }
 0x519   : > { %2903 = vmatprep.mubr.msk.f32.mxu1 %vm3242_vm8, %v3239_v37 }
 0x51a   : > { %3005 = vmatpush3.bf16.msra.mxu1 %v3004_v3 }
 0x51b   : > { %2901 = vmatprep.subr.mxu1 %v3239_v37 }
 0x51c   : > { %v3191_v8 = vpop.eup %3190 }
 0x51d   : > { %v1682_v9 = vmul.f32 %v3191_v8, %v3734_v10  ;;  %v1829_v10 = vld [vmem:[%s4168_s5] sm:$0xff] }
 0x51e   : > { %2902 = vmatpush3.msk.msra.mxu1 %vm970_vm11, %v1688_v5  ;;  %v3007_v11 = vpack.c.bf16 %v1830_v12, %v1829_v10  ;;  %v2663_v5 = vld [vmem:[%s4169_s6] ss:$0 sm:$0xff]  ;;  %v3230_v10 = vld [vmem:[%s3365_s2 + $0x10] sm:$0x1] }
 0x51f   : > { %2904 = vmatmul.mubr.msk.f32.vlgmr.msra.gmra.mrb[24].mxu1 %vm926_vm13, %v1680_v6  ;;  %v3228_v8 = vld [vmem:[%s3365_s2] sm:$0xff] }
 0x520   : > { %2906 = vmatprep.mubr.msk.f32.mxu1 %vm3242_vm8, %v3239_v37  ;;  %3008 = vmatpush3.bf16.msra.mxu0 %v3007_v11 }
 0x521   : > { %3009 = vmatprep.subr.bf16.mxu0 %v3240_v26 }
 0x523   : > { %2907 = vmatmul.mubr.msk.f32.gmra.mrb[26].mxu1 %vm926_vm13, %v1681_v7 }
 0x524   : > { %2909 = vmatprep.mubr.msk.f32.mxu1 %vm3242_vm8, %v3239_v37  ;;  %3011 = vmatpush3.bf16.msra.mxu0 %v3010_v29 }
 0x525   : > { %3012 = vmatprep.subr.bf16.mxu0 %v3240_v26 }
 0x527   : > { %2910 = vmatmul.mubr.msk.f32.gmra.mrb[28].mxu1 %vm926_vm13, %v1682_v9 }
 0x528   : > { %2117 = vmatprep.mubr.f32.mxu1 %v3239_v37  ;;  %3014 = vmatpush3.bf16.msra.mxu0 %v3013_v32 }
 0x529   : > { %3015 = vmatprep.subr.bf16.mxu0 %v3240_v26 }
 0x52c   : > { %3017 = vmatpush3.bf16.msra.mxu0 %v3016_v34 }
 0x59f   : > { %v1040_v13 = vpop.f32.mrb[6].mxu1 }
 0x5a0   : > { %v2815_v14 = vpop.f32.mrb[7].mxu1 }
 0x5aa   : > { %v1045_v15 = vpop.f32.mrb[8].mxu1 }
 0x5ab   : > { %v2818_v16 = vpop.f32.mrb[9].mxu1 }
 0x5ae   : > { %v3797_v19 = vpop.f32.mrb[10].mxu1 }
 0x5af   : > { %v2821_v20 = vpop.f32.mrb[11].mxu1 }
 0x5b2   : > { %v1284_v4 = vpop.f32.mrb[12].mxu1 }
 0x5b3   : > { %1785 = vrot.lane.b32.xlu1 %v1284_v4, %s4185_s3  ;;  %v2845_v18 = vpop.f32.mrb[13].mxu1 }
 0x5b6   : > { %v1289_v21 = vpop.f32.mrb[14].mxu1 }
 0x5b7   : > { %1787 = vrot.lane.b32.xlu1 %v1289_v21, %s4185_s3  ;;  %v2848_v22 = vpop.f32.mrb[15].mxu1  ;;  %s4199_s3 = smov 16  }
 0x5df   : > { %v1294_v33 = vpop.f32.mrb[16].mxu1 }
 0x5e0   : > { %v2851_v58 = vpop.f32.mrb[17].mxu1 }
 0x5e3   : > { %v1526_v30 = vpop.f32.mrb[18].mxu1 }
 0x5e4   : > { %1797 = vrot.lane.b32.xlu1 %v1526_v30, %s3243_s1  ;;  %v2875_v35 = vpop.f32.mrb[19].mxu1 }
 0x5e7   : > { %v1531_v36 = vpop.f32.mrb[20].mxu1 }
 0x5e8   : > { %1799 = vrot.lane.b32.xlu1 %v1531_v36, %s3243_s1  ;;  %v2878_v42 = vpop.f32.mrb[21].mxu1 }
 0x5eb   : > { %v1536_v43 = vpop.f32.mrb[22].mxu1 }
 0x5ec   : > { %v2881_v45 = vpop.f32.mrb[23].mxu1 }
 0x5ed   : > { %v2019_v45 = vld [vmem:[%s4172_s9 + $0x18] sm:$0xff] }
 0x5f2   : > { %v1768_v41 = vpop.f32.mrb[24].mxu1 }
 0x5f3   : > { %1809 = vrot.lane.b32.xlu1 %v1768_v41, %s4198_s22  ;;  %v2905_v46 = vpop.f32.mrb[25].mxu1 }
 0x5f4   : > { %v2016_v46 = vld [vmem:[%s4172_s9] sm:$0xff] }
 0x5f6   : > { %v1773_v44 = vpop.f32.mrb[26].mxu1 }
 0x5f7   : > { %1789 = vrot.lane.b32.xlu1 %v1294_v33, %s4199_s3  ;;  %1811 = vrot.lane.b32.xlu0 %v1773_v44, %s4198_s22  ;;  %v2908_v47 = vpop.f32.mrb[27].mxu1  ;;  %v2018_v44 = vld [vmem:[%s4172_s9 + $0x10] sm:$0xff] }
 0x5f8   : > { %v3020_v47 = vpack.c.bf16 %v2018_v44, %v2016_v46 }
 0x5fa   : > { %v1778_v39 = vpop.f32.mrb[28].mxu1 }
 0x5fb   : > { %1801 = vrot.lane.b32.xlu0 %v1536_v43, %s3243_s1  ;;  %1813 = vrot.lane.b32.xlu1 %v1778_v39, %s4198_s22  ;;  %v2911_v48 = vpop.f32.mrb[29].mxu1  ;;  %v2017_v43 = vld [vmem:[%s4172_s9 + $0x8] sm:$0xff]  ;;  %s4200_s1 = smul.u32 24, %s4202_s30 }
 0x5fc   : > { %v3018_v41 = vpack.c.bf16 %v2019_v45, %v2017_v43  ;;  %v2021_v39 = vld [vmem:[%s4172_s9 + $0x28] sm:$0xff]  ;;  %v2023_v48 = vld [vmem:[%s4172_s9 + $0x38] sm:$0xff] }
 0x5fd   : > { %s602_s26 = scalar_lea.vmem %s4182_s19, %s4200_s1 }
 0x5fe   : > { %3019 = vmatprep.subr.bf16.mxu1 %v3018_v41 }
 0x5ff   : > { %3021 = vmatpush1.bf16.msra.mxu1 %v3020_v47 }
 0x625   : > { %v1786_v49 = vpop.permute.xlu1 %1785 }
 0x626   : > { %v1818_v54 = vsel %vm827_vm9, %v1040_v13, %v1786_v49  ;;  %v3022_v49 = vpack.c.bf16 %v2023_v48, %v2021_v39 }
 0x628   : > { %3023 = vmatprep.subr.bf16.mxu1 %v3022_v49 }
 0x629   : > { %v1788_v52 = vpop.permute.xlu1 %1787 }
 0x62a   : > { %v1819_v60 = vsel %vm827_vm9, %v1045_v15, %v1788_v52  ;;  %v2020_v52 = vld [vmem:[%s4172_s9 + $0x20] sm:$0xff] }
 0x656   : > { %v1798_v53 = vpop.permute.xlu1 %1797 }
 0x657   : > { %v1822_v55 = vsel %vm1821_vm3, %v1818_v54, %v1798_v53  ;;  %v2022_v53 = vld [vmem:[%s4172_s9 + $0x30] sm:$0xff]  ;;  %v2025_v54 = vld [vmem:[%s4172_s9 + $0x48] sm:$0xff] }
 0x65a   : > { %v1800_v38 = vpop.permute.xlu1 %1799 }
 0x65b   : > { %v1823_v61 = vsel %vm1821_vm3, %v1819_v60, %v1800_v38  ;;  %v3024_v38 = vpack.c.bf16 %v2022_v53, %v2020_v52  ;;  %v2026_v60 = vld [vmem:[%s4172_s9 + $0x50] sm:$0xff] }
 0x65d   : > { %3025 = vmatpush1.bf16.msra.mxu1 %v3024_v38 }
 0x665   : > { %v1810_v56 = vpop.permute.xlu1 %1809 }
 0x666   : > { %v1826_v59 = vsel %vm1825_vm4, %v1822_v55, %v1810_v56  ;;  %v2027_v55 = vld [vmem:[%s4172_s9 + $0x58] sm:$0xff]  ;;  %v2024_v56 = vld [vmem:[%s4172_s9 + $0x40] sm:$0xff] }
 0x667   : > { %2929 = vmatmul.mubr.msk.f32.vlgmr.msra.gmra.mrb[24].mxu0 %vm608_vm0, %v1826_v59  ;;  %v3026_v59 = vpack.c.bf16 %v2027_v55, %v2025_v54 }
 0x668   : > { %2931 = vmatprep.mubr.msk.f32.mxu0 %vm3242_vm8, %v3239_v37 }
 0x669   : > { %v1790_v62 = vpop.permute.xlu1 %1789  ;;  %v1812_v0 = vpop.permute.xlu0 %1811  ;;  %3027 = vmatprep.subr.bf16.mxu1 %v3026_v59 }
 0x66a   : > { %v1827_v1 = vsel %vm1825_vm4, %v1823_v61, %v1812_v0  ;;  %v1820_v50 = vsel %vm827_vm9, %v3797_v19, %v1790_v62  ;;  %v3229_v19 = vld [vmem:[%s3365_s2 + $0x8] sm:$0xff]  ;;  %v2031_v62 = vld [vmem:[%s4172_s9 + $0x78] sm:$0xff]  ;;  %v3028_v0 = vpack.c.bf16 %v2026_v60, %v2024_v56 }
 0x66b   : > { %2932 = vmatmul.mubr.msk.f32.gmra.mrb[26].mxu0 %vm608_vm0, %v1827_v1  ;;  %v2029_v61 = vld [vmem:[%s4172_s9 + $0x68] sm:$0xff] }
 0x66c   : > { %2934 = vmatprep.mubr.msk.f32.mxu0 %vm3242_vm8, %v3239_v37  ;;  %v3030_v1 = vpack.c.bf16 %v2031_v62, %v2029_v61  ;;  %3029 = vmatpush1.bf16.msra.mxu1 %v3028_v0 }
 0x66d   : > { %v1802_v2 = vpop.permute.xlu0 %1801  ;;  %v1814_v51 = vpop.permute.xlu1 %1813 }
 0x66e   : > { %v1824_v3 = vsel %vm1821_vm3, %v1820_v50, %v1802_v2  ;;  %v2028_v50 = vld [vmem:[%s4172_s9 + $0x60] sm:$0xff]  ;;  %v2030_v2 = vld [vmem:[%s4172_s9 + $0x70] sm:$0xff]  ;;  %3031 = vmatprep.subr.bf16.mxu1 %v3030_v1 }
 0x66f   : > { %v1828_v57 = vsel %vm1825_vm4, %v1824_v3, %v1814_v51  ;;  %v3032_v51 = vpack.c.bf16 %v2030_v2, %v2028_v50 }
 0x670   : > { %2935 = vmatmul.mubr.msk.f32.gmra.mrb[28].mxu0 %vm608_vm0, %v1828_v57 }
 0x671   : > { %3033 = vmatpush1.bf16.msra.mxu1 %v3032_v51 }
 0x672   : > { %3066 = vmatprep.subr.bf16.mxu1 %v3240_v26 }
 0x73a   : > { %v1919_v6 = vpop.f32.mrb[24].mxu0 }
 0x73b   : > { %v1920_v63 = vadd.f32 %v2663_v5, %v1919_v6  ;;  %v2930_v7 = vpop.f32.mrb[25].mxu0 }
 0x73d   : > { %v1933_v9 = vadd.f32 %v3228_v8, %v1920_v63 }
 0x73e   : > { %v1924_v13 = vpop.f32.mrb[26].mxu0 }
 0x73f   : > { %v1925_v14 = vadd.f32 %v2663_v5, %v1924_v13  ;;  %v2933_v15 = vpop.f32.mrb[27].mxu0  ;;  %v1938_v16 = vsel %vm608_vm0, %v1933_v9, 0.0 }
 0x740   : > { %1939 = vadd.xlane.f32.xlu0 %v1938_v16 }
 0x741   : > { %v1934_v20 = vadd.f32 %v3229_v19, %v1925_v14 }
 0x743   : > { %v1929_v4 = vpop.f32.mrb[28].mxu0  ;;  %v1941_v18 = vsel %vm608_vm0, %v1934_v20, 0.0 }
 0x744   : > { %v1930_v21 = vadd.f32 %v2663_v5, %v1929_v4  ;;  %1942 = vadd.xlane.f32.xlu1 %v1941_v18  ;;  %v2936_v22 = vpop.f32.mrb[29].mxu0 }
 0x746   : > { %v1935_v12 = vadd.f32 %v3230_v10, %v1930_v21 }
 0x748   : > { %v1944_v11 = vsel %vm615_vm1, %v1935_v12, 0.0 }
 0x749   : > { %1945 = vadd.xlane.f32.xlu0 %v1944_v11 }
 0x7cd   : > { %v1940_v25 = vpop.xlane.xlu0 %1939 }
 0x7ce   : > { %v1947_v27 = vmul.f32 0.015625, %v1940_v25 }
 0x7d0   : > { %v3861_v28 = vsub.f32 %v1933_v9, %v1947_v27  ;;  %v2667_v27 = vld [vmem:[%s4170_s7] ss:$0 sm:$0xff] }
 0x7d1   : > { %v1943_v29 = vpop.xlane.xlu1 %1942 }
 0x7d2   : > { %v1948_v31 = vmul.f32 0.015625, %v1943_v29  ;;  %v1953_v32 = vmul.f32 %v3861_v28, %v3861_v28 }
 0x7d4   : > { %v3865_v33 = vsub.f32 %v1934_v20, %v1948_v31  ;;  %v1956_v17 = vsel %vm608_vm0, %v1953_v32, 0.0  ;;  %v1974_v32 = vmul.f32 %v2667_v27, %v3861_v28 }
 0x7d5   : > { %1957 = vadd.xlane.f32.xlu0 %v1956_v17 }
 0x7d6   : > { %v1946_v40 = vpop.xlane.xlu0 %1945  ;;  %v1954_v58 = vmul.f32 %v3865_v33, %v3865_v33 }
 0x7d7   : > { %v1949_v34 = vmul.f32 0.015625, %v1946_v40  ;;  %v2668_v40 = vld [vmem:[%s4171_s8] ss:$0 sm:$0xff] }
 0x7d8   : > { %v1959_v30 = vsel %vm608_vm0, %v1954_v58, 0.0 }
 0x7d9   : > { %v3871_v35 = vsub.f32 %v1935_v12, %v1949_v34  ;;  %1960 = vadd.xlane.f32.xlu0 %v1959_v30  ;;  %v1975_v34 = vmul.f32 %v2667_v27, %v3865_v33  ;;  %v2032_v33 = vld [vmem:[%s4173_s10] sm:$0x3] }
 0x7da   : > { %v2037_v44 = vrot.slane %v2032_v33, %v3455_v23 }
 0x7db   : > { %v1955_v36 = vmul.f32 %v3871_v35, %v3871_v35  ;;  %v1976_v45 = vmul.f32 %v2667_v27, %v3871_v35  ;;  %v2041_v35 = vrot.slane %v2032_v33, %v3461_v24  ;;  %v2263_v27 = vld [vmem:[%s4176_s13 + $0x88] sm:$0xff] }
 0x7dd   : > { %v1962_v42 = vsel %vm615_vm1, %v1955_v36, 0.0 }
 0x7de   : > { %1963 = vadd.xlane.f32.xlu1 %v1962_v42 }
 0x862   : > { %v1958_v3 = vpop.xlane.xlu0 %1957 }
 0x863   : > { %v1965_v57 = vmul.f32 0.015873017, %v1958_v3 }
 0x865   : > { %3192 = vrsqrt.f32 %v1965_v57  ;;  %vm1979_vm5 = vcmp.eq.f32.partialorder %v1965_v57, inf  ;;  %v1982_v13 = vand.u32 2147483648, %v1965_v57  ;;  %vm1981_vm6 = vcmp.eq.f32.partialorder %v1965_v57, 0.0 }
 0x866   : > { %v1961_v5 = vpop.xlane.xlu0 %1960 }
 0x867   : > { %v1966_v6 = vmul.f32 0.015873017, %v1961_v5 }
 0x869   : > { %3194 = vrsqrt.f32 %v1966_v6  ;;  %vm1986_vm7 = vcmp.eq.f32.partialorder %v1966_v6, inf  ;;  %v1989_v4 = vand.u32 2147483648, %v1966_v6  ;;  %vm1988_vm9 = vcmp.eq.f32.partialorder %v1966_v6, 0.0 }
 0x86b   : > { %v1964_v63 = vpop.xlane.xlu1 %1963 }
 0x86c   : > { %v1967_v7 = vmul.f32 0.015873017, %v1964_v63 }
 0x86e   : > { %3196 = vrsqrt.f32 %v1967_v7  ;;  %vm1993_vm10 = vcmp.eq.f32.partialorder %v1967_v7, inf  ;;  %v1996_v11 = vand.u32 2147483648, %v1967_v7  ;;  %vm1995_vm12 = vcmp.eq.f32.partialorder %v1967_v7, 0.0 }
 0x86f   : > { %v3193_v8 = vpop.eup %3192 }
 0x870   : > { %v1978_v9 = vmul.f32 %v3193_v8, %v1965_v57 }
 0x872   : > { %v1980_v14 = vsel %vm1979_vm5, %v1965_v57, %v1978_v9 }
 0x873   : > { %v3195_v15 = vpop.eup %3194  ;;  %v1983_v16 = vsel %vm1981_vm6, %v1982_v13, %v1980_v14 }
 0x874   : > { %v1998_v19 = vadd.f32 1e-06, %v1983_v16  ;;  %v1985_v20 = vmul.f32 %v3195_v15, %v1966_v6 }
 0x876   : > { %3198 = vrcp.f32 %v1998_v19  ;;  %v1987_v18 = vsel %vm1986_vm7, %v1966_v6, %v1985_v20 }
 0x877   : > { %v1990_v21 = vsel %vm1988_vm9, %v1989_v4, %v1987_v18 }
 0x878   : > { %v3197_v22 = vpop.eup %3196  ;;  %v1999_v10 = vadd.f32 1e-06, %v1990_v21 }
 0x879   : > { %v1992_v12 = vmul.f32 %v3197_v22, %v1967_v7 }
 0x87a   : > { %3200 = vrcp.f32 %v1999_v10 }
 0x87b   : > { %v1994_v25 = vsel %vm1993_vm10, %v1967_v7, %v1992_v12 }
 0x87c   : > { %v1997_v29 = vsel %vm1995_vm12, %v1996_v11, %v1994_v25  ;;  %v2262_v25 = vld [vmem:[%s4176_s13 + $0x80] sm:$0xff] }
 0x87d   : > { %v2000_v31 = vadd.f32 1e-06, %v1997_v29  ;;  %v3034_v29 = vpack.c.bf16 %v2263_v27, %v2262_v25 }
 0x87f   : > { %3202 = vrcp.f32 %v2000_v31  ;;  %v2246_v31 = vld [vmem:[%s4176_s13] sm:$0xff]  ;;  %3035 = vmatprep.subr.bf16.mxu0 %v3034_v29 }
 0x880   : > { %v3199_v17 = vpop.eup %3198 }
 0x881   : > { %v2002_v58 = vmul.f32 %v3199_v17, %v1974_v32  ;;  %v2247_v32 = vld [vmem:[%s4176_s13 + $0x8] sm:$0xff] }
 0x882   : > { %v3036_v17 = vpack.c.bf16 %v2247_v32, %v2246_v31 }
 0x883   : > { %v2013_v30 = vadd.f32 %v2668_v40, %v2002_v58  ;;  %v2265_v58 = vld [vmem:[%s4176_s13 + $0x98] sm:$0xff] }
 0x884   : > { %v3201_v36 = vpop.eup %3200  ;;  %3037 = vmatpush3.bf16.msra.mxu0 %v3036_v17 }
 0x885   : > { %2669 = vmatmul.mubr.msk.f32.vlgmr.msra.gmra.mrb[30].mxu1 %vm608_vm0, %v2013_v30  ;;  %v2004_v42 = vmul.f32 %v3201_v36, %v1975_v34  ;;  %v2248_v30 = vld [vmem:[%s4176_s13 + $0x10] sm:$0xff]  ;;  %v2249_v36 = vld [vmem:[%s4176_s13 + $0x18] sm:$0xff] }
 0x886   : > { %2123 = vmatprep.mubr.f32.mxu1 %v3239_v37 }
 0x887   : > { %v2014_v43 = vadd.f32 %v2668_v40, %v2004_v42  ;;  %v3040_v42 = vpack.c.bf16 %v2249_v36, %v2248_v30 }
 0x889   : > { %v3203_v28 = vpop.eup %3202  ;;  %2670 = vmatmul.mubr.msk.f32.gmra.mrb[32].mxu1 %vm608_vm0, %v2014_v43  ;;  %v2266_v43 = vld [vmem:[%s4176_s13 + $0xa0] sm:$0xff] }
 0x88a   : > { %2129 = vmatprep.mubr.f32.mxu1 %v3239_v37  ;;  %v2006_v41 = vmul.f32 %v3203_v28, %v1976_v45  ;;  %v2267_v45 = vld [vmem:[%s4176_s13 + $0xa8] sm:$0xff] }
 0x88b   : > { %v3042_v28 = vpack.c.bf16 %v2267_v45, %v2266_v43  ;;  %v2136_v43 = vld [vmem:[%s4174_s11] sm:$0x3] }
 0x88c   : > { %v2015_v46 = vadd.f32 %v2668_v40, %v2006_v41  ;;  %v2264_v40 = vld [vmem:[%s4176_s13 + $0x90] sm:$0xff]  ;;  %v2250_v41 = vld [vmem:[%s4176_s13 + $0x20] sm:$0xff] }
 0x88d   : > { %v3038_v34 = vpack.c.bf16 %v2265_v58, %v2264_v40 }
 0x88e   : > { %2671 = vmatmul.mubr.msk.f32.gmra.mrb[34].mxu1 %vm608_vm0, %v2015_v46  ;;  %v2251_v46 = vld [vmem:[%s4176_s13 + $0x28] sm:$0xff] }
 0x88f   : > { %2953 = vmatprep.mubr.msk.f32.mxu1 %vm3242_vm8, %v3239_v37  ;;  %3039 = vmatprep.subr.bf16.mxu0 %v3038_v34  ;;  %v3044_v33 = vpack.c.bf16 %v2251_v46, %v2250_v41  ;;  %v2183_v41 = vrot.slane %v2136_v43, %v3455_v23  ;;  %v2187_v46 = vrot.slane %v2136_v43, %v3461_v24 }
 0x890   : > { %3041 = vmatpush3.bf16.msra.mxu0 %v3040_v42 }
 0x891   : > { %3043 = vmatprep.subr.bf16.mxu0 %v3042_v28 }
 0x894   : > { %3045 = vmatpush3.bf16.msra.mxu0 %v3044_v33 }
 0x958   : > { %v2119_v47 = vpop.f32.mrb[30].mxu1 }
 0x959   : > { %v2120_v39 = vadd.f32 %v2119_v47, %v2037_v44  ;;  %v2121_v48 = vpop.f32.mrb[31].mxu1 }
 0x95a   : > { %v2122_v49 = vadd.f32 %v2121_v48, %v2041_v35  ;;  %v2253_v48 = vld [vmem:[%s4176_s13 + $0x38] sm:$0xff] }
 0x95c   : > { %v2125_v52 = vpop.f32.mrb[32].mxu1  ;;  %v2138_v53 = vadd.f32 %v2122_v49, %v2120_v39 }
 0x95d   : > { %v2126_v38 = vadd.f32 %v2125_v52, %v2037_v44  ;;  %v2127_v54 = vpop.f32.mrb[33].mxu1  ;;  %v2270_v52 = vld [vmem:[%s4176_s13 + $0xc0] sm:$0xff] }
 0x95e   : > { %v2128_v55 = vadd.f32 %v2127_v54, %v2041_v35  ;;  %2139 = vadd.xlane.f32.xlu0 %v2138_v53  ;;  %v2271_v53 = vld [vmem:[%s4176_s13 + $0xc8] sm:$0xff]  ;;  %v2254_v54 = vld [vmem:[%s4176_s13 + $0x40] sm:$0xff] }
 0x960   : > { %v2141_v56 = vadd.f32 %v2128_v55, %v2126_v38 }
 0x961   : > { %v2131_v59 = vpop.f32.mrb[34].mxu1 }
 0x962   : > { %v2132_v60 = vadd.f32 %v2131_v59, %v2037_v44  ;;  %v2133_v61 = vpop.f32.mrb[35].mxu1  ;;  %2142 = vadd.xlane.f32.xlu1 %v2141_v56  ;;  %v2268_v44 = vld [vmem:[%s4176_s13 + $0xb0] sm:$0xff] }
 0x963   : > { %v2134_v62 = vadd.f32 %v2133_v61, %v2041_v35  ;;  %v2269_v35 = vld [vmem:[%s4176_s13 + $0xb8] sm:$0xff]  ;;  %v2272_v59 = vld [vmem:[%s4176_s13 + $0xd0] sm:$0xff] }
 0x964   : > { %v2144_v0 = vsel %vm970_vm11, %v2132_v60, 0.0  ;;  %v3046_v47 = vpack.c.bf16 %v2269_v35, %v2268_v44  ;;  %v2137_v35 = vld [vmem:[%s4175_s12] sm:$0x3] }
 0x965   : > { %v2145_v1 = vsel %vm970_vm11, %v2134_v62, 0.0 }
 0x966   : > { %v2146_v50 = vadd.f32 %v2145_v1, %v2144_v0  ;;  %3047 = vmatprep.subr.bf16.mxu0 %v3046_v47  ;;  %v2257_v0 = vld [vmem:[%s4176_s13 + $0x58] sm:$0xff] }
 0x968   : > { %2147 = vadd.xlane.f32.xlu0 %v2146_v50  ;;  %v2274_v50 = vld [vmem:[%s4176_s13 + $0xe0] sm:$0xff] }
 0x9eb   : > { %v2140_v2 = vpop.xlane.xlu0 %2139 }
 0x9ec   : > { %v2150_v51 = vmul.f32 0.00390625, %v2140_v2  ;;  %v2275_v2 = vld [vmem:[%s4176_s13 + $0xe8] sm:$0xff] }
 0x9ee   : > { %v3948_v3 = vsub.f32 %v2120_v39, %v2150_v51  ;;  %v3950_v57 = vsub.f32 %v2122_v49, %v2150_v51  ;;  %v2252_v39 = vld [vmem:[%s4176_s13 + $0x30] sm:$0xff]  ;;  %v2258_v51 = vld [vmem:[%s4176_s13 + $0x60] sm:$0xff] }
 0x9ef   : > { %v2143_v5 = vpop.xlane.xlu1 %2142  ;;  %v3048_v49 = vpack.c.bf16 %v2253_v48, %v2252_v39 }
 0x9f0   : > { %v2151_v6 = vmul.f32 0.00390625, %v2143_v5  ;;  %v2159_v63 = vmul.f32 %v3948_v3, %v3948_v3  ;;  %v2160_v7 = vmul.f32 %v3950_v57, %v3950_v57  ;;  %v3058_v5 = vpack.c.bf16 %v2275_v2, %v2274_v50 }
 0x9f1   : > { %3049 = vmatpush3.bf16.msra.mxu0 %v3048_v49  ;;  %v2190_v48 = vmul.f32 %v2183_v41, %v3948_v3  ;;  %v2191_v49 = vmul.f32 %v2187_v46, %v3950_v57 }
 0x9f2   : > { %v3956_v8 = vsub.f32 %v2126_v38, %v2151_v6  ;;  %v3958_v9 = vsub.f32 %v2128_v55, %v2151_v6  ;;  %v2165_v13 = vadd.f32 %v2160_v7, %v2159_v63  ;;  %v3050_v38 = vpack.c.bf16 %v2271_v53, %v2270_v52  ;;  %v2255_v55 = vld [vmem:[%s4176_s13 + $0x48] sm:$0xff]  ;;  %v2276_v63 = vld [vmem:[%s4176_s13 + $0xf0] sm:$0xff]  ;;  %v2277_v7 = vld [vmem:[%s4176_s13 + $0xf8] sm:$0xff] }
 0x9f3   : > { %v3052_v56 = vpack.c.bf16 %v2255_v55, %v2254_v54  ;;  %v2259_v6 = vld [vmem:[%s4176_s13 + $0x68] sm:$0xff]  ;;  %v2233_v52 = vrot.slane %v2137_v35, %v3455_v23  ;;  %v2237_v53 = vrot.slane %v2137_v35, %v3461_v24 }
 0x9f4   : > { %v2161_v14 = vmul.f32 %v3956_v8, %v3956_v8  ;;  %v2162_v15 = vmul.f32 %v3958_v9, %v3958_v9  ;;  %2166 = vadd.xlane.f32.xlu1 %v2165_v13  ;;  %3051 = vmatprep.subr.bf16.mxu0 %v3050_v38  ;;  %v3060_v13 = vpack.c.bf16 %v2259_v6, %v2258_v51 }
 0x9f5   : > { %v2148_v16 = vpop.xlane.xlu0 %2147  ;;  %3053 = vmatpush3.bf16.msra.mxu0 %v3052_v56  ;;  %v2192_v56 = vmul.f32 %v2183_v41, %v3956_v8 }
 0x9f6   : > { %v2152_v19 = vmul.f32 0.00390625, %v2148_v16  ;;  %v2168_v20 = vadd.f32 %v2162_v15, %v2161_v14  ;;  %v3062_v14 = vpack.c.bf16 %v2277_v7, %v2276_v63  ;;  %v2260_v15 = vld [vmem:[%s4176_s13 + $0x70] sm:$0xff]  ;;  %v2261_v16 = vld [vmem:[%s4176_s13 + $0x78] sm:$0xff]  ;;  %v2672_v63 = vld [vmem:[%s4177_s14] ss:$0 sm:$0xff] }
 0x9f8   : > { %v3964_v4 = vsub.f32 %v2132_v60, %v2152_v19  ;;  %v3966_v18 = vsub.f32 %v2134_v62, %v2152_v19  ;;  %2169 = vadd.xlane.f32.xlu0 %v2168_v20  ;;  %v2273_v60 = vld [vmem:[%s4176_s13 + $0xd8] sm:$0xff]  ;;  %v2256_v62 = vld [vmem:[%s4176_s13 + $0x50] sm:$0xff]  ;;  %v3064_v19 = vpack.c.bf16 %v2261_v16, %v2260_v15 }
 0x9f9   : > { %v3054_v61 = vpack.c.bf16 %v2273_v60, %v2272_v59  ;;  %v3056_v1 = vpack.c.bf16 %v2257_v0, %v2256_v62  ;;  %v2193_v59 = vmul.f32 %v2187_v46, %v3958_v9 }
 0x9fa   : > { %v2163_v21 = vmul.f32 %v3964_v4, %v3964_v4  ;;  %v2164_v22 = vmul.f32 %v3966_v18, %v3966_v18  ;;  %v2194_v23 = vmul.f32 %v2183_v41, %v3964_v4  ;;  %v2195_v24 = vmul.f32 %v2187_v46, %v3966_v18  ;;  %v2446_v41 = vld [vmem:[%s4180_s17 + $0x8] sm:$0xff] }
 0x9fb   : > { %3055 = vmatprep.subr.bf16.mxu0 %v3054_v61 }
 0x9fc   : > { %v2171_v10 = vsel %vm970_vm11, %v2163_v21, 0.0  ;;  %v2172_v12 = vsel %vm970_vm11, %v2164_v22, 0.0  ;;  %3057 = vmatpush3.bf16.msra.mxu0 %v3056_v1 }
 0x9fd   : > { %v2173_v11 = vadd.f32 %v2172_v12, %v2171_v10  ;;  %3059 = vmatprep.subr.bf16.mxu0 %v3058_v5 }
 0x9ff   : > { %2174 = vadd.xlane.f32.xlu1 %v2173_v11 }
 0xa00   : > { %3061 = vmatpush3.bf16.msra.mxu0 %v3060_v13 }
 0xa01   : > { %3063 = vmatprep.subr.bf16.mxu0 %v3062_v14 }
 0xa04   : > { %3065 = vmatpush3.bf16.msra.mxu0 %v3064_v19 }
 0xa81   : > { %v2167_v20 = vpop.xlane.xlu1 %2166 }
 0xa82   : > { %v2176_v21 = vmul.f32 0.003921569, %v2167_v20 }
 0xa84   : > { %3204 = vrsqrt.f32 %v2176_v21  ;;  %vm2198_vm11 = vcmp.eq.f32.partialorder %v2176_v21, inf  ;;  %v2201_v29 = vand.u32 2147483648, %v2176_v21  ;;  %vm2200_vm13 = vcmp.eq.f32.partialorder %v2176_v21, 0.0 }
 0xa85   : > { %v2170_v22 = vpop.xlane.xlu0 %2169 }
 0xa86   : > { %v2177_v10 = vmul.f32 0.003921569, %v2170_v22 }
 0xa88   : > { %3206 = vrsqrt.f32 %v2177_v10  ;;  %vm2205_vm14 = vcmp.eq.f32.partialorder %v2177_v10, inf  ;;  %v2208_v58 = vand.u32 2147483648, %v2177_v10  ;;  %vm2207_vm15 = vcmp.eq.f32.partialorder %v2177_v10, 0.0 }
 0xa8c   : > { %v2175_v12 = vpop.xlane.xlu1 %2174 }
 0xa8d   : > { %v2178_v11 = vmul.f32 0.003921569, %v2175_v12 }
 0xa8e   : > { %v3205_v25 = vpop.eup %3204 }
 0xa8f   : > { %3208 = vrsqrt.f32 %v2178_v11  ;;  %v2197_v27 = vmul.f32 %v3205_v25, %v2176_v21  ;;  %vm2212_vm2 = vcmp.eq.f32.partialorder %v2178_v11, inf  ;;  %v2215_v33 = vand.u32 2147483648, %v2178_v11 }
 0xa90   : > { %vm2214_vm4 = vcmp.eq.f32.partialorder %v2178_v11, 0.0 }
 0xa91   : > { %v2199_v32 = vsel %vm2198_vm11, %v2176_v21, %v2197_v27 }
 0xa92   : > { %v3207_v31 = vpop.eup %3206  ;;  %v2202_v40 = vsel %vm2200_vm13, %v2201_v29, %v2199_v32 }
 0xa93   : > { %v2204_v17 = vmul.f32 %v3207_v31, %v2177_v10  ;;  %v2217_v34 = vadd.f32 1e-06, %v2202_v40 }
 0xa95   : > { %v2206_v30 = vsel %vm2205_vm14, %v2177_v10, %v2204_v17  ;;  %3210 = vrcp.f32 %v2217_v34 }
 0xa96   : > { %v2209_v36 = vsel %vm2207_vm15, %v2208_v58, %v2206_v30 }
 0xa97   : > { %v2218_v42 = vadd.f32 1e-06, %v2209_v36 }
 0xa99   : > { %v3209_v45 = vpop.eup %3208  ;;  %3212 = vrcp.f32 %v2218_v42 }
 0xa9a   : > { %v2211_v28 = vmul.f32 %v3209_v45, %v2178_v11 }
 0xa9c   : > { %v2213_v44 = vsel %vm2212_vm2, %v2178_v11, %v2211_v28  ;;  %v2445_v28 = vld [vmem:[%s4180_s17] sm:$0xff] }
 0xa9d   : > { %v2216_v47 = vsel %vm2214_vm4, %v2215_v33, %v2213_v44  ;;  %v3067_v46 = vpack.c.bf16 %v2446_v41, %v2445_v28  ;;  %v2447_v33 = vld [vmem:[%s4180_s17 + $0x10] sm:$0xff]  ;;  %v2448_v44 = vld [vmem:[%s4180_s17 + $0x18] sm:$0xff] }
 0xa9e   : > { %v2219_v39 = vadd.f32 1e-06, %v2216_v47  ;;  %v3070_v35 = vpack.c.bf16 %v2448_v44, %v2447_v33  ;;  %v2449_v47 = vld [vmem:[%s4180_s17 + $0x20] sm:$0xff] }
 0xa9f   : > { %v3211_v38 = vpop.eup %3210  ;;  %3068 = vmatpush3.bf16.msra.mxu1 %v3067_v46 }
 0xaa0   : > { %3214 = vrcp.f32 %v2219_v39  ;;  %v2222_v54 = vmul.f32 %v3211_v38, %v2191_v49  ;;  %v2221_v55 = vmul.f32 %v3211_v38, %v2190_v48  ;;  %3069 = vmatprep.subr.bf16.mxu1 %v3240_v26  ;;  %v2450_v39 = vld [vmem:[%s4180_s17 + $0x28] sm:$0xff]  ;;  %v2451_v49 = vld [vmem:[%s4180_s17 + $0x30] sm:$0xff] }
 0xaa1   : > { %v3073_v48 = vpack.c.bf16 %v2450_v39, %v2449_v47 }
 0xaa2   : > { %v2241_v61 = vadd.f32 %v2237_v53, %v2222_v54  ;;  %v2240_v62 = vadd.f32 %v2233_v52, %v2221_v55 }
 0xaa3   : > { %v3213_v60 = vpop.eup %3212  ;;  %3071 = vmatpush3.bf16.msra.mxu1 %v3070_v35 }
 0xaa4   : > { %v2225_v0 = vmul.f32 %v3213_v60, %v2193_v59  ;;  %v2224_v1 = vmul.f32 %v3213_v60, %v2192_v56  ;;  %2349 = vmatprep.mubr.f32.mxu0 %v2241_v61  ;;  %3072 = vmatprep.subr.bf16.mxu1 %v3240_v26 }
 0xaa5   : > { %2350 = vmatmul.mubr.f32.vlgmr.msra.gmra.mrb[30].mxu0 %v2240_v62 }
 0xaa6   : > { %v2243_v3 = vadd.f32 %v2237_v53, %v2225_v0  ;;  %v2242_v57 = vadd.f32 %v2233_v52, %v2224_v1 }
 0xaa7   : > { %3074 = vmatpush3.bf16.msra.mxu1 %v3073_v48 }
 0xaa8   : > { %2354 = vmatprep.mubr.f32.mxu0 %v2243_v3  ;;  %3075 = vmatprep.subr.bf16.mxu1 %v3240_v26 }
 0xaa9   : > { %2355 = vmatmul.mubr.f32.gmra.mrb[32].mxu0 %v2242_v57 }
 0xaaa   : > { %v3215_v50 = vpop.eup %3214 }
 0xaab   : > { %v2228_v2 = vmul.f32 %v3215_v50, %v2195_v24  ;;  %v2227_v8 = vmul.f32 %v3215_v50, %v2194_v23 }
 0xaad   : > { %v2245_v51 = vadd.f32 %v2237_v53, %v2228_v2  ;;  %v2244_v9 = vadd.f32 %v2233_v52, %v2227_v8  ;;  %v2452_v52 = vld [vmem:[%s4180_s17 + $0x38] sm:$0xff] }
 0xaae   : > { %v3076_v53 = vpack.c.bf16 %v2452_v52, %v2451_v49 }
 0xaaf   : > { %2359 = vmatprep.mubr.f32.mxu0 %v2245_v51 }
 0xab0   : > { %2360 = vmatmul.mubr.f32.gmra.mrb[34].mxu0 %v2244_v9  ;;  %3077 = vmatpush3.bf16.msra.mxu1 %v3076_v53 }
 0xb78   : > { %v2772_v5 = vpop.f32.mrb[30].mxu0 }
 0xb79   : > { %v2773_v6 = vpop.f32.mrb[31].mxu0 }
 0xb7a   : > { %v2774_v7 = vadd.f32 %v2773_v6, %v2772_v5  ;;  %v2673_v6 = vld [vmem:[%s4178_s15] ss:$0 sm:$0xff] }
 0xb7c   : > { %v2775_v13 = vpop.f32.mrb[32].mxu0  ;;  %v2352_v14 = vadd.f32 %v2774_v7, %v2672_v63 }
 0xb7d   : > { %v2776_v4 = vpop.f32.mrb[33].mxu0 }
 0xb7e   : > { %v2777_v15 = vadd.f32 %v2776_v4, %v2775_v13  ;;  %v2367_v18 = vsel %vm608_vm0, %v2352_v14, 0.0 }
 0xb7f   : > { %2368 = vadd.xlane.f32.xlu0 %v2367_v18 }
 0xb80   : > { %v2357_v16 = vadd.f32 %v2777_v15, %v2672_v63  ;;  %v2674_v15 = vld [vmem:[%s4179_s16] ss:$0 sm:$0xff] }
 0xb82   : > { %v2370_v20 = vsel %vm608_vm0, %v2357_v16, 0.0 }
 0xb83   : > { %v2778_v19 = vpop.f32.mrb[34].mxu0  ;;  %2371 = vadd.xlane.f32.xlu1 %v2370_v20 }
 0xb84   : > { %v2779_v21 = vpop.f32.mrb[35].mxu0 }
 0xb85   : > { %v2780_v22 = vadd.f32 %v2779_v21, %v2778_v19 }
 0xb87   : > { %v2362_v10 = vadd.f32 %v2780_v22, %v2672_v63 }
 0xb89   : > { %v2373_v12 = vsel %vm615_vm1, %v2362_v10, 0.0 }
 0xb8a   : > { %2374 = vadd.xlane.f32.xlu0 %v2373_v12 }
 0xc0c   : > { %v2369_v11 = vpop.xlane.xlu0 %2368 }
 0xc0d   : > { %v2376_v25 = vmul.f32 0.015625, %v2369_v11 }
 0xc0f   : > { %v4092_v27 = vsub.f32 %v2352_v14, %v2376_v25 }
 0xc10   : > { %v2372_v29 = vpop.xlane.xlu1 %2371 }
 0xc11   : > { %v2377_v31 = vmul.f32 0.015625, %v2372_v29  ;;  %v2382_v32 = vmul.f32 %v4092_v27, %v4092_v27  ;;  %v2403_v14 = vmul.f32 %v2673_v6, %v4092_v27  ;;  %v2675_v27 = vld [vmem:[%s4181_s18] ss:$0 sm:$0xff] }
 0xc13   : > { %v4096_v17 = vsub.f32 %v2357_v16, %v2377_v31  ;;  %v2385_v40 = vsel %vm608_vm0, %v2382_v32, 0.0 }
 0xc14   : > { %2386 = vadd.xlane.f32.xlu1 %v2385_v40 }
 0xc15   : > { %v2383_v58 = vmul.f32 %v4096_v17, %v4096_v17  ;;  %v2404_v16 = vmul.f32 %v2673_v6, %v4096_v17 }
 0xc17   : > { %v2375_v34 = vpop.xlane.xlu0 %2374  ;;  %v2388_v36 = vsel %vm608_vm0, %v2383_v58, 0.0 }
 0xc18   : > { %v2378_v30 = vmul.f32 0.015625, %v2375_v34  ;;  %2389 = vadd.xlane.f32.xlu0 %v2388_v36 }
 0xc1a   : > { %v4102_v42 = vsub.f32 %v2362_v10, %v2378_v30 }
 0xc1c   : > { %v2384_v43 = vmul.f32 %v4102_v42, %v4102_v42  ;;  %v2405_v10 = vmul.f32 %v2673_v6, %v4102_v42 }
 0xc1e   : > { %v2391_v45 = vsel %vm615_vm1, %v2384_v43, 0.0 }
 0xc1f   : > { %2392 = vadd.xlane.f32.xlu1 %v2391_v45 }
 0xca1   : > { %v2387_v38 = vpop.xlane.xlu1 %2386 }
 0xca2   : > { %v2394_v54 = vmul.f32 0.015873017, %v2387_v38 }
 0xca4   : > { %3216 = vrsqrt.f32 %v2394_v54  ;;  %vm2408_vm1 = vcmp.eq.f32.partialorder %v2394_v54, inf  ;;  %v2411_v0 = vand.u32 2147483648, %v2394_v54  ;;  %vm2410_vm5 = vcmp.eq.f32.partialorder %v2394_v54, 0.0 }
 0xca5   : > { %v2390_v55 = vpop.xlane.xlu0 %2389 }
 0xca6   : > { %v2395_v56 = vmul.f32 0.015873017, %v2390_v55 }
 0xca8   : > { %3218 = vrsqrt.f32 %v2395_v56  ;;  %vm2415_vm6 = vcmp.eq.f32.partialorder %v2395_v56, inf  ;;  %v2418_v24 = vand.u32 2147483648, %v2395_v56  ;;  %vm2417_vm7 = vcmp.eq.f32.partialorder %v2395_v56, 0.0 }
 0xcac   : > { %v2393_v59 = vpop.xlane.xlu1 %2392 }
 0xcad   : > { %v2396_v60 = vmul.f32 0.015873017, %v2393_v59 }
 0xcae   : > { %v3217_v61 = vpop.eup %3216 }
 0xcaf   : > { %3220 = vrsqrt.f32 %v2396_v60  ;;  %v2407_v62 = vmul.f32 %v3217_v61, %v2394_v54  ;;  %vm2422_vm9 = vcmp.eq.f32.partialorder %v2396_v60, inf  ;;  %v2425_v5 = vand.u32 2147483648, %v2396_v60 }
 0xcb0   : > { %vm2424_vm10 = vcmp.eq.f32.partialorder %v2396_v60, 0.0 }
 0xcb1   : > { %v2409_v1 = vsel %vm2408_vm1, %v2394_v54, %v2407_v62 }
 0xcb2   : > { %v3219_v3 = vpop.eup %3218  ;;  %v2412_v57 = vsel %vm2410_vm5, %v2411_v0, %v2409_v1 }
 0xcb3   : > { %v2427_v23 = vadd.f32 1e-06, %v2412_v57  ;;  %v2414_v26 = vmul.f32 %v3219_v3, %v2395_v56 }
 0xcb5   : > { %3222 = vrcp.f32 %v2427_v23  ;;  %v2416_v50 = vsel %vm2415_vm6, %v2395_v56, %v2414_v26 }
 0xcb6   : > { %v2419_v2 = vsel %vm2417_vm7, %v2418_v24, %v2416_v50 }
 0xcb7   : > { %v2428_v8 = vadd.f32 1e-06, %v2419_v2 }
 0xcb9   : > { %v3221_v51 = vpop.eup %3220  ;;  %3224 = vrcp.f32 %v2428_v8 }
 0xcba   : > { %v2421_v9 = vmul.f32 %v3221_v51, %v2396_v60 }
 0xcbc   : > { %v2423_v63 = vsel %vm2422_vm9, %v2396_v60, %v2421_v9 }
 0xcbd   : > { %v2426_v7 = vsel %vm2424_vm10, %v2425_v5, %v2423_v63 }
 0xcbe   : > { %v2429_v13 = vadd.f32 1e-06, %v2426_v7 }
 0xcbf   : > { %v3223_v4 = vpop.eup %3222 }
 0xcc0   : > { %3226 = vrcp.f32 %v2429_v13  ;;  %v2431_v18 = vmul.f32 %v3223_v4, %v2403_v14 }
 0xcc2   : > { %v2442_v19 = vadd.f32 %v2674_v15, %v2431_v18 }
 0xcc3   : > { %v3225_v20 = vpop.eup %3224 }
 0xcc4   : > { %2954 = vmatmul.mubr.msk.f32.vlgmr.msra.gmra.mrb[36].mxu1 %vm608_vm0, %v2442_v19  ;;  %v2433_v21 = vmul.f32 %v3225_v20, %v2404_v16 }
 0xcc5   : > { %2956 = vmatprep.mubr.msk.f32.mxu1 %vm3242_vm8, %v3239_v37 }
 0xcc6   : > { %v2443_v22 = vadd.f32 %v2674_v15, %v2433_v21 }
 0xcc8   : > { %2957 = vmatmul.mubr.msk.f32.gmra.mrb[38].mxu1 %vm608_vm0, %v2443_v22 }
 0xcc9   : > { %2959 = vmatprep.mubr.msk.f32.mxu1 %vm3242_vm8, %v3239_v37 }
 0xcca   : > { %v3227_v12 = vpop.eup %3226 }
 0xccb   : > { %v2435_v11 = vmul.f32 %v3227_v12, %v2405_v10 }
 0xccd   : > { %v2444_v25 = vadd.f32 %v2674_v15, %v2435_v11 }
 0xccf   : > { %2960 = vmatmul.mubr.msk.f32.gmra.mrb[40].mxu1 %vm608_vm0, %v2444_v25  ;;  %vm2554_vm0 = vcmask 253952  }
 0xd97   : > { %v2535_v29 = vpop.f32.mrb[36].mxu1 }
 0xd98   : > { %v2536_v31 = vadd.f32 %v2675_v27, %v2535_v29  ;;  %v2955_v32 = vpop.f32.mrb[37].mxu1 }
 0xd9a   : > { %v2549_v17 = vmax.f32 %v2536_v31, 0.0 }
 0xd9b   : > { %v2540_v40 = vpop.f32.mrb[38].mxu1 }
 0xd9c   : > { %2552 = vst.msk [vmem:[%s602_s26] sm:$0xff] %vm1821_vm3, %v2549_v17  ;;  %v2541_v37 = vadd.f32 %v2675_v27, %v2540_v40  ;;  %v2958_v58 = vpop.f32.mrb[39].mxu1 }
 0xd9e   : > { %v2550_v34 = vmax.f32 %v2541_v37, 0.0 }
 0xda0   : > { %2553 = vst.msk [vmem:[%s602_s26 + $0x8] sm:$0xff] %vm1821_vm3, %v2550_v34 }
 0xda2   : > { %v2545_v30 = vpop.f32.mrb[40].mxu1 }
 0xda3   : > { %v2546_v36 = vadd.f32 %v2675_v27, %v2545_v30  ;;  %v2961_v42 = vpop.f32.mrb[41].mxu1 }
 0xda5   : > { %v2551_v43 = vmax.f32 %v2546_v36, 0.0 }
 0xda7   : > { %2555 = vst.msk [vmem:[%s602_s26 + $0x10] sm:$0x1] %vm2554_vm0, %v2551_v43 }
 0xda8 PF: > { %s29_s0 = sadd.s32 1, %s3237_s0  }
 0xda9   : > { %p26_p4 = scmp.ge.s32.totalorder %s29_s0, 4  }
 0xdab   :  { %28 = sbr.rel (!%p26_p4) target bundleno = 5 (0x5), region = 126 }

// kernel: dncoder_forward.3
= control target key start
LH: loop header
LB: loop body
LE: loop exit
PB: predicated region body
PF: predicated region fallthrough
CT: control target
= control target key end

     0   :  { %s7801_s0 = inlined_call_operand.vmem [shape: f32[2,65,16], index: 0, kind: input, shape index: {}]   ;;  %s7802_s1 = inlined_call_operand.vmem [shape: f32[1,16], index: 1, kind: input, shape index: {}]   ;;  %s7803_s2 = inlined_call_operand.vmem [shape: f32[1,16], index: 2, kind: input, shape index: {}]   ;;  %s7804_s3 = inlined_call_operand.vmem [shape: f32[16,48], index: 3, kind: input, shape index: {}]   ;;  %s7805_s4 = inlined_call_operand.vmem [shape: f32[1,48], index: 4, kind: input, shape index: {}]   ;;  %s7806_s5 = inlined_call_operand.vmem [shape: f32[16,16], index: 5, kind: input, shape index: {}]   ;;  %s7807_s6 = inlined_call_operand.vmem [shape: f32[1,16], index: 6, kind: input, shape index: {}]   ;;  %s7808_s7 = inlined_call_operand.vmem [shape: f32[1,16], index: 7, kind: input, shape index: {}]   ;;  %s7809_s8 = inlined_call_operand.vmem [shape: f32[1,16], index: 8, kind: input, shape index: {}]   ;;  %s7810_s9 = inlined_call_operand.vmem [shape: f32[16,64], index: 9, kind: input, shape index: {}]   ;;  %s7811_s10 = inlined_call_operand.vmem [shape: f32[1,64], index: 10, kind: input, shape index: {}]   ;;  %s7812_s11 = inlined_call_operand.vmem [shape: f32[1,64], index: 11, kind: input, shape index: {}]   ;;  %s7813_s12 = inlined_call_operand.vmem [shape: f32[1,64], index: 12, kind: input, shape index: {}]   ;;  %s7814_s13 = inlined_call_operand.vmem [shape: f32[64,16], index: 13, kind: input, shape index: {}]   ;;  %s7815_s14 = inlined_call_operand.vmem [shape: f32[1,16], index: 14, kind: input, shape index: {}]   ;;  %s7816_s15 = inlined_call_operand.vmem [shape: f32[1,16], index: 15, kind: input, shape index: {}]   ;;  %s7817_s16 = inlined_call_operand.vmem [shape: f32[1,16], index: 16, kind: input, shape index: {}]   ;;  %s7818_s17 = inlined_call_operand.vmem [shape: f32[16,32], index: 17, kind: input, shape index: {}]   ;;  %s7819_s18 = inlined_call_operand.vmem [shape: f32[1,32], index: 18, kind: input, shape index: {}]   ;;  %s7820_s19 = inlined_call_operand.vmem [shape: f32[2,65,32], index: 19, kind: output, shape index: {}]  }
   0x1   :  { %7830 = sst [smem:[#allocation6_spill]] %s7801_s0  ;;  %s5950_s0 = smov 0  }
   0x2   :  { %7831 = sst [smem:[#allocation7_spill]] %s7802_s1 }
   0x3   :  { %7832 = sst [smem:[#allocation8_spill]] %s7803_s2 }
   0x4   :  { %7833 = sst [smem:[#allocation9_spill]] %s7804_s3 }
   0x5 LB: > { %s4295_s30 = sadd.s32 4294967295, %s5831_s0   ;;  %p4299_p0 = scmp.ge.s32.totalorder %s5831_s0, 1  ;;  %s5831_s0 = sphi %s5950_s0, %s29_s0  }
   0x6   : > { %p537_p1 = scmp.lt.s32.totalorder %s5831_s0, 3 }
   0x8   : > { %p538_p2 = pnand %p4299_p0, %p537_p1 }
   0xa   : > { %541 = sbr.rel (%p538_p2) target bundleno = 3637 (0xe35), region = 96 }
  0x11   : > { %p593_p3 = scmp.lt.s32.totalorder %s4295_s30, 1  ;;  %vm614_vm0 = vcmask 130048   ;;  %s7834_s22 = sld [smem:[#allocation6_spill]]  ;;  %vm639_vm1 = vcmask 122880   ;;  %vm5834_vm2 = vmmov 0  }
  0x12   : > { %s7835_s25 = sld [smem:[#allocation9_spill]]  ;;  %s7836_s29 = sld [smem:[#allocation7_spill]] }
  0x13   : > { %s7851_s30 = smov (!%p593_p3, %s4295_s30), 1  ;;  %s5836_s3 = smov 112  }
  0x14   : > { %s5342_s20 = smul.u32 72, %s7851_s30  ;;  %s5837_s26 = smov 108  }
  0x15   : > { %s5838_s27 = smov 104   ;;  %s5839_s28 = smov 124  }
  0x16   : > { %s5841_s21 = smov 120   ;;  %s5842_s1 = smov 116  }
  0x17   : > { %s5966_s2 = scalar_lea.vmem %s7834_s22, %s5342_s20  ;;  %s7837_s22 = sld [smem:[#allocation8_spill]] }
  0x18   : > { %v603_v0 = vld [vmem:[%s5966_s2] sm:$0xff]  ;;  %v605_v1 = vld [vmem:[%s5966_s2 + $0x10] sm:$0xff]  ;;  %v604_v2 = vld [vmem:[%s5966_s2 + $0x8] sm:$0xff]  ;;  %s5844_s23 = smov 92   ;;  %s5845_s24 = smov 88  }
  0x19   : > { %v615_v3 = vsel %vm614_vm0, %v603_v0, 0.0  ;;  %v621_v4 = vsel %vm614_vm0, %v605_v1, 0.0  ;;  %v606_v5 = vld [vmem:[%s5966_s2 + $0x18] sm:$0xff]  ;;  %v618_v6 = vsel %vm614_vm0, %v604_v2, 0.0  ;;  %v607_v8 = vld [vmem:[%s5966_s2 + $0x20] sm:$0xff]  ;;  %v608_v9 = vld [vmem:[%s5966_s2 + $0x28] sm:$0xff] }
  0x1a   : > { %616 = vadd.xlane.f32.xlu0 %v615_v3  ;;  %622 = vadd.xlane.f32.xlu1 %v621_v4  ;;  %v624_v7 = vsel %vm614_vm0, %v606_v5, 0.0  ;;  %v627_v10 = vsel %vm614_vm0, %v607_v8, 0.0  ;;  %v630_v11 = vsel %vm614_vm0, %v608_v9, 0.0  ;;  %v609_v12 = vld [vmem:[%s5966_s2 + $0x30] sm:$0xff]  ;;  %v610_v13 = vld [vmem:[%s5966_s2 + $0x38] sm:$0xff]  ;;  %v827_v63 = vld [vmem:[%s7835_s25] sm:$0xff] }
  0x1b   : > { %v633_v14 = vsel %vm614_vm0, %v609_v12, 0.0  ;;  %v636_v15 = vsel %vm614_vm0, %v610_v13, 0.0  ;;  %v611_v16 = vld [vmem:[%s5966_s2 + $0x40] sm:$0x1]  ;;  %v7824_v3 = vmov 0.0  }
  0x1c   : > { %v640_v17 = vsel %vm639_vm1, %v611_v16, 0.0  ;;  %4683 = vmatprep.mubr.msk.f32.mxu0 %vm5834_vm2, %v7824_v3  ;;  %4728 = vmatprep.mubr.msk.f32.mxu1 %vm5834_vm2, %v7824_v3 }
  0x1e   : > { %619 = vadd.xlane.f32.xlu0 %v618_v6  ;;  %625 = vadd.xlane.f32.xlu1 %v624_v7 }
  0x22   : > { %628 = vadd.xlane.f32.xlu0 %v627_v10  ;;  %631 = vadd.xlane.f32.xlu1 %v630_v11 }
  0x26   : > { %634 = vadd.xlane.f32.xlu0 %v633_v14  ;;  %637 = vadd.xlane.f32.xlu1 %v636_v15 }
  0x2a   : > { %641 = vadd.xlane.f32.xlu0 %v640_v17 }
  0xa7   : > { %v617_v18 = vpop.xlane.xlu0 %616  ;;  %v623_v19 = vpop.xlane.xlu1 %622 }
  0xa8   : > { %v644_v20 = vmul.f32 0.0625, %v617_v18  ;;  %v646_v21 = vmul.f32 0.0625, %v623_v19 }
  0xaa   : > { %v5986_v22 = vsub.f32 %v603_v0, %v644_v20  ;;  %v5988_v23 = vsub.f32 %v605_v1, %v646_v21  ;;  %v828_v0 = vld [vmem:[%s7835_s25 + $0x8] sm:$0xff] }
  0xab   : > { %v620_v24 = vpop.xlane.xlu0 %619  ;;  %v626_v25 = vpop.xlane.xlu1 %625  ;;  %v5207_v1 = vpack.c.bf16 %v828_v0, %v827_v63 }
  0xac   : > { %v645_v26 = vmul.f32 0.0625, %v620_v24  ;;  %v647_v27 = vmul.f32 0.0625, %v626_v25  ;;  %v662_v28 = vmul.f32 %v5986_v22, %v5986_v22  ;;  %v664_v29 = vmul.f32 %v5988_v23, %v5988_v23 }
  0xae   : > { %v5994_v30 = vsub.f32 %v604_v2, %v645_v26  ;;  %v5996_v31 = vsub.f32 %v606_v5, %v647_v27  ;;  %v671_v32 = vsel %vm614_vm0, %v662_v28, 0.0  ;;  %v677_v37 = vsel %vm614_vm0, %v664_v29, 0.0 }
  0xaf   : > { %v629_v33 = vpop.xlane.xlu0 %628  ;;  %v632_v34 = vpop.xlane.xlu1 %631  ;;  %672 = vadd.xlane.f32.xlu1 %v671_v32  ;;  %v7822_v2 = vmov 0.0|0.0  }
  0xb0   : > { %v648_v35 = vmul.f32 0.0625, %v629_v33  ;;  %v649_v36 = vmul.f32 0.0625, %v632_v34  ;;  %v663_v38 = vmul.f32 %v5994_v30, %v5994_v30  ;;  %v665_v39 = vmul.f32 %v5996_v31, %v5996_v31  ;;  %5206 = vmatprep.subr.bf16.mxu0 %v7822_v2  ;;  %5209 = vmatprep.subr.bf16.mxu1 %v7822_v2 }
  0xb1   : > { %5208 = vmatpush3.bf16.msra.mxu0 %v5207_v1 }
  0xb2   : > { %v6004_v40 = vsub.f32 %v607_v8, %v648_v35  ;;  %v6006_v41 = vsub.f32 %v608_v9, %v649_v36  ;;  %v674_v42 = vsel %vm614_vm0, %v663_v38, 0.0  ;;  %v680_v47 = vsel %vm614_vm0, %v665_v39, 0.0  ;;  %5225 = vmatprep.subr.bf16.mxu0 %v7822_v2 }
  0xb3   : > { %v635_v43 = vpop.xlane.xlu0 %634  ;;  %v638_v44 = vpop.xlane.xlu1 %637  ;;  %678 = vadd.xlane.f32.xlu1 %v677_v37  ;;  %675 = vadd.xlane.f32.xlu0 %v674_v42 }
  0xb4   : > { %v650_v45 = vmul.f32 0.0625, %v635_v43  ;;  %v651_v46 = vmul.f32 0.0625, %v638_v44  ;;  %v666_v48 = vmul.f32 %v6004_v40, %v6004_v40  ;;  %v667_v49 = vmul.f32 %v6006_v41, %v6006_v41 }
  0xb6   : > { %v6014_v50 = vsub.f32 %v609_v12, %v650_v45  ;;  %v6016_v51 = vsub.f32 %v610_v13, %v651_v46  ;;  %v683_v52 = vsel %vm614_vm0, %v666_v48, 0.0  ;;  %v686_v56 = vsel %vm614_vm0, %v667_v49, 0.0 }
  0xb7   : > { %v642_v53 = vpop.xlane.xlu0 %641  ;;  %681 = vadd.xlane.f32.xlu0 %v680_v47  ;;  %684 = vadd.xlane.f32.xlu1 %v683_v52 }
  0xb8   : > { %v652_v54 = vmul.f32 0.0625, %v642_v53  ;;  %v668_v55 = vmul.f32 %v6014_v50, %v6014_v50  ;;  %v669_v57 = vmul.f32 %v6016_v51, %v6016_v51 }
  0xba   : > { %v6024_v58 = vsub.f32 %v611_v16, %v652_v54  ;;  %v689_v59 = vsel %vm614_vm0, %v668_v55, 0.0  ;;  %v692_v61 = vsel %vm614_vm0, %v669_v57, 0.0 }
  0xbb   : > { %687 = vadd.xlane.f32.xlu0 %v686_v56  ;;  %690 = vadd.xlane.f32.xlu1 %v689_v59 }
  0xbc   : > { %v670_v60 = vmul.f32 %v6024_v58, %v6024_v58 }
  0xbe   : > { %v695_v62 = vsel %vm639_vm1, %v670_v60, 0.0 }
  0xbf   : > { %693 = vadd.xlane.f32.xlu0 %v692_v61  ;;  %696 = vadd.xlane.f32.xlu1 %v695_v62  ;;  %v6059_v61 = vld [vmem:[%s7836_s29] ss:$0 sm:$0xff]  ;;  %s5840_s29 = smov 100  }
 0x13c   : > { %v673_v4 = vpop.xlane.xlu1 %672 }
 0x13d   : > { %v698_v5 = vmul.f32 0.06666667, %v673_v4 }
 0x13f   : > { %5528 = vrsqrt.f32 %v698_v5  ;;  %vm724_vm3 = vcmp.eq.f32.partialorder %v698_v5, inf  ;;  %v727_v20 = vand.u32 2147483648, %v698_v5  ;;  %vm726_vm4 = vcmp.eq.f32.partialorder %v698_v5, 0.0 }
 0x140   : > { %v679_v6 = vpop.xlane.xlu1 %678  ;;  %v676_v7 = vpop.xlane.xlu0 %675 }
 0x141   : > { %v700_v8 = vmul.f32 0.06666667, %v679_v6  ;;  %v699_v9 = vmul.f32 0.06666667, %v676_v7  ;;  %v713_v7 = vmul.f32 %v6059_v61, %v5986_v22 }
 0x143   : > { %5530 = vrsqrt.f32 %v700_v8  ;;  %vm738_vm5 = vcmp.eq.f32.partialorder %v700_v8, inf  ;;  %v741_v35 = vand.u32 2147483648, %v700_v8  ;;  %vm731_vm6 = vcmp.eq.f32.partialorder %v699_v9, inf }
 0x144   : > { %5532 = vrsqrt.f32 %v699_v9  ;;  %v685_v10 = vpop.xlane.xlu1 %684  ;;  %v682_v11 = vpop.xlane.xlu0 %681  ;;  %v734_v38 = vand.u32 2147483648, %v699_v9  ;;  %vm740_vm7 = vcmp.eq.f32.partialorder %v700_v8, 0.0  ;;  %vm733_vm8 = vcmp.eq.f32.partialorder %v699_v9, 0.0 }
 0x145   : > { %v702_v12 = vmul.f32 0.06666667, %v685_v10  ;;  %v701_v13 = vmul.f32 0.06666667, %v682_v11 }
 0x147   : > { %5534 = vrsqrt.f32 %v702_v12  ;;  %vm752_vm9 = vcmp.eq.f32.partialorder %v702_v12, inf  ;;  %v755_v53 = vand.u32 2147483648, %v702_v12  ;;  %vm745_vm10 = vcmp.eq.f32.partialorder %v701_v13, inf }
 0x148   : > { %5536 = vrsqrt.f32 %v701_v13  ;;  %v691_v14 = vpop.xlane.xlu1 %690  ;;  %v688_v15 = vpop.xlane.xlu0 %687  ;;  %v748_v54 = vand.u32 2147483648, %v701_v13  ;;  %vm754_vm11 = vcmp.eq.f32.partialorder %v702_v12, 0.0  ;;  %vm747_vm12 = vcmp.eq.f32.partialorder %v701_v13, 0.0 }
 0x149   : > { %v5529_v16 = vpop.eup %5528  ;;  %v6044_v17 = vmul.f32 0.06666667, %v691_v14  ;;  %v6046_v18 = vmul.f32 0.06666667, %v688_v15 }
 0x14a   : > { %v723_v19 = vmul.f32 %v5529_v16, %v698_v5  ;;  %v714_v16 = vmul.f32 %v6059_v61, %v5994_v30 }
 0x14b   : > { %5538 = vrsqrt.f32 %v6044_v17  ;;  %vm766_vm13 = vcmp.eq.f32.partialorder %v6044_v17, inf  ;;  %vm759_vm14 = vcmp.eq.f32.partialorder %v6046_v18, inf  ;;  %v762_v1 = vand.u32 2147483648, %v6046_v18 }
 0x14c   : > { %v725_v21 = vsel %vm724_vm3, %v698_v5, %v723_v19  ;;  %5540 = vrsqrt.f32 %v6046_v18  ;;  %v697_v24 = vpop.xlane.xlu1 %696  ;;  %v694_v25 = vpop.xlane.xlu0 %693  ;;  %vm761_vm15 = vcmp.eq.f32.partialorder %v6046_v18, 0.0  ;;  %vm768_vm3 = vcmp.eq.f32.partialorder %v6044_v17, 0.0 }
 0x14d   : > { %v5531_v26 = vpop.eup %5530  ;;  %v6050_v27 = vmul.f32 0.06666667, %v694_v25  ;;  %v728_v28 = vsel %vm726_vm4, %v727_v20, %v725_v21  ;;  %v6052_v33 = vmul.f32 0.06666667, %v697_v24 }
 0x14e   : > { %v5533_v29 = vpop.eup %5532  ;;  %v737_v32 = vmul.f32 %v5531_v26, %v700_v8  ;;  %v785_v34 = vadd.f32 1e-06, %v728_v28  ;;  %v715_v26 = vmul.f32 %v6059_v61, %v5988_v23  ;;  %v716_v23 = vmul.f32 %v6059_v61, %v5996_v31 }
 0x14f   : > { %v730_v36 = vmul.f32 %v5533_v29, %v699_v9  ;;  %5542 = vrsqrt.f32 %v6050_v27  ;;  %vm773_vm4 = vcmp.eq.f32.partialorder %v6050_v27, inf  ;;  %v783_v29 = vand.u32 2147483648, %v6052_v33 }
 0x150   : > { %v739_v37 = vsel %vm738_vm5, %v700_v8, %v737_v32  ;;  %5544 = vrcp.f32 %v785_v34  ;;  %v769_v8 = vand.u32 2147483648, %v6044_v17  ;;  %vm775_vm5 = vcmp.eq.f32.partialorder %v6050_v27, 0.0 }
 0x151   : > { %v5535_v39 = vpop.eup %5534  ;;  %v732_v42 = vsel %vm731_vm6, %v699_v9, %v730_v36  ;;  %5546 = vrsqrt.f32 %v6052_v33  ;;  %v742_v46 = vsel %vm740_vm7, %v741_v35, %v739_v37  ;;  %vm780_vm6 = vcmp.eq.f32.partialorder %v6052_v33, inf }
 0x152   : > { %v5537_v43 = vpop.eup %5536  ;;  %v751_v44 = vmul.f32 %v5535_v39, %v702_v12  ;;  %v735_v45 = vsel %vm733_vm8, %v734_v38, %v732_v42  ;;  %v787_v49 = vadd.f32 1e-06, %v742_v46  ;;  %vm782_vm7 = vcmp.eq.f32.partialorder %v6052_v33, 0.0 }
 0x153   : > { %v744_v47 = vmul.f32 %v5537_v43, %v701_v13  ;;  %v786_v48 = vadd.f32 1e-06, %v735_v45  ;;  %vm1021_vm8 = vcmask 31744  }
 0x154   : > { %v753_v52 = vsel %vm752_vm9, %v702_v12, %v751_v44  ;;  %v717_v44 = vmul.f32 %v6059_v61, %v6004_v40  ;;  %vm6232_vm9 = vmpackc.low %vm1021_vm8, %vm1021_vm8 }
 0x155   : > { %v5539_v55 = vpop.eup %5538  ;;  %v746_v56 = vsel %vm745_vm10, %v701_v13, %v744_v47  ;;  %5548 = vrcp.f32 %v786_v48  ;;  %v756_v60 = vsel %vm754_vm11, %v755_v53, %v753_v52  ;;  %v6077_v13 = vld [vmem:[%s7837_s22] ss:$0 sm:$0xff]  ;;  %v718_v47 = vmul.f32 %v6059_v61, %v6006_v41  ;;  %s5843_s22 = smov 96  }
 0x156   : > { %v5541_v57 = vpop.eup %5540  ;;  %5550 = vrcp.f32 %v787_v49  ;;  %v749_v59 = vsel %vm747_vm12, %v748_v54, %v746_v56  ;;  %v765_v62 = vmul.f32 %v5539_v55, %v6044_v17  ;;  %v789_v5 = vadd.f32 1e-06, %v756_v60 }
 0x157   : > { %v758_v63 = vmul.f32 %v5541_v57, %v6046_v18  ;;  %v788_v0 = vadd.f32 1e-06, %v749_v59  ;;  %v719_v52 = vmul.f32 %v6059_v61, %v6014_v50  ;;  %v720_v55 = vmul.f32 %v6059_v61, %v6016_v51 }
 0x158   : > { %v767_v11 = vsel %vm766_vm13, %v6044_v17, %v765_v62  ;;  %v721_v59 = vmul.f32 %v6059_v61, %v6024_v58  ;;  %vm1340_vm10 = vcmask 1040384   ;;  %vm1186_vm12 = vcmask 531456  }
 0x159   : > { %v760_v4 = vsel %vm759_vm14, %v6046_v18, %v758_v63  ;;  %5552 = vrcp.f32 %v788_v0  ;;  %v5543_v6 = vpop.eup %5542  ;;  %v776_v18 = vand.u32 2147483648, %v6050_v27  ;;  %v770_v19 = vsel %vm768_vm3, %v769_v8, %v767_v11  ;;  %v4304_v63 = vld [vmem:[%s7805_s4] ss:$0 sm:$0xff] }
 0x15a   : > { %v763_v9 = vsel %vm761_vm15, %v762_v1, %v760_v4  ;;  %v5545_v10 = vpop.eup %5544  ;;  %v772_v12 = vmul.f32 %v5543_v6, %v6050_v27  ;;  %5554 = vrcp.f32 %v789_v5  ;;  %v791_v28 = vadd.f32 1e-06, %v770_v19 }
 0x15b   : > { %v5547_v14 = vpop.eup %5546  ;;  %v795_v15 = vmul.f32 %v5545_v10, %v713_v7  ;;  %v790_v22 = vadd.f32 1e-06, %v763_v9 }
 0x15c   : > { %v779_v21 = vmul.f32 %v5547_v14, %v6052_v33  ;;  %v774_v24 = vsel %vm773_vm4, %v6050_v27, %v772_v12 }
 0x15d   : > { %v818_v17 = vadd.f32 %v6077_v13, %v795_v15  ;;  %5556 = vrcp.f32 %v790_v22  ;;  %v777_v27 = vsel %vm775_vm5, %v776_v18, %v774_v24 }
 0x15e   : > { %v781_v36 = vsel %vm780_vm6, %v6052_v33, %v779_v21  ;;  %5558 = vrcp.f32 %v791_v28  ;;  %v792_v37 = vadd.f32 1e-06, %v777_v27 }
 0x15f   : > { %v5549_v20 = vpop.eup %5548  ;;  %4684 = vmatmul.mubr.msk.f32.vlgmr.msra.gmra.mrb[0].mxu0 %vm614_vm0, %v818_v17  ;;  %v784_v42 = vsel %vm782_vm7, %v783_v29, %v781_v36 }
 0x160   : > { %v5551_v25 = vpop.eup %5550  ;;  %v797_v30 = vmul.f32 %v5549_v20, %v714_v16  ;;  %4686 = vmatprep.mubr.msk.f32.mxu0 %vm5834_vm2, %v7824_v3  ;;  %5560 = vrcp.f32 %v792_v37  ;;  %v793_v31 = vadd.f32 1e-06, %v784_v42 }
 0x161   : > { %v799_v34 = vmul.f32 %v5551_v25, %v715_v26 }
 0x162   : > { %v819_v32 = vadd.f32 %v6077_v13, %v797_v30  ;;  %5562 = vrcp.f32 %v793_v31 }
 0x163   : > { %v5553_v35 = vpop.eup %5552  ;;  %v820_v38 = vadd.f32 %v6077_v13, %v799_v34 }
 0x164   : > { %4687 = vmatmul.mubr.msk.f32.gmra.mrb[2].mxu0 %vm614_vm0, %v819_v32  ;;  %v801_v39 = vmul.f32 %v5553_v35, %v716_v23  ;;  %v5555_v43 = vpop.eup %5554  ;;  %v973_v23 = vlaneseq }
 0x165   : > { %4689 = vmatprep.mubr.msk.f32.mxu0 %vm5834_vm2, %v7824_v3  ;;  %v803_v45 = vmul.f32 %v5555_v43, %v717_v44 }
 0x166   : > { %v821_v33 = vadd.f32 %v6077_v13, %v801_v39 }
 0x167   : > { %v5557_v46 = vpop.eup %5556  ;;  %v822_v40 = vadd.f32 %v6077_v13, %v803_v45 }
 0x168   : > { %4690 = vmatmul.mubr.msk.f32.gmra.mrb[4].mxu0 %vm614_vm0, %v820_v38  ;;  %v805_v48 = vmul.f32 %v5557_v46, %v718_v47  ;;  %v5559_v49 = vpop.eup %5558 }
 0x169   : > { %4692 = vmatprep.mubr.msk.f32.mxu0 %vm5834_vm2, %v7824_v3  ;;  %v807_v53 = vmul.f32 %v5559_v49, %v719_v52 }
 0x16a   : > { %v823_v41 = vadd.f32 %v6077_v13, %v805_v48  ;;  %v5561_v54 = vpop.eup %5560 }
 0x16b   : > { %v824_v56 = vadd.f32 %v6077_v13, %v807_v53  ;;  %v809_v50 = vmul.f32 %v5561_v54, %v720_v55 }
 0x16c   : > { %4693 = vmatmul.mubr.msk.f32.gmra.mrb[6].mxu0 %vm614_vm0, %v821_v33  ;;  %v5563_v57 = vpop.eup %5562 }
 0x16d   : > { %4695 = vmatprep.mubr.msk.f32.mxu0 %vm5834_vm2, %v7824_v3  ;;  %v825_v60 = vadd.f32 %v6077_v13, %v809_v50  ;;  %v811_v51 = vmul.f32 %v5563_v57, %v721_v59 }
 0x16f   : > { %v826_v62 = vadd.f32 %v6077_v13, %v811_v51 }
 0x170   : > { %4696 = vmatmul.mubr.msk.f32.gmra.mrb[8].mxu0 %vm614_vm0, %v822_v40 }
 0x171   : > { %4698 = vmatprep.mubr.msk.f32.mxu0 %vm5834_vm2, %v7824_v3 }
 0x174   : > { %4699 = vmatmul.mubr.msk.f32.gmra.mrb[10].mxu0 %vm614_vm0, %v823_v41 }
 0x175   : > { %4701 = vmatprep.mubr.msk.f32.mxu0 %vm5834_vm2, %v7824_v3 }
 0x178   : > { %4702 = vmatmul.mubr.msk.f32.gmra.mrb[12].mxu0 %vm614_vm0, %v824_v56 }
 0x179   : > { %4704 = vmatprep.mubr.msk.f32.mxu0 %vm5834_vm2, %v7824_v3 }
 0x17c   : > { %4705 = vmatmul.mubr.msk.f32.gmra.mrb[14].mxu0 %vm614_vm0, %v825_v60 }
 0x17d   : > { %4707 = vmatprep.mubr.msk.f32.mxu0 %vm5834_vm2, %v7824_v3 }
 0x180   : > { %4708 = vmatmul.mubr.msk.f32.gmra.mrb[16].mxu0 %vm614_vm0, %v826_v62 }
 0x181   : > { %4773 = vmatprep.mubr.msk.f32.mxu0 %vm5834_vm2, %v7824_v3 }
 0x232   : > { %v929_v58 = vpop.f32.mrb[0].mxu0 }
 0x233   : > { %v4685_v61 = vpop.f32.mrb[1].mxu0  ;;  %v6143_v1 = vadd.f32 %v4304_v63, %v929_v58 }
 0x237   : > { %v934_v0 = vpop.f32.mrb[2].mxu0 }
 0x238   : > { %v6145_v4 = vadd.f32 %v4304_v63, %v934_v0  ;;  %v4688_v5 = vpop.f32.mrb[3].mxu0 }
 0x23a   : > { %v6149_v6 = vpack.i.bf16 %v6145_v4, %v6143_v1 }
 0x23b   : > { %v939_v7 = vpop.f32.mrb[4].mxu0 }
 0x23c   : > { %5369 = vrot.lane.b32.xlu0 %v6149_v6, %s5836_s3  ;;  %v4691_v8 = vpop.f32.mrb[5].mxu0  ;;  %v6152_v10 = vadd.f32 %v4304_v63, %v939_v7 }
 0x23f   : > { %v944_v9 = vpop.f32.mrb[6].mxu0 }
 0x240   : > { %v6154_v11 = vadd.f32 %v4304_v63, %v944_v9  ;;  %v4694_v12 = vpop.f32.mrb[7].mxu0 }
 0x242   : > { %v6158_v13 = vpack.i.bf16 %v6154_v11, %v6152_v10 }
 0x243   : > { %v949_v14 = vpop.f32.mrb[8].mxu0 }
 0x244   : > { %5374 = vrot.lane.b32.xlu1 %v6158_v13, %s5836_s3  ;;  %v4697_v15 = vpop.f32.mrb[9].mxu0  ;;  %v6161_v16 = vadd.f32 %v4304_v63, %v949_v14 }
 0x247   : > { %v954_v22 = vpop.f32.mrb[10].mxu0 }
 0x248   : > { %v6163_v18 = vadd.f32 %v4304_v63, %v954_v22  ;;  %v4700_v17 = vpop.f32.mrb[11].mxu0 }
 0x24a   : > { %v6167_v19 = vpack.i.bf16 %v6163_v18, %v6161_v16 }
 0x24b   : > { %v959_v20 = vpop.f32.mrb[12].mxu0 }
 0x24c   : > { %5379 = vrot.lane.b32.xlu1 %v6167_v19, %s5836_s3  ;;  %v4703_v21 = vpop.f32.mrb[13].mxu0  ;;  %v6170_v25 = vadd.f32 %v4304_v63, %v959_v20 }
 0x24f   : > { %v964_v24 = vpop.f32.mrb[14].mxu0 }
 0x250   : > { %v6172_v26 = vadd.f32 %v4304_v63, %v964_v24  ;;  %v4706_v30 = vpop.f32.mrb[15].mxu0 }
 0x252   : > { %v6176_v28 = vpack.i.bf16 %v6172_v26, %v6170_v25 }
 0x253   : > { %v969_v29 = vpop.f32.mrb[16].mxu0 }
 0x254   : > { %v6178_v32 = vadd.f32 %v4304_v63, %v969_v29  ;;  %5384 = vrot.lane.b32.xlu1 %v6176_v28, %s5836_s3  ;;  %v4709_v34 = vpop.f32.mrb[17].mxu0 }
 0x256   : > { %1019 = vrot.lane.b32.xlu0 %v6178_v32, %s5836_s3  ;;  %s5846_s3 = smov 84  }
 0x258   : > { %5389 = vrot.lane.b32.xlu1 %v6149_v6, %s5837_s26 }
 0x25a   : > { %5394 = vrot.lane.b32.xlu0 %v6158_v13, %s5837_s26 }
 0x25c   : > { %5399 = vrot.lane.b32.xlu1 %v6167_v19, %s5837_s26 }
 0x25e   : > { %5404 = vrot.lane.b32.xlu0 %v6176_v28, %s5837_s26 }
 0x260   : > { %1487 = vrot.lane.b32.xlu1 %v6178_v32, %s5837_s26  ;;  %s5847_s26 = smov 4  }
 0x262   : > { %5409 = vrot.lane.b32.xlu0 %v6149_v6, %s5838_s27 }
 0x264   : > { %1453 = vrot.lane.b32.xlu1 %v6143_v1, %s5839_s28 }
 0x266   : > { %1455 = vrot.lane.b32.xlu0 %v6145_v4, %s5839_s28 }
 0x268   : > { %5414 = vrot.lane.b32.xlu1 %v6158_v13, %s5838_s27 }
 0x26a   : > { %1457 = vrot.lane.b32.xlu0 %v6152_v10, %s5839_s28 }
 0x26c   : > { %1459 = vrot.lane.b32.xlu1 %v6154_v11, %s5839_s28 }
 0x26e   : > { %5419 = vrot.lane.b32.xlu0 %v6167_v19, %s5838_s27 }
 0x270   : > { %1461 = vrot.lane.b32.xlu1 %v6161_v16, %s5839_s28 }
 0x272   : > { %1463 = vrot.lane.b32.xlu0 %v6163_v18, %s5839_s28 }
 0x274   : > { %5424 = vrot.lane.b32.xlu1 %v6176_v28, %s5838_s27 }
 0x276   : > { %1465 = vrot.lane.b32.xlu0 %v6170_v25, %s5839_s28 }
 0x278   : > { %1467 = vrot.lane.b32.xlu1 %v6172_v26, %s5839_s28 }
 0x27a   : > { %1469 = vrot.lane.b32.xlu0 %v6178_v32, %s5839_s28 }
 0x27c   : > { %1951 = vrot.lane.b32.xlu1 %v6178_v32, %s5838_s27  ;;  %s5848_s27 = smov 8  }
 0x27e   : > { %5429 = vrot.lane.b32.xlu0 %v6149_v6, %s5840_s29 }
 0x280   : > { %1917 = vrot.lane.b32.xlu1 %v6143_v1, %s5841_s21 }
 0x282   : > { %1919 = vrot.lane.b32.xlu0 %v6145_v4, %s5841_s21 }
 0x284   : > { %5434 = vrot.lane.b32.xlu1 %v6158_v13, %s5840_s29 }
 0x286   : > { %1921 = vrot.lane.b32.xlu0 %v6152_v10, %s5841_s21 }
 0x288   : > { %1923 = vrot.lane.b32.xlu1 %v6154_v11, %s5841_s21 }
 0x28a   : > { %5439 = vrot.lane.b32.xlu0 %v6167_v19, %s5840_s29 }
 0x28c   : > { %1925 = vrot.lane.b32.xlu1 %v6161_v16, %s5841_s21 }
 0x28e   : > { %1927 = vrot.lane.b32.xlu0 %v6163_v18, %s5841_s21 }
 0x290   : > { %5444 = vrot.lane.b32.xlu1 %v6176_v28, %s5840_s29 }
 0x292   : > { %1929 = vrot.lane.b32.xlu0 %v6170_v25, %s5841_s21 }
 0x294   : > { %1931 = vrot.lane.b32.xlu1 %v6172_v26, %s5841_s21 }
 0x296   : > { %1933 = vrot.lane.b32.xlu0 %v6178_v32, %s5841_s21 }
 0x298   : > { %2415 = vrot.lane.b32.xlu1 %v6178_v32, %s5840_s29 }
 0x29a   : > { %2381 = vrot.lane.b32.xlu0 %v6143_v1, %s5842_s1 }
 0x29c   : > { %2383 = vrot.lane.b32.xlu1 %v6145_v4, %s5842_s1 }
 0x29e   : > { %2385 = vrot.lane.b32.xlu0 %v6152_v10, %s5842_s1 }
 0x2a0   : > { %2387 = vrot.lane.b32.xlu1 %v6154_v11, %s5842_s1 }
 0x2a2   : > { %2389 = vrot.lane.b32.xlu0 %v6161_v16, %s5842_s1 }
 0x2a4   : > { %2391 = vrot.lane.b32.xlu1 %v6163_v18, %s5842_s1 }
 0x2a6   : > { %2393 = vrot.lane.b32.xlu0 %v6170_v25, %s5842_s1 }
 0x2a8   : > { %2395 = vrot.lane.b32.xlu1 %v6172_v26, %s5842_s1 }
 0x2aa   : > { %2397 = vrot.lane.b32.xlu0 %v6178_v32, %s5842_s1 }
 0x2ac   : > { %5454 = vrot.lane.b32.xlu1 %v6158_v13, %s5843_s22 }
 0x2ae   : > { %5449 = vrot.lane.b32.xlu0 %v6149_v6, %s5843_s22  ;;  %v5370_v27 = vpop.permute.xlu0 %5369 }
 0x2af   : > { %v5372_v35 = vunpack.i.h.bf16 %v5370_v27  ;;  %v5371_v36 = vunpack.i.l.bf16 %v5370_v27 }
 0x2b0   : > { %5464 = vrot.lane.b32.xlu1 %v6176_v28, %s5843_s22 }
 0x2b1   : > { %v5210_v37 = vpack.c.bf16 %v5372_v35, %v5371_v36 }
 0x2b2   : > { %5459 = vrot.lane.b32.xlu0 %v6167_v19, %s5843_s22 }
 0x2b3   : > { %5212 = vmatpush3.bf16.xpose.msk.msra.mxu1 %vm6232_vm9, %v5210_v37 }
 0x2b4   : > { %5469 = vrot.lane.b32.xlu1 %v6149_v6, %s5844_s23  ;;  %5213 = vmatprep.subr.bf16.mxu1 %v7822_v2 }
 0x2b6   : > { %v5375_v38 = vpop.permute.xlu1 %5374  ;;  %5474 = vrot.lane.b32.xlu0 %v6158_v13, %s5844_s23 }
 0x2b7   : > { %v5377_v39 = vunpack.i.h.bf16 %v5375_v38  ;;  %v5376_v42 = vunpack.i.l.bf16 %v5375_v38 }
 0x2b8   : > { %5479 = vrot.lane.b32.xlu1 %v6167_v19, %s5844_s23 }
 0x2b9   : > { %v5214_v43 = vpack.c.bf16 %v5377_v39, %v5376_v42 }
 0x2ba   : > { %5484 = vrot.lane.b32.xlu0 %v6176_v28, %s5844_s23 }
 0x2bb   : > { %5216 = vmatpush3.bf16.xpose.msk.msra.mxu1 %vm6232_vm9, %v5214_v43 }
 0x2bc   : > { %5494 = vrot.lane.b32.xlu1 %v6158_v13, %s5845_s24  ;;  %5217 = vmatprep.subr.bf16.mxu1 %v7822_v2 }
 0x2be   : > { %v5380_v44 = vpop.permute.xlu1 %5379  ;;  %5489 = vrot.lane.b32.xlu0 %v6149_v6, %s5845_s24 }
 0x2bf   : > { %v5382_v31 = vunpack.i.h.bf16 %v5380_v44  ;;  %v5381_v33 = vunpack.i.l.bf16 %v5380_v44 }
 0x2c0   : > { %5499 = vrot.lane.b32.xlu1 %v6167_v19, %s5845_s24 }
 0x2c1   : > { %v5218_v45 = vpack.c.bf16 %v5382_v31, %v5381_v33 }
 0x2c2   : > { %5504 = vrot.lane.b32.xlu0 %v6176_v28, %s5845_s24 }
 0x2c3   : > { %5220 = vmatpush3.bf16.xpose.msk.msra.mxu1 %vm6232_vm9, %v5218_v45 }
 0x2c4   : > { %1768 = vrot.lane.b32.xlu1 %v6178_v32, %s5844_s23  ;;  %5221 = vmatprep.subr.bf16.mxu1 %v7822_v2 }
 0x2c6   : > { %v5385_v46 = vpop.permute.xlu1 %5384  ;;  %1303 = vrot.lane.b32.xlu0 %v6178_v32, %s5843_s22  ;;  %s5849_s22 = smov 12  }
 0x2c7   : > { %v5387_v47 = vunpack.i.h.bf16 %v5385_v46  ;;  %v5386_v40 = vunpack.i.l.bf16 %v5385_v46 }
 0x2c8   : > { %2232 = vrot.lane.b32.xlu1 %v6178_v32, %s5845_s24  ;;  %v1020_v48 = vpop.permute.xlu0 %1019 }
 0x2c9   : > { %v5222_v49 = vpack.c.bf16 %v5387_v47, %v5386_v40 }
 0x2ca   : > { %v5390_v52 = vpop.permute.xlu1 %5389 }
 0x2cb   : > { %5224 = vmatpush3.bf16.xpose.msk.msra.mxu1 %vm6232_vm9, %v5222_v49  ;;  %v5392_v55 = vunpack.i.h.bf16 %v5390_v52  ;;  %v5391_v56 = vunpack.i.l.bf16 %v5390_v52 }
 0x2cc   : > { %v5395_v41 = vpop.permute.xlu0 %5394  ;;  %4726 = vmatprep.subr.mxu1 %v7824_v3 }
 0x2cd   : > { %v5238_v59 = vpack.c.bf16 %v5392_v55, %v5391_v56  ;;  %v5397_v62 = vunpack.i.h.bf16 %v5395_v41  ;;  %v5396_v58 = vunpack.i.l.bf16 %v5395_v41 }
 0x2ce   : > { %v5400_v53 = vpop.permute.xlu1 %5399 }
 0x2cf   : > { %v5242_v0 = vpack.c.bf16 %v5397_v62, %v5396_v58  ;;  %v5401_v7 = vunpack.i.l.bf16 %v5400_v53 }
 0x2d0   : > { %v5405_v54 = vpop.permute.xlu0 %5404 }
 0x2d1   : > { %v5406_v15 = vunpack.i.l.bf16 %v5405_v54 }
 0x2d2   : > { %v1488_v50 = vpop.permute.xlu1 %1487 }
 0x2d3   : > { %4727 = vmatpush3.xpose.msk.msra.mxu1 %vm1021_vm8, %v1020_v48 }
 0x2d4   : > { %v5410_v57 = vpop.permute.xlu0 %5409  ;;  %5237 = vmatprep.subr.bf16.mxu1 %v7822_v2 }
 0x2d5   : > { %v5411_v30 = vunpack.i.l.bf16 %v5410_v57 }
 0x2d6   : > { %v1454_v60 = vpop.permute.xlu1 %1453  ;;  %4729 = vmatmul.mubr.msk.f32.vlgmr.msra.gmra.mrb[0].mxu1 %vm1021_vm8, %v6143_v1 }
 0x2d7   : > { %5240 = vmatpush3.bf16.xpose.msk.msra.mxu1 %vm6232_vm9, %v5238_v59  ;;  %4731 = vmatprep.mubr.msk.f32.mxu1 %vm5834_vm2, %v7824_v3 }
 0x2d8   : > { %v6270_v51 = vpop.permute.xlu0 %1455  ;;  %5241 = vmatprep.subr.bf16.mxu1 %v7822_v2 }
 0x2da   : > { %v6273_v61 = vpop.permute.xlu1 %5414  ;;  %4732 = vmatmul.mubr.msk.f32.gmra.mrb[2].mxu1 %vm1021_vm8, %v6145_v4  ;;  %v5402_v4 = vunpack.i.h.bf16 %v5400_v53 }
 0x2db   : > { %4734 = vmatprep.mubr.msk.f32.mxu1 %vm5834_vm2, %v7824_v3  ;;  %v5417_v36 = vunpack.i.h.bf16 %v6273_v61  ;;  %v5416_v37 = vunpack.i.l.bf16 %v6273_v61 }
 0x2dc   : > { %v1458_v63 = vpop.permute.xlu0 %1457 }
 0x2dd   : > { %v5270_v42 = vpack.c.bf16 %v5417_v36, %v5416_v37 }
 0x2de   : > { %v6279_v1 = vpop.permute.xlu1 %1459  ;;  %4735 = vmatmul.mubr.msk.f32.gmra.mrb[4].mxu1 %vm1021_vm8, %v6152_v10  ;;  %v5246_v10 = vpack.c.bf16 %v5402_v4, %v5401_v7 }
 0x2df   : > { %5244 = vmatpush3.bf16.xpose.msk.msra.mxu1 %vm6232_vm9, %v5242_v0  ;;  %4737 = vmatprep.mubr.msk.f32.mxu1 %vm5834_vm2, %v7824_v3 }
 0x2e0   : > { %v6287_v5 = vpop.permute.xlu0 %5419  ;;  %5245 = vmatprep.subr.bf16.mxu1 %v7822_v2 }
 0x2e1   : > { %v5422_v31 = vunpack.i.h.bf16 %v6287_v5  ;;  %v5421_v33 = vunpack.i.l.bf16 %v6287_v5 }
 0x2e2   : > { %v6290_v8 = vpop.permute.xlu1 %1461  ;;  %4738 = vmatmul.mubr.msk.f32.gmra.mrb[6].mxu1 %vm1021_vm8, %v6154_v11  ;;  %v5407_v11 = vunpack.i.h.bf16 %v5405_v54 }
 0x2e3   : > { %4740 = vmatprep.mubr.msk.f32.mxu1 %vm5834_vm2, %v7824_v3  ;;  %v5274_v47 = vpack.c.bf16 %v5422_v31, %v5421_v33 }
 0x2e4   : > { %v6296_v9 = vpop.permute.xlu0 %1463  ;;  %v5250_v17 = vpack.c.bf16 %v5407_v11, %v5406_v15 }
 0x2e6   : > { %v6298_v12 = vpop.permute.xlu1 %5424  ;;  %4741 = vmatmul.mubr.msk.f32.gmra.mrb[8].mxu1 %vm1021_vm8, %v6161_v16 }
 0x2e7   : > { %5248 = vmatpush3.bf16.xpose.msk.msra.mxu1 %vm6232_vm9, %v5246_v10  ;;  %4743 = vmatprep.mubr.msk.f32.mxu1 %vm5834_vm2, %v7824_v3  ;;  %v5427_v49 = vunpack.i.h.bf16 %v6298_v12  ;;  %v5426_v52 = vunpack.i.l.bf16 %v6298_v12 }
 0x2e8   : > { %v6306_v14 = vpop.permute.xlu0 %1465  ;;  %5249 = vmatprep.subr.bf16.mxu1 %v7822_v2 }
 0x2e9   : > { %v5278_v54 = vpack.c.bf16 %v5427_v49, %v5426_v52 }
 0x2ea   : > { %v6309_v22 = vpop.permute.xlu1 %1467  ;;  %4744 = vmatmul.mubr.msk.f32.gmra.mrb[10].mxu1 %vm1021_vm8, %v6163_v18 }
 0x2eb   : > { %4746 = vmatprep.mubr.msk.f32.mxu1 %vm5834_vm2, %v7824_v3 }
 0x2ec   : > { %v6315_v16 = vpop.permute.xlu0 %1469 }
 0x2ee   : > { %v6317_v20 = vpop.permute.xlu1 %1951  ;;  %4747 = vmatmul.mubr.msk.f32.gmra.mrb[12].mxu1 %vm1021_vm8, %v6170_v25  ;;  %v5412_v25 = vunpack.i.h.bf16 %v5410_v57 }
 0x2ef   : > { %5252 = vmatpush3.bf16.xpose.msk.msra.mxu1 %vm6232_vm9, %v5250_v17  ;;  %4749 = vmatprep.mubr.msk.f32.mxu1 %vm5834_vm2, %v7824_v3 }
 0x2f0   : > { %v6325_v21 = vpop.permute.xlu0 %5429  ;;  %4816 = vmatprep.subr.mxu1 %v7824_v3 }
 0x2f1   : > { %v5432_v59 = vunpack.i.h.bf16 %v6325_v21 }
 0x2f2   : > { %v6328_v18 = vpop.permute.xlu1 %1917  ;;  %4750 = vmatmul.mubr.msk.f32.gmra.mrb[14].mxu1 %vm1021_vm8, %v6172_v26  ;;  %v5266_v26 = vpack.c.bf16 %v5412_v25, %v5411_v30 }
 0x2f3   : > { %4752 = vmatprep.mubr.msk.f32.mxu1 %vm5834_vm2, %v7824_v3 }
 0x2f4   : > { %v6334_v24 = vpop.permute.xlu0 %1919 }
 0x2f6   : > { %v6336_v29 = vpop.permute.xlu1 %5434  ;;  %4753 = vmatmul.mubr.msk.f32.gmra.mrb[16].mxu1 %vm1021_vm8, %v6178_v32 }
 0x2f7   : > { %4817 = vmatpush3.xpose.msk.msra.mxu1 %vm1021_vm8, %v1488_v50  ;;  %4818 = vmatprep.mubr.msk.f32.mxu1 %vm5834_vm2, %v7824_v3  ;;  %v5437_v0 = vunpack.i.h.bf16 %v6336_v29 }
 0x2f8   : > { %v6343_v34 = vpop.permute.xlu0 %1921  ;;  %5265 = vmatprep.subr.bf16.mxu1 %v7822_v2 }
 0x2fa   : > { %v6346_v27 = vpop.permute.xlu1 %1923  ;;  %4819 = vmatmul.mubr.msk.f32.vlgmr.msra.gmra.mrb[18].mxu1 %vm1021_vm8, %v1454_v60  ;;  %v5431_v60 = vunpack.i.l.bf16 %v6325_v21 }
 0x2fb   : > { %5268 = vmatpush3.bf16.xpose.msk.msra.mxu1 %vm6232_vm9, %v5266_v26  ;;  %4821 = vmatprep.mubr.msk.f32.mxu1 %vm5834_vm2, %v7824_v3 }
 0x2fc   : > { %v6353_v35 = vpop.permute.xlu0 %5439  ;;  %5269 = vmatprep.subr.bf16.mxu1 %v7822_v2  ;;  %v5294_v58 = vpack.c.bf16 %v5432_v59, %v5431_v60 }
 0x2fd   : > { %v5442_v17 = vunpack.i.h.bf16 %v6353_v35 }
 0x2fe   : > { %v6358_v38 = vpop.permute.xlu1 %1925  ;;  %4822 = vmatmul.mubr.msk.f32.gmra.mrb[20].mxu1 %vm1021_vm8, %v6270_v51 }
 0x2ff   : > { %4824 = vmatprep.mubr.msk.f32.mxu1 %vm5834_vm2, %v7824_v3 }
 0x300   : > { %v6364_v39 = vpop.permute.xlu0 %1927 }
 0x302   : > { %v6366_v43 = vpop.permute.xlu1 %5444  ;;  %4825 = vmatmul.mubr.msk.f32.gmra.mrb[22].mxu1 %vm1021_vm8, %v1458_v63 }
 0x303   : > { %5272 = vmatpush3.bf16.xpose.msk.msra.mxu1 %vm6232_vm9, %v5270_v42  ;;  %4827 = vmatprep.mubr.msk.f32.mxu1 %vm5834_vm2, %v7824_v3  ;;  %v5447_v26 = vunpack.i.h.bf16 %v6366_v43 }
 0x304   : > { %v6373_v44 = vpop.permute.xlu0 %1929  ;;  %5273 = vmatprep.subr.bf16.mxu1 %v7822_v2 }
 0x306   : > { %v6378_v45 = vpop.permute.xlu1 %1931  ;;  %4828 = vmatmul.mubr.msk.f32.gmra.mrb[24].mxu1 %vm1021_vm8, %v6279_v1  ;;  %v5436_v1 = vunpack.i.l.bf16 %v6336_v29 }
 0x307   : > { %4830 = vmatprep.mubr.msk.f32.mxu1 %vm5834_vm2, %v7824_v3 }
 0x308   : > { %v6384_v46 = vpop.permute.xlu0 %1933  ;;  %v5298_v12 = vpack.c.bf16 %v5437_v0, %v5436_v1 }
 0x30a   : > { %v6386_v40 = vpop.permute.xlu1 %2415  ;;  %4831 = vmatmul.mubr.msk.f32.gmra.mrb[26].mxu1 %vm1021_vm8, %v6290_v8 }
 0x30b   : > { %5276 = vmatpush3.bf16.xpose.msk.msra.mxu1 %vm6232_vm9, %v5274_v47  ;;  %4833 = vmatprep.mubr.msk.f32.mxu1 %vm5834_vm2, %v7824_v3 }
 0x30c   : > { %v6394_v48 = vpop.permute.xlu0 %2381  ;;  %5277 = vmatprep.subr.bf16.mxu1 %v7822_v2 }
 0x30e   : > { %v6399_v41 = vpop.permute.xlu1 %2383  ;;  %4834 = vmatmul.mubr.msk.f32.gmra.mrb[28].mxu1 %vm1021_vm8, %v6296_v9 }
 0x30f   : > { %4836 = vmatprep.mubr.msk.f32.mxu1 %vm5834_vm2, %v7824_v3 }
 0x310   : > { %v6405_v53 = vpop.permute.xlu0 %2385 }
 0x312   : > { %v6407_v55 = vpop.permute.xlu1 %2387  ;;  %4837 = vmatmul.mubr.msk.f32.gmra.mrb[30].mxu1 %vm1021_vm8, %v6306_v14 }
 0x313   : > { %5280 = vmatpush3.bf16.xpose.msk.msra.mxu1 %vm6232_vm9, %v5278_v54  ;;  %4839 = vmatprep.mubr.msk.f32.mxu1 %vm5834_vm2, %v7824_v3 }
 0x314   : > { %v6415_v56 = vpop.permute.xlu0 %2389  ;;  %4906 = vmatprep.subr.mxu1 %v7824_v3 }
 0x316   : > { %v6418_v50 = vpop.permute.xlu1 %2391  ;;  %4840 = vmatmul.mubr.msk.f32.gmra.mrb[32].mxu1 %vm1021_vm8, %v6309_v22 }
 0x317   : > { %4842 = vmatprep.mubr.msk.f32.mxu1 %vm5834_vm2, %v7824_v3 }
 0x318   : > { %v6424_v57 = vpop.permute.xlu0 %2393 }
 0x31a   : > { %v6428_v51 = vpop.permute.xlu1 %2395  ;;  %4843 = vmatmul.mubr.msk.f32.gmra.mrb[34].mxu1 %vm1021_vm8, %v6315_v16 }
 0x31b   : > { %4907 = vmatpush3.xpose.msk.msra.mxu1 %vm1021_vm8, %v6317_v20  ;;  %4908 = vmatprep.mubr.msk.f32.mxu1 %vm5834_vm2, %v7824_v3  ;;  %v5441_v20 = vunpack.i.l.bf16 %v6353_v35 }
 0x31c   : > { %v6436_v62 = vpop.permute.xlu0 %2397  ;;  %5293 = vmatprep.subr.bf16.mxu1 %v7822_v2 }
 0x31d   : > { %v5302_v30 = vpack.c.bf16 %v5442_v17, %v5441_v20 }
 0x31e   : > { %4909 = vmatmul.mubr.msk.f32.vlgmr.msra.gmra.mrb[36].mxu1 %vm1021_vm8, %v6328_v18  ;;  %v5455_v61 = vpop.permute.xlu1 %5454 }
 0x31f   : > { %5296 = vmatpush3.bf16.xpose.msk.msra.mxu1 %vm6232_vm9, %v5294_v58  ;;  %4911 = vmatprep.mubr.msk.f32.mxu1 %vm5834_vm2, %v7824_v3  ;;  %v5457_v7 = vunpack.i.h.bf16 %v5455_v61  ;;  %v5456_v8 = vunpack.i.l.bf16 %v5455_v61 }
 0x320   : > { %v5450_v63 = vpop.permute.xlu0 %5449  ;;  %5297 = vmatprep.subr.bf16.mxu1 %v7822_v2 }
 0x321   : > { %v5452_v5 = vunpack.i.h.bf16 %v5450_v63  ;;  %v5451_v4 = vunpack.i.l.bf16 %v5450_v63  ;;  %v5229_v14 = vpack.c.bf16 %v5457_v7, %v5456_v8 }
 0x322   : > { %4912 = vmatmul.mubr.msk.f32.gmra.mrb[38].mxu1 %vm1021_vm8, %v6334_v24  ;;  %v5465_v22 = vpop.permute.xlu1 %5464 }
 0x323   : > { %v5226_v9 = vpack.c.bf16 %v5452_v5, %v5451_v4  ;;  %4914 = vmatprep.mubr.msk.f32.mxu1 %vm5834_vm2, %v7824_v3  ;;  %v5467_v21 = vunpack.i.h.bf16 %v5465_v22  ;;  %v5466_v18 = vunpack.i.l.bf16 %v5465_v22 }
 0x324   : > { %v5460_v10 = vpop.permute.xlu0 %5459 }
 0x325   : > { %5227 = vmatpush3.bf16.msra.mxu0 %v5226_v9  ;;  %v5462_v11 = vunpack.i.h.bf16 %v5460_v10  ;;  %v5461_v15 = vunpack.i.l.bf16 %v5460_v10  ;;  %v5235_v29 = vpack.c.bf16 %v5467_v21, %v5466_v18 }
 0x326   : > { %4915 = vmatmul.mubr.msk.f32.gmra.mrb[40].mxu1 %vm1021_vm8, %v6343_v34  ;;  %5228 = vmatprep.subr.bf16.mxu0 %v7822_v2 }
 0x327   : > { %5300 = vmatpush3.bf16.xpose.msk.msra.mxu1 %vm6232_vm9, %v5298_v12  ;;  %4917 = vmatprep.mubr.msk.f32.mxu1 %vm5834_vm2, %v7824_v3  ;;  %v5232_v24 = vpack.c.bf16 %v5462_v11, %v5461_v15 }
 0x328   : > { %v6459_v16 = vpop.permute.xlu0 %5474  ;;  %5301 = vmatprep.subr.bf16.mxu1 %v7822_v2 }
 0x329   : > { %5230 = vmatpush3.bf16.msra.mxu0 %v5229_v14 }
 0x32a   : > { %4918 = vmatmul.mubr.msk.f32.gmra.mrb[42].mxu1 %vm1021_vm8, %v6346_v27  ;;  %5231 = vmatprep.subr.bf16.mxu0 %v7822_v2  ;;  %v5446_v27 = vunpack.i.l.bf16 %v6366_v43 }
 0x32b   : > { %4920 = vmatprep.mubr.msk.f32.mxu1 %vm5834_vm2, %v7824_v3 }
 0x32c   : > { %v6469_v25 = vpop.permute.xlu0 %5484  ;;  %v5306_v36 = vpack.c.bf16 %v5447_v26, %v5446_v27 }
 0x32d   : > { %5233 = vmatpush3.bf16.msra.mxu0 %v5232_v24 }
 0x32e   : > { %4921 = vmatmul.mubr.msk.f32.gmra.mrb[44].mxu1 %vm1021_vm8, %v6358_v38  ;;  %5234 = vmatprep.subr.bf16.mxu0 %v7822_v2  ;;  %v6546_v38 = vshrl.u32 %v973_v23, 7 }
 0x32f   : > { %5304 = vmatpush3.bf16.xpose.msk.msra.mxu1 %vm6232_vm9, %v5302_v30  ;;  %4923 = vmatprep.mubr.msk.f32.mxu1 %vm5834_vm2, %v7824_v3 }
 0x330   : > { %v6478_v34 = vpop.permute.xlu0 %5489  ;;  %5305 = vmatprep.subr.bf16.mxu1 %v7822_v2  ;;  %v6553_v43 = vadd.s32 8, %v6546_v38  ;;  %v6565_v47 = vadd.s32 16, %v6546_v38  ;;  %v6589_v59 = vadd.s32 32, %v6546_v38  ;;  %v6601_v63 = vadd.s32 40, %v6546_v38 }
 0x331   : > { %7840 = vst [vmem:[#allocation2_spill] sm:$0xff] %v6478_v34  ;;  %5236 = vmatpush3.bf16.msra.mxu0 %v5235_v29  ;;  %v6613_v8 = vadd.s32 48, %v6546_v38  ;;  %v6625_v15 = vadd.s32 56, %v6546_v38  ;;  %v6637_v24 = vadd.s32 64, %v6546_v38 }
 0x332   : > { %4924 = vmatmul.mubr.msk.f32.gmra.mrb[46].mxu1 %vm1021_vm8, %v6364_v39  ;;  %4771 = vmatprep.subr.mxu0 %v7824_v3  ;;  %v6548_v39 = vand.u32 127, %v973_v23 }
 0x333   : > { %4926 = vmatprep.mubr.msk.f32.mxu1 %vm5834_vm2, %v7824_v3 }
 0x334   : > { %v6488_v35 = vpop.permute.xlu0 %5504  ;;  %vm985_vm11 = vcmp.gt.s32.totalorder %v6548_v39, %v6546_v38  ;;  %vm986_vm13 = vcmp.gt.s32.totalorder %v6548_v39, %v6553_v43  ;;  %vm987_vm14 = vcmp.gt.s32.totalorder %v6548_v39, %v6565_v47  ;;  %vm989_vm3 = vcmp.gt.s32.totalorder %v6548_v39, %v6589_v59 }
 0x335   : > { %7841 = vst [vmem:[#allocation3_spill] sm:$0xff] %v6488_v35  ;;  %vm990_vm4 = vcmp.gt.s32.totalorder %v6548_v39, %v6601_v63  ;;  %vm991_vm5 = vcmp.gt.s32.totalorder %v6548_v39, %v6613_v8  ;;  %vm992_vm6 = vcmp.gt.s32.totalorder %v6548_v39, %v6625_v15  ;;  %vm993_vm7 = vcmp.gt.s32.totalorder %v6548_v39, %v6637_v24 }
 0x336   : > { %4927 = vmatmul.mubr.msk.f32.gmra.mrb[48].mxu1 %vm1021_vm8, %v6373_v44 }
 0x337   : > { %5308 = vmatpush3.bf16.xpose.msk.msra.mxu1 %vm6232_vm9, %v5306_v36  ;;  %4929 = vmatprep.mubr.msk.f32.mxu1 %vm5834_vm2, %v7824_v3  ;;  %vm1211_vm9 = vcmask 524288  }
 0x338   : > { %v1304_v37 = vpop.permute.xlu0 %1303  ;;  %4996 = vmatprep.subr.mxu1 %v7824_v3 }
 0x339   : > { %4772 = vmatpush3.msk.msra.mxu0 %vm1340_vm10, %v1304_v37 }
 0x33a   : > { %4930 = vmatmul.mubr.msk.f32.gmra.mrb[50].mxu1 %vm1021_vm8, %v6378_v45  ;;  %5253 = vmatprep.subr.bf16.mxu0 %v7822_v2 }
 0x33b   : > { %4932 = vmatprep.mubr.msk.f32.mxu1 %vm5834_vm2, %v7824_v3 }
 0x33e   : > { %4933 = vmatmul.mubr.msk.f32.gmra.mrb[52].mxu1 %vm1021_vm8, %v6384_v46 }
 0x33f   : > { %4997 = vmatpush3.xpose.msk.msra.mxu1 %vm1021_vm8, %v6386_v40  ;;  %4998 = vmatprep.mubr.msk.f32.mxu1 %vm5834_vm2, %v7824_v3 }
 0x340   : > { %5321 = vmatprep.subr.bf16.mxu1 %v7822_v2 }
 0x342   : > { %4999 = vmatmul.mubr.msk.f32.vlgmr.msra.gmra.mrb[54].mxu1 %vm1021_vm8, %v6394_v48 }
 0x343   : > { %5001 = vmatprep.mubr.msk.f32.mxu1 %vm5834_vm2, %v7824_v3 }
 0x346   : > { %5002 = vmatmul.mubr.msk.f32.gmra.mrb[56].mxu1 %vm1021_vm8, %v6399_v41 }
 0x347   : > { %5004 = vmatprep.mubr.msk.f32.mxu1 %vm5834_vm2, %v7824_v3 }
 0x34a   : > { %5005 = vmatmul.mubr.msk.f32.gmra.mrb[58].mxu1 %vm1021_vm8, %v6405_v53  ;;  %v6577_v53 = vadd.s32 24, %v6546_v38 }
 0x34b   : > { %5007 = vmatprep.mubr.msk.f32.mxu1 %vm5834_vm2, %v7824_v3 }
 0x34c   : > { %vm988_vm15 = vcmp.gt.s32.totalorder %v6548_v39, %v6577_v53 }
 0x34e   : > { %5008 = vmatmul.mubr.msk.f32.gmra.mrb[60].mxu1 %vm1021_vm8, %v6407_v55 }
 0x34f   : > { %5010 = vmatprep.mubr.msk.f32.mxu1 %vm5834_vm2, %v7824_v3 }
 0x352   : > { %5011 = vmatmul.mubr.msk.f32.gmra.mrb[62].mxu1 %vm1021_vm8, %v6415_v56 }
 0x353   : > { %5013 = vmatprep.mubr.msk.f32.mxu1 %vm5834_vm2, %v7824_v3 }
 0x356   : > { %5014 = vmatmul.mubr.msk.f32.gmra.mrb[64].mxu1 %vm1021_vm8, %v6418_v50 }
 0x357   : > { %5016 = vmatprep.mubr.msk.f32.mxu1 %vm5834_vm2, %v7824_v3 }
 0x35a   : > { %5017 = vmatmul.mubr.msk.f32.gmra.mrb[66].mxu1 %vm1021_vm8, %v6424_v57 }
 0x35b   : > { %5019 = vmatprep.mubr.msk.f32.mxu1 %vm5834_vm2, %v7824_v3 }
 0x35e   : > { %5020 = vmatmul.mubr.msk.f32.gmra.mrb[68].mxu1 %vm1021_vm8, %v6428_v51 }
 0x35f   : > { %5022 = vmatprep.mubr.msk.f32.mxu1 %vm5834_vm2, %v7824_v3 }
 0x362   : > { %5023 = vmatmul.mubr.msk.f32.gmra.mrb[70].mxu1 %vm1021_vm8, %v6436_v62 }
 0x363   : > { %5074 = vmatprep.mubr.msk.f32.mxu1 %vm5834_vm2, %v7824_v3 }
 0x3a9   : > { %v1124_v42 = vpop.f32.mrb[0].mxu1 }
 0x3aa   : > { %v1168_v44 = vmul.f32 0.5, %v1124_v42  ;;  %v4730_v31 = vpop.f32.mrb[1].mxu1 }
 0x3ac   : > { %v6558_v33 = vsel %vm985_vm11, %v1168_v44, -1e+09 }
 0x3ad   : > { %v1129_v45 = vpop.f32.mrb[2].mxu1  ;;  %v1187_v46 = vsel %vm1186_vm12, %v6558_v33, -inf }
 0x3ae   : > { %v1169_v40 = vmul.f32 0.5, %v1129_v45  ;;  %1188 = vmax.xlane.f32.xlu1 %v1187_v46  ;;  %v4733_v48 = vpop.f32.mrb[3].mxu1 }
 0x3b0   : > { %v6570_v49 = vsel %vm986_vm13, %v1169_v40, -1e+09 }
 0x3b1   : > { %v1134_v52 = vpop.f32.mrb[4].mxu1  ;;  %v1190_v41 = vsel %vm1186_vm12, %v6570_v49, -inf }
 0x3b2   : > { %v1170_v54 = vmul.f32 0.5, %v1134_v52  ;;  %1191 = vmax.xlane.f32.xlu0 %v1190_v41  ;;  %v4736_v55 = vpop.f32.mrb[5].mxu1 }
 0x3b4   : > { %v6582_v56 = vsel %vm987_vm14, %v1170_v54, -1e+09 }
 0x3b5   : > { %v1139_v50 = vpop.f32.mrb[6].mxu1  ;;  %v1193_v57 = vsel %vm1186_vm12, %v6582_v56, -inf }
 0x3b6   : > { %v1171_v60 = vmul.f32 0.5, %v1139_v50  ;;  %1194 = vmax.xlane.f32.xlu0 %v1193_v57  ;;  %v4739_v51 = vpop.f32.mrb[7].mxu1 }
 0x3b8   : > { %v6594_v62 = vsel %vm988_vm15, %v1171_v60, -1e+09 }
 0x3b9   : > { %v1144_v58 = vpop.f32.mrb[8].mxu1  ;;  %v1196_v61 = vsel %vm1186_vm12, %v6594_v62, -inf }
 0x3ba   : > { %v1172_v0 = vmul.f32 0.5, %v1144_v58  ;;  %1197 = vmax.xlane.f32.xlu0 %v1196_v61  ;;  %v4742_v1 = vpop.f32.mrb[9].mxu1 }
 0x3bc   : > { %v6606_v5 = vsel %vm989_vm3, %v1172_v0, -1e+09 }
 0x3bd   : > { %v1149_v4 = vpop.f32.mrb[10].mxu1  ;;  %v1199_v7 = vsel %vm1186_vm12, %v6606_v5, -inf }
 0x3be   : > { %v1173_v9 = vmul.f32 0.5, %v1149_v4  ;;  %1200 = vmax.xlane.f32.xlu1 %v1199_v7  ;;  %v4745_v10 = vpop.f32.mrb[11].mxu1 }
 0x3c0   : > { %v6618_v12 = vsel %vm990_vm4, %v1173_v9, -1e+09 }
 0x3c1   : > { %v1154_v14 = vpop.f32.mrb[12].mxu1  ;;  %v1202_v11 = vsel %vm1186_vm12, %v6618_v12, -inf }
 0x3c2   : > { %v1174_v22 = vmul.f32 0.5, %v1154_v14  ;;  %1203 = vmax.xlane.f32.xlu0 %v1202_v11  ;;  %v4748_v17 = vpop.f32.mrb[13].mxu1 }
 0x3c4   : > { %v6630_v20 = vsel %vm991_vm5, %v1174_v22, -1e+09 }
 0x3c5   : > { %v1159_v21 = vpop.f32.mrb[14].mxu1  ;;  %v1205_v18 = vsel %vm1186_vm12, %v6630_v20, -inf }
 0x3c6   : > { %v1175_v30 = vmul.f32 0.5, %v1159_v21  ;;  %1206 = vmax.xlane.f32.xlu1 %v1205_v18  ;;  %v4751_v29 = vpop.f32.mrb[15].mxu1 }
 0x3c8   : > { %v6642_v26 = vsel %vm992_vm6, %v1175_v30, -1e+09 }
 0x3c9   : > { %v1164_v27 = vpop.f32.mrb[16].mxu1  ;;  %v1208_v36 = vsel %vm1186_vm12, %v6642_v26, -inf }
 0x3ca   : > { %v1176_v37 = vmul.f32 0.5, %v1164_v27  ;;  %1209 = vmax.xlane.f32.xlu0 %v1208_v36  ;;  %v4754_v23 = vpop.f32.mrb[17].mxu1 }
 0x3cc   : > { %v6651_v42 = vsel %vm993_vm7, %v1176_v37, -1e+09 }
 0x3cd   : > { %v1591_v44 = vpop.f32.mrb[18].mxu1  ;;  %v1212_v31 = vsel %vm1211_vm9, %v6651_v42, -inf }
 0x3ce   : > { %v1635_v45 = vmul.f32 0.5, %v1591_v44  ;;  %1213 = vmax.xlane.f32.xlu1 %v1212_v31  ;;  %v4820_v46 = vpop.f32.mrb[19].mxu1 }
 0x3d0   : > { %v6658_v40 = vsel %vm985_vm11, %v1635_v45, -1e+09 }
 0x3d1   : > { %v1596_v48 = vpop.f32.mrb[20].mxu1  ;;  %v1653_v52 = vsel %vm1186_vm12, %v6658_v40, -inf }
 0x3d2   : > { %v1636_v41 = vmul.f32 0.5, %v1596_v48  ;;  %1654 = vmax.xlane.f32.xlu0 %v1653_v52  ;;  %v4823_v54 = vpop.f32.mrb[21].mxu1 }
 0x3d4   : > { %v6665_v55 = vsel %vm986_vm13, %v1636_v41, -1e+09 }
 0x3d5   : > { %v1601_v50 = vpop.f32.mrb[22].mxu1  ;;  %v1656_v57 = vsel %vm1186_vm12, %v6665_v55, -inf }
 0x3d6   : > { %v1637_v60 = vmul.f32 0.5, %v1601_v50  ;;  %1657 = vmax.xlane.f32.xlu1 %v1656_v57  ;;  %v4826_v51 = vpop.f32.mrb[23].mxu1 }
 0x3d8   : > { %v6672_v58 = vsel %vm987_vm14, %v1637_v60, -1e+09 }
 0x3d9   : > { %v1606_v61 = vpop.f32.mrb[24].mxu1  ;;  %v1659_v0 = vsel %vm1186_vm12, %v6672_v58, -inf }
 0x3da   : > { %v1638_v1 = vmul.f32 0.5, %v1606_v61  ;;  %1660 = vmax.xlane.f32.xlu0 %v1659_v0  ;;  %v4829_v4 = vpop.f32.mrb[25].mxu1 }
 0x3dc   : > { %v6679_v7 = vsel %vm988_vm15, %v1638_v1, -1e+09 }
 0x3dd   : > { %v1611_v9 = vpop.f32.mrb[26].mxu1  ;;  %v1662_v10 = vsel %vm1186_vm12, %v6679_v7, -inf }
 0x3de   : > { %v1639_v14 = vmul.f32 0.5, %v1611_v9  ;;  %1663 = vmax.xlane.f32.xlu1 %v1662_v10  ;;  %v4832_v11 = vpop.f32.mrb[27].mxu1 }
 0x3e0   : > { %v6686_v22 = vsel %vm989_vm3, %v1639_v14, -1e+09 }
 0x3e1   : > { %v1616_v17 = vpop.f32.mrb[28].mxu1  ;;  %v1665_v21 = vsel %vm1186_vm12, %v6686_v22, -inf }
 0x3e2   : > { %v1640_v18 = vmul.f32 0.5, %v1616_v17  ;;  %1666 = vmax.xlane.f32.xlu0 %v1665_v21  ;;  %v4835_v30 = vpop.f32.mrb[29].mxu1 }
 0x3e4   : > { %v6693_v29 = vsel %vm990_vm4, %v1640_v18, -1e+09 }
 0x3e5   : > { %v1621_v27 = vpop.f32.mrb[30].mxu1  ;;  %v1668_v36 = vsel %vm1186_vm12, %v6693_v29, -inf }
 0x3e6   : > { %v1641_v37 = vmul.f32 0.5, %v1621_v27  ;;  %1669 = vmax.xlane.f32.xlu1 %v1668_v36  ;;  %v4838_v23 = vpop.f32.mrb[31].mxu1 }
 0x3e8   : > { %v6700_v44 = vsel %vm991_vm5, %v1641_v37, -1e+09 }
 0x3e9   : > { %v1626_v31 = vpop.f32.mrb[32].mxu1  ;;  %v1671_v45 = vsel %vm1186_vm12, %v6700_v44, -inf }
 0x3ea   : > { %v1642_v46 = vmul.f32 0.5, %v1626_v31  ;;  %1672 = vmax.xlane.f32.xlu0 %v1671_v45  ;;  %v4841_v48 = vpop.f32.mrb[33].mxu1 }
 0x3ec   : > { %v6707_v52 = vsel %vm992_vm6, %v1642_v46, -1e+09 }
 0x3ed   : > { %v1631_v41 = vpop.f32.mrb[34].mxu1  ;;  %v1674_v54 = vsel %vm1186_vm12, %v6707_v52, -inf }
 0x3ee   : > { %v1643_v50 = vmul.f32 0.5, %v1631_v41  ;;  %1675 = vmax.xlane.f32.xlu1 %v1674_v54  ;;  %v4844_v57 = vpop.f32.mrb[35].mxu1 }
 0x3f0   : > { %v6714_v60 = vsel %vm993_vm7, %v1643_v50, -1e+09 }
 0x3f1   : > { %v2055_v51 = vpop.f32.mrb[36].mxu1  ;;  %v1677_v61 = vsel %vm1211_vm9, %v6714_v60, -inf }
 0x3f2   : > { %v2099_v0 = vmul.f32 0.5, %v2055_v51  ;;  %1678 = vmax.xlane.f32.xlu0 %v1677_v61  ;;  %v4910_v1 = vpop.f32.mrb[37].mxu1 }
 0x3f4   : > { %v6721_v4 = vsel %vm985_vm11, %v2099_v0, -1e+09  ;;  %v6736_v0 = vpop.permute.xlu1 %5469 }
 0x3f5   : > { %v2060_v9 = vpop.f32.mrb[38].mxu1  ;;  %v2117_v10 = vsel %vm1186_vm12, %v6721_v4, -inf }
 0x3f6   : > { %v2100_v14 = vmul.f32 0.5, %v2060_v9  ;;  %2118 = vmax.xlane.f32.xlu1 %v2117_v10  ;;  %v4913_v11 = vpop.f32.mrb[39].mxu1 }
 0x3f8   : > { %v6728_v17 = vsel %vm986_vm13, %v2100_v14, -1e+09  ;;  %v6738_v11 = vpop.permute.xlu1 %5479 }
 0x3f9   : > { %v2065_v21 = vpop.f32.mrb[40].mxu1  ;;  %v2120_v18 = vsel %vm1186_vm12, %v6728_v17, -inf }
 0x3fa   : > { %2121 = vmax.xlane.f32.xlu0 %v2120_v18  ;;  %v4916_v30 = vpop.f32.mrb[41].mxu1 }
 0x3fb   : > { %v2101_v30 = vmul.f32 0.5, %v2065_v21 }
 0x3fd   : > { %v2070_v27 = vpop.f32.mrb[42].mxu1 }
 0x3fe   : > { %v4919_v36 = vpop.f32.mrb[43].mxu1 }
 0x3ff   : > { %v6742_v36 = vpop.permute.xlu1 %5494 }
 0x400   : > { %7842 = vst [vmem:[#allocation4_spill] sm:$0xff] %v6742_v36 }
 0x401   : > { %v2075_v37 = vpop.f32.mrb[44].mxu1 }
 0x402   : > { %v4922_v23 = vpop.f32.mrb[45].mxu1 }
 0x405   : > { %v2080_v31 = vpop.f32.mrb[46].mxu1 }
 0x406   : > { %v4925_v45 = vpop.f32.mrb[47].mxu1 }
 0x407   : > { %5514 = vrot.lane.b32.xlu1 %v6158_v13, %s5846_s3  ;;  %v6747_v45 = vsel %vm987_vm14, %v2101_v30, -1e+09 }
 0x409   : > { %v2085_v46 = vpop.f32.mrb[48].mxu1 }
 0x40a   : > { %v4928_v48 = vpop.f32.mrb[49].mxu1 }
 0x40b   : > { %v2102_v48 = vmul.f32 0.5, %v2070_v27 }
 0x40d   : > { %v2090_v41 = vpop.f32.mrb[50].mxu1  ;;  %v6756_v21 = vsel %vm988_vm15, %v2102_v48, -1e+09 }
 0x40e   : > { %v4931_v54 = vpop.f32.mrb[51].mxu1 }
 0x40f   : > { %v2105_v54 = vmul.f32 0.5, %v2085_v46 }
 0x410   : > { %5509 = vrot.lane.b32.xlu0 %v6149_v6, %s5846_s3 }
 0x411   : > { %v2095_v50 = vpop.f32.mrb[52].mxu1  ;;  %v6761_v30 = vsel %vm991_vm5, %v2105_v54, -1e+09 }
 0x412   : > { %v4934_v57 = vpop.f32.mrb[53].mxu1  ;;  %v2107_v27 = vmul.f32 0.5, %v2095_v50  ;;  %v2135_v2 = vsel %vm1186_vm12, %v6761_v30, -inf }
 0x414   : > { %v6775_v54 = vsel %vm993_vm7, %v2107_v27, -1e+09  ;;  %v2106_v27 = vmul.f32 0.5, %v2090_v41 }
 0x415   : > { %v2519_v51 = vpop.f32.mrb[54].mxu1 }
 0x416   : > { %v5000_v61 = vpop.f32.mrb[55].mxu1  ;;  %v6802_v41 = vsel %vm992_vm6, %v2106_v27, -1e+09  ;;  %v2563_v47 = vmul.f32 0.5, %v2519_v51 }
 0x419   : > { %v2524_v1 = vpop.f32.mrb[56].mxu1 }
 0x41a   : > { %v5003_v9 = vpop.f32.mrb[57].mxu1  ;;  %v2564_v51 = vmul.f32 0.5, %v2524_v1 }
 0x41b   : > { %v2123_v9 = vsel %vm1186_vm12, %v6747_v45, -inf }
 0x41c   : > { %v6831_v1 = vsel %vm986_vm13, %v2564_v51, -1e+09 }
 0x41d   : > { %v2529_v10 = vpop.f32.mrb[58].mxu1 }
 0x41e   : > { %v5006_v14 = vpop.f32.mrb[59].mxu1  ;;  %v2565_v50 = vmul.f32 0.5, %v2529_v10 }
 0x41f   : > { %v6751_v14 = vpop.permute.xlu1 %5499 }
 0x420   : > { %7843 = vst [vmem:[#allocation5_spill] sm:$0xff] %v6751_v14 }
 0x421   : > { %v6740_v13 = vpop.f32.mrb[60].mxu1 }
 0x422   : > { %v5009_v18 = vpop.f32.mrb[61].mxu1  ;;  %v2566_v63 = vmul.f32 0.5, %v6740_v13 }
 0x423   : > { %v2103_v18 = vmul.f32 0.5, %v2075_v37  ;;  %v2104_v37 = vmul.f32 0.5, %v2080_v31 }
 0x424   : > { %v6847_v13 = vsel %vm988_vm15, %v2566_v63, -1e+09 }
 0x425   : > { %v2539_v23 = vpop.f32.mrb[62].mxu1  ;;  %v6770_v48 = vsel %vm989_vm3, %v2103_v18, -1e+09  ;;  %v2141_v18 = vsel %vm1211_vm9, %v6775_v54, -inf  ;;  %v6786_v31 = vsel %vm990_vm4, %v2104_v37, -1e+09 }
 0x426   : > { %v5012_v6 = vpop.f32.mrb[63].mxu1  ;;  %v2129_v35 = vsel %vm1186_vm12, %v6770_v48, -inf  ;;  %v2567_v10 = vmul.f32 0.5, %v2539_v23  ;;  %v2132_v14 = vsel %vm1186_vm12, %v6786_v31, -inf  ;;  %v2138_v37 = vsel %vm1186_vm12, %v6802_v41, -inf }
 0x427   : > { %v2590_v51 = vsel %vm1186_vm12, %v6847_v13, -inf }
 0x429   : > { %v2544_v57 = vpop.f32.mrb[64].mxu1 }
 0x42a   : > { %v5015_v61 = vpop.f32.mrb[65].mxu1  ;;  %v2568_v23 = vmul.f32 0.5, %v2544_v57 }
 0x42b   : > { %2124 = vmax.xlane.f32.xlu1 %v2123_v9  ;;  %v2126_v61 = vsel %vm1186_vm12, %v6756_v21, -inf  ;;  %v6777_v9 = vpop.permute.xlu1 %1768 }
 0x42c   : > { %v6821_v59 = vsel %vm990_vm4, %v2568_v23, -1e+09  ;;  %v2584_v23 = vsel %vm1186_vm12, %v6831_v1, -inf }
 0x42d   : > { %v2549_v46 = vpop.f32.mrb[66].mxu1  ;;  %v2596_v38 = vsel %vm1186_vm12, %v6821_v59, -inf }
 0x42e   : > { %v5018_v6 = vpop.f32.mrb[67].mxu1  ;;  %v2569_v15 = vmul.f32 0.5, %v2549_v46 }
 0x42f   : > { %2127 = vmax.xlane.f32.xlu0 %v2126_v61  ;;  %2136 = vmax.xlane.f32.xlu1 %v2135_v2  ;;  %v6791_v2 = vsel %vm987_vm14, %v2565_v50, -1e+09  ;;  %v6797_v34 = vpop.permute.xlu1 %2232 }
 0x430   : > { %v2587_v36 = vsel %vm1186_vm12, %v6791_v2, -inf }
 0x431   : > { %v2554_v6 = vpop.f32.mrb[68].mxu1 }
 0x432   : > { %v5021_v3 = vpop.f32.mrb[69].mxu1  ;;  %v2570_v57 = vmul.f32 0.5, %v2554_v6 }
 0x433   : > { %2130 = vmax.xlane.f32.xlu0 %v2129_v35  ;;  %2142 = vmax.xlane.f32.xlu1 %v2141_v18  ;;  %v6807_v35 = vsel %vm989_vm3, %v2567_v10, -1e+09  ;;  %v6816_v18 = vsel %vm985_vm11, %v2563_v47, -1e+09  ;;  %vm2972_vm11 = vcmask 97280  }
 0x434   : > { %v2593_v50 = vsel %vm1186_vm12, %v6807_v35, -inf  ;;  %v2581_v10 = vsel %vm1186_vm12, %v6816_v18, -inf  ;;  %v6837_v6 = vsel %vm992_vm6, %v2570_v57, -1e+09  ;;  %v6855_v57 = vsel %vm991_vm5, %v2569_v15, -1e+09 }
 0x435   : > { %v2559_v3 = vpop.f32.mrb[70].mxu1  ;;  %v2602_v43 = vsel %vm1186_vm12, %v6837_v6, -inf }
 0x436   : > { %v5024_v61 = vpop.f32.mrb[71].mxu1 }
 0x437   : > { %2133 = vmax.xlane.f32.xlu0 %v2132_v14  ;;  %2588 = vmax.xlane.f32.xlu1 %v2587_v36 }
 0x43b   : > { %v1189_v14 = vpop.xlane.xlu1 %1188  ;;  %2139 = vmax.xlane.f32.xlu0 %v2138_v37  ;;  %2594 = vmax.xlane.f32.xlu1 %v2593_v50 }
 0x43c   : > { %v1215_v36 = vsub.f32 %v6558_v33, %v1189_v14  ;;  %v2571_v14 = vmul.f32 0.5, %v2559_v3 }
 0x43e   : > { %v1224_v27 = vmul.f32 1.442695, %v1215_v36 }
 0x43f   : > { %v1192_v33 = vpop.xlane.xlu0 %1191  ;;  %2582 = vmax.xlane.f32.xlu0 %v2581_v10  ;;  %2597 = vmax.xlane.f32.xlu1 %v2596_v38  ;;  %v6865_v10 = vsel %vm993_vm7, %v2571_v14, -1e+09 }
 0x440   : > { %5564 = vpow2.f32 %v1224_v27  ;;  %v1216_v61 = vsub.f32 %v6570_v49, %v1192_v33  ;;  %v2605_v33 = vsel %vm1211_vm9, %v6865_v10, -inf }
 0x442   : > { %v1226_v47 = vmul.f32 1.442695, %v1216_v61 }
 0x443   : > { %v1195_v37 = vpop.xlane.xlu0 %1194  ;;  %2585 = vmax.xlane.f32.xlu0 %v2584_v23  ;;  %2603 = vmax.xlane.f32.xlu1 %v2602_v43 }
 0x444   : > { %5566 = vpow2.f32 %v1226_v47  ;;  %v1217_v50 = vsub.f32 %v6582_v56, %v1195_v37  ;;  %v2599_v56 = vsel %vm1186_vm12, %v6855_v57, -inf }
 0x446   : > { %v1228_v49 = vmul.f32 1.442695, %v1217_v50 }
 0x447   : > { %v1198_v53 = vpop.xlane.xlu0 %1197  ;;  %2591 = vmax.xlane.f32.xlu0 %v2590_v51 }
 0x448   : > { %5568 = vpow2.f32 %v1228_v49  ;;  %v1218_v46 = vsub.f32 %v6594_v62, %v1198_v53 }
 0x44a   : > { %v6858_v36 = vpop.eup %5564  ;;  %v1230_v27 = vmul.f32 1.442695, %v1218_v46 }
 0x44b   : > { %v1201_v8 = vpop.xlane.xlu1 %1200  ;;  %2600 = vmax.xlane.f32.xlu0 %v2599_v56  ;;  %v1242_v3 = vsel %vm1186_vm12, %v6858_v36, 0.0 }
 0x44c   : > { %5570 = vpow2.f32 %v1230_v27  ;;  %v1219_v38 = vsub.f32 %v6606_v5, %v1201_v8  ;;  %1243 = vadd.xlane.f32.xlu1 %v1242_v3 }
 0x44e   : > { %v6870_v62 = vpop.eup %5566  ;;  %v1232_v63 = vmul.f32 1.442695, %v1219_v38 }
 0x44f   : > { %v1204_v61 = vpop.xlane.xlu0 %1203  ;;  %2606 = vmax.xlane.f32.xlu0 %v2605_v33  ;;  %v1245_v39 = vsel %vm1186_vm12, %v6870_v62, 0.0 }
 0x450   : > { %5572 = vpow2.f32 %v1232_v63  ;;  %v1220_v24 = vsub.f32 %v6618_v12, %v1204_v61  ;;  %1246 = vadd.xlane.f32.xlu1 %v1245_v39 }
 0x452   : > { %v6877_v47 = vpop.eup %5568  ;;  %v1234_v23 = vmul.f32 1.442695, %v1220_v24 }
 0x453   : > { %v1207_v5 = vpop.xlane.xlu1 %1206  ;;  %v1248_v43 = vsel %vm1186_vm12, %v6877_v47, 0.0 }
 0x454   : > { %5574 = vpow2.f32 %v1234_v23  ;;  %v1221_v15 = vsub.f32 %v6630_v20, %v1207_v5  ;;  %1249 = vadd.xlane.f32.xlu1 %v1248_v43 }
 0x456   : > { %v6882_v37 = vpop.eup %5570  ;;  %v1236_v50 = vmul.f32 1.442695, %v1221_v15 }
 0x457   : > { %v1210_v49 = vpop.xlane.xlu0 %1209  ;;  %v1251_v51 = vsel %vm1186_vm12, %v6882_v37, 0.0 }
 0x458   : > { %5576 = vpow2.f32 %v1236_v50  ;;  %v1222_v12 = vsub.f32 %v6642_v26, %v1210_v49  ;;  %1252 = vadd.xlane.f32.xlu1 %v1251_v51 }
 0x45a   : > { %v6887_v14 = vpop.eup %5572  ;;  %v1238_v53 = vmul.f32 1.442695, %v1222_v12 }
 0x45b   : > { %v1214_v46 = vpop.xlane.xlu1 %1213  ;;  %v1254_v27 = vsel %vm1186_vm12, %v6887_v14, 0.0 }
 0x45c   : > { %5578 = vpow2.f32 %v1238_v53  ;;  %v1223_v20 = vsub.f32 %v6651_v42, %v1214_v46  ;;  %1255 = vadd.xlane.f32.xlu1 %v1254_v27 }
 0x45e   : > { %v6892_v56 = vpop.eup %5574  ;;  %v1240_v8 = vmul.f32 1.442695, %v1223_v20 }
 0x45f   : > { %v1655_v3 = vpop.xlane.xlu0 %1654  ;;  %v1257_v38 = vsel %vm1186_vm12, %v6892_v56, 0.0 }
 0x460   : > { %5580 = vpow2.f32 %v1240_v8  ;;  %v1680_v26 = vsub.f32 %v6658_v40, %v1655_v3  ;;  %1258 = vadd.xlane.f32.xlu1 %v1257_v38 }
 0x462   : > { %v6897_v63 = vpop.eup %5576  ;;  %v1689_v33 = vmul.f32 1.442695, %v1680_v26 }
 0x463   : > { %v1658_v61 = vpop.xlane.xlu1 %1657  ;;  %v1260_v39 = vsel %vm1186_vm12, %v6897_v63, 0.0 }
 0x464   : > { %5582 = vpow2.f32 %v1689_v33  ;;  %v1681_v42 = vsub.f32 %v6665_v55, %v1658_v61  ;;  %1261 = vadd.xlane.f32.xlu1 %v1260_v39 }
 0x466   : > { %v6902_v24 = vpop.eup %5578  ;;  %v1691_v23 = vmul.f32 1.442695, %v1681_v42 }
 0x467   : > { %v1661_v5 = vpop.xlane.xlu0 %1660  ;;  %v1263_v43 = vsel %vm1186_vm12, %v6902_v24, 0.0 }
 0x468   : > { %5584 = vpow2.f32 %v1691_v23  ;;  %v1682_v40 = vsub.f32 %v6672_v58, %v1661_v5  ;;  %1264 = vadd.xlane.f32.xlu1 %v1263_v43 }
 0x46a   : > { %v6907_v15 = vpop.eup %5580  ;;  %v1693_v50 = vmul.f32 1.442695, %v1682_v40 }
 0x46b   : > { %v1664_v49 = vpop.xlane.xlu1 %1663  ;;  %v1266_v51 = vsel %vm1211_vm9, %v6907_v15, 0.0 }
 0x46c   : > { %5586 = vpow2.f32 %v1693_v50  ;;  %v1683_v55 = vsub.f32 %v6679_v7, %v1664_v49  ;;  %1267 = vadd.xlane.f32.xlu1 %v1266_v51 }
 0x46e   : > { %v6912_v12 = vpop.eup %5582  ;;  %v1695_v53 = vmul.f32 1.442695, %v1683_v55 }
 0x46f   : > { %v1667_v46 = vpop.xlane.xlu0 %1666  ;;  %v1707_v27 = vsel %vm1186_vm12, %v6912_v12, 0.0 }
 0x470   : > { %5588 = vpow2.f32 %v1695_v53  ;;  %v1684_v58 = vsub.f32 %v6686_v22, %v1667_v46  ;;  %1708 = vadd.xlane.f32.xlu1 %v1707_v27 }
 0x472   : > { %v6917_v20 = vpop.eup %5584  ;;  %v1697_v8 = vmul.f32 1.442695, %v1684_v58 }
 0x473   : > { %v1670_v3 = vpop.xlane.xlu1 %1669  ;;  %v1710_v38 = vsel %vm1186_vm12, %v6917_v20, 0.0 }
 0x474   : > { %5590 = vpow2.f32 %v1697_v8  ;;  %v1685_v7 = vsub.f32 %v6693_v29, %v1670_v3  ;;  %1711 = vadd.xlane.f32.xlu1 %v1710_v38 }
 0x476   : > { %v6922_v26 = vpop.eup %5586  ;;  %v1699_v33 = vmul.f32 1.442695, %v1685_v7 }
 0x477   : > { %v1673_v61 = vpop.xlane.xlu0 %1672  ;;  %v1713_v39 = vsel %vm1186_vm12, %v6922_v26, 0.0 }
 0x478   : > { %5592 = vpow2.f32 %v1699_v33  ;;  %v1686_v22 = vsub.f32 %v6700_v44, %v1673_v61  ;;  %1714 = vadd.xlane.f32.xlu1 %v1713_v39 }
 0x47a   : > { %v6927_v42 = vpop.eup %5588  ;;  %v1701_v23 = vmul.f32 1.442695, %v1686_v22 }
 0x47b   : > { %v1716_v5 = vsel %vm1186_vm12, %v6927_v42, 0.0  ;;  %v1676_v43 = vpop.xlane.xlu1 %1675 }
 0x47c   : > { %5594 = vpow2.f32 %v1701_v23  ;;  %1717 = vadd.xlane.f32.xlu0 %v1716_v5  ;;  %v1687_v22 = vsub.f32 %v6707_v52, %v1676_v43 }
 0x47e   : > { %v6931_v29 = vpop.eup %5590  ;;  %v1703_v23 = vmul.f32 1.442695, %v1687_v22 }
 0x47f   : > { %v1679_v40 = vpop.xlane.xlu0 %1678  ;;  %v1719_v50 = vsel %vm1186_vm12, %v6931_v29, 0.0 }
 0x480   : > { %v1688_v49 = vsub.f32 %v6714_v60, %v1679_v40  ;;  %1720 = vadd.xlane.f32.xlu0 %v1719_v50 }
 0x482   : > { %v6936_v44 = vpop.eup %5592  ;;  %v1705_v51 = vmul.f32 1.442695, %v1688_v49 }
 0x483   : > { %v2119_v55 = vpop.xlane.xlu1 %2118  ;;  %v1722_v53 = vsel %vm1186_vm12, %v6936_v44, 0.0 }
 0x484   : > { %5596 = vpow2.f32 %v1705_v51  ;;  %v2144_v46 = vsub.f32 %v6721_v4, %v2119_v55  ;;  %1723 = vadd.xlane.f32.xlu1 %v1722_v53 }
 0x486   : > { %v6941_v27 = vpop.eup %5594  ;;  %v2153_v58 = vmul.f32 1.442695, %v2144_v46 }
 0x487   : > { %v2122_v8 = vpop.xlane.xlu0 %2121  ;;  %v1725_v3 = vsel %vm1186_vm12, %v6941_v27, 0.0  ;;  %v6961_v5 = vpop.permute.xlu1 %5514 }
 0x488   : > { %5598 = vpow2.f32 %v2153_v58  ;;  %v2145_v60 = vsub.f32 %v6728_v17, %v2122_v8  ;;  %1726 = vadd.xlane.f32.xlu0 %v1725_v3 }
 0x48a   : > { %v2155_v38 = vmul.f32 1.442695, %v2145_v60 }
 0x48b   : > { %v6965_v50 = vpop.permute.xlu0 %5509 }
 0x48c   : > { %5600 = vpow2.f32 %v2155_v38 }
 0x48d   : > { %5602 = vpow2.f32 %v1703_v23 }
 0x48e   : > { %v6946_v7 = vpop.eup %5596 }
 0x48f   : > { %v1731_v33 = vsel %vm1211_vm9, %v6946_v7, 0.0 }
 0x490   : > { %1732 = vadd.xlane.f32.xlu0 %v1731_v33 }
 0x492   : > { %v6950_v4 = vpop.eup %5598 }
 0x493   : > { %v2171_v61 = vsel %vm1186_vm12, %v6950_v4, 0.0 }
 0x494   : > { %2172 = vadd.xlane.f32.xlu0 %v2171_v61 }
 0x495   : > { %5519 = vrot.lane.b32.xlu1 %v6167_v19, %s5846_s3 }
 0x496   : > { %v6956_v39 = vpop.eup %5600 }
 0x497   : > { %v2174_v17 = vsel %vm1186_vm12, %v6956_v39, 0.0  ;;  %v6963_v40 = vpop.eup %5602 }
 0x498   : > { %2175 = vadd.xlane.f32.xlu0 %v2174_v17  ;;  %v1728_v19 = vsel %vm1186_vm12, %v6963_v40, 0.0 }
 0x4b8   : > { %v2125_v49 = vpop.xlane.xlu1 %2124 }
 0x4b9   : > { %v2146_v51 = vsub.f32 %v6747_v45, %v2125_v49  ;;  %1729 = vadd.xlane.f32.xlu1 %v1728_v19 }
 0x4bb   : > { %v2157_v55 = vmul.f32 1.442695, %v2146_v51 }
 0x4bc   : > { %v2128_v53 = vpop.xlane.xlu0 %2127  ;;  %v2137_v46 = vpop.xlane.xlu1 %2136 }
 0x4bd   : > { %5604 = vpow2.f32 %v2157_v55  ;;  %v2147_v52 = vsub.f32 %v6756_v21, %v2128_v53  ;;  %v2150_v58 = vsub.f32 %v6761_v30, %v2137_v46 }
 0x4bf   : > { %v2159_v43 = vmul.f32 1.442695, %v2147_v52  ;;  %v2165_v38 = vmul.f32 1.442695, %v2150_v58 }
 0x4c0   : > { %v2131_v8 = vpop.xlane.xlu0 %2130  ;;  %v2143_v3 = vpop.xlane.xlu1 %2142 }
 0x4c1   : > { %5606 = vpow2.f32 %v2159_v43  ;;  %v2148_v60 = vsub.f32 %v6770_v48, %v2131_v8  ;;  %v2152_v61 = vsub.f32 %v6775_v54, %v2143_v3 }
 0x4c3   : > { %v2161_v33 = vmul.f32 1.442695, %v2148_v60  ;;  %v2169_v21 = vmul.f32 1.442695, %v2152_v61 }
 0x4c4   : > { %v2134_v45 = vpop.xlane.xlu0 %2133  ;;  %v2589_v17 = vpop.xlane.xlu1 %2588 }
 0x4c5   : > { %5608 = vpow2.f32 %v2161_v33  ;;  %v2149_v22 = vsub.f32 %v6786_v31, %v2134_v45  ;;  %v2610_v43 = vsub.f32 %v6791_v2, %v2589_v17 }
 0x4c6   : > { %5610 = vpow2.f32 %v2165_v38 }
 0x4c7   : > { %v6975_v23 = vpop.eup %5604  ;;  %v2163_v49 = vmul.f32 1.442695, %v2149_v22  ;;  %v2621_v61 = vmul.f32 1.442695, %v2610_v43 }
 0x4c8   : > { %v2140_v30 = vpop.xlane.xlu0 %2139  ;;  %v2177_v19 = vsel %vm1186_vm12, %v6975_v23, 0.0  ;;  %v2595_v51 = vpop.xlane.xlu1 %2594 }
 0x4c9   : > { %5612 = vpow2.f32 %v2163_v49  ;;  %v2151_v48 = vsub.f32 %v6802_v41, %v2140_v30  ;;  %2178 = vadd.xlane.f32.xlu0 %v2177_v19  ;;  %v2612_v8 = vsub.f32 %v6807_v35, %v2595_v51 }
 0x4ca   : > { %5614 = vpow2.f32 %v2169_v21 }
 0x4cb   : > { %v6980_v54 = vpop.eup %5606  ;;  %v2167_v55 = vmul.f32 1.442695, %v2151_v48  ;;  %v2625_v17 = vmul.f32 1.442695, %v2612_v8 }
 0x4cc   : > { %v2583_v53 = vpop.xlane.xlu0 %2582  ;;  %v2180_v31 = vsel %vm1186_vm12, %v6980_v54, 0.0  ;;  %v2598_v41 = vpop.xlane.xlu1 %2597 }
 0x4cd   : > { %5616 = vpow2.f32 %v2167_v55  ;;  %v2608_v46 = vsub.f32 %v6816_v18, %v2583_v53  ;;  %2181 = vadd.xlane.f32.xlu1 %v2180_v31  ;;  %v2613_v45 = vsub.f32 %v6821_v59, %v2598_v41 }
 0x4cf   : > { %v6985_v52 = vpop.eup %5608  ;;  %v2617_v58 = vmul.f32 1.442695, %v2608_v46  ;;  %v2627_v59 = vmul.f32 1.442695, %v2613_v45  ;;  %v5471_v45 = vunpack.i.l.bf16 %v6736_v0 }
 0x4d0   : > { %v2586_v3 = vpop.xlane.xlu0 %2585  ;;  %v2183_v60 = vsel %vm1186_vm12, %v6985_v52, 0.0  ;;  %v6991_v38 = vpop.eup %5610 }
 0x4d1   : > { %5618 = vpow2.f32 %v2617_v58  ;;  %v2609_v33 = vsub.f32 %v6831_v1, %v2586_v3  ;;  %2184 = vadd.xlane.f32.xlu0 %v2183_v60  ;;  %v2189_v21 = vsel %vm1186_vm12, %v6991_v38, 0.0  ;;  %v7003_v30 = vpop.xlane.xlu1 %2603 }
 0x4d3   : > { %v6994_v18 = vpop.eup %5612  ;;  %v2619_v2 = vmul.f32 1.442695, %v2609_v33 }
 0x4d4   : > { %v2592_v22 = vpop.xlane.xlu0 %2591  ;;  %v2186_v35 = vsel %vm1186_vm12, %v6994_v18, 0.0  ;;  %v7001_v49 = vpop.eup %5614 }
 0x4d5   : > { %5620 = vpow2.f32 %v2619_v2  ;;  %v2611_v1 = vsub.f32 %v6847_v13, %v2592_v22  ;;  %2187 = vadd.xlane.f32.xlu1 %v2186_v35  ;;  %2190 = vadd.xlane.f32.xlu0 %v2189_v21  ;;  %v2195_v53 = vsel %vm1211_vm9, %v7001_v49, 0.0 }
 0x4d6   : > { %5622 = vpow2.f32 %v2621_v61  ;;  %v5472_v61 = vunpack.i.h.bf16 %v6736_v0  ;;  %v5477_v0 = vunpack.i.h.bf16 %v6459_v16 }
 0x4d7   : > { %v7006_v19 = vpop.eup %5616  ;;  %v2623_v48 = vmul.f32 1.442695, %v2611_v1  ;;  %5624 = vpow2.f32 %v2625_v17 }
 0x4d8   : > { %v2601_v51 = vpop.xlane.xlu0 %2600  ;;  %v2192_v55 = vsel %vm1186_vm12, %v7006_v19, 0.0 }
 0x4d9   : > { %5626 = vpow2.f32 %v2623_v48  ;;  %v2614_v31 = vsub.f32 %v6855_v57, %v2601_v51  ;;  %2193 = vadd.xlane.f32.xlu1 %v2192_v55  ;;  %v1244_v13 = vpop.xlane.xlu1 %1243  ;;  %2196 = vadd.xlane.f32.xlu0 %v2195_v53  ;;  %v5254_v48 = vpack.c.bf16 %v5472_v61, %v5471_v45  ;;  %v5476_v51 = vunpack.i.l.bf16 %v6459_v16 }
 0x4da   : > { %5628 = vrcp.f32 %v1244_v13 }
 0x4db   : > { %v7013_v46 = vpop.eup %5618  ;;  %5630 = vpow2.f32 %v2627_v59  ;;  %v2629_v43 = vmul.f32 1.442695, %v2614_v31 }
 0x4dc   : > { %v2635_v58 = vsel %vm1186_vm12, %v7013_v46, 0.0 }
 0x4dd   : > { %v1247_v41 = vpop.xlane.xlu1 %1246  ;;  %2636 = vadd.xlane.f32.xlu0 %v2635_v58  ;;  %v5257_v58 = vpack.c.bf16 %v5477_v0, %v5476_v51 }
 0x4de   : > { %5632 = vrcp.f32 %v1247_v41  ;;  %v5482_v41 = vunpack.i.h.bf16 %v6738_v11 }
 0x4df   : > { %v7017_v8 = vpop.eup %5620  ;;  %5634 = vpow2.f32 %v2629_v43 }
 0x4e0   : > { %v2638_v57 = vsel %vm1186_vm12, %v7017_v8, 0.0  ;;  %v7021_v3 = vpop.eup %5622 }
 0x4e1   : > { %v1250_v60 = vpop.xlane.xlu1 %1249  ;;  %2639 = vadd.xlane.f32.xlu0 %v2638_v57  ;;  %v7023_v33 = vpop.eup %5624  ;;  %v2641_v35 = vsel %vm1186_vm12, %v7021_v3, 0.0  ;;  %v5481_v57 = vunpack.i.l.bf16 %v6738_v11 }
 0x4e2   : > { %5636 = vrcp.f32 %v1250_v60  ;;  %v2647_v31 = vsel %vm1186_vm12, %v7023_v33, 0.0  ;;  %v7845_v60 = vmov 0.0|0.0  }
 0x4e3   : > { %v7027_v2 = vpop.eup %5626  ;;  %v5260_v11 = vpack.c.bf16 %v5482_v41, %v5481_v57  ;;  %v7846_v57 = vld [vmem:[#allocation2_spill] sm:$0xff] }
 0x4e4   : > { %v5629_v17 = vpop.eup %5628  ;;  %v2644_v22 = vsel %vm1186_vm12, %v7027_v2, 0.0 }
 0x4e5   : > { %v7033_v21 = vpop.eup %5630  ;;  %v1278_v1 = vmul.f32 %v5629_v17, %v6858_v36  ;;  %2645 = vadd.xlane.f32.xlu1 %v2644_v22  ;;  %v1253_v59 = vpop.xlane.xlu1 %1252  ;;  %2642 = vadd.xlane.f32.xlu0 %v2641_v35  ;;  %v7844_v36 = vmov 0.0   ;;  %v5487_v22 = vunpack.i.h.bf16 %v6469_v25  ;;  %v5486_v35 = vunpack.i.l.bf16 %v6469_v25 }
 0x4e6   : > { %5638 = vrcp.f32 %v1253_v59  ;;  %v2650_v53 = vsel %vm1186_vm12, %v7033_v21, 0.0 }
 0x4e7   : > { %4774 = vmatmul.mubr.msk.f32.vlgmr.msra.gmra.mrb[18].mxu0 %vm1186_vm12, %v1278_v1  ;;  %v5263_v0 = vpack.c.bf16 %v5487_v22, %v5486_v35 }
 0x4e8   : > { %v5633_v55 = vpop.eup %5632  ;;  %5255 = vmatpush3.bf16.msra.mxu0 %v5254_v48  ;;  %4776 = vmatprep.mubr.msk.f32.mxu0 %vm5834_vm2, %v7844_v36 }
 0x4e9   : > { %v7045_v13 = vpop.eup %5634  ;;  %2651 = vadd.xlane.f32.xlu1 %v2650_v53  ;;  %v1256_v43 = vpop.xlane.xlu1 %1255  ;;  %2648 = vadd.xlane.f32.xlu0 %v2647_v31  ;;  %v1279_v16 = vmul.f32 %v5633_v55, %v6870_v62 }
 0x4ea   : > { %5640 = vrcp.f32 %v1256_v43  ;;  %5256 = vmatprep.subr.bf16.mxu0 %v7845_v60  ;;  %v2653_v45 = vsel %vm1186_vm12, %v7045_v13, 0.0 }
 0x4eb   : > { %4777 = vmatmul.mubr.msk.f32.gmra.mrb[20].mxu0 %vm1186_vm12, %v1279_v16 }
 0x4ec   : > { %v5637_v61 = vpop.eup %5636  ;;  %5258 = vmatpush3.bf16.msra.mxu0 %v5257_v58  ;;  %4779 = vmatprep.mubr.msk.f32.mxu0 %vm5834_vm2, %v7844_v36 }
 0x4ed   : > { %2654 = vadd.xlane.f32.xlu1 %v2653_v45  ;;  %v1259_v62 = vpop.xlane.xlu1 %1258  ;;  %5259 = vmatprep.subr.bf16.mxu0 %v7845_v60  ;;  %v1280_v17 = vmul.f32 %v5637_v61, %v6877_v47  ;;  %v5491_v61 = vunpack.i.l.bf16 %v7846_v57 }
 0x4ee   : > { %5642 = vrcp.f32 %v1259_v62 }
 0x4ef   : > { %4780 = vmatmul.mubr.msk.f32.gmra.mrb[22].mxu0 %vm1186_vm12, %v1280_v17 }
 0x4f0   : > { %v5639_v1 = vpop.eup %5638  ;;  %5261 = vmatpush3.bf16.msra.mxu0 %v5260_v11  ;;  %4782 = vmatprep.mubr.msk.f32.mxu0 %vm5834_vm2, %v7844_v36  ;;  %v7847_v11 = vld [vmem:[#allocation4_spill] sm:$0xff] }
 0x4f1   : > { %v1262_v59 = vpop.xlane.xlu1 %1261  ;;  %5262 = vmatprep.subr.bf16.mxu0 %v7845_v60  ;;  %v1281_v48 = vmul.f32 %v5639_v1, %v6882_v37  ;;  %v5497_v22 = vunpack.i.h.bf16 %v7847_v11 }
 0x4f2   : > { %5644 = vrcp.f32 %v1262_v59 }
 0x4f3   : > { %4783 = vmatmul.mubr.msk.f32.gmra.mrb[24].mxu0 %vm1186_vm12, %v1281_v48 }
 0x4f4   : > { %v5641_v47 = vpop.eup %5640  ;;  %5264 = vmatpush3.bf16.msra.mxu0 %v5263_v0  ;;  %4785 = vmatprep.mubr.msk.f32.mxu0 %vm5834_vm2, %v7844_v36  ;;  %v7848_v0 = vld [vmem:[#allocation5_spill] sm:$0xff] }
 0x4f5   : > { %v1265_v25 = vpop.xlane.xlu1 %1264  ;;  %4861 = vmatprep.subr.mxu0 %v7844_v36  ;;  %v1282_v51 = vmul.f32 %v5641_v47, %v6887_v14  ;;  %v5502_v47 = vunpack.i.h.bf16 %v7848_v0 }
 0x4f6   : > { %5646 = vrcp.f32 %v1265_v25  ;;  %v5501_v25 = vunpack.i.l.bf16 %v7848_v0 }
 0x4f7   : > { %4786 = vmatmul.mubr.msk.f32.gmra.mrb[26].mxu0 %vm1186_vm12, %v1282_v51 }
 0x4f8   : > { %v5643_v55 = vpop.eup %5642  ;;  %4862 = vmatpush3.msk.msra.mxu0 %vm1340_vm10, %v6777_v9  ;;  %4788 = vmatprep.mubr.msk.f32.mxu0 %vm5834_vm2, %v7844_v36 }
 0x4f9   : > { %v1268_v37 = vpop.xlane.xlu1 %1267  ;;  %v1283_v53 = vmul.f32 %v5643_v55, %v6892_v56  ;;  %5281 = vmatprep.subr.bf16.mxu0 %v7845_v60 }
 0x4fa   : > { %5648 = vrcp.f32 %v1268_v37  ;;  %v5288_v37 = vpack.c.bf16 %v5502_v47, %v5501_v25 }
 0x4fb   : > { %4789 = vmatmul.mubr.msk.f32.gmra.mrb[28].mxu0 %vm1186_vm12, %v1283_v53  ;;  %v7849_v53 = vld [vmem:[#allocation3_spill] sm:$0xff] }
 0x4fc   : > { %v5645_v31 = vpop.eup %5644  ;;  %4791 = vmatprep.mubr.msk.f32.mxu0 %vm5834_vm2, %v7844_v36 }
 0x4fd   : > { %v1709_v14 = vpop.xlane.xlu1 %1708  ;;  %v1284_v43 = vmul.f32 %v5645_v31, %v6897_v63  ;;  %v5507_v31 = vunpack.i.h.bf16 %v7849_v53 }
 0x4fe   : > { %5650 = vrcp.f32 %v1709_v14  ;;  %2696 = vrot.lane.b32.xlu1 %v6178_v32, %s5846_s3  ;;  %v2607_v32 = vpop.xlane.xlu0 %2606  ;;  %v5506_v14 = vunpack.i.l.bf16 %v7849_v53 }
 0x4ff   : > { %4792 = vmatmul.mubr.msk.f32.gmra.mrb[30].mxu0 %vm1186_vm12, %v1284_v43  ;;  %5524 = vrot.lane.b32.xlu0 %v6176_v28, %s5846_s3  ;;  %v5492_v28 = vunpack.i.h.bf16 %v7846_v57  ;;  %v2616_v48 = vsub.f32 %v6865_v10, %v2607_v32 }
 0x500   : > { %v5647_v9 = vpop.eup %5646  ;;  %4794 = vmatprep.mubr.msk.f32.mxu0 %vm5834_vm2, %v7844_v36 }
 0x501   : > { %v1712_v56 = vpop.xlane.xlu1 %1711  ;;  %v1285_v16 = vmul.f32 %v5647_v9, %v6902_v24  ;;  %v2615_v24 = vsub.f32 %v6837_v6, %v7003_v30  ;;  %v5282_v35 = vpack.c.bf16 %v5492_v28, %v5491_v61  ;;  %v2633_v10 = vmul.f32 1.442695, %v2616_v48 }
 0x502   : > { %5652 = vrcp.f32 %v1712_v56 }
 0x503   : > { %4795 = vmatmul.mubr.msk.f32.gmra.mrb[32].mxu0 %vm1186_vm12, %v1285_v16  ;;  %v2631_v59 = vmul.f32 1.442695, %v2615_v24 }
 0x504   : > { %v5649_v63 = vpop.eup %5648  ;;  %4797 = vmatprep.mubr.msk.f32.mxu0 %vm5834_vm2, %v7844_v36 }
 0x505   : > { %v1715_v58 = vpop.xlane.xlu1 %1714  ;;  %v1286_v41 = vmul.f32 %v5649_v63, %v6907_v15  ;;  %v5496_v15 = vunpack.i.l.bf16 %v7847_v11 }
 0x506   : > { %5654 = vrcp.f32 %v1715_v58 }
 0x507   : > { %4798 = vmatmul.mubr.msk.f32.gmra.mrb[34].mxu0 %vm1186_vm12, %v1286_v41  ;;  %v5285_v30 = vpack.c.bf16 %v5497_v22, %v5496_v15 }
 0x508   : > { %v5651_v45 = vpop.eup %5650  ;;  %4863 = vmatprep.mubr.msk.f32.mxu0 %vm5834_vm2, %v7844_v36 }
 0x509   : > { %v1743_v62 = vmul.f32 %v5651_v45, %v6912_v12  ;;  %v1718_v17 = vpop.xlane.xlu0 %1717 }
 0x50a   : > { %5656 = vrcp.f32 %v1718_v17 }
 0x50b   : > { %4864 = vmatmul.mubr.msk.f32.vlgmr.msra.gmra.mrb[36].mxu0 %vm1186_vm12, %v1743_v62 }
 0x50c   : > { %v5653_v1 = vpop.eup %5652  ;;  %5283 = vmatpush3.bf16.msra.mxu0 %v5282_v35  ;;  %4866 = vmatprep.mubr.msk.f32.mxu0 %vm5834_vm2, %v7844_v36 }
 0x50d   : > { %v1721_v6 = vpop.xlane.xlu0 %1720  ;;  %5284 = vmatprep.subr.bf16.mxu0 %v7845_v60  ;;  %v1744_v12 = vmul.f32 %v5653_v1, %v6917_v20  ;;  %v5512_v1 = vunpack.i.h.bf16 %v6965_v50 }
 0x50e   : > { %5658 = vrcp.f32 %v1721_v6 }
 0x50f   : > { %4867 = vmatmul.mubr.msk.f32.gmra.mrb[38].mxu0 %vm1186_vm12, %v1744_v12  ;;  %5660 = vpow2.f32 %v2631_v59  ;;  %v5511_v59 = vunpack.i.l.bf16 %v6965_v50  ;;  %v5517_v12 = vunpack.i.h.bf16 %v6961_v5 }
 0x510   : > { %v5655_v51 = vpop.eup %5654  ;;  %5286 = vmatpush3.bf16.msra.mxu0 %v5285_v30  ;;  %4869 = vmatprep.mubr.msk.f32.mxu0 %vm5834_vm2, %v7844_v36  ;;  %v5516_v30 = vunpack.i.l.bf16 %v6961_v5 }
 0x511   : > { %v1724_v55 = vpop.xlane.xlu1 %1723  ;;  %5287 = vmatprep.subr.bf16.mxu0 %v7845_v60  ;;  %v1745_v20 = vmul.f32 %v5655_v51, %v6922_v26  ;;  %v5291_v26 = vpack.c.bf16 %v5507_v31, %v5506_v14 }
 0x512   : > { %5662 = vrcp.f32 %v1724_v55 }
 0x513   : > { %4870 = vmatmul.mubr.msk.f32.gmra.mrb[40].mxu0 %vm1186_vm12, %v1745_v20  ;;  %5664 = vpow2.f32 %v2633_v10 }
 0x514   : > { %v5657_v43 = vpop.eup %5656  ;;  %5289 = vmatpush3.bf16.msra.mxu0 %v5288_v37  ;;  %4872 = vmatprep.mubr.msk.f32.mxu0 %vm5834_vm2, %v7844_v36 }
 0x515   : > { %v1727_v9 = vpop.xlane.xlu0 %1726  ;;  %5290 = vmatprep.subr.bf16.mxu0 %v7845_v60  ;;  %v1746_v56 = vmul.f32 %v5657_v43, %v6927_v42 }
 0x516   : > { %5666 = vrcp.f32 %v1727_v9 }
 0x517   : > { %4873 = vmatmul.mubr.msk.f32.gmra.mrb[42].mxu0 %vm1186_vm12, %v1746_v56 }
 0x518   : > { %v5659_v16 = vpop.eup %5658  ;;  %5292 = vmatpush3.bf16.msra.mxu0 %v5291_v26  ;;  %4875 = vmatprep.mubr.msk.f32.mxu0 %vm5834_vm2, %v7844_v36 }
 0x519   : > { %4951 = vmatprep.subr.mxu0 %v7844_v36  ;;  %v1747_v63 = vmul.f32 %v5659_v16, %v6931_v29  ;;  %v7128_v32 = vpop.eup %5660 }
 0x51a   : > { %v2656_v42 = vsel %vm1186_vm12, %v7128_v32, 0.0 }
 0x51b   : > { %4876 = vmatmul.mubr.msk.f32.gmra.mrb[44].mxu0 %vm1186_vm12, %v1747_v63 }
 0x51c   : > { %v5663_v58 = vpop.eup %5662  ;;  %4952 = vmatpush3.msk.msra.mxu0 %vm1340_vm10, %v6797_v34  ;;  %4878 = vmatprep.mubr.msk.f32.mxu0 %vm5834_vm2, %v7844_v36 }
 0x51d   : > { %v1748_v41 = vmul.f32 %v5663_v58, %v6936_v44  ;;  %5309 = vmatprep.subr.bf16.mxu0 %v7845_v60  ;;  %v7139_v57 = vpop.eup %5664  ;;  %v5520_v44 = vpop.permute.xlu1 %5519 }
 0x51e   : > { %2657 = vadd.xlane.f32.xlu0 %v2656_v42  ;;  %v2659_v34 = vsel %vm1211_vm9, %v7139_v57, 0.0  ;;  %v1733_v61 = vpop.xlane.xlu0 %1732  ;;  %v5522_v47 = vunpack.i.h.bf16 %v5520_v44  ;;  %v5521_v25 = vunpack.i.l.bf16 %v5520_v44 }
 0x51f   : > { %4879 = vmatmul.mubr.msk.f32.gmra.mrb[46].mxu0 %vm1186_vm12, %v1748_v41 }
 0x520   : > { %v5667_v29 = vpop.eup %5666  ;;  %4881 = vmatprep.mubr.msk.f32.mxu0 %vm5834_vm2, %v7844_v36  ;;  %v5316_v20 = vpack.c.bf16 %v5522_v47, %v5521_v25 }
 0x521   : > { %v1749_v28 = vmul.f32 %v5667_v29, %v6941_v27 }
 0x522   : > { %2660 = vadd.xlane.f32.xlu1 %v2659_v34  ;;  %v2173_v24 = vpop.xlane.xlu0 %2172 }
 0x523   : > { %4882 = vmatmul.mubr.msk.f32.gmra.mrb[48].mxu0 %vm1186_vm12, %v1749_v28 }
 0x524   : > { %4884 = vmatprep.mubr.msk.f32.mxu0 %vm5834_vm2, %v7844_v36 }
 0x526   : > { %v2176_v62 = vpop.xlane.xlu0 %2175 }
 0x546   : > { %v1730_v45 = vpop.xlane.xlu1 %1729 }
 0x547   : > { %5668 = vrcp.f32 %v1730_v45 }
 0x548   : > { %5670 = vrcp.f32 %v1733_v61 }
 0x549   : > { %5672 = vrcp.f32 %v2173_v24 }
 0x54a   : > { %5674 = vrcp.f32 %v2176_v62 }
 0x551   : > { %v5669_v17 = vpop.eup %5668 }
 0x552   : > { %v1750_v11 = vmul.f32 %v5669_v17, %v6963_v40  ;;  %v5671_v22 = vpop.eup %5670 }
 0x553   : > { %v1751_v15 = vmul.f32 %v5671_v22, %v6946_v7  ;;  %v5673_v35 = vpop.eup %5672  ;;  %v5310_v7 = vpack.c.bf16 %v5512_v1, %v5511_v59 }
 0x554   : > { %4885 = vmatmul.mubr.msk.f32.gmra.mrb[50].mxu0 %vm1186_vm12, %v1750_v11  ;;  %v2207_v40 = vmul.f32 %v5673_v35, %v6950_v4  ;;  %v5675_v6 = vpop.eup %5674  ;;  %v5313_v4 = vpack.c.bf16 %v5517_v12, %v5516_v30 }
 0x555   : > { %4887 = vmatprep.mubr.msk.f32.mxu0 %vm5834_vm2, %v7844_v36  ;;  %v2208_v0 = vmul.f32 %v5675_v6, %v6956_v39 }
 0x556   : > { %v2179_v27 = vpop.xlane.xlu0 %2178 }
 0x557   : > { %5676 = vrcp.f32 %v2179_v27 }
 0x558   : > { %4888 = vmatmul.mubr.msk.f32.gmra.mrb[52].mxu0 %vm1186_vm12, %v1751_v15 }
 0x559   : > { %4953 = vmatprep.mubr.msk.f32.mxu0 %vm5834_vm2, %v7844_v36 }
 0x55a   : > { %v2182_v48 = vpop.xlane.xlu1 %2181 }
 0x55b   : > { %5678 = vrcp.f32 %v2182_v48 }
 0x55c   : > { %4954 = vmatmul.mubr.msk.f32.vlgmr.msra.gmra.mrb[54].mxu0 %vm1186_vm12, %v2207_v40 }
 0x55d   : > { %5311 = vmatpush3.bf16.msra.mxu0 %v5310_v7  ;;  %4956 = vmatprep.mubr.msk.f32.mxu0 %vm5834_vm2, %v7844_v36 }
 0x55e   : > { %v2185_v50 = vpop.xlane.xlu0 %2184  ;;  %5312 = vmatprep.subr.bf16.mxu0 %v7845_v60 }
 0x55f   : > { %5680 = vrcp.f32 %v2185_v50 }
 0x560   : > { %4957 = vmatmul.mubr.msk.f32.gmra.mrb[56].mxu0 %vm1186_vm12, %v2208_v0 }
 0x561   : > { %v5677_v5 = vpop.eup %5676  ;;  %5314 = vmatpush3.bf16.msra.mxu0 %v5313_v4  ;;  %4959 = vmatprep.mubr.msk.f32.mxu0 %vm5834_vm2, %v7844_v36 }
 0x562   : > { %v2188_v51 = vpop.xlane.xlu1 %2187  ;;  %v2191_v10 = vpop.xlane.xlu0 %2190  ;;  %5315 = vmatprep.subr.bf16.mxu0 %v7845_v60  ;;  %v2209_v55 = vmul.f32 %v5677_v5, %v6975_v23 }
 0x563   : > { %5682 = vrcp.f32 %v2188_v51 }
 0x564   : > { %4960 = vmatmul.mubr.msk.f32.gmra.mrb[58].mxu0 %vm1186_vm12, %v2209_v55  ;;  %5684 = vrcp.f32 %v2191_v10 }
 0x565   : > { %v5679_v39 = vpop.eup %5678  ;;  %5317 = vmatpush3.bf16.msra.mxu0 %v5316_v20  ;;  %4962 = vmatprep.mubr.msk.f32.mxu0 %vm5834_vm2, %v7844_v36 }
 0x566   : > { %v2194_v37 = vpop.xlane.xlu1 %2193  ;;  %v2197_v53 = vpop.xlane.xlu0 %2196  ;;  %v2210_v31 = vmul.f32 %v5679_v39, %v6980_v54  ;;  %5318 = vmatprep.subr.bf16.mxu0 %v7845_v60 }
 0x567   : > { %5686 = vrcp.f32 %v2194_v37 }
 0x568   : > { %4963 = vmatmul.mubr.msk.f32.gmra.mrb[60].mxu0 %vm1186_vm12, %v2210_v31  ;;  %5688 = vrcp.f32 %v2197_v53 }
 0x569   : > { %v5681_v14 = vpop.eup %5680  ;;  %4965 = vmatprep.mubr.msk.f32.mxu0 %vm5834_vm2, %v7844_v36 }
 0x56a   : > { %v2637_v23 = vpop.xlane.xlu0 %2636  ;;  %v2211_v43 = vmul.f32 %v5681_v14, %v6985_v52 }
 0x56b   : > { %5690 = vrcp.f32 %v2637_v23 }
 0x56c   : > { %4966 = vmatmul.mubr.msk.f32.gmra.mrb[62].mxu0 %vm1186_vm12, %v2211_v43 }
 0x56d   : > { %v5683_v9 = vpop.eup %5682  ;;  %4968 = vmatprep.mubr.msk.f32.mxu0 %vm5834_vm2, %v7844_v36 }
 0x56e   : > { %v2640_v54 = vpop.xlane.xlu0 %2639  ;;  %v2212_v56 = vmul.f32 %v5683_v9, %v6994_v18  ;;  %v5685_v26 = vpop.eup %5684 }
 0x56f   : > { %v2213_v52 = vmul.f32 %v5685_v26, %v6991_v38  ;;  %5692 = vrcp.f32 %v2640_v54 }
 0x570   : > { %4969 = vmatmul.mubr.msk.f32.gmra.mrb[64].mxu0 %vm1186_vm12, %v2212_v56 }
 0x571   : > { %4971 = vmatprep.mubr.msk.f32.mxu0 %vm5834_vm2, %v7844_v36  ;;  %v5687_v58 = vpop.eup %5686 }
 0x572   : > { %v2646_v16 = vpop.xlane.xlu1 %2645  ;;  %v2643_v63 = vpop.xlane.xlu0 %2642  ;;  %v2214_v18 = vmul.f32 %v5687_v58, %v7006_v19 }
 0x573   : > { %v5689_v29 = vpop.eup %5688  ;;  %5694 = vrcp.f32 %v2643_v63 }
 0x574   : > { %4972 = vmatmul.mubr.msk.f32.gmra.mrb[66].mxu0 %vm1186_vm12, %v2213_v52  ;;  %v2215_v38 = vmul.f32 %v5689_v29, %v7001_v49  ;;  %5696 = vrcp.f32 %v2646_v16 }
 0x575   : > { %4974 = vmatprep.mubr.msk.f32.mxu0 %vm5834_vm2, %v7844_v36  ;;  %v5691_v19 = vpop.eup %5690 }
 0x576   : > { %v2652_v42 = vpop.xlane.xlu1 %2651  ;;  %v2649_v41 = vpop.xlane.xlu0 %2648  ;;  %v2671_v24 = vmul.f32 %v5691_v19, %v7013_v46  ;;  %v2983_v19 = vld [vmem:[%s7806_s5 + $0x8] sm:$0xff] }
 0x577   : > { %5698 = vrcp.f32 %v2649_v41 }
 0x578   : > { %4975 = vmatmul.mubr.msk.f32.gmra.mrb[68].mxu0 %vm1186_vm12, %v2214_v18  ;;  %5700 = vrcp.f32 %v2652_v42 }
 0x579   : > { %4977 = vmatprep.mubr.msk.f32.mxu0 %vm5834_vm2, %v7844_v36  ;;  %v5693_v17 = vpop.eup %5692 }
 0x57a   : > { %v5525_v34 = vpop.permute.xlu0 %5524  ;;  %v2655_v61 = vpop.xlane.xlu1 %2654  ;;  %v2672_v49 = vmul.f32 %v5693_v17, %v7017_v8 }
 0x57b   : > { %v5527_v28 = vunpack.i.h.bf16 %v5525_v34  ;;  %v5526_v44 = vunpack.i.l.bf16 %v5525_v34  ;;  %5702 = vrcp.f32 %v2655_v61 }
 0x57c   : > { %4978 = vmatmul.mubr.msk.f32.gmra.mrb[70].mxu0 %vm1186_vm12, %v2215_v38 }
 0x57d   : > { %v5319_v45 = vpack.c.bf16 %v5527_v28, %v5526_v44  ;;  %5043 = vmatprep.mubr.msk.f32.mxu0 %vm5834_vm2, %v7844_v36  ;;  %v5695_v11 = vpop.eup %5694 }
 0x57e   : > { %v2697_v62 = vpop.permute.xlu1 %2696  ;;  %v2673_v46 = vmul.f32 %v5695_v11, %v7021_v3  ;;  %v5697_v22 = vpop.eup %5696 }
 0x57f   : > { %5320 = vmatpush3.bf16.msra.mxu0 %v5319_v45  ;;  %v2674_v27 = vmul.f32 %v5697_v22, %v7027_v2  ;;  %v2982_v45 = vld [vmem:[%s7806_s5] sm:$0xff] }
 0x580   : > { %5041 = vmatprep.subr.mxu0 %v7844_v36 }
 0x581   : > { %v5699_v15 = vpop.eup %5698 }
 0x582   : > { %v2675_v8 = vmul.f32 %v5699_v15, %v7023_v33  ;;  %v5701_v35 = vpop.eup %5700 }
 0x583   : > { %5042 = vmatpush3.msk.msra.mxu0 %vm1340_vm10, %v2697_v62  ;;  %v2676_v3 = vmul.f32 %v5701_v35, %v7033_v21  ;;  %v5322_v62 = vpack.c.bf16 %v2983_v19, %v2982_v45  ;;  %vm2962_vm10 = vcmask 64512  }
 0x584   : > { %5044 = vmatmul.mubr.msk.f32.vlgmr.msra.gmra.mrb[72].mxu0 %vm1186_vm12, %v2671_v24  ;;  %5324 = vmatprep.subr.bf16.mxu0 %v7845_v60 }
 0x585   : > { %5046 = vmatprep.mubr.msk.f32.mxu0 %vm5834_vm2, %v7844_v36  ;;  %v5703_v1 = vpop.eup %5702  ;;  %5323 = vmatpush3.bf16.msra.mxu1 %v5322_v62 }
 0x586   : > { %v2677_v2 = vmul.f32 %v5703_v1, %v7045_v13  ;;  %5327 = vmatprep.subr.bf16.mxu1 %v7845_v60 }
 0x588   : > { %5047 = vmatmul.mubr.msk.f32.gmra.mrb[74].mxu0 %vm1186_vm12, %v2672_v49 }
 0x589   : > { %5049 = vmatprep.mubr.msk.f32.mxu0 %vm5834_vm2, %v7844_v36 }
 0x58c   : > { %5050 = vmatmul.mubr.msk.f32.gmra.mrb[76].mxu0 %vm1186_vm12, %v2673_v46 }
 0x58d   : > { %5052 = vmatprep.mubr.msk.f32.mxu0 %vm5834_vm2, %v7844_v36 }
 0x590   : > { %5053 = vmatmul.mubr.msk.f32.gmra.mrb[78].mxu0 %vm1186_vm12, %v2674_v27 }
 0x591   : > { %5055 = vmatprep.mubr.msk.f32.mxu0 %vm5834_vm2, %v7844_v36 }
 0x594   : > { %5056 = vmatmul.mubr.msk.f32.gmra.mrb[80].mxu0 %vm1186_vm12, %v2675_v8 }
 0x595   : > { %5058 = vmatprep.mubr.msk.f32.mxu0 %vm5834_vm2, %v7844_v36 }
 0x598   : > { %5059 = vmatmul.mubr.msk.f32.gmra.mrb[82].mxu0 %vm1186_vm12, %v2676_v3 }
 0x599   : > { %5061 = vmatprep.mubr.msk.f32.mxu0 %vm5834_vm2, %v7844_v36 }
 0x59c   : > { %5062 = vmatmul.mubr.msk.f32.gmra.mrb[84].mxu0 %vm1186_vm12, %v2677_v2 }
 0x59d   : > { %5064 = vmatprep.mubr.msk.f32.mxu0 %vm5834_vm2, %v7844_v36 }
 0x5ab   : > { %v2658_v33 = vpop.xlane.xlu0 %2657 }
 0x5ac   : > { %5704 = vrcp.f32 %v2658_v33 }
 0x5af   : > { %v2661_v59 = vpop.xlane.xlu1 %2660 }
 0x5b0   : > { %5706 = vrcp.f32 %v2661_v59 }
 0x5b6   : > { %v5705_v40 = vpop.eup %5704 }
 0x5b7   : > { %v2678_v21 = vmul.f32 %v5705_v40, %v7128_v32 }
 0x5b9   : > { %5065 = vmatmul.mubr.msk.f32.gmra.mrb[86].mxu0 %vm1186_vm12, %v2678_v21 }
 0x5ba   : > { %v5707_v48 = vpop.eup %5706  ;;  %v7234_v6 = vpop.f32.mrb[18].mxu0  ;;  %5067 = vmatprep.mubr.msk.f32.mxu0 %vm5834_vm2, %v7844_v36 }
 0x5bb   : > { %v4775_v13 = vpop.f32.mrb[19].mxu0  ;;  %v2679_v12 = vmul.f32 %v5707_v48, %v7139_v57 }
 0x5bd   : > { %5068 = vmatmul.mubr.msk.f32.gmra.mrb[88].mxu0 %vm1186_vm12, %v2679_v12 }
 0x5be   : > { %v7240_v30 = vpop.f32.mrb[20].mxu0  ;;  %5105 = vmatprep.mubr.msk.f32.mxu0 %vm5834_vm2, %v7844_v36 }
 0x5bf   : > { %v4778_v7 = vpop.f32.mrb[21].mxu0 }
 0x5c2   : > { %v7244_v32 = vpop.f32.mrb[22].mxu0 }
 0x5c3   : > { %v4781_v50 = vpop.f32.mrb[23].mxu0 }
 0x5c6   : > { %v7246_v0 = vpop.f32.mrb[24].mxu0 }
 0x5c7   : > { %v4784_v4 = vpop.f32.mrb[25].mxu0 }
 0x5ca   : > { %v7248_v47 = vpop.f32.mrb[26].mxu0 }
 0x5cb   : > { %v4787_v25 = vpop.f32.mrb[27].mxu0 }
 0x5ce   : > { %v7250_v5 = vpop.f32.mrb[28].mxu0 }
 0x5cf   : > { %v4790_v57 = vpop.f32.mrb[29].mxu0 }
 0x5d2   : > { %v7252_v51 = vpop.f32.mrb[30].mxu0 }
 0x5d3   : > { %v4793_v10 = vpop.f32.mrb[31].mxu0 }
 0x5d6   : > { %v7254_v55 = vpop.f32.mrb[32].mxu0 }
 0x5d7   : > { %v4796_v20 = vpop.f32.mrb[33].mxu0 }
 0x5da   : > { %v7256_v39 = vpop.f32.mrb[34].mxu0 }
 0x5db   : > { %v4799_v37 = vpop.f32.mrb[35].mxu0 }
 0x5de   : > { %v1873_v53 = vpop.f32.mrb[36].mxu0 }
 0x5df   : > { %v4865_v31 = vpop.f32.mrb[37].mxu0  ;;  %2854 = vrot.lane.b32.xlu0 %v1873_v53, %s5847_s26 }
 0x5e2   : > { %v1878_v14 = vpop.f32.mrb[38].mxu0 }
 0x5e3   : > { %v4868_v23 = vpop.f32.mrb[39].mxu0  ;;  %2856 = vrot.lane.b32.xlu0 %v1878_v14, %s5847_s26 }
 0x5e6   : > { %v1883_v43 = vpop.f32.mrb[40].mxu0 }
 0x5e7   : > { %v4871_v9 = vpop.f32.mrb[41].mxu0  ;;  %2858 = vrot.lane.b32.xlu1 %v1883_v43, %s5847_s26 }
 0x5ea   : > { %v1888_v54 = vpop.f32.mrb[42].mxu0 }
 0x5eb   : > { %2860 = vrot.lane.b32.xlu0 %v1888_v54, %s5847_s26  ;;  %v4874_v56 = vpop.f32.mrb[43].mxu0 }
 0x5ee   : > { %v1893_v26 = vpop.f32.mrb[44].mxu0 }
 0x5ef   : > { %2862 = vrot.lane.b32.xlu1 %v1893_v26, %s5847_s26  ;;  %v4877_v16 = vpop.f32.mrb[45].mxu0 }
 0x5f2   : > { %v1898_v63 = vpop.f32.mrb[46].mxu0 }
 0x5f3   : > { %v4880_v52 = vpop.f32.mrb[47].mxu0 }
 0x5f6   : > { %v1903_v58 = vpop.f32.mrb[48].mxu0 }
 0x5f7   : > { %v4883_v42 = vpop.f32.mrb[49].mxu0 }
 0x627   : > { %v1908_v41 = vpop.f32.mrb[50].mxu0 }
 0x628   : > { %v4886_v18 = vpop.f32.mrb[51].mxu0 }
 0x62b   : > { %v1913_v29 = vpop.f32.mrb[52].mxu0 }
 0x62c   : > { %v4889_v34 = vpop.f32.mrb[53].mxu0 }
 0x62f   : > { %v2337_v38 = vpop.f32.mrb[54].mxu0 }
 0x630   : > { %2890 = vrot.lane.b32.xlu1 %v2337_v38, %s5848_s27  ;;  %v4955_v28 = vpop.f32.mrb[55].mxu0 }
 0x633   : > { %v2342_v44 = vpop.f32.mrb[56].mxu0 }
 0x634   : > { %2892 = vrot.lane.b32.xlu0 %v2342_v44, %s5848_s27  ;;  %v4958_v61 = vpop.f32.mrb[57].mxu0 }
 0x637   : > { %v2347_v24 = vpop.f32.mrb[58].mxu0 }
 0x638   : > { %2894 = vrot.lane.b32.xlu0 %v2347_v24, %s5848_s27  ;;  %v4961_v17 = vpop.f32.mrb[59].mxu0 }
 0x63b   : > { %v2352_v49 = vpop.f32.mrb[60].mxu0 }
 0x63c   : > { %2896 = vrot.lane.b32.xlu1 %v2352_v49, %s5848_s27  ;;  %v4964_v11 = vpop.f32.mrb[61].mxu0 }
 0x63f   : > { %v2357_v46 = vpop.f32.mrb[62].mxu0 }
 0x640   : > { %2898 = vrot.lane.b32.xlu0 %v2357_v46, %s5848_s27  ;;  %v4967_v22 = vpop.f32.mrb[63].mxu0 }
 0x643   : > { %v2362_v27 = vpop.f32.mrb[64].mxu0 }
 0x644   : > { %2900 = vrot.lane.b32.xlu1 %v2362_v27, %s5848_s27  ;;  %v4970_v15 = vpop.f32.mrb[65].mxu0 }
 0x647   : > { %v2367_v8 = vpop.f32.mrb[66].mxu0 }
 0x648   : > { %v4973_v35 = vpop.f32.mrb[67].mxu0 }
 0x64b   : > { %v2372_v3 = vpop.f32.mrb[68].mxu0 }
 0x64c   : > { %v4976_v1 = vpop.f32.mrb[69].mxu0 }
 0x64f   : > { %v2377_v2 = vpop.f32.mrb[70].mxu0 }
 0x650   : > { %v4979_v33 = vpop.f32.mrb[71].mxu0 }
 0x651   : > { %v2855_v43 = vpop.permute.xlu0 %2854 }
 0x652   : > { %v2953_v42 = vsel %vm1021_vm8, %v7234_v6, %v2855_v43 }
 0x655   : > { %v2857_v9 = vpop.permute.xlu0 %2856 }
 0x656   : > { %v2954_v38 = vsel %vm1021_vm8, %v7240_v30, %v2857_v9 }
 0x657   : > { %v2801_v59 = vpop.f32.mrb[72].mxu0 }
 0x658   : > { %2926 = vrot.lane.b32.xlu0 %v2801_v59, %s5849_s22  ;;  %v5045_v40 = vpop.f32.mrb[73].mxu0 }
 0x659   : > { %v2859_v26 = vpop.permute.xlu1 %2858 }
 0x65a   : > { %v2955_v45 = vsel %vm1021_vm8, %v7244_v32, %v2859_v26 }
 0x65b   : > { %v2806_v21 = vpop.f32.mrb[74].mxu0 }
 0x65c   : > { %2928 = vrot.lane.b32.xlu0 %v2806_v21, %s5849_s22  ;;  %v5048_v48 = vpop.f32.mrb[75].mxu0 }
 0x65d   : > { %v2861_v54 = vpop.permute.xlu0 %2860 }
 0x65e   : > { %v2956_v17 = vsel %vm1021_vm8, %v7246_v0, %v2861_v54  ;;  %v5817_v54 = vld [vmem:[%s5966_s2 + $0x8] sm:$0xff] }
 0x65f   : > { %v2811_v13 = vpop.f32.mrb[76].mxu0 }
 0x660   : > { %2864 = vrot.lane.b32.xlu0 %v1898_v63, %s5847_s26  ;;  %2930 = vrot.lane.b32.xlu1 %v2811_v13, %s5849_s22  ;;  %v5051_v12 = vpop.f32.mrb[77].mxu0 }
 0x661   : > { %v2863_v16 = vpop.permute.xlu1 %2862 }
 0x662   : > { %v2957_v22 = vsel %vm1021_vm8, %v7248_v47, %v2863_v16 }
 0x663   : > { %v2816_v7 = vpop.f32.mrb[78].mxu0 }
 0x664   : > { %2866 = vrot.lane.b32.xlu1 %v1903_v58, %s5847_s26  ;;  %2932 = vrot.lane.b32.xlu0 %v2816_v7, %s5849_s22  ;;  %v5054_v50 = vpop.f32.mrb[79].mxu0 }
 0x667   : > { %v2821_v4 = vpop.f32.mrb[80].mxu0 }
 0x668   : > { %2902 = vrot.lane.b32.xlu0 %v2367_v8, %s5848_s27  ;;  %2934 = vrot.lane.b32.xlu1 %v2821_v4, %s5849_s22  ;;  %v5057_v25 = vpop.f32.mrb[81].mxu0 }
 0x66b   : > { %v2826_v57 = vpop.f32.mrb[82].mxu0 }
 0x66c   : > { %2904 = vrot.lane.b32.xlu1 %v2372_v3, %s5848_s27  ;;  %2936 = vrot.lane.b32.xlu0 %v2826_v57, %s5849_s22  ;;  %v5060_v10 = vpop.f32.mrb[83].mxu0 }
 0x66d   : > { %v4426_v10 = vld [vmem:[%s7807_s6] ss:$0 sm:$0xff] }
 0x66f   : > { %v2831_v20 = vpop.f32.mrb[84].mxu0 }
 0x670   : > { %2868 = vrot.lane.b32.xlu0 %v1908_v41, %s5847_s26  ;;  %2938 = vrot.lane.b32.xlu1 %v2831_v20, %s5849_s22  ;;  %v5063_v37 = vpop.f32.mrb[85].mxu0 }
 0x674   : > { %2870 = vrot.lane.b32.xlu1 %v1913_v29, %s5847_s26 }
 0x68c   : > { %v2836_v53 = vpop.f32.mrb[86].mxu0 }
 0x68d   : > { %2940 = vrot.lane.b32.xlu0 %v2836_v53, %s5849_s22  ;;  %v5066_v31 = vpop.f32.mrb[87].mxu0  ;;  %v5816_v53 = vld [vmem:[%s5966_s2] sm:$0xff] }
 0x690   : > { %v2841_v14 = vpop.f32.mrb[88].mxu0 }
 0x691   : > { %2906 = vrot.lane.b32.xlu0 %v2377_v2, %s5848_s27  ;;  %2942 = vrot.lane.b32.xlu1 %v2841_v14, %s5849_s22  ;;  %v5069_v23 = vpop.f32.mrb[89].mxu0 }
 0x6a2   : > { %v2891_v52 = vpop.permute.xlu1 %2890 }
 0x6a3   : > { %v2963_v41 = vsel %vm2962_vm10, %v2953_v42, %v2891_v52 }
 0x6a6   : > { %v2893_v56 = vpop.permute.xlu0 %2892 }
 0x6a7   : > { %v2964_v28 = vsel %vm2962_vm10, %v2954_v38, %v2893_v56  ;;  %v5819_v38 = vld [vmem:[%s5966_s2 + $0x18] sm:$0xff] }
 0x6aa   : > { %v2895_v63 = vpop.permute.xlu0 %2894 }
 0x6ab   : > { %v2965_v19 = vsel %vm2962_vm10, %v2955_v45, %v2895_v63 }
 0x6ae   : > { %v2897_v18 = vpop.permute.xlu1 %2896 }
 0x6af   : > { %v2966_v49 = vsel %vm2962_vm10, %v2956_v17, %v2897_v18 }
 0x6b2   : > { %v2899_v58 = vpop.permute.xlu0 %2898 }
 0x6b3   : > { %v2967_v27 = vsel %vm2962_vm10, %v2957_v22, %v2899_v58  ;;  %v5818_v58 = vld [vmem:[%s5966_s2 + $0x10] sm:$0xff] }
 0x6b6   : > { %v2901_v44 = vpop.permute.xlu1 %2900 }
 0x6ca   : > { %v2927_v29 = vpop.permute.xlu0 %2926 }
 0x6cb   : > { %v2973_v34 = vsel %vm2972_vm11, %v2963_v41, %v2927_v29 }
 0x6cc   : > { %5075 = vmatmul.mubr.msk.f32.vlgmr.msra.gmra.mrb[72].mxu1 %vm614_vm0, %v2973_v34 }
 0x6cd   : > { %5077 = vmatprep.mubr.msk.f32.mxu1 %vm5834_vm2, %v7844_v36 }
 0x6ce   : > { %v2929_v61 = vpop.permute.xlu0 %2928 }
 0x6cf   : > { %v2974_v6 = vsel %vm2972_vm11, %v2964_v28, %v2929_v61 }
 0x6d0   : > { %5078 = vmatmul.mubr.msk.f32.gmra.mrb[74].mxu1 %vm614_vm0, %v2974_v6 }
 0x6d1   : > { %5080 = vmatprep.mubr.msk.f32.mxu1 %vm5834_vm2, %v7844_v36 }
 0x6d2   : > { %v2865_v30 = vpop.permute.xlu0 %2864  ;;  %v2931_v24 = vpop.permute.xlu1 %2930 }
 0x6d3   : > { %v2975_v62 = vsel %vm2972_vm11, %v2965_v19, %v2931_v24  ;;  %v2958_v8 = vsel %vm1021_vm8, %v7250_v5, %v2865_v30  ;;  %v5820_v19 = vld [vmem:[%s5966_s2 + $0x20] sm:$0xff] }
 0x6d4   : > { %5081 = vmatmul.mubr.msk.f32.gmra.mrb[76].mxu1 %vm614_vm0, %v2975_v62  ;;  %v2968_v47 = vsel %vm2962_vm10, %v2958_v8, %v2901_v44 }
 0x6d5   : > { %5083 = vmatprep.mubr.msk.f32.mxu1 %vm5834_vm2, %v7844_v36 }
 0x6d6   : > { %v2867_v32 = vpop.permute.xlu1 %2866  ;;  %v2933_v11 = vpop.permute.xlu0 %2932 }
 0x6d7   : > { %v2976_v46 = vsel %vm2972_vm11, %v2966_v49, %v2933_v11  ;;  %v2959_v33 = vsel %vm1021_vm8, %v7252_v51, %v2867_v32  ;;  %v5821_v32 = vld [vmem:[%s5966_s2 + $0x28] sm:$0xff] }
 0x6d8   : > { %5084 = vmatmul.mubr.msk.f32.gmra.mrb[78].mxu1 %vm614_vm0, %v2976_v46 }
 0x6d9   : > { %5086 = vmatprep.mubr.msk.f32.mxu1 %vm5834_vm2, %v7844_v36 }
 0x6da   : > { %v2903_v0 = vpop.permute.xlu0 %2902  ;;  %v2935_v15 = vpop.permute.xlu1 %2934 }
 0x6db   : > { %v2977_v35 = vsel %vm2972_vm11, %v2967_v27, %v2935_v15  ;;  %v2969_v5 = vsel %vm2962_vm10, %v2959_v33, %v2903_v0  ;;  %v5822_v15 = vld [vmem:[%s5966_s2 + $0x30] sm:$0xff] }
 0x6dc   : > { %5087 = vmatmul.mubr.msk.f32.gmra.mrb[80].mxu1 %vm614_vm0, %v2977_v35 }
 0x6dd   : > { %5089 = vmatprep.mubr.msk.f32.mxu1 %vm5834_vm2, %v7844_v36 }
 0x6de   : > { %v2905_v3 = vpop.permute.xlu1 %2904  ;;  %v2937_v1 = vpop.permute.xlu0 %2936 }
 0x6df   : > { %v2978_v2 = vsel %vm2972_vm11, %v2968_v47, %v2937_v1 }
 0x6e0   : > { %5090 = vmatmul.mubr.msk.f32.gmra.mrb[82].mxu1 %vm614_vm0, %v2978_v2  ;;  %v5823_v2 = vld [vmem:[%s5966_s2 + $0x38] sm:$0xff] }
 0x6e1   : > { %5092 = vmatprep.mubr.msk.f32.mxu1 %vm5834_vm2, %v7844_v36 }
 0x6e2   : > { %v2939_v59 = vpop.permute.xlu1 %2938  ;;  %v2869_v21 = vpop.permute.xlu0 %2868 }
 0x6e3   : > { %v2979_v40 = vsel %vm2972_vm11, %v2969_v5, %v2939_v59  ;;  %v2960_v48 = vsel %vm1021_vm8, %v7254_v55, %v2869_v21 }
 0x6e4   : > { %5093 = vmatmul.mubr.msk.f32.gmra.mrb[84].mxu1 %vm614_vm0, %v2979_v40  ;;  %v2970_v51 = vsel %vm2962_vm10, %v2960_v48, %v2905_v3  ;;  %v5824_v48 = vld [vmem:[%s5966_s2 + $0x40] sm:$0x1]  ;;  %s7779_s2 = scalar_lea.vmem %s7820_s19, %s5342_s20 }
 0x6e5   : > { %5095 = vmatprep.mubr.msk.f32.mxu1 %vm5834_vm2, %v7844_v36 }
 0x6e6   : > { %v2871_v13 = vpop.permute.xlu1 %2870 }
 0x6e7   : > { %v2961_v50 = vsel %vm1021_vm8, %v7256_v39, %v2871_v13 }
 0x6ff   : > { %v2941_v12 = vpop.permute.xlu0 %2940 }
 0x700   : > { %v2980_v7 = vsel %vm2972_vm11, %v2970_v51, %v2941_v12 }
 0x701   : > { %5096 = vmatmul.mubr.msk.f32.gmra.mrb[86].mxu1 %vm614_vm0, %v2980_v7 }
 0x702   : > { %5098 = vmatprep.mubr.msk.f32.mxu1 %vm5834_vm2, %v7844_v36 }
 0x703   : > { %v2907_v4 = vpop.permute.xlu0 %2906  ;;  %v2943_v25 = vpop.permute.xlu1 %2942 }
 0x704   : > { %v2971_v55 = vsel %vm2962_vm10, %v2961_v50, %v2907_v4 }
 0x705   : > { %v2981_v57 = vsel %vm2972_vm11, %v2971_v55, %v2943_v25 }
 0x706   : > { %5099 = vmatmul.mubr.msk.f32.gmra.mrb[88].mxu1 %vm614_vm0, %v2981_v57 }
 0x707   : > { %5148 = vmatprep.mubr.msk.f32.mxu1 %vm5834_vm2, %v7844_v36 }
 0x79f   : > { %v3084_v20 = vpop.f32.mrb[72].mxu1 }
 0x7a0   : > { %v3085_v37 = vadd.f32 %v4426_v10, %v3084_v20  ;;  %v5076_v39 = vpop.f32.mrb[73].mxu1 }
 0x7a2   : > { %v3128_v31 = vadd.f32 %v5816_v53, %v3085_v37 }
 0x7a3   : > { %v3089_v14 = vpop.f32.mrb[74].mxu1 }
 0x7a4   : > { %v3090_v23 = vadd.f32 %v4426_v10, %v3089_v14  ;;  %v5079_v43 = vpop.f32.mrb[75].mxu1  ;;  %v3139_v9 = vsel %vm614_vm0, %v3128_v31, 0.0 }
 0x7a5   : > { %3140 = vadd.xlane.f32.xlu0 %v3139_v9 }
 0x7a6   : > { %v3129_v56 = vadd.f32 %v5817_v54, %v3090_v23 }
 0x7a7   : > { %v3094_v26 = vpop.f32.mrb[76].mxu1 }
 0x7a8   : > { %v3095_v16 = vadd.f32 %v4426_v10, %v3094_v26  ;;  %v5082_v63 = vpop.f32.mrb[77].mxu1  ;;  %v3142_v52 = vsel %vm614_vm0, %v3129_v56, 0.0 }
 0x7a9   : > { %3143 = vadd.xlane.f32.xlu1 %v3142_v52 }
 0x7aa   : > { %v3130_v42 = vadd.f32 %v5818_v58, %v3095_v16 }
 0x7ab   : > { %v3099_v41 = vpop.f32.mrb[78].mxu1 }
 0x7ac   : > { %v3100_v18 = vadd.f32 %v4426_v10, %v3099_v41  ;;  %v5085_v29 = vpop.f32.mrb[79].mxu1  ;;  %v3145_v34 = vsel %vm614_vm0, %v3130_v42, 0.0 }
 0x7ad   : > { %3146 = vadd.xlane.f32.xlu0 %v3145_v34 }
 0x7ae   : > { %v3131_v28 = vadd.f32 %v5819_v38, %v3100_v18 }
 0x7af   : > { %v3104_v44 = vpop.f32.mrb[80].mxu1 }
 0x7b0   : > { %v3105_v61 = vadd.f32 %v4426_v10, %v3104_v44  ;;  %v5088_v6 = vpop.f32.mrb[81].mxu1  ;;  %v3148_v45 = vsel %vm614_vm0, %v3131_v28, 0.0 }
 0x7b1   : > { %3149 = vadd.xlane.f32.xlu0 %v3148_v45 }
 0x7b2   : > { %v3132_v30 = vadd.f32 %v5820_v19, %v3105_v61  ;;  %v3349_v19 = vld [vmem:[%s7810_s9] sm:$0xff] }
 0x7b3   : > { %v3109_v24 = vpop.f32.mrb[82].mxu1 }
 0x7b4   : > { %v3110_v62 = vadd.f32 %v4426_v10, %v3109_v24  ;;  %v5091_v17 = vpop.f32.mrb[83].mxu1  ;;  %v3151_v49 = vsel %vm614_vm0, %v3132_v30, 0.0 }
 0x7b5   : > { %3152 = vadd.xlane.f32.xlu0 %v3151_v49 }
 0x7b6   : > { %v3133_v11 = vadd.f32 %v5821_v32, %v3110_v62 }
 0x7b7   : > { %v3114_v46 = vpop.f32.mrb[84].mxu1 }
 0x7b8   : > { %v3115_v22 = vadd.f32 %v4426_v10, %v3114_v46  ;;  %v5094_v27 = vpop.f32.mrb[85].mxu1  ;;  %v3154_v0 = vsel %vm614_vm0, %v3133_v11, 0.0 }
 0x7b9   : > { %3155 = vadd.xlane.f32.xlu1 %v3154_v0 }
 0x7ba   : > { %v3134_v8 = vadd.f32 %v5822_v15, %v3115_v22 }
 0x7bc   : > { %v3157_v35 = vsel %vm614_vm0, %v3134_v8, 0.0 }
 0x7bd   : > { %3158 = vadd.xlane.f32.xlu0 %v3157_v35 }
 0x7d4   : > { %v3119_v3 = vpop.f32.mrb[86].mxu1 }
 0x7d5   : > { %v3120_v47 = vadd.f32 %v4426_v10, %v3119_v3  ;;  %v5097_v1 = vpop.f32.mrb[87].mxu1 }
 0x7d7   : > { %v3135_v33 = vadd.f32 %v5823_v2, %v3120_v47 }
 0x7d9   : > { %v3124_v5 = vpop.f32.mrb[88].mxu1  ;;  %v3160_v59 = vsel %vm614_vm0, %v3135_v33, 0.0 }
 0x7da   : > { %v3125_v40 = vadd.f32 %v4426_v10, %v3124_v5  ;;  %3161 = vadd.xlane.f32.xlu1 %v3160_v59  ;;  %v5100_v21 = vpop.f32.mrb[89].mxu1 }
 0x7dc   : > { %v3136_v13 = vadd.f32 %v5824_v48, %v3125_v40 }
 0x7de   : > { %v3163_v51 = vsel %vm639_vm1, %v3136_v13, 0.0 }
 0x7df   : > { %3164 = vadd.xlane.f32.xlu0 %v3163_v51 }
 0x832   : > { %v3141_v12 = vpop.xlane.xlu0 %3140 }
 0x833   : > { %v3166_v7 = vmul.f32 0.0625, %v3141_v12 }
 0x835   : > { %v7376_v50 = vsub.f32 %v3128_v31, %v3166_v7 }
 0x836   : > { %v3144_v4 = vpop.xlane.xlu1 %3143 }
 0x837   : > { %v3167_v25 = vmul.f32 0.0625, %v3144_v4  ;;  %v3184_v55 = vmul.f32 %v7376_v50, %v7376_v50 }
 0x839   : > { %v7380_v57 = vsub.f32 %v3129_v56, %v3167_v25  ;;  %v3193_v10 = vsel %vm614_vm0, %v3184_v55, 0.0 }
 0x83a   : > { %v3147_v20 = vpop.xlane.xlu0 %3146  ;;  %3194 = vadd.xlane.f32.xlu1 %v3193_v10 }
 0x83b   : > { %v3168_v37 = vmul.f32 0.0625, %v3147_v20  ;;  %v3185_v39 = vmul.f32 %v7380_v57, %v7380_v57 }
 0x83d   : > { %v7385_v53 = vsub.f32 %v3130_v42, %v3168_v37  ;;  %v3196_v31 = vsel %vm614_vm0, %v3185_v39, 0.0 }
 0x83e   : > { %v3150_v14 = vpop.xlane.xlu0 %3149  ;;  %3197 = vadd.xlane.f32.xlu0 %v3196_v31 }
 0x83f   : > { %v3169_v23 = vmul.f32 0.0625, %v3150_v14  ;;  %v3186_v43 = vmul.f32 %v7385_v53, %v7385_v53 }
 0x841   : > { %v7390_v9 = vsub.f32 %v3131_v28, %v3169_v23  ;;  %v3199_v54 = vsel %vm614_vm0, %v3186_v43, 0.0 }
 0x842   : > { %v3153_v56 = vpop.xlane.xlu0 %3152  ;;  %3200 = vadd.xlane.f32.xlu1 %v3199_v54 }
 0x843   : > { %v3170_v26 = vmul.f32 0.0625, %v3153_v56  ;;  %v3187_v16 = vmul.f32 %v7390_v9, %v7390_v9 }
 0x845   : > { %v7395_v63 = vsub.f32 %v3132_v30, %v3170_v26  ;;  %v3202_v52 = vsel %vm614_vm0, %v3187_v16, 0.0  ;;  %v3350_v30 = vld [vmem:[%s7810_s9 + $0x8] sm:$0xff] }
 0x846   : > { %v3156_v58 = vpop.xlane.xlu1 %3155  ;;  %3203 = vadd.xlane.f32.xlu0 %v3202_v52  ;;  %v5325_v24 = vpack.c.bf16 %v3350_v30, %v3349_v19  ;;  %v7438_v19 = vld [vmem:[%s7809_s8] ss:$0 sm:$0xff] }
 0x847   : > { %v3171_v42 = vmul.f32 0.0625, %v3156_v58  ;;  %v3188_v41 = vmul.f32 %v7395_v63, %v7395_v63  ;;  %v7431_v58 = vld [vmem:[%s7808_s7] ss:$0 sm:$0xff] }
 0x848   : > { %5326 = vmatpush3.bf16.msra.mxu0 %v5325_v24 }
 0x849   : > { %v7400_v18 = vsub.f32 %v3133_v11, %v3171_v42  ;;  %v3205_v29 = vsel %vm614_vm0, %v3188_v41, 0.0  ;;  %5339 = vmatprep.subr.bf16.mxu0 %v7845_v60 }
 0x84a   : > { %v3159_v34 = vpop.xlane.xlu0 %3158  ;;  %3206 = vadd.xlane.f32.xlu1 %v3205_v29 }
 0x84b   : > { %v3172_v38 = vmul.f32 0.0625, %v3159_v34  ;;  %v3189_v28 = vmul.f32 %v7400_v18, %v7400_v18 }
 0x84d   : > { %v7405_v44 = vsub.f32 %v3134_v8, %v3172_v38  ;;  %v3208_v61 = vsel %vm614_vm0, %v3189_v28, 0.0  ;;  %v3235_v28 = vmul.f32 %v7431_v58, %v7376_v50 }
 0x84e   : > { %3209 = vadd.xlane.f32.xlu0 %v3208_v61 }
 0x84f   : > { %v3190_v6 = vmul.f32 %v7405_v44, %v7405_v44 }
 0x851   : > { %v3211_v45 = vsel %vm614_vm0, %v3190_v6, 0.0 }
 0x852   : > { %3212 = vadd.xlane.f32.xlu1 %v3211_v45 }
 0x867   : > { %v3162_v62 = vpop.xlane.xlu1 %3161 }
 0x868   : > { %v3173_v17 = vmul.f32 0.0625, %v3162_v62 }
 0x86a   : > { %v7418_v49 = vsub.f32 %v3135_v33, %v3173_v17 }
 0x86c   : > { %v3165_v32 = vpop.xlane.xlu0 %3164  ;;  %v3191_v11 = vmul.f32 %v7418_v49, %v7418_v49 }
 0x86d   : > { %v3174_v46 = vmul.f32 0.0625, %v3165_v32 }
 0x86e   : > { %v3214_v22 = vsel %vm614_vm0, %v3191_v11, 0.0  ;;  %v3236_v11 = vmul.f32 %v7431_v58, %v7380_v57  ;;  %v3237_v57 = vmul.f32 %v7431_v58, %v7385_v53  ;;  %v3238_v53 = vmul.f32 %v7431_v58, %v7390_v9 }
 0x86f   : > { %v7423_v27 = vsub.f32 %v3136_v13, %v3174_v46  ;;  %3215 = vadd.xlane.f32.xlu0 %v3214_v22 }
 0x871   : > { %v3192_v0 = vmul.f32 %v7423_v27, %v7423_v27 }
 0x873   : > { %v3217_v15 = vsel %vm639_vm1, %v3192_v0, 0.0 }
 0x874   : > { %3218 = vadd.xlane.f32.xlu1 %v3217_v15 }
 0x8c7   : > { %v3195_v8 = vpop.xlane.xlu1 %3194 }
 0x8c8   : > { %v3220_v35 = vmul.f32 0.06666667, %v3195_v8 }
 0x8ca   : > { %5708 = vrsqrt.f32 %v3220_v35  ;;  %vm3246_vm8 = vcmp.eq.f32.partialorder %v3220_v35, inf  ;;  %v3249_v21 = vand.u32 2147483648, %v3220_v35  ;;  %vm3248_vm12 = vcmp.eq.f32.partialorder %v3220_v35, 0.0 }
 0x8cb   : > { %v3198_v3 = vpop.xlane.xlu0 %3197 }
 0x8cc   : > { %v3221_v47 = vmul.f32 0.06666667, %v3198_v3 }
 0x8ce   : > { %5710 = vrsqrt.f32 %v3221_v47  ;;  %vm3253_vm13 = vcmp.eq.f32.partialorder %v3221_v47, inf  ;;  %v3256_v55 = vand.u32 2147483648, %v3221_v47  ;;  %vm3255_vm14 = vcmp.eq.f32.partialorder %v3221_v47, 0.0 }
 0x8cf   : > { %v3201_v1 = vpop.xlane.xlu1 %3200 }
 0x8d0   : > { %v3222_v2 = vmul.f32 0.06666667, %v3201_v1 }
 0x8d2   : > { %5712 = vrsqrt.f32 %v3222_v2  ;;  %vm3260_vm15 = vcmp.eq.f32.partialorder %v3222_v2, inf  ;;  %v3263_v43 = vand.u32 2147483648, %v3222_v2  ;;  %vm3262_vm3 = vcmp.eq.f32.partialorder %v3222_v2, 0.0 }
 0x8d3   : > { %v3204_v33 = vpop.xlane.xlu0 %3203 }
 0x8d4   : > { %v5709_v5 = vpop.eup %5708  ;;  %v3223_v59 = vmul.f32 0.06666667, %v3204_v33 }
 0x8d5   : > { %v3245_v40 = vmul.f32 %v5709_v5, %v3220_v35 }
 0x8d6   : > { %5714 = vrsqrt.f32 %v3223_v59  ;;  %vm3267_vm4 = vcmp.eq.f32.partialorder %v3223_v59, inf  ;;  %v3270_v29 = vand.u32 2147483648, %v3223_v59  ;;  %vm3269_vm5 = vcmp.eq.f32.partialorder %v3223_v59, 0.0 }
 0x8d7   : > { %v3247_v48 = vsel %vm3246_vm8, %v3220_v35, %v3245_v40  ;;  %v3207_v13 = vpop.xlane.xlu1 %3206 }
 0x8d8   : > { %v5711_v51 = vpop.eup %5710  ;;  %v3250_v12 = vsel %vm3248_vm12, %v3249_v21, %v3247_v48  ;;  %v3224_v7 = vmul.f32 0.06666667, %v3207_v13 }
 0x8d9   : > { %v3307_v4 = vadd.f32 1e-06, %v3250_v12  ;;  %v3252_v25 = vmul.f32 %v5711_v51, %v3221_v47 }
 0x8da   : > { %5716 = vrsqrt.f32 %v3224_v7  ;;  %vm3274_vm6 = vcmp.eq.f32.partialorder %v3224_v7, inf  ;;  %v3277_v24 = vand.u32 2147483648, %v3224_v7  ;;  %vm3276_vm7 = vcmp.eq.f32.partialorder %v3224_v7, 0.0 }
 0x8db   : > { %5718 = vrcp.f32 %v3307_v4  ;;  %v3254_v10 = vsel %vm3253_vm13, %v3221_v47, %v3252_v25  ;;  %v3210_v20 = vpop.xlane.xlu0 %3209  ;;  %v3239_v25 = vmul.f32 %v7431_v58, %v7395_v63  ;;  %v3241_v63 = vmul.f32 %v7431_v58, %v7405_v44 }
 0x8dc   : > { %v5713_v37 = vpop.eup %5712  ;;  %v3257_v39 = vsel %vm3255_vm14, %v3256_v55, %v3254_v10  ;;  %v3225_v31 = vmul.f32 0.06666667, %v3210_v20  ;;  %v3240_v20 = vmul.f32 %v7431_v58, %v7400_v18 }
 0x8dd   : > { %v3259_v14 = vmul.f32 %v5713_v37, %v3222_v2  ;;  %v3308_v23 = vadd.f32 1e-06, %v3257_v39 }
 0x8de   : > { %5720 = vrsqrt.f32 %v3225_v31  ;;  %vm3281_vm9 = vcmp.eq.f32.partialorder %v3225_v31, inf  ;;  %v3284_v8 = vand.u32 2147483648, %v3225_v31  ;;  %vm3283_vm10 = vcmp.eq.f32.partialorder %v3225_v31, 0.0 }
 0x8df   : > { %v3261_v54 = vsel %vm3260_vm15, %v3222_v2, %v3259_v14  ;;  %v3213_v56 = vpop.xlane.xlu1 %3212  ;;  %5722 = vrcp.f32 %v3308_v23 }
 0x8e0   : > { %v5715_v26 = vpop.eup %5714  ;;  %v3264_v16 = vsel %vm3262_vm3, %v3263_v43, %v3261_v54  ;;  %v3226_v52 = vmul.f32 0.06666667, %v3213_v56  ;;  %vm3497_vm3 = vcmask 523264  }
 0x8e1   : > { %v3266_v42 = vmul.f32 %v5715_v26, %v3223_v59  ;;  %v3309_v41 = vadd.f32 1e-06, %v3264_v16 }
 0x8e2   : > { %5724 = vrsqrt.f32 %v3226_v52  ;;  %vm3288_vm11 = vcmp.eq.f32.partialorder %v3226_v52, inf  ;;  %v3291_v40 = vand.u32 2147483648, %v3226_v52  ;;  %vm3290_vm8 = vcmp.eq.f32.partialorder %v3226_v52, 0.0 }
 0x8e3   : > { %v3268_v34 = vsel %vm3267_vm4, %v3223_v59, %v3266_v42  ;;  %5726 = vrcp.f32 %v3309_v41  ;;  %vm3522_vm4 = vcmask 516096  }
 0x8e4   : > { %v5717_v38 = vpop.eup %5716  ;;  %v3271_v61 = vsel %vm3269_vm5, %v3270_v29, %v3268_v34 }
 0x8e5   : > { %v5719_v6 = vpop.eup %5718  ;;  %v3273_v45 = vmul.f32 %v5717_v38, %v3224_v7  ;;  %v3310_v30 = vadd.f32 1e-06, %v3271_v61 }
 0x8e6   : > { %v3317_v62 = vmul.f32 %v5719_v6, %v3235_v28 }
 0x8e7   : > { %v3275_v17 = vsel %vm3274_vm6, %v3224_v7, %v3273_v45  ;;  %5728 = vrcp.f32 %v3310_v30 }
 0x8e8   : > { %v5721_v32 = vpop.eup %5720  ;;  %v3278_v50 = vsel %vm3276_vm7, %v3277_v24, %v3275_v17  ;;  %v3340_v46 = vadd.f32 %v7438_v19, %v3317_v62  ;;  %v3242_v24 = vmul.f32 %v7431_v58, %v7418_v49  ;;  %v4438_v49 = vld [vmem:[%s7811_s10] ss:$0 sm:$0xff] }
 0x8e9   : > { %v5723_v22 = vpop.eup %5722  ;;  %v3280_v0 = vmul.f32 %v5721_v32, %v3225_v31  ;;  %v3311_v15 = vadd.f32 1e-06, %v3278_v50 }
 0x8ea   : > { %5106 = vmatmul.mubr.msk.f32.vlgmr.msra.gmra.mrb[90].mxu0 %vm614_vm0, %v3340_v46  ;;  %v3319_v35 = vmul.f32 %v5723_v22, %v3236_v11  ;;  %v3243_v11 = vmul.f32 %v7431_v58, %v7423_v27 }
 0x8eb   : > { %v3282_v3 = vsel %vm3281_vm9, %v3225_v31, %v3280_v0  ;;  %5108 = vmatprep.mubr.msk.f32.mxu0 %vm5834_vm2, %v7844_v36  ;;  %5730 = vrcp.f32 %v3311_v15 }
 0x8ec   : > { %v5725_v47 = vpop.eup %5724  ;;  %v3285_v1 = vsel %vm3283_vm10, %v3284_v8, %v3282_v3  ;;  %v3341_v2 = vadd.f32 %v7438_v19, %v3319_v35 }
 0x8ed   : > { %v5727_v33 = vpop.eup %5726  ;;  %v3287_v5 = vmul.f32 %v5725_v47, %v3226_v52  ;;  %v3312_v59 = vadd.f32 1e-06, %v3285_v1 }
 0x8ee   : > { %5109 = vmatmul.mubr.msk.f32.gmra.mrb[92].mxu0 %vm614_vm0, %v3341_v2  ;;  %v3321_v21 = vmul.f32 %v5727_v33, %v3237_v57 }
 0x8ef   : > { %v3289_v48 = vsel %vm3288_vm11, %v3226_v52, %v3287_v5  ;;  %5111 = vmatprep.mubr.msk.f32.mxu0 %vm5834_vm2, %v7844_v36  ;;  %5732 = vrcp.f32 %v3312_v59 }
 0x8f0   : > { %v3292_v13 = vsel %vm3290_vm8, %v3291_v40, %v3289_v48  ;;  %v3342_v51 = vadd.f32 %v7438_v19, %v3321_v21 }
 0x8f1   : > { %v5729_v12 = vpop.eup %5728  ;;  %v3313_v7 = vadd.f32 1e-06, %v3292_v13 }
 0x8f2   : > { %5112 = vmatmul.mubr.msk.f32.gmra.mrb[94].mxu0 %vm614_vm0, %v3342_v51  ;;  %v3323_v4 = vmul.f32 %v5729_v12, %v3238_v53 }
 0x8f3   : > { %5114 = vmatprep.mubr.msk.f32.mxu0 %vm5834_vm2, %v7844_v36  ;;  %5734 = vrcp.f32 %v3313_v7 }
 0x8f4   : > { %v3343_v55 = vadd.f32 %v7438_v19, %v3323_v4 }
 0x8f5   : > { %v5731_v10 = vpop.eup %5730 }
 0x8f6   : > { %5115 = vmatmul.mubr.msk.f32.gmra.mrb[96].mxu0 %vm614_vm0, %v3343_v55  ;;  %v3325_v9 = vmul.f32 %v5731_v10, %v3239_v25 }
 0x8f7   : > { %5117 = vmatprep.mubr.msk.f32.mxu0 %vm5834_vm2, %v7844_v36 }
 0x8f8   : > { %v3344_v37 = vadd.f32 %v7438_v19, %v3325_v9 }
 0x8f9   : > { %v5733_v39 = vpop.eup %5732 }
 0x8fa   : > { %5118 = vmatmul.mubr.msk.f32.gmra.mrb[98].mxu0 %vm614_vm0, %v3344_v37  ;;  %v3327_v31 = vmul.f32 %v5733_v39, %v3240_v20 }
 0x8fb   : > { %5120 = vmatprep.mubr.msk.f32.mxu0 %vm5834_vm2, %v7844_v36 }
 0x8fc   : > { %v3216_v14 = vpop.xlane.xlu0 %3215  ;;  %v3345_v23 = vadd.f32 %v7438_v19, %v3327_v31 }
 0x8fd   : > { %v5735_v43 = vpop.eup %5734  ;;  %v3227_v54 = vmul.f32 0.06666667, %v3216_v14 }
 0x8fe   : > { %5121 = vmatmul.mubr.msk.f32.gmra.mrb[100].mxu0 %vm614_vm0, %v3345_v23  ;;  %v3329_v18 = vmul.f32 %v5735_v43, %v3241_v63 }
 0x8ff   : > { %5736 = vrsqrt.f32 %v3227_v54  ;;  %5123 = vmatprep.mubr.msk.f32.mxu0 %vm5834_vm2, %v7844_v36  ;;  %vm3295_vm12 = vcmp.eq.f32.partialorder %v3227_v54, inf  ;;  %v3298_v42 = vand.u32 2147483648, %v3227_v54  ;;  %vm3297_vm13 = vcmp.eq.f32.partialorder %v3227_v54, 0.0 }
 0x900   : > { %v3346_v56 = vadd.f32 %v7438_v19, %v3329_v18 }
 0x901   : > { %v3219_v26 = vpop.xlane.xlu1 %3218 }
 0x902   : > { %v3228_v16 = vmul.f32 0.06666667, %v3219_v26  ;;  %5124 = vmatmul.mubr.msk.f32.gmra.mrb[102].mxu0 %vm614_vm0, %v3346_v56 }
 0x903   : > { %5126 = vmatprep.mubr.msk.f32.mxu0 %vm5834_vm2, %v7844_v36 }
 0x904   : > { %5738 = vrsqrt.f32 %v3228_v16  ;;  %vm3302_vm14 = vcmp.eq.f32.partialorder %v3228_v16, inf  ;;  %v3305_v61 = vand.u32 2147483648, %v3228_v16  ;;  %vm3304_vm15 = vcmp.eq.f32.partialorder %v3228_v16, 0.0 }
 0x909   : > { %v5737_v44 = vpop.eup %5736 }
 0x90a   : > { %v3294_v52 = vmul.f32 %v5737_v44, %v3227_v54 }
 0x90c   : > { %v3296_v41 = vsel %vm3295_vm12, %v3227_v54, %v3294_v52 }
 0x90d   : > { %v3299_v29 = vsel %vm3297_vm13, %v3298_v42, %v3296_v41 }
 0x90e   : > { %v5739_v34 = vpop.eup %5738  ;;  %v3314_v38 = vadd.f32 1e-06, %v3299_v29 }
 0x90f   : > { %v3301_v28 = vmul.f32 %v5739_v34, %v3228_v16 }
 0x910   : > { %5740 = vrcp.f32 %v3314_v38 }
 0x911   : > { %v3303_v6 = vsel %vm3302_vm14, %v3228_v16, %v3301_v28 }
 0x912   : > { %v3306_v45 = vsel %vm3304_vm15, %v3305_v61, %v3303_v6 }
 0x913   : > { %v3315_v30 = vadd.f32 1e-06, %v3306_v45 }
 0x915   : > { %5742 = vrcp.f32 %v3315_v30 }
 0x91a   : > { %v5741_v62 = vpop.eup %5740 }
 0x91b   : > { %v3331_v17 = vmul.f32 %v5741_v62, %v3242_v24 }
 0x91d   : > { %v3347_v32 = vadd.f32 %v7438_v19, %v3331_v17 }
 0x91f   : > { %v5743_v50 = vpop.eup %5742  ;;  %5127 = vmatmul.mubr.msk.f32.gmra.mrb[104].mxu0 %vm614_vm0, %v3347_v32 }
 0x920   : > { %5129 = vmatprep.mubr.msk.f32.mxu0 %vm5834_vm2, %v7844_v36  ;;  %v3333_v46 = vmul.f32 %v5743_v50, %v3243_v11 }
 0x922   : > { %v3348_v22 = vadd.f32 %v7438_v19, %v3333_v46 }
 0x924   : > { %5130 = vmatmul.mubr.msk.f32.gmra.mrb[106].mxu0 %vm614_vm0, %v3348_v22 }
 0x925   : > { %5179 = vmatprep.mubr.msk.f32.mxu0 %vm5834_vm2, %v7844_v36 }
 0x9bd   : > { %v3451_v0 = vpop.f32.mrb[90].mxu0 }
 0x9be   : > { %v3452_v27 = vadd.f32 %v4438_v49, %v3451_v0  ;;  %v5107_v58 = vpop.f32.mrb[91].mxu0 }
 0x9c0   : > { %v3498_v15 = vsel %vm3497_vm3, %v3452_v27, 0.0 }
 0x9c1   : > { %3499 = vadd.xlane.f32.xlu0 %v3498_v15  ;;  %v3456_v8 = vpop.f32.mrb[92].mxu0 }
 0x9c2   : > { %v3457_v35 = vadd.f32 %v4438_v49, %v3456_v8  ;;  %v5110_v3 = vpop.f32.mrb[93].mxu0 }
 0x9c4   : > { %v3501_v19 = vsel %vm3497_vm3, %v3457_v35, 0.0 }
 0x9c5   : > { %3502 = vadd.xlane.f32.xlu1 %v3501_v19  ;;  %v3461_v47 = vpop.f32.mrb[94].mxu0 }
 0x9c6   : > { %v3462_v57 = vadd.f32 %v4438_v49, %v3461_v47  ;;  %v5113_v1 = vpop.f32.mrb[95].mxu0 }
 0x9c7   : > { %v3711_v1 = vld [vmem:[%s7814_s13 + $0x8] sm:$0xff] }
 0x9c8   : > { %v3504_v2 = vsel %vm3497_vm3, %v3462_v57, 0.0 }
 0x9c9   : > { %3505 = vadd.xlane.f32.xlu0 %v3504_v2  ;;  %v3466_v33 = vpop.f32.mrb[96].mxu0 }
 0x9ca   : > { %v3467_v5 = vadd.f32 %v4438_v49, %v3466_v33  ;;  %v5116_v59 = vpop.f32.mrb[97].mxu0  ;;  %v3712_v33 = vld [vmem:[%s7814_s13 + $0x10] sm:$0xff] }
 0x9cc   : > { %v3507_v40 = vsel %vm3497_vm3, %v3467_v5, 0.0 }
 0x9cd   : > { %3508 = vadd.xlane.f32.xlu1 %v3507_v40  ;;  %v3471_v21 = vpop.f32.mrb[98].mxu0  ;;  %v3714_v40 = vld [vmem:[%s7814_s13 + $0x20] sm:$0xff] }
 0x9ce   : > { %v3472_v48 = vadd.f32 %v4438_v49, %v3471_v21  ;;  %v5119_v53 = vpop.f32.mrb[99].mxu0  ;;  %v3715_v21 = vld [vmem:[%s7814_s13 + $0x28] sm:$0xff] }
 0x9cf   : > { %v3716_v53 = vld [vmem:[%s7814_s13 + $0x30] sm:$0xff] }
 0x9d0   : > { %v3510_v13 = vsel %vm3497_vm3, %v3472_v48, 0.0 }
 0x9d1   : > { %3511 = vadd.xlane.f32.xlu0 %v3510_v13  ;;  %v3476_v51 = vpop.f32.mrb[100].mxu0  ;;  %v3717_v13 = vld [vmem:[%s7814_s13 + $0x38] sm:$0xff] }
 0x9d2   : > { %v3477_v12 = vadd.f32 %v4438_v49, %v3476_v51  ;;  %v5122_v7 = vpop.f32.mrb[101].mxu0  ;;  %v5337_v51 = vpack.c.bf16 %v3717_v13, %v3716_v53 }
 0x9d4   : > { %v3513_v4 = vsel %vm3497_vm3, %v3477_v12, 0.0 }
 0x9d5   : > { %3514 = vadd.xlane.f32.xlu1 %v3513_v4  ;;  %v3481_v25 = vpop.f32.mrb[102].mxu0 }
 0x9d6   : > { %v3482_v55 = vadd.f32 %v4438_v49, %v3481_v25  ;;  %v5125_v10 = vpop.f32.mrb[103].mxu0 }
 0x9d8   : > { %v3516_v9 = vsel %vm3497_vm3, %v3482_v55, 0.0 }
 0x9d9   : > { %3517 = vadd.xlane.f32.xlu0 %v3516_v9 }
 0x9f2   : > { %v3486_v20 = vpop.f32.mrb[104].mxu0 }
 0x9f3   : > { %v7502_v37 = vadd.f32 %v4438_v49, %v3486_v20  ;;  %v5128_v39 = vpop.f32.mrb[105].mxu0 }
 0x9f5   : > { %v3519_v31 = vsel %vm3497_vm3, %v7502_v37, 0.0 }
 0x9f6   : > { %3520 = vadd.xlane.f32.xlu1 %v3519_v31 }
 0x9f7   : > { %v3491_v63 = vpop.f32.mrb[106].mxu0 }
 0x9f8   : > { %v7506_v14 = vadd.f32 %v4438_v49, %v3491_v63  ;;  %v5131_v23 = vpop.f32.mrb[107].mxu0 }
 0x9fa   : > { %v3523_v43 = vsel %vm3522_vm4, %v7506_v14, 0.0 }
 0x9fb   : > { %3524 = vadd.xlane.f32.xlu0 %v3523_v43 }
 0xa4e   : > { %v3500_v54 = vpop.xlane.xlu0 %3499 }
 0xa4f   : > { %v3527_v18 = vmul.f32 0.015625, %v3500_v54 }
 0xa51   : > { %v7510_v56 = vsub.f32 %v3452_v27, %v3527_v18 }
 0xa52   : > { %v3503_v26 = vpop.xlane.xlu1 %3502 }
 0xa53   : > { %v3528_v16 = vmul.f32 0.015625, %v3503_v26  ;;  %v3545_v44 = vmul.f32 %v7510_v56, %v7510_v56 }
 0xa55   : > { %v7514_v52 = vsub.f32 %v3457_v35, %v3528_v16  ;;  %v3554_v42 = vsel %vm3497_vm3, %v3545_v44, 0.0 }
 0xa56   : > { %3555 = vadd.xlane.f32.xlu1 %v3554_v42  ;;  %v3506_v41 = vpop.xlane.xlu0 %3505 }
 0xa57   : > { %v3529_v29 = vmul.f32 0.015625, %v3506_v41  ;;  %v3546_v34 = vmul.f32 %v7514_v52, %v7514_v52 }
 0xa59   : > { %v7519_v38 = vsub.f32 %v3462_v57, %v3529_v29  ;;  %v3557_v28 = vsel %vm3497_vm3, %v3546_v34, 0.0  ;;  %v3710_v57 = vld [vmem:[%s7814_s13] sm:$0xff] }
 0xa5a   : > { %v3509_v61 = vpop.xlane.xlu1 %3508  ;;  %3558 = vadd.xlane.f32.xlu0 %v3557_v28  ;;  %v5328_v2 = vpack.c.bf16 %v3711_v1, %v3710_v57 }
 0xa5b   : > { %v3530_v6 = vmul.f32 0.015625, %v3509_v61  ;;  %v3547_v45 = vmul.f32 %v7519_v38, %v7519_v38 }
 0xa5c   : > { %5329 = vmatpush3.bf16.msra.mxu1 %v5328_v2 }
 0xa5d   : > { %v7524_v30 = vsub.f32 %v3467_v5, %v3530_v6  ;;  %v3560_v24 = vsel %vm3497_vm3, %v3547_v45, 0.0  ;;  %5330 = vmatprep.subr.bf16.mxu1 %v7845_v60  ;;  %v3713_v5 = vld [vmem:[%s7814_s13 + $0x18] sm:$0xff] }
 0xa5e   : > { %3561 = vadd.xlane.f32.xlu1 %v3560_v24  ;;  %v3512_v62 = vpop.xlane.xlu0 %3511  ;;  %v5331_v59 = vpack.c.bf16 %v3713_v5, %v3712_v33 }
 0xa5f   : > { %v3531_v17 = vmul.f32 0.015625, %v3512_v62  ;;  %v3548_v32 = vmul.f32 %v7524_v30, %v7524_v30 }
 0xa60   : > { %5332 = vmatpush3.bf16.msra.mxu1 %v5331_v59 }
 0xa61   : > { %v7529_v11 = vsub.f32 %v3472_v48, %v3531_v17  ;;  %v3563_v50 = vsel %vm3497_vm3, %v3548_v32, 0.0  ;;  %5333 = vmatprep.subr.bf16.mxu1 %v7845_v60  ;;  %v5334_v48 = vpack.c.bf16 %v3715_v21, %v3714_v40 }
 0xa62   : > { %v3515_v46 = vpop.xlane.xlu1 %3514  ;;  %3564 = vadd.xlane.f32.xlu0 %v3563_v50 }
 0xa63   : > { %v3532_v22 = vmul.f32 0.015625, %v3515_v46  ;;  %v3549_v49 = vmul.f32 %v7529_v11, %v7529_v11 }
 0xa64   : > { %5335 = vmatpush3.bf16.msra.mxu1 %v5334_v48  ;;  %v7594_v48 = vld [vmem:[%s7813_s12] ss:$0 sm:$0xff] }
 0xa65   : > { %v7534_v0 = vsub.f32 %v3477_v12, %v3532_v22  ;;  %v3566_v27 = vsel %vm3497_vm3, %v3549_v49, 0.0  ;;  %5336 = vmatprep.subr.bf16.mxu1 %v7845_v60 }
 0xa66   : > { %3567 = vadd.xlane.f32.xlu1 %v3566_v27  ;;  %v3518_v58 = vpop.xlane.xlu0 %3517 }
 0xa67   : > { %v3533_v15 = vmul.f32 0.015625, %v3518_v58  ;;  %v3550_v8 = vmul.f32 %v7534_v0, %v7534_v0 }
 0xa68   : > { %5338 = vmatpush3.bf16.msra.mxu1 %v5337_v51 }
 0xa69   : > { %v7539_v35 = vsub.f32 %v3482_v55, %v3533_v15  ;;  %v3569_v3 = vsel %vm3497_vm3, %v3550_v8, 0.0 }
 0xa6a   : > { %3570 = vadd.xlane.f32.xlu0 %v3569_v3 }
 0xa6b   : > { %v3551_v19 = vmul.f32 %v7539_v35, %v7539_v35 }
 0xa6d   : > { %v3572_v47 = vsel %vm3497_vm3, %v3551_v19, 0.0  ;;  %v7587_v19 = vld [vmem:[%s7812_s11] ss:$0 sm:$0xff] }
 0xa6e   : > { %3573 = vadd.xlane.f32.xlu1 %v3572_v47  ;;  %v3596_v5 = vmul.f32 %v7587_v19, %v7510_v56 }
 0xa83   : > { %v3521_v12 = vpop.xlane.xlu1 %3520 }
 0xa84   : > { %v3534_v7 = vmul.f32 0.015625, %v3521_v12 }
 0xa86   : > { %v7573_v4 = vsub.f32 %v7502_v37, %v3534_v7 }
 0xa88   : > { %v3525_v25 = vpop.xlane.xlu0 %3524  ;;  %v3552_v55 = vmul.f32 %v7573_v4, %v7573_v4 }
 0xa89   : > { %v3535_v60 = vmul.f32 0.015625, %v3525_v25  ;;  %v3597_v25 = vmul.f32 %v7587_v19, %v7514_v52  ;;  %v3598_v52 = vmul.f32 %v7587_v19, %v7519_v38  ;;  %v3599_v38 = vmul.f32 %v7587_v19, %v7524_v30 }
 0xa8a   : > { %v3575_v10 = vsel %vm3497_vm3, %v3552_v55, 0.0 }
 0xa8b   : > { %v7579_v9 = vsub.f32 %v7506_v14, %v3535_v60  ;;  %3576 = vadd.xlane.f32.xlu0 %v3575_v10 }
 0xa8d   : > { %v3553_v20 = vmul.f32 %v7579_v9, %v7579_v9 }
 0xa8f   : > { %v3578_v39 = vsel %vm3522_vm4, %v3553_v20, 0.0 }
 0xa90   : > { %3579 = vadd.xlane.f32.xlu1 %v3578_v39 }
 0xae3   : > { %v3556_v31 = vpop.xlane.xlu1 %3555 }
 0xae4   : > { %v3581_v37 = vmul.f32 0.015873017, %v3556_v31 }
 0xae6   : > { %5744 = vrsqrt.f32 %v3581_v37  ;;  %vm3607_vm5 = vcmp.eq.f32.partialorder %v3581_v37, inf  ;;  %v3610_v44 = vand.u32 2147483648, %v3581_v37  ;;  %vm3609_vm6 = vcmp.eq.f32.partialorder %v3581_v37, 0.0 }
 0xae7   : > { %v3559_v63 = vpop.xlane.xlu0 %3558 }
 0xae8   : > { %v3582_v23 = vmul.f32 0.015873017, %v3559_v63 }
 0xaea   : > { %5746 = vrsqrt.f32 %v3582_v23  ;;  %vm3614_vm7 = vcmp.eq.f32.partialorder %v3582_v23, inf  ;;  %v3617_v45 = vand.u32 2147483648, %v3582_v23  ;;  %vm3616_vm9 = vcmp.eq.f32.partialorder %v3582_v23, 0.0 }
 0xaeb   : > { %v3562_v43 = vpop.xlane.xlu1 %3561 }
 0xaec   : > { %v3583_v54 = vmul.f32 0.015873017, %v3562_v43 }
 0xaee   : > { %5748 = vrsqrt.f32 %v3583_v54  ;;  %vm3621_vm10 = vcmp.eq.f32.partialorder %v3583_v54, inf  ;;  %v3624_v49 = vand.u32 2147483648, %v3583_v54  ;;  %vm3623_vm11 = vcmp.eq.f32.partialorder %v3583_v54, 0.0 }
 0xaef   : > { %v3565_v18 = vpop.xlane.xlu0 %3564 }
 0xaf0   : > { %v5745_v26 = vpop.eup %5744  ;;  %v3584_v14 = vmul.f32 0.015873017, %v3565_v18 }
 0xaf1   : > { %v3606_v16 = vmul.f32 %v5745_v26, %v3581_v37 }
 0xaf2   : > { %5750 = vrsqrt.f32 %v3584_v14  ;;  %vm3628_vm8 = vcmp.eq.f32.partialorder %v3584_v14, inf  ;;  %v3631_v1 = vand.u32 2147483648, %v3584_v14  ;;  %vm3630_vm12 = vcmp.eq.f32.partialorder %v3584_v14, 0.0 }
 0xaf3   : > { %v3608_v42 = vsel %vm3607_vm5, %v3581_v37, %v3606_v16  ;;  %v3568_v41 = vpop.xlane.xlu1 %3567 }
 0xaf4   : > { %v5747_v29 = vpop.eup %5746  ;;  %v3611_v34 = vsel %vm3609_vm6, %v3610_v44, %v3608_v42  ;;  %v3585_v28 = vmul.f32 0.015873017, %v3568_v41 }
 0xaf5   : > { %v3668_v61 = vadd.f32 1e-06, %v3611_v34  ;;  %v3613_v6 = vmul.f32 %v5747_v29, %v3582_v23 }
 0xaf6   : > { %5752 = vrsqrt.f32 %v3585_v28  ;;  %vm3635_vm13 = vcmp.eq.f32.partialorder %v3585_v28, inf  ;;  %v3638_v13 = vand.u32 2147483648, %v3585_v28  ;;  %vm3637_vm14 = vcmp.eq.f32.partialorder %v3585_v28, 0.0 }
 0xaf7   : > { %5754 = vrcp.f32 %v3668_v61  ;;  %v3615_v24 = vsel %vm3614_vm7, %v3582_v23, %v3613_v6  ;;  %v3571_v62 = vpop.xlane.xlu0 %3570  ;;  %v3600_v61 = vmul.f32 %v7587_v19, %v7529_v11  ;;  %v3602_v11 = vmul.f32 %v7587_v19, %v7539_v35 }
 0xaf8   : > { %v5749_v17 = vpop.eup %5748  ;;  %v3618_v32 = vsel %vm3616_vm9, %v3617_v45, %v3615_v24  ;;  %v3586_v50 = vmul.f32 0.015873017, %v3571_v62  ;;  %v3601_v24 = vmul.f32 %v7587_v19, %v7534_v0 }
 0xaf9   : > { %v3620_v46 = vmul.f32 %v5749_v17, %v3583_v54  ;;  %v3669_v22 = vadd.f32 1e-06, %v3618_v32 }
 0xafa   : > { %5756 = vrsqrt.f32 %v3586_v50  ;;  %vm3642_vm15 = vcmp.eq.f32.partialorder %v3586_v50, inf  ;;  %v3645_v39 = vand.u32 2147483648, %v3586_v50  ;;  %vm3644_vm4 = vcmp.eq.f32.partialorder %v3586_v50, 0.0 }
 0xafb   : > { %v3622_v27 = vsel %vm3621_vm10, %v3583_v54, %v3620_v46  ;;  %v3574_v58 = vpop.xlane.xlu1 %3573  ;;  %5758 = vrcp.f32 %v3669_v22 }
 0xafc   : > { %v5751_v15 = vpop.eup %5750  ;;  %v3625_v8 = vsel %vm3623_vm11, %v3624_v49, %v3622_v27  ;;  %v3587_v3 = vmul.f32 0.015873017, %v3574_v58 }
 0xafd   : > { %v3627_v47 = vmul.f32 %v5751_v15, %v3584_v14  ;;  %v3670_v57 = vadd.f32 1e-06, %v3625_v8 }
 0xafe   : > { %5760 = vrsqrt.f32 %v3587_v3  ;;  %vm3649_vm5 = vcmp.eq.f32.partialorder %v3587_v3, inf  ;;  %vm3651_vm6 = vcmp.eq.f32.partialorder %v3587_v3, 0.0 }
 0xaff   : > { %v3629_v2 = vsel %vm3628_vm8, %v3584_v14, %v3627_v47  ;;  %5762 = vrcp.f32 %v3670_v57  ;;  %v3652_v14 = vand.u32 2147483648, %v3587_v3 }
 0xb00   : > { %v5753_v33 = vpop.eup %5752  ;;  %v3632_v59 = vsel %vm3630_vm12, %v3631_v1, %v3629_v2 }
 0xb01   : > { %v5755_v40 = vpop.eup %5754  ;;  %v3634_v21 = vmul.f32 %v5753_v33, %v3585_v28  ;;  %v3671_v53 = vadd.f32 1e-06, %v3632_v59 }
 0xb02   : > { %v3678_v51 = vmul.f32 %v5755_v40, %v3596_v5 }
 0xb03   : > { %v3636_v12 = vsel %vm3635_vm13, %v3585_v28, %v3634_v21  ;;  %5764 = vrcp.f32 %v3671_v53  ;;  %v3603_v53 = vmul.f32 %v7587_v19, %v7573_v4  ;;  %v4450_v4 = vld [vmem:[%s7815_s14] ss:$0 sm:$0xff] }
 0xb04   : > { %v5757_v7 = vpop.eup %5756  ;;  %v3639_v56 = vsel %vm3637_vm14, %v3638_v13, %v3636_v12  ;;  %v3701_v55 = vadd.f32 %v7594_v48, %v3678_v51 }
 0xb05   : > { %v5759_v60 = vpop.eup %5758  ;;  %v3641_v10 = vmul.f32 %v5757_v7, %v3586_v50  ;;  %v3672_v20 = vadd.f32 1e-06, %v3639_v56  ;;  %v3604_v7 = vmul.f32 %v7587_v19, %v7579_v9 }
 0xb06   : > { %5149 = vmatmul.mubr.msk.f32.vlgmr.msra.gmra.mrb[90].mxu1 %vm3497_vm3, %v3701_v55  ;;  %v3680_v31 = vmul.f32 %v5759_v60, %v3597_v25 }
 0xb07   : > { %v3643_v37 = vsel %vm3642_vm15, %v3586_v50, %v3641_v10  ;;  %5151 = vmatprep.mubr.msk.f32.mxu1 %vm5834_vm2, %v7844_v36  ;;  %5766 = vrcp.f32 %v3672_v20 }
 0xb08   : > { %v5761_v63 = vpop.eup %5760  ;;  %v3646_v23 = vsel %vm3644_vm4, %v3645_v39, %v3643_v37  ;;  %v3702_v43 = vadd.f32 %v7594_v48, %v3680_v31 }
 0xb09   : > { %v5763_v54 = vpop.eup %5762  ;;  %v3648_v18 = vmul.f32 %v5761_v63, %v3587_v3  ;;  %v3673_v26 = vadd.f32 1e-06, %v3646_v23 }
 0xb0a   : > { %5152 = vmatmul.mubr.msk.f32.gmra.mrb[92].mxu1 %vm3497_vm3, %v3702_v43  ;;  %v3682_v16 = vmul.f32 %v5763_v54, %v3598_v52 }
 0xb0b   : > { %v3650_v44 = vsel %vm3649_vm5, %v3587_v3, %v3648_v18  ;;  %5154 = vmatprep.mubr.msk.f32.mxu1 %vm5834_vm2, %v7844_v36  ;;  %5768 = vrcp.f32 %v3673_v26 }
 0xb0c   : > { %v3653_v42 = vsel %vm3651_vm6, %v3652_v14, %v3650_v44  ;;  %v3703_v41 = vadd.f32 %v7594_v48, %v3682_v16 }
 0xb0d   : > { %v5765_v29 = vpop.eup %5764  ;;  %v3674_v34 = vadd.f32 1e-06, %v3653_v42 }
 0xb0e   : > { %5155 = vmatmul.mubr.msk.f32.gmra.mrb[94].mxu1 %vm3497_vm3, %v3703_v41  ;;  %v3684_v28 = vmul.f32 %v5765_v29, %v3599_v38 }
 0xb0f   : > { %5157 = vmatprep.mubr.msk.f32.mxu1 %vm5834_vm2, %v7844_v36  ;;  %5770 = vrcp.f32 %v3674_v34 }
 0xb10   : > { %v3704_v6 = vadd.f32 %v7594_v48, %v3684_v28 }
 0xb11   : > { %v5767_v45 = vpop.eup %5766 }
 0xb12   : > { %5158 = vmatmul.mubr.msk.f32.gmra.mrb[96].mxu1 %vm3497_vm3, %v3704_v6  ;;  %v3686_v30 = vmul.f32 %v5767_v45, %v3600_v61 }
 0xb13   : > { %5160 = vmatprep.mubr.msk.f32.mxu1 %vm5834_vm2, %v7844_v36 }
 0xb14   : > { %v3705_v62 = vadd.f32 %v7594_v48, %v3686_v30 }
 0xb15   : > { %v5769_v17 = vpop.eup %5768 }
 0xb16   : > { %5161 = vmatmul.mubr.msk.f32.gmra.mrb[98].mxu1 %vm3497_vm3, %v3705_v62  ;;  %v3688_v32 = vmul.f32 %v5769_v17, %v3601_v24 }
 0xb17   : > { %5163 = vmatprep.mubr.msk.f32.mxu1 %vm5834_vm2, %v7844_v36 }
 0xb18   : > { %v3577_v50 = vpop.xlane.xlu0 %3576  ;;  %v3706_v46 = vadd.f32 %v7594_v48, %v3688_v32 }
 0xb19   : > { %v5771_v22 = vpop.eup %5770  ;;  %v3588_v49 = vmul.f32 0.015873017, %v3577_v50 }
 0xb1a   : > { %5164 = vmatmul.mubr.msk.f32.gmra.mrb[100].mxu1 %vm3497_vm3, %v3706_v46  ;;  %v3690_v0 = vmul.f32 %v5771_v22, %v3602_v11 }
 0xb1b   : > { %5772 = vrsqrt.f32 %v3588_v49  ;;  %5166 = vmatprep.mubr.msk.f32.mxu1 %vm5834_vm2, %v7844_v36  ;;  %vm3656_vm7 = vcmp.eq.f32.partialorder %v3588_v49, inf  ;;  %v3659_v3 = vand.u32 2147483648, %v3588_v49  ;;  %vm3658_vm9 = vcmp.eq.f32.partialorder %v3588_v49, 0.0 }
 0xb1c   : > { %v3707_v27 = vadd.f32 %v7594_v48, %v3690_v0 }
 0xb1d   : > { %v3580_v58 = vpop.xlane.xlu1 %3579 }
 0xb1e   : > { %v3589_v15 = vmul.f32 0.015873017, %v3580_v58  ;;  %5167 = vmatmul.mubr.msk.f32.gmra.mrb[102].mxu1 %vm3497_vm3, %v3707_v27 }
 0xb1f   : > { %5169 = vmatprep.mubr.msk.f32.mxu1 %vm5834_vm2, %v7844_v36 }
 0xb20   : > { %5774 = vrsqrt.f32 %v3589_v15  ;;  %vm3663_vm10 = vcmp.eq.f32.partialorder %v3589_v15, inf  ;;  %v3666_v5 = vand.u32 2147483648, %v3589_v15  ;;  %vm3665_vm11 = vcmp.eq.f32.partialorder %v3589_v15, 0.0 }
 0xb25   : > { %v5773_v35 = vpop.eup %5772 }
 0xb26   : > { %v3655_v8 = vmul.f32 %v5773_v35, %v3588_v49 }
 0xb28   : > { %v3657_v47 = vsel %vm3656_vm7, %v3588_v49, %v3655_v8 }
 0xb29   : > { %v3660_v57 = vsel %vm3658_vm9, %v3659_v3, %v3657_v47 }
 0xb2a   : > { %v5775_v1 = vpop.eup %5774  ;;  %v3675_v2 = vadd.f32 1e-06, %v3660_v57 }
 0xb2b   : > { %v3662_v33 = vmul.f32 %v5775_v1, %v3589_v15 }
 0xb2c   : > { %5776 = vrcp.f32 %v3675_v2 }
 0xb2d   : > { %v3664_v59 = vsel %vm3663_vm10, %v3589_v15, %v3662_v33 }
 0xb2e   : > { %v3667_v40 = vsel %vm3665_vm11, %v3666_v5, %v3664_v59 }
 0xb2f   : > { %v3676_v21 = vadd.f32 1e-06, %v3667_v40 }
 0xb31   : > { %5778 = vrcp.f32 %v3676_v21 }
 0xb36   : > { %v5777_v13 = vpop.eup %5776 }
 0xb37   : > { %v3692_v51 = vmul.f32 %v5777_v13, %v3603_v53 }
 0xb39   : > { %v3708_v12 = vadd.f32 %v7594_v48, %v3692_v51 }
 0xb3b   : > { %v5779_v25 = vpop.eup %5778  ;;  %5170 = vmatmul.mubr.msk.f32.gmra.mrb[104].mxu1 %vm3497_vm3, %v3708_v12 }
 0xb3c   : > { %5172 = vmatprep.mubr.msk.f32.mxu1 %vm5834_vm2, %v7844_v36  ;;  %v3694_v56 = vmul.f32 %v5779_v25, %v3604_v7 }
 0xb3e   : > { %v3709_v55 = vadd.f32 %v7594_v48, %v3694_v56 }
 0xb40   : > { %5173 = vmatmul.mubr.msk.f32.gmra.mrb[106].mxu1 %vm3497_vm3, %v3709_v55 }
 0xbd9   : > { %v3818_v60 = vpop.f32.mrb[90].mxu1 }
 0xbda   : > { %v3819_v10 = vadd.f32 %v4450_v4, %v3818_v60  ;;  %v5150_v20 = vpop.f32.mrb[91].mxu1 }
 0xbdc   : > { %v3864_v9 = vsel %vm614_vm0, %v3819_v10, 0.0 }
 0xbdd   : > { %3865 = vadd.xlane.f32.xlu0 %v3864_v9  ;;  %v3823_v19 = vpop.f32.mrb[92].mxu1 }
 0xbde   : > { %v3824_v39 = vadd.f32 %v4450_v4, %v3823_v19  ;;  %v5153_v31 = vpop.f32.mrb[93].mxu1 }
 0xbe0   : > { %v3867_v37 = vsel %vm614_vm0, %v3824_v39, 0.0 }
 0xbe1   : > { %3868 = vadd.xlane.f32.xlu1 %v3867_v37  ;;  %v3828_v63 = vpop.f32.mrb[94].mxu1 }
 0xbe2   : > { %v3829_v48 = vadd.f32 %v4450_v4, %v3828_v63  ;;  %v5156_v52 = vpop.f32.mrb[95].mxu1  ;;  %v4074_v63 = vld [vmem:[%s7818_s17] sm:$0xff] }
 0xbe4   : > { %v3870_v23 = vsel %vm614_vm0, %v3829_v48, 0.0 }
 0xbe5   : > { %3871 = vadd.xlane.f32.xlu0 %v3870_v23  ;;  %v3833_v43 = vpop.f32.mrb[96].mxu1 }
 0xbe6   : > { %v3834_v54 = vadd.f32 %v4450_v4, %v3833_v43  ;;  %v5159_v18 = vpop.f32.mrb[97].mxu1 }
 0xbe8   : > { %v3873_v26 = vsel %vm614_vm0, %v3834_v54, 0.0 }
 0xbe9   : > { %3874 = vadd.xlane.f32.xlu1 %v3873_v26  ;;  %v3838_v14 = vpop.f32.mrb[98].mxu1 }
 0xbea   : > { %v3839_v16 = vadd.f32 %v4450_v4, %v3838_v14  ;;  %v5162_v44 = vpop.f32.mrb[99].mxu1 }
 0xbec   : > { %v3876_v38 = vsel %vm614_vm0, %v3839_v16, 0.0 }
 0xbed   : > { %3877 = vadd.xlane.f32.xlu0 %v3876_v38  ;;  %v3843_v42 = vpop.f32.mrb[100].mxu1 }
 0xbee   : > { %v3844_v41 = vadd.f32 %v4450_v4, %v3843_v42  ;;  %v5165_v29 = vpop.f32.mrb[101].mxu1 }
 0xbf0   : > { %v3879_v34 = vsel %vm614_vm0, %v3844_v41, 0.0 }
 0xbf1   : > { %3880 = vadd.xlane.f32.xlu1 %v3879_v34  ;;  %v3848_v28 = vpop.f32.mrb[102].mxu1 }
 0xbf2   : > { %v3849_v61 = vadd.f32 %v4450_v4, %v3848_v28  ;;  %v5168_v6 = vpop.f32.mrb[103].mxu1 }
 0xbf4   : > { %v3882_v45 = vsel %vm614_vm0, %v3849_v61, 0.0 }
 0xbf5   : > { %3883 = vadd.xlane.f32.xlu0 %v3882_v45 }
 0xc0e   : > { %v3853_v30 = vpop.f32.mrb[104].mxu1 }
 0xc0f   : > { %v3854_v24 = vadd.f32 %v4450_v4, %v3853_v30  ;;  %v5171_v62 = vpop.f32.mrb[105].mxu1 }
 0xc11   : > { %v3885_v17 = vsel %vm614_vm0, %v3854_v24, 0.0 }
 0xc12   : > { %3886 = vadd.xlane.f32.xlu1 %v3885_v17 }
 0xc13   : > { %v3858_v32 = vpop.f32.mrb[106].mxu1 }
 0xc14   : > { %v3859_v11 = vadd.f32 %v4450_v4, %v3858_v32  ;;  %v5174_v50 = vpop.f32.mrb[107].mxu1 }
 0xc16   : > { %v3888_v46 = vsel %vm639_vm1, %v3859_v11, 0.0 }
 0xc17   : > { %3889 = vadd.xlane.f32.xlu0 %v3888_v46 }
 0xc6a   : > { %v3866_v22 = vpop.xlane.xlu0 %3865 }
 0xc6b   : > { %v3891_v49 = vmul.f32 0.0625, %v3866_v22 }
 0xc6d   : > { %v7658_v0 = vsub.f32 %v3819_v10, %v3891_v49 }
 0xc6e   : > { %v3869_v27 = vpop.xlane.xlu1 %3868 }
 0xc6f   : > { %v3892_v58 = vmul.f32 0.0625, %v3869_v27  ;;  %v3909_v15 = vmul.f32 %v7658_v0, %v7658_v0 }
 0xc71   : > { %v7662_v35 = vsub.f32 %v3824_v39, %v3892_v58  ;;  %v3918_v8 = vsel %vm614_vm0, %v3909_v15, 0.0 }
 0xc72   : > { %v3872_v3 = vpop.xlane.xlu0 %3871  ;;  %3919 = vadd.xlane.f32.xlu1 %v3918_v8 }
 0xc73   : > { %v3893_v47 = vmul.f32 0.0625, %v3872_v3  ;;  %v3910_v57 = vmul.f32 %v7662_v35, %v7662_v35 }
 0xc75   : > { %v7667_v1 = vsub.f32 %v3829_v48, %v3893_v47  ;;  %v3921_v2 = vsel %vm614_vm0, %v3910_v57, 0.0  ;;  %v4075_v48 = vld [vmem:[%s7818_s17 + $0x8] sm:$0xff] }
 0xc76   : > { %v3875_v33 = vpop.xlane.xlu1 %3874  ;;  %3922 = vadd.xlane.f32.xlu0 %v3921_v2  ;;  %v5340_v52 = vpack.c.bf16 %v4075_v48, %v4074_v63 }
 0xc77   : > { %v3894_v5 = vmul.f32 0.0625, %v3875_v33  ;;  %v3911_v59 = vmul.f32 %v7667_v1, %v7667_v1 }
 0xc78   : > { %5341 = vmatpush3.bf16.msra.mxu0 %v5340_v52 }
 0xc79   : > { %v7672_v40 = vsub.f32 %v3834_v54, %v3894_v5  ;;  %v3924_v21 = vsel %vm614_vm0, %v3911_v59, 0.0 }
 0xc7a   : > { %v3878_v53 = vpop.xlane.xlu0 %3877  ;;  %3925 = vadd.xlane.f32.xlu1 %v3924_v21 }
 0xc7b   : > { %v3895_v13 = vmul.f32 0.0625, %v3878_v53  ;;  %v3912_v51 = vmul.f32 %v7672_v40, %v7672_v40 }
 0xc7d   : > { %v7677_v12 = vsub.f32 %v3839_v16, %v3895_v13  ;;  %v3927_v7 = vsel %vm614_vm0, %v3912_v51, 0.0 }
 0xc7e   : > { %v3881_v25 = vpop.xlane.xlu1 %3880  ;;  %3928 = vadd.xlane.f32.xlu0 %v3927_v7  ;;  %v7712_v7 = vld [vmem:[%s7816_s15] ss:$0 sm:$0xff] }
 0xc7f   : > { %v3896_v56 = vmul.f32 0.0625, %v3881_v25  ;;  %v3913_v55 = vmul.f32 %v7677_v12, %v7677_v12 }
 0xc81   : > { %v7682_v4 = vsub.f32 %v3844_v41, %v3896_v56  ;;  %v3930_v60 = vsel %vm614_vm0, %v3913_v55, 0.0 }
 0xc82   : > { %v3884_v10 = vpop.xlane.xlu0 %3883  ;;  %3931 = vadd.xlane.f32.xlu1 %v3930_v60 }
 0xc83   : > { %v3897_v20 = vmul.f32 0.0625, %v3884_v10  ;;  %v3914_v9 = vmul.f32 %v7682_v4, %v7682_v4 }
 0xc85   : > { %v7687_v19 = vsub.f32 %v3849_v61, %v3897_v20  ;;  %v3933_v39 = vsel %vm614_vm0, %v3914_v9, 0.0  ;;  %v3960_v20 = vmul.f32 %v7712_v7, %v7658_v0 }
 0xc86   : > { %3934 = vadd.xlane.f32.xlu0 %v3933_v39 }
 0xc87   : > { %v3915_v31 = vmul.f32 %v7687_v19, %v7687_v19 }
 0xc89   : > { %v3936_v37 = vsel %vm614_vm0, %v3915_v31, 0.0 }
 0xc8a   : > { %3937 = vadd.xlane.f32.xlu1 %v3936_v37  ;;  %v7719_v37 = vld [vmem:[%s7817_s16] ss:$0 sm:$0xff] }
 0xc9f   : > { %v3887_v23 = vpop.xlane.xlu1 %3886 }
 0xca0   : > { %v3898_v43 = vmul.f32 0.0625, %v3887_v23 }
 0xca2   : > { %v7699_v54 = vsub.f32 %v3854_v24, %v3898_v43 }
 0xca4   : > { %v3890_v18 = vpop.xlane.xlu0 %3889  ;;  %v3916_v26 = vmul.f32 %v7699_v54, %v7699_v54 }
 0xca5   : > { %v3899_v14 = vmul.f32 0.0625, %v3890_v18  ;;  %v3961_v18 = vmul.f32 %v7712_v7, %v7662_v35  ;;  %v3962_v35 = vmul.f32 %v7712_v7, %v7667_v1  ;;  %v3963_v1 = vmul.f32 %v7712_v7, %v7672_v40 }
 0xca6   : > { %v3939_v16 = vsel %vm614_vm0, %v3916_v26, 0.0 }
 0xca7   : > { %v7704_v44 = vsub.f32 %v3859_v11, %v3899_v14  ;;  %3940 = vadd.xlane.f32.xlu0 %v3939_v16 }
 0xca9   : > { %v3917_v38 = vmul.f32 %v7704_v44, %v7704_v44 }
 0xcab   : > { %v3942_v42 = vsel %vm639_vm1, %v3917_v38, 0.0 }
 0xcac   : > { %3943 = vadd.xlane.f32.xlu1 %v3942_v42 }
 0xcff   : > { %v3920_v41 = vpop.xlane.xlu1 %3919 }
 0xd00   : > { %v3945_v29 = vmul.f32 0.06666667, %v3920_v41 }
 0xd02   : > { %5780 = vrsqrt.f32 %v3945_v29  ;;  %vm3971_vm3 = vcmp.eq.f32.partialorder %v3945_v29, inf  ;;  %v3974_v17 = vand.u32 2147483648, %v3945_v29  ;;  %vm3973_vm8 = vcmp.eq.f32.partialorder %v3945_v29, 0.0 }
 0xd03   : > { %v3923_v34 = vpop.xlane.xlu0 %3922 }
 0xd04   : > { %v3946_v28 = vmul.f32 0.06666667, %v3923_v34 }
 0xd06   : > { %5782 = vrsqrt.f32 %v3946_v28  ;;  %vm3978_vm1 = vcmp.eq.f32.partialorder %v3946_v28, inf  ;;  %v3981_v58 = vand.u32 2147483648, %v3946_v28  ;;  %vm3980_vm12 = vcmp.eq.f32.partialorder %v3946_v28, 0.0 }
 0xd07   : > { %v3926_v61 = vpop.xlane.xlu1 %3925 }
 0xd08   : > { %v3947_v6 = vmul.f32 0.06666667, %v3926_v61 }
 0xd0a   : > { %5784 = vrsqrt.f32 %v3947_v6  ;;  %vm3985_vm13 = vcmp.eq.f32.partialorder %v3947_v6, inf  ;;  %v3988_v5 = vand.u32 2147483648, %v3947_v6  ;;  %vm3987_vm14 = vcmp.eq.f32.partialorder %v3947_v6, 0.0 }
 0xd0b   : > { %v3929_v45 = vpop.xlane.xlu0 %3928 }
 0xd0c   : > { %v5781_v30 = vpop.eup %5780  ;;  %v3948_v24 = vmul.f32 0.06666667, %v3929_v45 }
 0xd0d   : > { %v3970_v62 = vmul.f32 %v5781_v30, %v3945_v29 }
 0xd0e   : > { %5786 = vrsqrt.f32 %v3948_v24  ;;  %vm3992_vm15 = vcmp.eq.f32.partialorder %v3948_v24, inf  ;;  %v3995_v55 = vand.u32 2147483648, %v3948_v24  ;;  %vm3994_vm4 = vcmp.eq.f32.partialorder %v3948_v24, 0.0 }
 0xd0f   : > { %v3972_v32 = vsel %vm3971_vm3, %v3945_v29, %v3970_v62  ;;  %v3932_v11 = vpop.xlane.xlu1 %3931 }
 0xd10   : > { %v5783_v50 = vpop.eup %5782  ;;  %v3975_v46 = vsel %vm3973_vm8, %v3974_v17, %v3972_v32  ;;  %v3949_v22 = vmul.f32 0.06666667, %v3932_v11 }
 0xd11   : > { %v4032_v49 = vadd.f32 1e-06, %v3975_v46  ;;  %v3977_v27 = vmul.f32 %v5783_v50, %v3946_v28 }
 0xd12   : > { %5788 = vrsqrt.f32 %v3949_v22  ;;  %vm3999_vm5 = vcmp.eq.f32.partialorder %v3949_v22, inf  ;;  %v4002_v48 = vand.u32 2147483648, %v3949_v22  ;;  %vm4001_vm6 = vcmp.eq.f32.partialorder %v3949_v22, 0.0 }
 0xd13   : > { %5790 = vrcp.f32 %v4032_v49  ;;  %v3979_v15 = vsel %vm3978_vm1, %v3946_v28, %v3977_v27  ;;  %v3935_v8 = vpop.xlane.xlu0 %3934  ;;  %v3964_v49 = vmul.f32 %v7712_v7, %v7677_v12  ;;  %v3966_v12 = vmul.f32 %v7712_v7, %v7687_v19 }
 0xd14   : > { %v5785_v3 = vpop.eup %5784  ;;  %v3982_v47 = vsel %vm3980_vm12, %v3981_v58, %v3979_v15  ;;  %v3950_v57 = vmul.f32 0.06666667, %v3935_v8  ;;  %v3965_v15 = vmul.f32 %v7712_v7, %v7682_v4 }
 0xd15   : > { %v3984_v2 = vmul.f32 %v5785_v3, %v3947_v6  ;;  %v4033_v33 = vadd.f32 1e-06, %v3982_v47 }
 0xd16   : > { %5792 = vrsqrt.f32 %v3950_v57  ;;  %vm4006_vm7 = vcmp.eq.f32.partialorder %v3950_v57, inf  ;;  %v4009_v42 = vand.u32 2147483648, %v3950_v57  ;;  %vm4008_vm9 = vcmp.eq.f32.partialorder %v3950_v57, 0.0 }
 0xd17   : > { %v3986_v59 = vsel %vm3985_vm13, %v3947_v6, %v3984_v2  ;;  %v3938_v21 = vpop.xlane.xlu1 %3937  ;;  %5794 = vrcp.f32 %v4033_v33 }
 0xd18   : > { %v5787_v53 = vpop.eup %5786  ;;  %v3989_v13 = vsel %vm3987_vm14, %v3988_v5, %v3986_v59  ;;  %v3951_v51 = vmul.f32 0.06666667, %v3938_v21 }
 0xd19   : > { %v3991_v25 = vmul.f32 %v5787_v53, %v3948_v24  ;;  %v4034_v56 = vadd.f32 1e-06, %v3989_v13 }
 0xd1a   : > { %5796 = vrsqrt.f32 %v3951_v51  ;;  %vm4013_vm10 = vcmp.eq.f32.partialorder %v3951_v51, inf  ;;  %vm4015_vm11 = vcmp.eq.f32.partialorder %v3951_v51, 0.0 }
 0xd1b   : > { %v3993_v60 = vsel %vm3992_vm15, %v3948_v24, %v3991_v25  ;;  %5798 = vrcp.f32 %v4034_v56  ;;  %v4016_v24 = vand.u32 2147483648, %v3951_v51 }
 0xd1c   : > { %v5789_v10 = vpop.eup %5788  ;;  %v3996_v9 = vsel %vm3994_vm4, %v3995_v55, %v3993_v60 }
 0xd1d   : > { %v5791_v39 = vpop.eup %5790  ;;  %v3998_v31 = vmul.f32 %v5789_v10, %v3949_v22  ;;  %v4035_v63 = vadd.f32 1e-06, %v3996_v9 }
 0xd1e   : > { %v4042_v52 = vmul.f32 %v5791_v39, %v3960_v20 }
 0xd1f   : > { %v4000_v23 = vsel %vm3999_vm5, %v3949_v22, %v3998_v31  ;;  %5800 = vrcp.f32 %v4035_v63  ;;  %v3967_v63 = vmul.f32 %v7712_v7, %v7699_v54  ;;  %v4462_v54 = vld [vmem:[%s7819_s18] ss:$0 sm:$0xff] }
 0xd20   : > { %v5793_v43 = vpop.eup %5792  ;;  %v4003_v0 = vsel %vm4001_vm6, %v4002_v48, %v4000_v23  ;;  %v4065_v26 = vadd.f32 %v7719_v37, %v4042_v52 }
 0xd21   : > { %v5795_v14 = vpop.eup %5794  ;;  %v4005_v16 = vmul.f32 %v5793_v43, %v3950_v57  ;;  %v4036_v38 = vadd.f32 1e-06, %v4003_v0  ;;  %v3968_v43 = vmul.f32 %v7712_v7, %v7704_v44 }
 0xd22   : > { %5180 = vmatmul.mubr.msk.f32.vlgmr.msra.gmra.mrb[108].mxu0 %vm614_vm0, %v4065_v26  ;;  %v4044_v41 = vmul.f32 %v5795_v14, %v3961_v18 }
 0xd23   : > { %v4007_v29 = vsel %vm4006_vm7, %v3950_v57, %v4005_v16  ;;  %5182 = vmatprep.mubr.msk.f32.mxu0 %vm5834_vm2, %v7844_v36  ;;  %5802 = vrcp.f32 %v4036_v38 }
 0xd24   : > { %v5797_v34 = vpop.eup %5796  ;;  %v4010_v28 = vsel %vm4008_vm9, %v4009_v42, %v4007_v29  ;;  %v4066_v61 = vadd.f32 %v7719_v37, %v4044_v41 }
 0xd25   : > { %v5799_v6 = vpop.eup %5798  ;;  %v4012_v45 = vmul.f32 %v5797_v34, %v3951_v51  ;;  %v4037_v30 = vadd.f32 1e-06, %v4010_v28 }
 0xd26   : > { %5183 = vmatmul.mubr.msk.f32.gmra.mrb[110].mxu0 %vm614_vm0, %v4066_v61  ;;  %v4046_v62 = vmul.f32 %v5799_v6, %v3962_v35 }
 0xd27   : > { %v4014_v17 = vsel %vm4013_vm10, %v3951_v51, %v4012_v45  ;;  %5185 = vmatprep.mubr.msk.f32.mxu0 %vm5834_vm2, %v7844_v36  ;;  %5804 = vrcp.f32 %v4037_v30 }
 0xd28   : > { %v4017_v32 = vsel %vm4015_vm11, %v4016_v24, %v4014_v17  ;;  %v4067_v11 = vadd.f32 %v7719_v37, %v4046_v62 }
 0xd29   : > { %v5801_v50 = vpop.eup %5800  ;;  %v4038_v46 = vadd.f32 1e-06, %v4017_v32 }
 0xd2a   : > { %5186 = vmatmul.mubr.msk.f32.gmra.mrb[112].mxu0 %vm614_vm0, %v4067_v11  ;;  %v4048_v22 = vmul.f32 %v5801_v50, %v3963_v1 }
 0xd2b   : > { %5188 = vmatprep.mubr.msk.f32.mxu0 %vm5834_vm2, %v7844_v36  ;;  %5806 = vrcp.f32 %v4038_v46 }
 0xd2c   : > { %v4068_v27 = vadd.f32 %v7719_v37, %v4048_v22 }
 0xd2d   : > { %v5803_v58 = vpop.eup %5802 }
 0xd2e   : > { %5189 = vmatmul.mubr.msk.f32.gmra.mrb[114].mxu0 %vm614_vm0, %v4068_v27  ;;  %v4050_v40 = vmul.f32 %v5803_v58, %v3964_v49 }
 0xd2f   : > { %5191 = vmatprep.mubr.msk.f32.mxu0 %vm5834_vm2, %v7844_v36 }
 0xd30   : > { %v4069_v8 = vadd.f32 %v7719_v37, %v4050_v40 }
 0xd31   : > { %v5805_v3 = vpop.eup %5804 }
 0xd32   : > { %5192 = vmatmul.mubr.msk.f32.gmra.mrb[116].mxu0 %vm614_vm0, %v4069_v8  ;;  %v4052_v47 = vmul.f32 %v5805_v3, %v3965_v15 }
 0xd33   : > { %5194 = vmatprep.mubr.msk.f32.mxu0 %vm5834_vm2, %v7844_v36 }
 0xd34   : > { %v3941_v57 = vpop.xlane.xlu0 %3940  ;;  %v4070_v2 = vadd.f32 %v7719_v37, %v4052_v47 }
 0xd35   : > { %v5807_v33 = vpop.eup %5806  ;;  %v3952_v5 = vmul.f32 0.06666667, %v3941_v57 }
 0xd36   : > { %5195 = vmatmul.mubr.msk.f32.gmra.mrb[118].mxu0 %vm614_vm0, %v4070_v2  ;;  %v4054_v4 = vmul.f32 %v5807_v33, %v3966_v12 }
 0xd37   : > { %5808 = vrsqrt.f32 %v3952_v5  ;;  %5197 = vmatprep.mubr.msk.f32.mxu0 %vm5834_vm2, %v7844_v36  ;;  %vm4020_vm3 = vcmp.eq.f32.partialorder %v3952_v5, inf  ;;  %v4023_v51 = vand.u32 2147483648, %v3952_v5  ;;  %vm4022_vm8 = vcmp.eq.f32.partialorder %v3952_v5, 0.0 }
 0xd38   : > { %v4071_v59 = vadd.f32 %v7719_v37, %v4054_v4 }
 0xd39   : > { %v3944_v21 = vpop.xlane.xlu1 %3943 }
 0xd3a   : > { %v3953_v53 = vmul.f32 0.06666667, %v3944_v21  ;;  %5198 = vmatmul.mubr.msk.f32.gmra.mrb[120].mxu0 %vm614_vm0, %v4071_v59 }
 0xd3b   : > { %5200 = vmatprep.mubr.msk.f32.mxu0 %vm5834_vm2, %v7844_v36 }
 0xd3c   : > { %5810 = vrsqrt.f32 %v3953_v53  ;;  %vm4027_vm1 = vcmp.eq.f32.partialorder %v3953_v53, inf  ;;  %v4030_v20 = vand.u32 2147483648, %v3953_v53  ;;  %vm4029_vm12 = vcmp.eq.f32.partialorder %v3953_v53, 0.0 }
 0xd41   : > { %v5809_v19 = vpop.eup %5808 }
 0xd42   : > { %v4019_v13 = vmul.f32 %v5809_v19, %v3952_v5 }
 0xd44   : > { %v4021_v25 = vsel %vm4020_vm3, %v3952_v5, %v4019_v13 }
 0xd45   : > { %v4024_v56 = vsel %vm4022_vm8, %v4023_v51, %v4021_v25 }
 0xd46   : > { %v5811_v55 = vpop.eup %5810  ;;  %v4039_v60 = vadd.f32 1e-06, %v4024_v56 }
 0xd47   : > { %v4026_v10 = vmul.f32 %v5811_v55, %v3953_v53 }
 0xd48   : > { %5812 = vrcp.f32 %v4039_v60 }
 0xd49   : > { %v4028_v9 = vsel %vm4027_vm1, %v3953_v53, %v4026_v10 }
 0xd4a   : > { %v4031_v39 = vsel %vm4029_vm12, %v4030_v20, %v4028_v9 }
 0xd4b   : > { %v4040_v31 = vadd.f32 1e-06, %v4031_v39 }
 0xd4d   : > { %5814 = vrcp.f32 %v4040_v31 }
 0xd52   : > { %v5813_v48 = vpop.eup %5812 }
 0xd53   : > { %v4056_v52 = vmul.f32 %v5813_v48, %v3967_v63 }
 0xd55   : > { %v4072_v23 = vadd.f32 %v7719_v37, %v4056_v52 }
 0xd57   : > { %v5815_v18 = vpop.eup %5814  ;;  %5201 = vmatmul.mubr.msk.f32.gmra.mrb[122].mxu0 %vm614_vm0, %v4072_v23 }
 0xd58   : > { %5203 = vmatprep.mubr.msk.f32.mxu0 %vm5834_vm2, %v7844_v36  ;;  %v4058_v0 = vmul.f32 %v5815_v18, %v3968_v43  ;;  %vm4229_vm2 = vcmask 261120  }
 0xd5a   : > { %v4073_v26 = vadd.f32 %v7719_v37, %v4058_v0 }
 0xd5c   : > { %5204 = vmatmul.mubr.msk.f32.gmra.mrb[124].mxu0 %vm614_vm0, %v4073_v26  ;;  %vm4238_vm0 = vcmask 253952  }
 0xdf5   : > { %v4176_v14 = vpop.f32.mrb[108].mxu0 }
 0xdf6   : > { %v4177_v16 = vadd.f32 %v4462_v54, %v4176_v14  ;;  %v5181_v38 = vpop.f32.mrb[109].mxu0 }
 0xdf8   : > { %v4220_v36 = vmax.f32 %v4177_v16, 0.0 }
 0xdf9   : > { %v4181_v44 = vpop.f32.mrb[110].mxu0 }
 0xdfa   : > { %4230 = vst.msk [vmem:[%s7779_s2] sm:$0xff] %vm4229_vm2, %v4220_v36  ;;  %v4182_v7 = vadd.f32 %v4462_v54, %v4181_v44  ;;  %v5184_v37 = vpop.f32.mrb[111].mxu0 }
 0xdfc   : > { %v4221_v42 = vmax.f32 %v4182_v7, 0.0 }
 0xdfd   : > { %v4186_v41 = vpop.f32.mrb[112].mxu0 }
 0xdfe   : > { %4231 = vst.msk [vmem:[%s7779_s2 + $0x8] sm:$0xff] %vm4229_vm2, %v4221_v42  ;;  %v4187_v29 = vadd.f32 %v4462_v54, %v4186_v41  ;;  %v5187_v34 = vpop.f32.mrb[113].mxu0 }
 0xe00   : > { %v4222_v35 = vmax.f32 %v4187_v29, 0.0 }
 0xe01   : > { %v4191_v28 = vpop.f32.mrb[114].mxu0 }
 0xe02   : > { %4232 = vst.msk [vmem:[%s7779_s2 + $0x10] sm:$0xff] %vm4229_vm2, %v4222_v35  ;;  %v4192_v61 = vadd.f32 %v4462_v54, %v4191_v28  ;;  %v5190_v6 = vpop.f32.mrb[115].mxu0 }
 0xe04   : > { %v4223_v45 = vmax.f32 %v4192_v61, 0.0 }
 0xe05   : > { %v4196_v30 = vpop.f32.mrb[116].mxu0 }
 0xe06   : > { %4233 = vst.msk [vmem:[%s7779_s2 + $0x18] sm:$0xff] %vm4229_vm2, %v4223_v45  ;;  %v4197_v24 = vadd.f32 %v4462_v54, %v4196_v30  ;;  %v5193_v62 = vpop.f32.mrb[117].mxu0 }
 0xe08   : > { %v4224_v17 = vmax.f32 %v4197_v24, 0.0 }
 0xe09   : > { %v4201_v1 = vpop.f32.mrb[118].mxu0 }
 0xe0a   : > { %4234 = vst.msk [vmem:[%s7779_s2 + $0x20] sm:$0xff] %vm4229_vm2, %v4224_v17  ;;  %v4202_v32 = vadd.f32 %v4462_v54, %v4201_v1  ;;  %v5196_v11 = vpop.f32.mrb[119].mxu0 }
 0xe0c   : > { %v4225_v50 = vmax.f32 %v4202_v32, 0.0 }
 0xe0d   : > { %v4206_v46 = vpop.f32.mrb[120].mxu0 }
 0xe0e   : > { %4235 = vst.msk [vmem:[%s7779_s2 + $0x28] sm:$0xff] %vm4229_vm2, %v4225_v50  ;;  %v4207_v22 = vadd.f32 %v4462_v54, %v4206_v46  ;;  %v5199_v49 = vpop.f32.mrb[121].mxu0 }
 0xe10   : > { %v4226_v27 = vmax.f32 %v4207_v22, 0.0 }
 0xe12   : > { %4236 = vst.msk [vmem:[%s7779_s2 + $0x30] sm:$0xff] %vm4229_vm2, %v4226_v27 }
 0xe2a   : > { %v4211_v58 = vpop.f32.mrb[122].mxu0 }
 0xe2b   : > { %v4212_v40 = vadd.f32 %v4462_v54, %v4211_v58  ;;  %v5202_v15 = vpop.f32.mrb[123].mxu0 }
 0xe2d   : > { %v4227_v8 = vmax.f32 %v4212_v40, 0.0 }
 0xe2f   : > { %4237 = vst.msk [vmem:[%s7779_s2 + $0x38] sm:$0xff] %vm4229_vm2, %v4227_v8  ;;  %v4216_v3 = vpop.f32.mrb[124].mxu0 }
 0xe30   : > { %v4217_v47 = vadd.f32 %v4462_v54, %v4216_v3  ;;  %v5205_v12 = vpop.f32.mrb[125].mxu0 }
 0xe32   : > { %v4228_v57 = vmax.f32 %v4217_v47, 0.0 }
 0xe34   : > { %4239 = vst.msk [vmem:[%s7779_s2 + $0x40] sm:$0x1] %vm4238_vm0, %v4228_v57 }
 0xe35 PF: > { %s29_s0 = sadd.s32 1, %s5831_s0  }
 0xe36   : > { %p26_p4 = scmp.ge.s32.totalorder %s29_s0, 4  }
 0xe38   :  { %28 = sbr.rel (!%p26_p4) target bundleno = 5 (0x5), region = 126 }

</bundles_post_ra>
